<compile_context>
chip_gen: v5e
topology: v5e:2x2
jax: 0.10.0
libtpu: 0.0.40
codegen_flags: <defaults>
</compile_context>

<pallas_src>
import functools

import jax
import jax.numpy as jnp
from jax import lax
from jax.experimental import pallas as pl
from jax.experimental.pallas import tpu as pltpu

NEG_SLOPE = 0.02
BN_EPS = 1e-5
LANE = 128
BF16_SUBLANE = 16   # bf16 packs 16 sublanes per vreg -> full MXU LHS tiles


def _round_up(n, m):
    return ((n + m - 1) // m) * m


def _full_spec(shape):
    # Whole-array block (gridless call).
    return pl.BlockSpec(shape, lambda: (0,) * len(shape))


# ----------------------------------------------------------------------------
# Fused generator kernel
# ----------------------------------------------------------------------------
def _generator_kernel(*refs, batch, num_hidden, pdims, negative_slope, eps):
    """refs = (x, w0..w6 [HBM], bn0..bn5, b_last, out, wbuf0, wbuf1, dma_sem).

    x       : (Bpad, 128)        f32   padded concat(noise, features)
    w_i     : (Kpad_i, Npad_i)   bf16  padded weight (in, out), left in HBM
    bn_i    : (3, Npad_i)        f32   rows = [bias, gamma, beta]
    b_last  : (1, Npad_out)      f32   final-layer bias
    out     : (Bpad, Npad_out)   f32
    wbuf0/1 : (maxK, maxN)       bf16  VMEM double buffer for weights
    dma_sem : DMA semaphores, shape (2,)
    """
    n_layers = num_hidden + 1
    x_ref = refs[0]
    w_hbm = refs[1:1 + n_layers]
    bn_refs = refs[1 + n_layers:1 + n_layers + num_hidden]
    b_last_ref = refs[1 + n_layers + num_hidden]
    o_ref = refs[1 + n_layers + num_hidden + 1]
    wbufs = (refs[-3], refs[-2])
    sem = refs[-1]

    def weight_copy(li, slot):
        k, n = pdims[li], pdims[li + 1]
        return pltpu.make_async_copy(
            w_hbm[li], wbufs[slot].at[:k, :n], sem.at[slot])

    # Prime layer 0's weight DMA before touching any activations.
    weight_copy(0, 0).start()

    h = x_ref[...]                                    # (Bpad, 128) f32
    bpad = h.shape[0]
    inv_b = jnp.float32(1.0 / batch)

    # Mask padded batch rows out of the BN statistics (static decision).
    if batch < bpad:
        row = lax.broadcasted_iota(jnp.int32, (bpad, 1), 0)
        mask = (row < batch).astype(jnp.float32)
    else:
        mask = None

    for li in range(n_layers):
        slot = li % 2
        # Start next layer's weight DMA (other slot) so it overlaps this
        # layer's compute, then wait for the current layer's weight.
        if li + 1 < n_layers:
            weight_copy(li + 1, 1 - slot).start()
        weight_copy(li, slot).wait()

        k, n = pdims[li], pdims[li + 1]
        w = wbufs[slot][:k, :n]                       # bf16, tile-aligned view

        hdot = jnp.dot(h.astype(jnp.bfloat16), w,
                       preferred_element_type=jnp.float32)

        if li < num_hidden:
            bnp = bn_refs[li]                         # (3, Npad) f32
            h = hdot + bnp[0:1, :]                    # + bias
            h = jnp.maximum(h, negative_slope * h)    # LeakyReLU (slope < 1)
            # BatchNorm1d, train mode (biased variance about the mean).
            hm = h if mask is None else h * mask
            mean = jnp.sum(hm, axis=0, keepdims=True) * inv_b
            d = h - mean
            dm = d if mask is None else d * mask
            var = jnp.sum(dm * dm, axis=0, keepdims=True) * inv_b
            scale = bnp[1:2, :] * lax.rsqrt(var + eps)    # gamma / sqrt(var+eps)
            shift = bnp[2:3, :] - mean * scale            # beta - mean*scale
            h = h * scale + shift                         # folded affine
        else:
            # Final layer: Linear -> Tanh.
            h = hdot + b_last_ref[...]
            o_ref[...] = jnp.tanh(h).astype(o_ref.dtype)


# ----------------------------------------------------------------------------
# Parameters (pre-padded, weights in bf16)
# ----------------------------------------------------------------------------
def init_generator_params(key, noise_dim, feature_dim, channels, time_steps):
    """Xavier-normal weights, zero biases, BN gamma=1 / beta=0.

    Weights are zero-padded to (Kpad, Npad) with K/N rounded up to 128 and
    stored in bf16.  bias/gamma/beta are stacked into a (3, Npad) f32 array
    per hidden layer; the final layer keeps a (1, Npad) f32 bias.
    """
    dims = [noise_dim + feature_dim, 64, 128, 256, 512, 512, 1024,
            channels * time_steps]
    pdims = [_round_up(d, LANE) for d in dims]

    weights, bn_stacks, b_last = [], [], None
    for i in range(len(dims) - 1):
        fan_in, fan_out = dims[i], dims[i + 1]
        key, sub = jax.random.split(key)
        std = (2.0 / (fan_in + fan_out)) ** 0.5
        w = std * jax.random.normal(sub, (fan_in, fan_out), dtype=jnp.float32)
        w_pad = jnp.zeros((pdims[i], pdims[i + 1]), dtype=jnp.float32)
        w_pad = w_pad.at[:fan_in, :fan_out].set(w)
        weights.append(w_pad.astype(jnp.bfloat16))
        if i < len(dims) - 2:
            stack = jnp.zeros((3, pdims[i + 1]), dtype=jnp.float32)
            stack = stack.at[1, :fan_out].set(1.0)   # gamma = 1 (bias/beta = 0)
            bn_stacks.append(stack)
        else:
            b_last = jnp.zeros((1, pdims[i + 1]), dtype=jnp.float32)

    return {"weights": weights, "bn": bn_stacks, "b_last": b_last,
            "dims": dims, "pdims": pdims}


# ----------------------------------------------------------------------------
# Forward
# ----------------------------------------------------------------------------
def generator_forward(params, noise, features, channels, time_steps):
    dims, pdims = params["dims"], params["pdims"]
    num_hidden = len(params["bn"])
    n_layers = num_hidden + 1

    B = noise.shape[0]
    assert B >= 1, "batch must be >= 1 (BatchNorm needs batch statistics)"
    bpad = _round_up(B, BF16_SUBLANE)

    # torch.cat((noise, features), dim=1), padded to lane-dense (Bpad, 128).
    x = jnp.concatenate([noise, features], axis=1).astype(jnp.float32)
    x = jnp.pad(x, ((0, bpad - B), (0, pdims[0] - dims[0])))

    kernel = functools.partial(
        _generator_kernel, batch=B, num_hidden=num_hidden,
        pdims=tuple(pdims), negative_slope=NEG_SLOPE, eps=BN_EPS)

    inputs = [x] + list(params["weights"]) + list(params["bn"]) \
             + [params["b_last"]]
    out_pad = pdims[-1]

    # Weight double-buffer sized for the largest layer.
    max_k = max(pdims[:-1])
    max_n = max(pdims[1:])
    scratch_shapes = [
        pltpu.VMEM((max_k, max_n), jnp.bfloat16),
        pltpu.VMEM((max_k, max_n), jnp.bfloat16),
        pltpu.SemaphoreType.DMA((2,)),
    ]

    # Weights stay in HBM (manual DMA); everything else is a full VMEM block.
    in_specs = ([_full_spec(x.shape)]
                + [pl.BlockSpec(memory_space=pl.ANY)] * n_layers
                + [_full_spec(a.shape) for a in params["bn"]]
                + [_full_spec(params["b_last"].shape)])

    # Advisory cost so XLA can overlap this latency-bound call.
    flops = 2 * bpad * sum(pdims[i] * pdims[i + 1] for i in range(n_layers))
    weight_bytes = sum(pdims[i] * pdims[i + 1] * 2 for i in range(n_layers))
    io_bytes = (x.size + bpad * out_pad) * 4 \
        + sum(b.size for b in params["bn"]) * 4 + params["b_last"].size * 4
    transcendentals = bpad * out_pad + sum(pdims[i + 1]
                                           for i in range(num_hidden))

    scratch_bytes = 2 * max_k * max_n * 2
    vmem_limit = int(max(scratch_bytes + 2 * io_bytes + (2 << 20), 32 << 20))

    out = pl.pallas_call(
        kernel,
        out_shape=jax.ShapeDtypeStruct((bpad, out_pad), jnp.float32),
        in_specs=in_specs,
        out_specs=_full_spec((bpad, out_pad)),
        scratch_shapes=scratch_shapes,
        compiler_params=pltpu.CompilerParams(vmem_limit_bytes=vmem_limit),
        cost_estimate=pl.CostEstimate(
            flops=int(flops), transcendentals=int(transcendentals),
            bytes_accessed=int(weight_bytes + io_bytes)),
    )(*inputs)

    # Strip padding, then .view(-1, channels, time_steps) equivalent.
    out = out[:B, :channels * time_steps]
    return out.reshape(-1, channels, time_steps)


# ----------------------------------------------------------------------------
if __name__ == "__main__":
    # Small shapes consistent with the module's constructor arguments.
    NOISE_DIM = 32
    FEATURE_DIM = 4
    CHANNELS = 3
    TIME_STEPS = 64
    BATCH = 8

    key = jax.random.PRNGKey(0)
    k_params, k_noise, k_feat = jax.random.split(key, 3)

    params = init_generator_params(
        k_params, NOISE_DIM, FEATURE_DIM, CHANNELS, TIME_STEPS)

    noise = jax.random.normal(k_noise, (BATCH, NOISE_DIM), dtype=jnp.float32)
    features = jax.random.normal(k_feat, (BATCH, FEATURE_DIM),
                                 dtype=jnp.float32)

    out = generator_forward(params, noise, features, CHANNELS, TIME_STEPS)
    out = jax.block_until_ready(out)

    assert out.shape == (BATCH, CHANNELS, TIME_STEPS), out.shape
    assert bool(jnp.all(jnp.isfinite(out)))
    assert bool(jnp.all(jnp.abs(out) <= 1.0 + 1e-6))  # tanh output range
    print("KERNEL_OK")
</pallas_src>

<mosaic_0001>
module attributes {stable_mosaic.version = 11 : i64} {
  func.func @_generator_kernel(%arg0: memref<16x128xf32, #tpu.memory_space<vmem>>, %arg1: memref<128x128xbf16, #tpu.memory_space<any>>, %arg2: memref<128x128xbf16, #tpu.memory_space<any>>, %arg3: memref<128x256xbf16, #tpu.memory_space<any>>, %arg4: memref<256x512xbf16, #tpu.memory_space<any>>, %arg5: memref<512x512xbf16, #tpu.memory_space<any>>, %arg6: memref<512x1024xbf16, #tpu.memory_space<any>>, %arg7: memref<1024x256xbf16, #tpu.memory_space<any>>, %arg8: memref<3x128xf32, #tpu.memory_space<vmem>>, %arg9: memref<3x128xf32, #tpu.memory_space<vmem>>, %arg10: memref<3x256xf32, #tpu.memory_space<vmem>>, %arg11: memref<3x512xf32, #tpu.memory_space<vmem>>, %arg12: memref<3x512xf32, #tpu.memory_space<vmem>>, %arg13: memref<3x1024xf32, #tpu.memory_space<vmem>>, %arg14: memref<1x256xf32, #tpu.memory_space<vmem>>, %arg15: memref<16x256xf32, #tpu.memory_space<vmem>>, %arg16: memref<1024x1024xbf16, #tpu.memory_space<vmem>>, %arg17: memref<1024x1024xbf16, #tpu.memory_space<vmem>>, %arg18: memref<2x!tpu.dma_semaphore, #tpu.memory_space<semaphore_mem>>) attributes {dimension_semantics = [], scalar_prefetch = 0 : i64, scratch_operands = 3 : i64, tpu.core_type = #tpu.core_type<tc>} {
    %c0_i32 = arith.constant 0 : i32
    %c0_i32_0 = arith.constant 0 : i32
    %c0_i32_1 = arith.constant 0 : i32
    %0 = tpu.memref_slice %arg16[%c0_i32_0, %c0_i32_1] : memref<1024x1024xbf16, #tpu.memory_space<vmem>> -> memref<128x128xbf16, #tpu.memory_space<vmem>>
    %1 = tpu.memref_slice %arg18[%c0_i32] : memref<2x!tpu.dma_semaphore, #tpu.memory_space<semaphore_mem>> -> memref<1x!tpu.dma_semaphore, #tpu.memory_space<semaphore_mem>>
    %2 = tpu.memref_squeeze %1 : memref<1x!tpu.dma_semaphore, #tpu.memory_space<semaphore_mem>> -> memref<!tpu.dma_semaphore, #tpu.memory_space<semaphore_mem>>
    tpu.enqueue_dma source(%arg1 : memref<128x128xbf16, #tpu.memory_space<any>>) target(%0 : memref<128x128xbf16, #tpu.memory_space<vmem>>) target_semaphore(%2 : memref<!tpu.dma_semaphore, #tpu.memory_space<semaphore_mem>>)
    %c0 = arith.constant 0 : index
    %c0_2 = arith.constant 0 : index
    %3 = vector.load %arg0[%c0, %c0_2] : memref<16x128xf32, #tpu.memory_space<vmem>>, vector<16x128xf32>
    %4 = tpu.iota {dimensions = array<i32: 0>} : vector<16x1xi32>
    %c8_i32 = arith.constant 8 : i32
    %5 = vector.broadcast %c8_i32 : i32 to vector<16x1xi32>
    %6 = arith.cmpi slt, %4, %5 : vector<16x1xi32>
    %7 = arith.extui %6 : vector<16x1xi1> to vector<16x1xi32>
    %8 = arith.sitofp %7 : vector<16x1xi32> to vector<16x1xf32>
    %c1_i32 = arith.constant 1 : i32
    %c0_i32_3 = arith.constant 0 : i32
    %c0_i32_4 = arith.constant 0 : i32
    %9 = tpu.memref_slice %arg17[%c0_i32_3, %c0_i32_4] : memref<1024x1024xbf16, #tpu.memory_space<vmem>> -> memref<128x128xbf16, #tpu.memory_space<vmem>>
    %10 = tpu.memref_slice %arg18[%c1_i32] : memref<2x!tpu.dma_semaphore, #tpu.memory_space<semaphore_mem>> -> memref<1x!tpu.dma_semaphore, #tpu.memory_space<semaphore_mem>>
    %11 = tpu.memref_squeeze %10 : memref<1x!tpu.dma_semaphore, #tpu.memory_space<semaphore_mem>> -> memref<!tpu.dma_semaphore, #tpu.memory_space<semaphore_mem>>
    tpu.enqueue_dma source(%arg2 : memref<128x128xbf16, #tpu.memory_space<any>>) target(%9 : memref<128x128xbf16, #tpu.memory_space<vmem>>) target_semaphore(%11 : memref<!tpu.dma_semaphore, #tpu.memory_space<semaphore_mem>>)
    %c0_i32_5 = arith.constant 0 : i32
    %c0_i32_6 = arith.constant 0 : i32
    %c0_i32_7 = arith.constant 0 : i32
    %12 = tpu.memref_slice %arg16[%c0_i32_6, %c0_i32_7] : memref<1024x1024xbf16, #tpu.memory_space<vmem>> -> memref<128x128xbf16, #tpu.memory_space<vmem>>
    %13 = tpu.memref_slice %arg18[%c0_i32_5] : memref<2x!tpu.dma_semaphore, #tpu.memory_space<semaphore_mem>> -> memref<1x!tpu.dma_semaphore, #tpu.memory_space<semaphore_mem>>
    %14 = tpu.memref_squeeze %13 : memref<1x!tpu.dma_semaphore, #tpu.memory_space<semaphore_mem>> -> memref<!tpu.dma_semaphore, #tpu.memory_space<semaphore_mem>>
    tpu.wait_dma2 semaphore(%14 : memref<!tpu.dma_semaphore, #tpu.memory_space<semaphore_mem>>) src(%arg1 : memref<128x128xbf16, #tpu.memory_space<any>>) dst(%12 : memref<128x128xbf16, #tpu.memory_space<vmem>>)
    %c0_8 = arith.constant 0 : index
    %c0_9 = arith.constant 0 : index
    %15 = vector.load %arg16[%c0_8, %c0_9] : memref<1024x1024xbf16, #tpu.memory_space<vmem>>, vector<128x128xbf16>
    %16 = arith.truncf %3 : vector<16x128xf32> to vector<16x128xbf16>
    %cst = arith.constant dense<0.000000e+00> : vector<16x128xf32>
    %17 = tpu.matmul %16, %15, %cst {dimension_numbers = #tpu.dot_dimension_numbers<[1], [0], [0], [1], [0, 0, 1, 1], [], []>} : vector<16x128xbf16>, vector<128x128xbf16>, vector<16x128xf32> -> vector<16x128xf32>
    %c0_10 = arith.constant 0 : index
    %c0_11 = arith.constant 0 : index
    %18 = vector.load %arg8[%c0_10, %c0_11] : memref<3x128xf32, #tpu.memory_space<vmem>>, vector<1x128xf32>
    %19 = vector.broadcast %18 : vector<1x128xf32> to vector<16x128xf32>
    %20 = arith.addf %17, %19 : vector<16x128xf32>
    %cst_12 = arith.constant 2.000000e-02 : f32
    %21 = vector.broadcast %cst_12 : f32 to vector<16x128xf32>
    %22 = arith.mulf %21, %20 : vector<16x128xf32>
    %23 = arith.maximumf %20, %22 : vector<16x128xf32>
    %24 = vector.broadcast %8 : vector<16x1xf32> to vector<16x128xf32>
    %25 = arith.mulf %23, %24 : vector<16x128xf32>
    %cst_13 = arith.constant dense<0.000000e+00> : vector<128xf32>
    %26 = vector.multi_reduction <add>, %25, %cst_13 [0] : vector<16x128xf32> to vector<128xf32>
    %27 = vector.shape_cast %26 : vector<128xf32> to vector<1x128xf32>
    %cst_14 = arith.constant 1.250000e-01 : f32
    %28 = vector.broadcast %cst_14 : f32 to vector<1x128xf32>
    %29 = arith.mulf %27, %28 : vector<1x128xf32>
    %30 = vector.broadcast %29 : vector<1x128xf32> to vector<16x128xf32>
    %31 = arith.subf %23, %30 : vector<16x128xf32>
    %32 = vector.broadcast %8 : vector<16x1xf32> to vector<16x128xf32>
    %33 = arith.mulf %31, %32 : vector<16x128xf32>
    %34 = arith.mulf %33, %33 : vector<16x128xf32>
    %cst_15 = arith.constant dense<0.000000e+00> : vector<128xf32>
    %35 = vector.multi_reduction <add>, %34, %cst_15 [0] : vector<16x128xf32> to vector<128xf32>
    %36 = vector.shape_cast %35 : vector<128xf32> to vector<1x128xf32>
    %cst_16 = arith.constant 1.250000e-01 : f32
    %37 = vector.broadcast %cst_16 : f32 to vector<1x128xf32>
    %38 = arith.mulf %36, %37 : vector<1x128xf32>
    %c1 = arith.constant 1 : index
    %c0_17 = arith.constant 0 : index
    %39 = vector.load %arg8[%c1, %c0_17] : memref<3x128xf32, #tpu.memory_space<vmem>>, vector<1x128xf32>
    %cst_18 = arith.constant 9.99999974E-6 : f32
    %40 = vector.broadcast %cst_18 : f32 to vector<1x128xf32>
    %41 = arith.addf %38, %40 : vector<1x128xf32>
    %42 = math.rsqrt %41 : vector<1x128xf32>
    %43 = arith.mulf %39, %42 : vector<1x128xf32>
    %c2 = arith.constant 2 : index
    %c0_19 = arith.constant 0 : index
    %44 = vector.load %arg8[%c2, %c0_19] : memref<3x128xf32, #tpu.memory_space<vmem>>, vector<1x128xf32>
    %45 = arith.mulf %29, %43 : vector<1x128xf32>
    %46 = arith.subf %44, %45 : vector<1x128xf32>
    %47 = vector.broadcast %43 : vector<1x128xf32> to vector<16x128xf32>
    %48 = arith.mulf %23, %47 : vector<16x128xf32>
    %49 = vector.broadcast %46 : vector<1x128xf32> to vector<16x128xf32>
    %50 = arith.addf %48, %49 : vector<16x128xf32>
    %c0_i32_20 = arith.constant 0 : i32
    %c0_i32_21 = arith.constant 0 : i32
    %c0_i32_22 = arith.constant 0 : i32
    %51 = tpu.memref_slice %arg16[%c0_i32_21, %c0_i32_22] : memref<1024x1024xbf16, #tpu.memory_space<vmem>> -> memref<128x256xbf16, #tpu.memory_space<vmem>>
    %52 = tpu.memref_slice %arg18[%c0_i32_20] : memref<2x!tpu.dma_semaphore, #tpu.memory_space<semaphore_mem>> -> memref<1x!tpu.dma_semaphore, #tpu.memory_space<semaphore_mem>>
    %53 = tpu.memref_squeeze %52 : memref<1x!tpu.dma_semaphore, #tpu.memory_space<semaphore_mem>> -> memref<!tpu.dma_semaphore, #tpu.memory_space<semaphore_mem>>
    tpu.enqueue_dma source(%arg3 : memref<128x256xbf16, #tpu.memory_space<any>>) target(%51 : memref<128x256xbf16, #tpu.memory_space<vmem>>) target_semaphore(%53 : memref<!tpu.dma_semaphore, #tpu.memory_space<semaphore_mem>>)
    %c1_i32_23 = arith.constant 1 : i32
    %c0_i32_24 = arith.constant 0 : i32
    %c0_i32_25 = arith.constant 0 : i32
    %54 = tpu.memref_slice %arg17[%c0_i32_24, %c0_i32_25] : memref<1024x1024xbf16, #tpu.memory_space<vmem>> -> memref<128x128xbf16, #tpu.memory_space<vmem>>
    %55 = tpu.memref_slice %arg18[%c1_i32_23] : memref<2x!tpu.dma_semaphore, #tpu.memory_space<semaphore_mem>> -> memref<1x!tpu.dma_semaphore, #tpu.memory_space<semaphore_mem>>
    %56 = tpu.memref_squeeze %55 : memref<1x!tpu.dma_semaphore, #tpu.memory_space<semaphore_mem>> -> memref<!tpu.dma_semaphore, #tpu.memory_space<semaphore_mem>>
    tpu.wait_dma2 semaphore(%56 : memref<!tpu.dma_semaphore, #tpu.memory_space<semaphore_mem>>) src(%arg2 : memref<128x128xbf16, #tpu.memory_space<any>>) dst(%54 : memref<128x128xbf16, #tpu.memory_space<vmem>>)
    %c0_26 = arith.constant 0 : index
    %c0_27 = arith.constant 0 : index
    %57 = vector.load %arg17[%c0_26, %c0_27] : memref<1024x1024xbf16, #tpu.memory_space<vmem>>, vector<128x128xbf16>
    %58 = arith.truncf %50 : vector<16x128xf32> to vector<16x128xbf16>
    %cst_28 = arith.constant dense<0.000000e+00> : vector<16x128xf32>
    %59 = tpu.matmul %58, %57, %cst_28 {dimension_numbers = #tpu.dot_dimension_numbers<[1], [0], [0], [1], [0, 0, 1, 1], [], []>} : vector<16x128xbf16>, vector<128x128xbf16>, vector<16x128xf32> -> vector<16x128xf32>
    %c0_29 = arith.constant 0 : index
    %c0_30 = arith.constant 0 : index
    %60 = vector.load %arg9[%c0_29, %c0_30] : memref<3x128xf32, #tpu.memory_space<vmem>>, vector<1x128xf32>
    %61 = vector.broadcast %60 : vector<1x128xf32> to vector<16x128xf32>
    %62 = arith.addf %59, %61 : vector<16x128xf32>
    %cst_31 = arith.constant 2.000000e-02 : f32
    %63 = vector.broadcast %cst_31 : f32 to vector<16x128xf32>
    %64 = arith.mulf %63, %62 : vector<16x128xf32>
    %65 = arith.maximumf %62, %64 : vector<16x128xf32>
    %66 = vector.broadcast %8 : vector<16x1xf32> to vector<16x128xf32>
    %67 = arith.mulf %65, %66 : vector<16x128xf32>
    %cst_32 = arith.constant dense<0.000000e+00> : vector<128xf32>
    %68 = vector.multi_reduction <add>, %67, %cst_32 [0] : vector<16x128xf32> to vector<128xf32>
    %69 = vector.shape_cast %68 : vector<128xf32> to vector<1x128xf32>
    %cst_33 = arith.constant 1.250000e-01 : f32
    %70 = vector.broadcast %cst_33 : f32 to vector<1x128xf32>
    %71 = arith.mulf %69, %70 : vector<1x128xf32>
    %72 = vector.broadcast %71 : vector<1x128xf32> to vector<16x128xf32>
    %73 = arith.subf %65, %72 : vector<16x128xf32>
    %74 = vector.broadcast %8 : vector<16x1xf32> to vector<16x128xf32>
    %75 = arith.mulf %73, %74 : vector<16x128xf32>
    %76 = arith.mulf %75, %75 : vector<16x128xf32>
    %cst_34 = arith.constant dense<0.000000e+00> : vector<128xf32>
    %77 = vector.multi_reduction <add>, %76, %cst_34 [0] : vector<16x128xf32> to vector<128xf32>
    %78 = vector.shape_cast %77 : vector<128xf32> to vector<1x128xf32>
    %cst_35 = arith.constant 1.250000e-01 : f32
    %79 = vector.broadcast %cst_35 : f32 to vector<1x128xf32>
    %80 = arith.mulf %78, %79 : vector<1x128xf32>
    %c1_36 = arith.constant 1 : index
    %c0_37 = arith.constant 0 : index
    %81 = vector.load %arg9[%c1_36, %c0_37] : memref<3x128xf32, #tpu.memory_space<vmem>>, vector<1x128xf32>
    %cst_38 = arith.constant 9.99999974E-6 : f32
    %82 = vector.broadcast %cst_38 : f32 to vector<1x128xf32>
    %83 = arith.addf %80, %82 : vector<1x128xf32>
    %84 = math.rsqrt %83 : vector<1x128xf32>
    %85 = arith.mulf %81, %84 : vector<1x128xf32>
    %c2_39 = arith.constant 2 : index
    %c0_40 = arith.constant 0 : index
    %86 = vector.load %arg9[%c2_39, %c0_40] : memref<3x128xf32, #tpu.memory_space<vmem>>, vector<1x128xf32>
    %87 = arith.mulf %71, %85 : vector<1x128xf32>
    %88 = arith.subf %86, %87 : vector<1x128xf32>
    %89 = vector.broadcast %85 : vector<1x128xf32> to vector<16x128xf32>
    %90 = arith.mulf %65, %89 : vector<16x128xf32>
    %91 = vector.broadcast %88 : vector<1x128xf32> to vector<16x128xf32>
    %92 = arith.addf %90, %91 : vector<16x128xf32>
    %c1_i32_41 = arith.constant 1 : i32
    %c0_i32_42 = arith.constant 0 : i32
    %c0_i32_43 = arith.constant 0 : i32
    %93 = tpu.memref_slice %arg17[%c0_i32_42, %c0_i32_43] : memref<1024x1024xbf16, #tpu.memory_space<vmem>> -> memref<256x512xbf16, #tpu.memory_space<vmem>>
    %94 = tpu.memref_slice %arg18[%c1_i32_41] : memref<2x!tpu.dma_semaphore, #tpu.memory_space<semaphore_mem>> -> memref<1x!tpu.dma_semaphore, #tpu.memory_space<semaphore_mem>>
    %95 = tpu.memref_squeeze %94 : memref<1x!tpu.dma_semaphore, #tpu.memory_space<semaphore_mem>> -> memref<!tpu.dma_semaphore, #tpu.memory_space<semaphore_mem>>
    tpu.enqueue_dma source(%arg4 : memref<256x512xbf16, #tpu.memory_space<any>>) target(%93 : memref<256x512xbf16, #tpu.memory_space<vmem>>) target_semaphore(%95 : memref<!tpu.dma_semaphore, #tpu.memory_space<semaphore_mem>>)
    %c0_i32_44 = arith.constant 0 : i32
    %c0_i32_45 = arith.constant 0 : i32
    %c0_i32_46 = arith.constant 0 : i32
    %96 = tpu.memref_slice %arg16[%c0_i32_45, %c0_i32_46] : memref<1024x1024xbf16, #tpu.memory_space<vmem>> -> memref<128x256xbf16, #tpu.memory_space<vmem>>
    %97 = tpu.memref_slice %arg18[%c0_i32_44] : memref<2x!tpu.dma_semaphore, #tpu.memory_space<semaphore_mem>> -> memref<1x!tpu.dma_semaphore, #tpu.memory_space<semaphore_mem>>
    %98 = tpu.memref_squeeze %97 : memref<1x!tpu.dma_semaphore, #tpu.memory_space<semaphore_mem>> -> memref<!tpu.dma_semaphore, #tpu.memory_space<semaphore_mem>>
    tpu.wait_dma2 semaphore(%98 : memref<!tpu.dma_semaphore, #tpu.memory_space<semaphore_mem>>) src(%arg3 : memref<128x256xbf16, #tpu.memory_space<any>>) dst(%96 : memref<128x256xbf16, #tpu.memory_space<vmem>>)
    %c0_47 = arith.constant 0 : index
    %c0_48 = arith.constant 0 : index
    %99 = vector.load %arg16[%c0_47, %c0_48] : memref<1024x1024xbf16, #tpu.memory_space<vmem>>, vector<128x256xbf16>
    %100 = arith.truncf %92 : vector<16x128xf32> to vector<16x128xbf16>
    %cst_49 = arith.constant dense<0.000000e+00> : vector<16x256xf32>
    %101 = tpu.matmul %100, %99, %cst_49 {dimension_numbers = #tpu.dot_dimension_numbers<[1], [0], [0], [1], [0, 0, 1, 1], [], []>} : vector<16x128xbf16>, vector<128x256xbf16>, vector<16x256xf32> -> vector<16x256xf32>
    %c0_50 = arith.constant 0 : index
    %c0_51 = arith.constant 0 : index
    %102 = vector.load %arg10[%c0_50, %c0_51] : memref<3x256xf32, #tpu.memory_space<vmem>>, vector<1x256xf32>
    %103 = vector.broadcast %102 : vector<1x256xf32> to vector<16x256xf32>
    %104 = arith.addf %101, %103 : vector<16x256xf32>
    %cst_52 = arith.constant 2.000000e-02 : f32
    %105 = vector.broadcast %cst_52 : f32 to vector<16x256xf32>
    %106 = arith.mulf %105, %104 : vector<16x256xf32>
    %107 = arith.maximumf %104, %106 : vector<16x256xf32>
    %108 = vector.broadcast %8 : vector<16x1xf32> to vector<16x256xf32>
    %109 = arith.mulf %107, %108 : vector<16x256xf32>
    %cst_53 = arith.constant dense<0.000000e+00> : vector<256xf32>
    %110 = vector.multi_reduction <add>, %109, %cst_53 [0] : vector<16x256xf32> to vector<256xf32>
    %111 = vector.shape_cast %110 : vector<256xf32> to vector<1x256xf32>
    %cst_54 = arith.constant 1.250000e-01 : f32
    %112 = vector.broadcast %cst_54 : f32 to vector<1x256xf32>
    %113 = arith.mulf %111, %112 : vector<1x256xf32>
    %114 = vector.broadcast %113 : vector<1x256xf32> to vector<16x256xf32>
    %115 = arith.subf %107, %114 : vector<16x256xf32>
    %116 = vector.broadcast %8 : vector<16x1xf32> to vector<16x256xf32>
    %117 = arith.mulf %115, %116 : vector<16x256xf32>
    %118 = arith.mulf %117, %117 : vector<16x256xf32>
    %cst_55 = arith.constant dense<0.000000e+00> : vector<256xf32>
    %119 = vector.multi_reduction <add>, %118, %cst_55 [0] : vector<16x256xf32> to vector<256xf32>
    %120 = vector.shape_cast %119 : vector<256xf32> to vector<1x256xf32>
    %cst_56 = arith.constant 1.250000e-01 : f32
    %121 = vector.broadcast %cst_56 : f32 to vector<1x256xf32>
    %122 = arith.mulf %120, %121 : vector<1x256xf32>
    %c1_57 = arith.constant 1 : index
    %c0_58 = arith.constant 0 : index
    %123 = vector.load %arg10[%c1_57, %c0_58] : memref<3x256xf32, #tpu.memory_space<vmem>>, vector<1x256xf32>
    %cst_59 = arith.constant 9.99999974E-6 : f32
    %124 = vector.broadcast %cst_59 : f32 to vector<1x256xf32>
    %125 = arith.addf %122, %124 : vector<1x256xf32>
    %126 = math.rsqrt %125 : vector<1x256xf32>
    %127 = arith.mulf %123, %126 : vector<1x256xf32>
    %c2_60 = arith.constant 2 : index
    %c0_61 = arith.constant 0 : index
    %128 = vector.load %arg10[%c2_60, %c0_61] : memref<3x256xf32, #tpu.memory_space<vmem>>, vector<1x256xf32>
    %129 = arith.mulf %113, %127 : vector<1x256xf32>
    %130 = arith.subf %128, %129 : vector<1x256xf32>
    %131 = vector.broadcast %127 : vector<1x256xf32> to vector<16x256xf32>
    %132 = arith.mulf %107, %131 : vector<16x256xf32>
    %133 = vector.broadcast %130 : vector<1x256xf32> to vector<16x256xf32>
    %134 = arith.addf %132, %133 : vector<16x256xf32>
    %c0_i32_62 = arith.constant 0 : i32
    %c0_i32_63 = arith.constant 0 : i32
    %c0_i32_64 = arith.constant 0 : i32
    %135 = tpu.memref_slice %arg16[%c0_i32_63, %c0_i32_64] : memref<1024x1024xbf16, #tpu.memory_space<vmem>> -> memref<512x512xbf16, #tpu.memory_space<vmem>>
    %136 = tpu.memref_slice %arg18[%c0_i32_62] : memref<2x!tpu.dma_semaphore, #tpu.memory_space<semaphore_mem>> -> memref<1x!tpu.dma_semaphore, #tpu.memory_space<semaphore_mem>>
    %137 = tpu.memref_squeeze %136 : memref<1x!tpu.dma_semaphore, #tpu.memory_space<semaphore_mem>> -> memref<!tpu.dma_semaphore, #tpu.memory_space<semaphore_mem>>
    tpu.enqueue_dma source(%arg5 : memref<512x512xbf16, #tpu.memory_space<any>>) target(%135 : memref<512x512xbf16, #tpu.memory_space<vmem>>) target_semaphore(%137 : memref<!tpu.dma_semaphore, #tpu.memory_space<semaphore_mem>>)
    %c1_i32_65 = arith.constant 1 : i32
    %c0_i32_66 = arith.constant 0 : i32
    %c0_i32_67 = arith.constant 0 : i32
    %138 = tpu.memref_slice %arg17[%c0_i32_66, %c0_i32_67] : memref<1024x1024xbf16, #tpu.memory_space<vmem>> -> memref<256x512xbf16, #tpu.memory_space<vmem>>
    %139 = tpu.memref_slice %arg18[%c1_i32_65] : memref<2x!tpu.dma_semaphore, #tpu.memory_space<semaphore_mem>> -> memref<1x!tpu.dma_semaphore, #tpu.memory_space<semaphore_mem>>
    %140 = tpu.memref_squeeze %139 : memref<1x!tpu.dma_semaphore, #tpu.memory_space<semaphore_mem>> -> memref<!tpu.dma_semaphore, #tpu.memory_space<semaphore_mem>>
    tpu.wait_dma2 semaphore(%140 : memref<!tpu.dma_semaphore, #tpu.memory_space<semaphore_mem>>) src(%arg4 : memref<256x512xbf16, #tpu.memory_space<any>>) dst(%138 : memref<256x512xbf16, #tpu.memory_space<vmem>>)
    %c0_68 = arith.constant 0 : index
    %c0_69 = arith.constant 0 : index
    %141 = vector.load %arg17[%c0_68, %c0_69] : memref<1024x1024xbf16, #tpu.memory_space<vmem>>, vector<256x512xbf16>
    %142 = arith.truncf %134 : vector<16x256xf32> to vector<16x256xbf16>
    %cst_70 = arith.constant dense<0.000000e+00> : vector<16x512xf32>
    %143 = tpu.matmul %142, %141, %cst_70 {dimension_numbers = #tpu.dot_dimension_numbers<[1], [0], [0], [1], [0, 0, 1, 1], [], []>} : vector<16x256xbf16>, vector<256x512xbf16>, vector<16x512xf32> -> vector<16x512xf32>
    %c0_71 = arith.constant 0 : index
    %c0_72 = arith.constant 0 : index
    %144 = vector.load %arg11[%c0_71, %c0_72] : memref<3x512xf32, #tpu.memory_space<vmem>>, vector<1x512xf32>
    %145 = vector.broadcast %144 : vector<1x512xf32> to vector<16x512xf32>
    %146 = arith.addf %143, %145 : vector<16x512xf32>
    %cst_73 = arith.constant 2.000000e-02 : f32
    %147 = vector.broadcast %cst_73 : f32 to vector<16x512xf32>
    %148 = arith.mulf %147, %146 : vector<16x512xf32>
    %149 = arith.maximumf %146, %148 : vector<16x512xf32>
    %150 = vector.broadcast %8 : vector<16x1xf32> to vector<16x512xf32>
    %151 = arith.mulf %149, %150 : vector<16x512xf32>
    %cst_74 = arith.constant dense<0.000000e+00> : vector<512xf32>
    %152 = vector.multi_reduction <add>, %151, %cst_74 [0] : vector<16x512xf32> to vector<512xf32>
    %153 = vector.shape_cast %152 : vector<512xf32> to vector<1x512xf32>
    %cst_75 = arith.constant 1.250000e-01 : f32
    %154 = vector.broadcast %cst_75 : f32 to vector<1x512xf32>
    %155 = arith.mulf %153, %154 : vector<1x512xf32>
    %156 = vector.broadcast %155 : vector<1x512xf32> to vector<16x512xf32>
    %157 = arith.subf %149, %156 : vector<16x512xf32>
    %158 = vector.broadcast %8 : vector<16x1xf32> to vector<16x512xf32>
    %159 = arith.mulf %157, %158 : vector<16x512xf32>
    %160 = arith.mulf %159, %159 : vector<16x512xf32>
    %cst_76 = arith.constant dense<0.000000e+00> : vector<512xf32>
    %161 = vector.multi_reduction <add>, %160, %cst_76 [0] : vector<16x512xf32> to vector<512xf32>
    %162 = vector.shape_cast %161 : vector<512xf32> to vector<1x512xf32>
    %cst_77 = arith.constant 1.250000e-01 : f32
    %163 = vector.broadcast %cst_77 : f32 to vector<1x512xf32>
    %164 = arith.mulf %162, %163 : vector<1x512xf32>
    %c1_78 = arith.constant 1 : index
    %c0_79 = arith.constant 0 : index
    %165 = vector.load %arg11[%c1_78, %c0_79] : memref<3x512xf32, #tpu.memory_space<vmem>>, vector<1x512xf32>
    %cst_80 = arith.constant 9.99999974E-6 : f32
    %166 = vector.broadcast %cst_80 : f32 to vector<1x512xf32>
    %167 = arith.addf %164, %166 : vector<1x512xf32>
    %168 = math.rsqrt %167 : vector<1x512xf32>
    %169 = arith.mulf %165, %168 : vector<1x512xf32>
    %c2_81 = arith.constant 2 : index
    %c0_82 = arith.constant 0 : index
    %170 = vector.load %arg11[%c2_81, %c0_82] : memref<3x512xf32, #tpu.memory_space<vmem>>, vector<1x512xf32>
    %171 = arith.mulf %155, %169 : vector<1x512xf32>
    %172 = arith.subf %170, %171 : vector<1x512xf32>
    %173 = vector.broadcast %169 : vector<1x512xf32> to vector<16x512xf32>
    %174 = arith.mulf %149, %173 : vector<16x512xf32>
    %175 = vector.broadcast %172 : vector<1x512xf32> to vector<16x512xf32>
    %176 = arith.addf %174, %175 : vector<16x512xf32>
    %c1_i32_83 = arith.constant 1 : i32
    %c0_i32_84 = arith.constant 0 : i32
    %c0_i32_85 = arith.constant 0 : i32
    %177 = tpu.memref_slice %arg17[%c0_i32_84, %c0_i32_85] : memref<1024x1024xbf16, #tpu.memory_space<vmem>> -> memref<512x1024xbf16, #tpu.memory_space<vmem>>
    %178 = tpu.memref_slice %arg18[%c1_i32_83] : memref<2x!tpu.dma_semaphore, #tpu.memory_space<semaphore_mem>> -> memref<1x!tpu.dma_semaphore, #tpu.memory_space<semaphore_mem>>
    %179 = tpu.memref_squeeze %178 : memref<1x!tpu.dma_semaphore, #tpu.memory_space<semaphore_mem>> -> memref<!tpu.dma_semaphore, #tpu.memory_space<semaphore_mem>>
    tpu.enqueue_dma source(%arg6 : memref<512x1024xbf16, #tpu.memory_space<any>>) target(%177 : memref<512x1024xbf16, #tpu.memory_space<vmem>>) target_semaphore(%179 : memref<!tpu.dma_semaphore, #tpu.memory_space<semaphore_mem>>)
    %c0_i32_86 = arith.constant 0 : i32
    %c0_i32_87 = arith.constant 0 : i32
    %c0_i32_88 = arith.constant 0 : i32
    %180 = tpu.memref_slice %arg16[%c0_i32_87, %c0_i32_88] : memref<1024x1024xbf16, #tpu.memory_space<vmem>> -> memref<512x512xbf16, #tpu.memory_space<vmem>>
    %181 = tpu.memref_slice %arg18[%c0_i32_86] : memref<2x!tpu.dma_semaphore, #tpu.memory_space<semaphore_mem>> -> memref<1x!tpu.dma_semaphore, #tpu.memory_space<semaphore_mem>>
    %182 = tpu.memref_squeeze %181 : memref<1x!tpu.dma_semaphore, #tpu.memory_space<semaphore_mem>> -> memref<!tpu.dma_semaphore, #tpu.memory_space<semaphore_mem>>
    tpu.wait_dma2 semaphore(%182 : memref<!tpu.dma_semaphore, #tpu.memory_space<semaphore_mem>>) src(%arg5 : memref<512x512xbf16, #tpu.memory_space<any>>) dst(%180 : memref<512x512xbf16, #tpu.memory_space<vmem>>)
    %c0_89 = arith.constant 0 : index
    %c0_90 = arith.constant 0 : index
    %183 = vector.load %arg16[%c0_89, %c0_90] : memref<1024x1024xbf16, #tpu.memory_space<vmem>>, vector<512x512xbf16>
    %184 = arith.truncf %176 : vector<16x512xf32> to vector<16x512xbf16>
    %cst_91 = arith.constant dense<0.000000e+00> : vector<16x512xf32>
    %185 = tpu.matmul %184, %183, %cst_91 {dimension_numbers = #tpu.dot_dimension_numbers<[1], [0], [0], [1], [0, 0, 1, 1], [], []>} : vector<16x512xbf16>, vector<512x512xbf16>, vector<16x512xf32> -> vector<16x512xf32>
    %c0_92 = arith.constant 0 : index
    %c0_93 = arith.constant 0 : index
    %186 = vector.load %arg12[%c0_92, %c0_93] : memref<3x512xf32, #tpu.memory_space<vmem>>, vector<1x512xf32>
    %187 = vector.broadcast %186 : vector<1x512xf32> to vector<16x512xf32>
    %188 = arith.addf %185, %187 : vector<16x512xf32>
    %cst_94 = arith.constant 2.000000e-02 : f32
    %189 = vector.broadcast %cst_94 : f32 to vector<16x512xf32>
    %190 = arith.mulf %189, %188 : vector<16x512xf32>
    %191 = arith.maximumf %188, %190 : vector<16x512xf32>
    %192 = vector.broadcast %8 : vector<16x1xf32> to vector<16x512xf32>
    %193 = arith.mulf %191, %192 : vector<16x512xf32>
    %cst_95 = arith.constant dense<0.000000e+00> : vector<512xf32>
    %194 = vector.multi_reduction <add>, %193, %cst_95 [0] : vector<16x512xf32> to vector<512xf32>
    %195 = vector.shape_cast %194 : vector<512xf32> to vector<1x512xf32>
    %cst_96 = arith.constant 1.250000e-01 : f32
    %196 = vector.broadcast %cst_96 : f32 to vector<1x512xf32>
    %197 = arith.mulf %195, %196 : vector<1x512xf32>
    %198 = vector.broadcast %197 : vector<1x512xf32> to vector<16x512xf32>
    %199 = arith.subf %191, %198 : vector<16x512xf32>
    %200 = vector.broadcast %8 : vector<16x1xf32> to vector<16x512xf32>
    %201 = arith.mulf %199, %200 : vector<16x512xf32>
    %202 = arith.mulf %201, %201 : vector<16x512xf32>
    %cst_97 = arith.constant dense<0.000000e+00> : vector<512xf32>
    %203 = vector.multi_reduction <add>, %202, %cst_97 [0] : vector<16x512xf32> to vector<512xf32>
    %204 = vector.shape_cast %203 : vector<512xf32> to vector<1x512xf32>
    %cst_98 = arith.constant 1.250000e-01 : f32
    %205 = vector.broadcast %cst_98 : f32 to vector<1x512xf32>
    %206 = arith.mulf %204, %205 : vector<1x512xf32>
    %c1_99 = arith.constant 1 : index
    %c0_100 = arith.constant 0 : index
    %207 = vector.load %arg12[%c1_99, %c0_100] : memref<3x512xf32, #tpu.memory_space<vmem>>, vector<1x512xf32>
    %cst_101 = arith.constant 9.99999974E-6 : f32
    %208 = vector.broadcast %cst_101 : f32 to vector<1x512xf32>
    %209 = arith.addf %206, %208 : vector<1x512xf32>
    %210 = math.rsqrt %209 : vector<1x512xf32>
    %211 = arith.mulf %207, %210 : vector<1x512xf32>
    %c2_102 = arith.constant 2 : index
    %c0_103 = arith.constant 0 : index
    %212 = vector.load %arg12[%c2_102, %c0_103] : memref<3x512xf32, #tpu.memory_space<vmem>>, vector<1x512xf32>
    %213 = arith.mulf %197, %211 : vector<1x512xf32>
    %214 = arith.subf %212, %213 : vector<1x512xf32>
    %215 = vector.broadcast %211 : vector<1x512xf32> to vector<16x512xf32>
    %216 = arith.mulf %191, %215 : vector<16x512xf32>
    %217 = vector.broadcast %214 : vector<1x512xf32> to vector<16x512xf32>
    %218 = arith.addf %216, %217 : vector<16x512xf32>
    %c0_i32_104 = arith.constant 0 : i32
    %c0_i32_105 = arith.constant 0 : i32
    %c0_i32_106 = arith.constant 0 : i32
    %219 = tpu.memref_slice %arg16[%c0_i32_105, %c0_i32_106] : memref<1024x1024xbf16, #tpu.memory_space<vmem>> -> memref<1024x256xbf16, #tpu.memory_space<vmem>>
    %220 = tpu.memref_slice %arg18[%c0_i32_104] : memref<2x!tpu.dma_semaphore, #tpu.memory_space<semaphore_mem>> -> memref<1x!tpu.dma_semaphore, #tpu.memory_space<semaphore_mem>>
    %221 = tpu.memref_squeeze %220 : memref<1x!tpu.dma_semaphore, #tpu.memory_space<semaphore_mem>> -> memref<!tpu.dma_semaphore, #tpu.memory_space<semaphore_mem>>
    tpu.enqueue_dma source(%arg7 : memref<1024x256xbf16, #tpu.memory_space<any>>) target(%219 : memref<1024x256xbf16, #tpu.memory_space<vmem>>) target_semaphore(%221 : memref<!tpu.dma_semaphore, #tpu.memory_space<semaphore_mem>>)
    %c1_i32_107 = arith.constant 1 : i32
    %c0_i32_108 = arith.constant 0 : i32
    %c0_i32_109 = arith.constant 0 : i32
    %222 = tpu.memref_slice %arg17[%c0_i32_108, %c0_i32_109] : memref<1024x1024xbf16, #tpu.memory_space<vmem>> -> memref<512x1024xbf16, #tpu.memory_space<vmem>>
    %223 = tpu.memref_slice %arg18[%c1_i32_107] : memref<2x!tpu.dma_semaphore, #tpu.memory_space<semaphore_mem>> -> memref<1x!tpu.dma_semaphore, #tpu.memory_space<semaphore_mem>>
    %224 = tpu.memref_squeeze %223 : memref<1x!tpu.dma_semaphore, #tpu.memory_space<semaphore_mem>> -> memref<!tpu.dma_semaphore, #tpu.memory_space<semaphore_mem>>
    tpu.wait_dma2 semaphore(%224 : memref<!tpu.dma_semaphore, #tpu.memory_space<semaphore_mem>>) src(%arg6 : memref<512x1024xbf16, #tpu.memory_space<any>>) dst(%222 : memref<512x1024xbf16, #tpu.memory_space<vmem>>)
    %c0_110 = arith.constant 0 : index
    %c0_111 = arith.constant 0 : index
    %225 = vector.load %arg17[%c0_110, %c0_111] : memref<1024x1024xbf16, #tpu.memory_space<vmem>>, vector<512x1024xbf16>
    %226 = arith.truncf %218 : vector<16x512xf32> to vector<16x512xbf16>
    %cst_112 = arith.constant dense<0.000000e+00> : vector<16x1024xf32>
    %227 = tpu.matmul %226, %225, %cst_112 {dimension_numbers = #tpu.dot_dimension_numbers<[1], [0], [0], [1], [0, 0, 1, 1], [], []>} : vector<16x512xbf16>, vector<512x1024xbf16>, vector<16x1024xf32> -> vector<16x1024xf32>
    %c0_113 = arith.constant 0 : index
    %c0_114 = arith.constant 0 : index
    %228 = vector.load %arg13[%c0_113, %c0_114] : memref<3x1024xf32, #tpu.memory_space<vmem>>, vector<1x1024xf32>
    %229 = vector.broadcast %228 : vector<1x1024xf32> to vector<16x1024xf32>
    %230 = arith.addf %227, %229 : vector<16x1024xf32>
    %cst_115 = arith.constant 2.000000e-02 : f32
    %231 = vector.broadcast %cst_115 : f32 to vector<16x1024xf32>
    %232 = arith.mulf %231, %230 : vector<16x1024xf32>
    %233 = arith.maximumf %230, %232 : vector<16x1024xf32>
    %234 = vector.broadcast %8 : vector<16x1xf32> to vector<16x1024xf32>
    %235 = arith.mulf %233, %234 : vector<16x1024xf32>
    %cst_116 = arith.constant dense<0.000000e+00> : vector<1024xf32>
    %236 = vector.multi_reduction <add>, %235, %cst_116 [0] : vector<16x1024xf32> to vector<1024xf32>
    %237 = vector.shape_cast %236 : vector<1024xf32> to vector<1x1024xf32>
    %cst_117 = arith.constant 1.250000e-01 : f32
    %238 = vector.broadcast %cst_117 : f32 to vector<1x1024xf32>
    %239 = arith.mulf %237, %238 : vector<1x1024xf32>
    %240 = vector.broadcast %239 : vector<1x1024xf32> to vector<16x1024xf32>
    %241 = arith.subf %233, %240 : vector<16x1024xf32>
    %242 = vector.broadcast %8 : vector<16x1xf32> to vector<16x1024xf32>
    %243 = arith.mulf %241, %242 : vector<16x1024xf32>
    %244 = arith.mulf %243, %243 : vector<16x1024xf32>
    %cst_118 = arith.constant dense<0.000000e+00> : vector<1024xf32>
    %245 = vector.multi_reduction <add>, %244, %cst_118 [0] : vector<16x1024xf32> to vector<1024xf32>
    %246 = vector.shape_cast %245 : vector<1024xf32> to vector<1x1024xf32>
    %cst_119 = arith.constant 1.250000e-01 : f32
    %247 = vector.broadcast %cst_119 : f32 to vector<1x1024xf32>
    %248 = arith.mulf %246, %247 : vector<1x1024xf32>
    %c1_120 = arith.constant 1 : index
    %c0_121 = arith.constant 0 : index
    %249 = vector.load %arg13[%c1_120, %c0_121] : memref<3x1024xf32, #tpu.memory_space<vmem>>, vector<1x1024xf32>
    %cst_122 = arith.constant 9.99999974E-6 : f32
    %250 = vector.broadcast %cst_122 : f32 to vector<1x1024xf32>
    %251 = arith.addf %248, %250 : vector<1x1024xf32>
    %252 = math.rsqrt %251 : vector<1x1024xf32>
    %253 = arith.mulf %249, %252 : vector<1x1024xf32>
    %c2_123 = arith.constant 2 : index
    %c0_124 = arith.constant 0 : index
    %254 = vector.load %arg13[%c2_123, %c0_124] : memref<3x1024xf32, #tpu.memory_space<vmem>>, vector<1x1024xf32>
    %255 = arith.mulf %239, %253 : vector<1x1024xf32>
    %256 = arith.subf %254, %255 : vector<1x1024xf32>
    %257 = vector.broadcast %253 : vector<1x1024xf32> to vector<16x1024xf32>
    %258 = arith.mulf %233, %257 : vector<16x1024xf32>
    %259 = vector.broadcast %256 : vector<1x1024xf32> to vector<16x1024xf32>
    %260 = arith.addf %258, %259 : vector<16x1024xf32>
    %c0_i32_125 = arith.constant 0 : i32
    %c0_i32_126 = arith.constant 0 : i32
    %c0_i32_127 = arith.constant 0 : i32
    %261 = tpu.memref_slice %arg16[%c0_i32_126, %c0_i32_127] : memref<1024x1024xbf16, #tpu.memory_space<vmem>> -> memref<1024x256xbf16, #tpu.memory_space<vmem>>
    %262 = tpu.memref_slice %arg18[%c0_i32_125] : memref<2x!tpu.dma_semaphore, #tpu.memory_space<semaphore_mem>> -> memref<1x!tpu.dma_semaphore, #tpu.memory_space<semaphore_mem>>
    %263 = tpu.memref_squeeze %262 : memref<1x!tpu.dma_semaphore, #tpu.memory_space<semaphore_mem>> -> memref<!tpu.dma_semaphore, #tpu.memory_space<semaphore_mem>>
    tpu.wait_dma2 semaphore(%263 : memref<!tpu.dma_semaphore, #tpu.memory_space<semaphore_mem>>) src(%arg7 : memref<1024x256xbf16, #tpu.memory_space<any>>) dst(%261 : memref<1024x256xbf16, #tpu.memory_space<vmem>>)
    %c0_128 = arith.constant 0 : index
    %c0_129 = arith.constant 0 : index
    %264 = vector.load %arg16[%c0_128, %c0_129] : memref<1024x1024xbf16, #tpu.memory_space<vmem>>, vector<1024x256xbf16>
    %265 = arith.truncf %260 : vector<16x1024xf32> to vector<16x1024xbf16>
    %cst_130 = arith.constant dense<0.000000e+00> : vector<16x256xf32>
    %266 = tpu.matmul %265, %264, %cst_130 {dimension_numbers = #tpu.dot_dimension_numbers<[1], [0], [0], [1], [0, 0, 1, 1], [], []>} : vector<16x1024xbf16>, vector<1024x256xbf16>, vector<16x256xf32> -> vector<16x256xf32>
    %c0_131 = arith.constant 0 : index
    %c0_132 = arith.constant 0 : index
    %267 = vector.load %arg14[%c0_131, %c0_132] : memref<1x256xf32, #tpu.memory_space<vmem>>, vector<1x256xf32>
    %268 = vector.broadcast %267 : vector<1x256xf32> to vector<16x256xf32>
    %269 = arith.addf %266, %268 : vector<16x256xf32>
    %270 = math.tanh %269 : vector<16x256xf32>
    %c0_133 = arith.constant 0 : index
    %c0_134 = arith.constant 0 : index
    %271 = vector.load %arg15[%c0_133, %c0_134] : memref<16x256xf32, #tpu.memory_space<vmem>>, vector<16x256xf32>
    tpu.vector_store %arg15[%c0_133, %c0_134], %270 {strides = array<i32>} : memref<16x256xf32, #tpu.memory_space<vmem>>, vector<16x256xf32>,
    return
  }
}

</mosaic_0001>

<bundles_post_ra>
// kernel: tpu_custom_call.1
= control target key start
LH: loop header
LB: loop body
LE: loop exit
PB: predicated region body
PF: predicated region fallthrough
CT: control target
= control target key end

     0   :  { %20 = vsyncpa [#allocation6], 0  ;;  %s10506_s0 = inlined_call_operand.hbm [shape: f32[16,128], index: 0, kind: input, shape index: {}]   ;;  %s10507_s1 = inlined_call_operand.hbm [shape: bf16[128,128], index: 1, kind: input, shape index: {}]   ;;  %s10508_s2 = inlined_call_operand.hbm [shape: bf16[128,128], index: 2, kind: input, shape index: {}]   ;;  %s10509_s3 = inlined_call_operand.hbm [shape: bf16[128,256], index: 3, kind: input, shape index: {}]   ;;  %s10510_s4 = inlined_call_operand.hbm [shape: bf16[256,512], index: 4, kind: input, shape index: {}]   ;;  %s10511_s5 = inlined_call_operand.hbm [shape: bf16[512,512], index: 5, kind: input, shape index: {}]   ;;  %s10512_s6 = inlined_call_operand.hbm [shape: bf16[512,1024], index: 6, kind: input, shape index: {}]   ;;  %s10513_s7 = inlined_call_operand.hbm [shape: bf16[1024,256], index: 7, kind: input, shape index: {}]   ;;  %s10514_s8 = inlined_call_operand.hbm [shape: f32[3,128], index: 8, kind: input, shape index: {}]   ;;  %s10515_s9 = inlined_call_operand.hbm [shape: f32[3,128], index: 9, kind: input, shape index: {}]   ;;  %s10516_s10 = inlined_call_operand.vmem [shape: f32[3,256], index: 10, kind: input, shape index: {}]   ;;  %s10517_s11 = inlined_call_operand.hbm [shape: f32[3,512], index: 11, kind: input, shape index: {}]   ;;  %s10518_s12 = inlined_call_operand.hbm [shape: f32[3,512], index: 12, kind: input, shape index: {}]   ;;  %s10519_s13 = inlined_call_operand.hbm [shape: f32[3,1024], index: 13, kind: input, shape index: {}]   ;;  %s10520_s14 = inlined_call_operand.vmem [shape: f32[1,256], index: 14, kind: input, shape index: {}]   ;;  %s10521_s15 = inlined_call_operand.hbm [shape: f32[16,256], index: 15, kind: output, shape index: {}]  }
   0x1   :  { %21 = vsyncpa [#allocation9], 0 }
   0x2   :  { %22 = vsyncpa [#allocation12], 0 }
   0x3   :  { %23 = vsyncpa [#allocation15], 0  ;;  %s43_s20 = sshll.u32 %s10514_s8, 4  ;;  %s44_s20 = int_to_ptr.hbm [resolvable:$true] %s43_s20 }
   0x4   :  { %24 = vsyncpa [#allocation7], 0  ;;  %s9654_s21 = smov [#allocation8]   ;;  %s67_s25 = sshll.u32 %s10517_s11, 4  ;;  %s68_s25 = int_to_ptr.hbm [resolvable:$true] %s67_s25 }
   0x5   :  { %s45_s22 = sshll.u32 %s9654_s21, 4  ;;  %s9655_s26 = smov [#allocation11]   ;;  %s46_s22 = int_to_ptr.vmem [resolvable:$true] %s45_s22 }
   0x6   :  { %48 = dma.hbm_to_vmem [thread:$0]  %s44_s20, 64, %s46_s22, [#allocation9]  }
   0x7   :  { %s69_s27 = sshll.u32 %s9655_s26, 4  ;;  %s29_s30 = sshll.u32 %s10506_s0, 4  ;;  %s70_s27 = int_to_ptr.vmem [resolvable:$true] %s69_s27  ;;  %s30_s30 = int_to_ptr.hbm [resolvable:$true] %s29_s30 }
   0x8   :  { %72 = dma.hbm_to_vmem [thread:$0]  %s68_s25, 256, %s70_s27, [#allocation12]  }
   0x9   :  { %s9656_s8 = smov [#allocation5]   ;;  %s54_s19 = sshll.u32 %s10515_s9, 4  ;;  %s55_s19 = int_to_ptr.hbm [resolvable:$true] %s54_s19 }
   0xa   :  { %s31_s16 = sshll.u32 %s9656_s8, 4  ;;  %s9657_s21 = smov 128   ;;  %s32_s16 = int_to_ptr.vmem [resolvable:$true] %s31_s16 }
   0xb   :  { %s9658_s11 = smov 8   ;;  %s9659_s20 = smov [#allocation10]  }
   0xc   :  { %37 = dma.hbm_to_vmem [thread:$0]  %s30_s30, 256, %s32_s16, [#allocation6], %s9657_s21, %s9657_s21, %s9658_s11  }
   0xd   :  { %s56_s22 = sshll.u32 %s9659_s20, 4  ;;  %s78_s24 = sshll.u32 %s10518_s12, 4  ;;  %s57_s22 = int_to_ptr.vmem [resolvable:$true] %s56_s22  ;;  %s79_s24 = int_to_ptr.hbm [resolvable:$true] %s78_s24 }
   0xe   :  { %59 = dma.hbm_to_vmem [thread:$0]  %s55_s19, 64, %s57_s22, [#allocation9]  }
   0xf   :  { %s89_s9 = sshll.u32 %s10519_s13, 4  ;;  %s9660_s27 = smov [#allocation13]   ;;  %s90_s9 = int_to_ptr.hbm [resolvable:$true] %s89_s9 }
  0x10   :  { %s80_s28 = sshll.u32 %s9660_s27, 4  ;;  %s9661_s29 = smov [#allocation14]   ;;  %s81_s28 = int_to_ptr.vmem [resolvable:$true] %s80_s28 }
  0x11   :  { %83 = dma.hbm_to_vmem [thread:$0]  %s79_s24, 256, %s81_s28, [#allocation12]  }
  0x12   :  { %s91_s30 = sshll.u32 %s9661_s29, 4  ;;  %s92_s30 = int_to_ptr.vmem [resolvable:$true] %s91_s30 }
  0x13   :  { %94 = dma.hbm_to_vmem [thread:$0]  %s90_s9, 512, %s92_s30, [#allocation15]  }
  0x14   :  { %9630 = dma.done.wait [#allocation6], 256  }
  0x15   :  { %9631 = vsyncadd [#allocation6], 4294967040 }
  0x16   :  { %9632 = dma.done.wait [#allocation9], 128  }
  0x17   :  { %9633 = vsyncadd [#allocation9], 4294967168 }
  0x18   :  { %9634 = dma.done.wait [#allocation12], 512  }
  0x19   :  { %9635 = vsyncadd [#allocation12], 4294966784 }
  0x1a   :  { %9636 = dma.done.wait [#allocation15], 512  }
  0x1b   :  { %9637 = vsyncadd [#allocation15], 4294966784  ;;  %s121_s13 = sshll.u32 %s10507_s1, 4  ;;  %s9662_s16 = smov [#allocation2]   ;;  %v129_v0 = vld [vmem:[#allocation5] sm:$0xff]  ;;  %v130_v1 = vld [vmem:[#allocation5 + $0x8] sm:$0xff]  ;;  %s122_s13 = int_to_ptr.hbm [resolvable:$true] %s121_s13 }
  0x1c   :  { %s123_s17 = sshll.u32 %s9662_s16, 4  ;;  %s9663_s18 = smov 64   ;;  %s9774_s17 = int_to_ptr.vmem [resolvable:$true] %s123_s17 }
  0x1d   :  { %s9664_s19 = smov 512   ;;  %s9665_s20 = smov 4  }
  0x1e   :  { %128 = dma.hbm_to_vmem [thread:$0]  %s122_s13, 1024, %s9774_s17, [#allocation4], %s9663_s18, %s9664_s19, %s9665_s20 }
  0x1f   :  { %s141_s23 = sshll.u32 %s10508_s2, 4  ;;  %s9666_s24 = smov [#allocation3]   ;;  %s142_s23 = int_to_ptr.hbm [resolvable:$true] %s141_s23 }
  0x20   :  { %s143_s25 = sshll.u32 %s9666_s24, 4  ;;  %s9781_s25 = int_to_ptr.vmem [resolvable:$true] %s143_s25 }
  0x21   :  { %148 = dma.hbm_to_vmem [thread:$0]  %s142_s23, 1024, %s9781_s25, [#allocation4 + $0x1], %s9663_s18, %s9664_s19, %s9665_s20 }
  0x22   :  { %9638 = dma.done.wait [#allocation4], 1024 }
  0x23   :  { %9639 = vsyncadd [#allocation4], 4294966272  ;;  %v6213_v2 = vld [vmem:[#allocation2 + $0x1c0] sm:$0xf]  ;;  %v169_v26 = vpack.c.bf16 %v130_v1, %v129_v0  ;;  %s284_s26 = sshll.u32 %s10509_s3, 4  ;;  %s285_s26 = int_to_ptr.hbm [resolvable:$true] %s284_s26 }
  0x24   :  { %v8626_v3 = vld [vmem:[#allocation2 + $0x1dc] sm:$0xf0]  ;;  %v9243_v28 = vld [vmem:[#allocation8] ss:$0 sm:$0xff]  ;;  %v262_v0 = vld [vmem:[#allocation8 + $0x1] sm:$0x1] }
  0x25   :  { %v6209_v4 = vld [vmem:[#allocation2 + $0x180] sm:$0xf]  ;;  %v6214_v5 = vor.u32 %v8626_v3, %v6213_v2 }
  0x26   :  { %v8625_v6 = vld [vmem:[#allocation2 + $0x19c] sm:$0xf0] }
  0x27   :  { %220 = vmatpush.bf16.msra.mxu0 %v6214_v5  ;;  %v6210_v7 = vor.u32 %v8625_v6, %v6209_v4  ;;  %v6205_v8 = vld [vmem:[#allocation2 + $0x140] sm:$0xf]  ;;  %v275_v4 = vld [vmem:[#allocation8 + $0x2] sm:$0x1] }
  0x28   :  { %v8624_v9 = vld [vmem:[#allocation2 + $0x15c] sm:$0xf0] }
  0x29   :  { %v6206_v10 = vor.u32 %v8624_v9, %v6205_v8  ;;  %v6201_v11 = vld [vmem:[#allocation2 + $0x100] sm:$0xf] }
  0x2a   :  { %v8623_v12 = vld [vmem:[#allocation2 + $0x11c] sm:$0xf0] }
  0x2b   :  { %221 = vmatpush.bf16.msra.mxu0 %v6210_v7  ;;  %v6202_v13 = vor.u32 %v8623_v12, %v6201_v11  ;;  %v6197_v14 = vld [vmem:[#allocation2 + $0xc0] sm:$0xf] }
  0x2c   :  { %v8622_v15 = vld [vmem:[#allocation2 + $0xdc] sm:$0xf0] }
  0x2d   :  { %v6198_v16 = vor.u32 %v8622_v15, %v6197_v14  ;;  %v6193_v17 = vld [vmem:[#allocation2 + $0x80] sm:$0xf] }
  0x2e   :  { %v8621_v18 = vld [vmem:[#allocation2 + $0x9c] sm:$0xf0] }
  0x2f   :  { %222 = vmatpush.bf16.msra.mxu0 %v6206_v10  ;;  %v6194_v19 = vor.u32 %v8621_v18, %v6193_v17  ;;  %v6189_v20 = vld [vmem:[#allocation2 + $0x40] sm:$0xf] }
  0x30   :  { %v8620_v21 = vld [vmem:[#allocation2 + $0x5c] sm:$0xf0] }
  0x31   :  { %v6190_v22 = vor.u32 %v8620_v21, %v6189_v20  ;;  %v6185_v23 = vld [vmem:[#allocation2] sm:$0xf] }
  0x32   :  { %v8619_v24 = vld [vmem:[#allocation2 + $0x1c] sm:$0xf0] }
  0x33   :  { %223 = vmatpush.bf16.msra.mxu0 %v6202_v13  ;;  %v6186_v25 = vor.u32 %v8619_v24, %v6185_v23  ;;  %291 = dma.hbm_to_vmem [thread:$0]  %s285_s26, 2048, %s9774_s17, [#allocation4], %s9657_s21, %s9664_s19, %s9658_s11 }
  0x37   :  { %224 = vmatpush.bf16.msra.mxu0 %v6198_v16 }
  0x3b   :  { %225 = vmatpush.bf16.msra.mxu0 %v6194_v19 }
  0x3f   :  { %226 = vmatpush.bf16.msra.mxu0 %v6190_v22 }
  0x43   :  { %227 = vmatpush.bf16.msra.mxu0 %v6186_v25 }
  0x46   :  { %228 = vmatmul.bf16.vlgmr.msra.gmra.mxu0 %v169_v26 }
  0xc3   :  { %v229_v27 = vpop.f32.mrf.mxu0 }
  0xc4   :  { %v230_v29 = vadd.f32 %v9243_v28, %v229_v27 }
  0xc6   :  { %v234_v32 = vmul.f32 0.02, %v230_v29 }
  0xc8   :  { %v236_v35 = vmax.f32 %v230_v29, %v234_v32 }
  0xcb   :  { %v231_v30 = vpop.f32.mrf.mxu0 }
  0xcc   :  { %v232_v31 = vadd.f32 %v9243_v28, %v231_v30 }
  0xce   :  { %v235_v33 = vmul.f32 0.02, %v232_v31 }
  0xd0   :  { %v237_v34 = vmax.f32 %v232_v31, %v235_v33 }
  0xd2   :  { %v239_v36 = vmul.f32 0.0, %v237_v34 }
  0xd4   :  { %v240_v37 = vadd.f32 %v239_v36, %v236_v35 }
  0xd6   :  { %v241_v38 = vrot.slane %v240_v37, 4 }
  0xd8   :  { %v242_v39 = vadd.f32 %v241_v38, %v240_v37 }
  0xda   :  { %v243_v40 = vrot.slane %v242_v39, 2 }
  0xdc   :  { %v244_v41 = vadd.f32 %v243_v40, %v242_v39 }
  0xde   :  { %v245_v42 = vrot.slane %v244_v41, 1 }
  0xe0   :  { %v246_v43 = vadd.f32 %v245_v42, %v244_v41 }
  0xe2   :  { %v247_v44 = vmul.f32 0.125, %v246_v43 }
  0xe4   :  { %v248_v45 = vsub.f32 %v236_v35, %v247_v44  ;;  %v249_v46 = vsub.f32 %v237_v34, %v247_v44 }
  0xe6   :  { %v251_v47 = vmul.f32 0.0, %v249_v46  ;;  %v252_v48 = vmul.f32 %v248_v45, %v248_v45 }
  0xe8   :  { %v253_v49 = vmul.f32 %v251_v47, %v251_v47 }
  0xea   :  { %v254_v50 = vadd.f32 %v253_v49, %v252_v48 }
  0xec   :  { %v255_v51 = vrot.slane %v254_v50, 4 }
  0xee   :  { %v256_v52 = vadd.f32 %v255_v51, %v254_v50 }
  0xf0   :  { %v257_v53 = vrot.slane %v256_v52, 2 }
  0xf2   :  { %v258_v54 = vadd.f32 %v257_v53, %v256_v52 }
  0xf4   :  { %v259_v55 = vrot.slane %v258_v54, 1 }
  0xf6   :  { %v260_v56 = vadd.f32 %v259_v55, %v258_v54 }
  0xf8   :  { %v261_v57 = vmul.f32 0.125, %v260_v56 }
  0xfa   :  { %v263_v58 = vadd.f32 1e-05, %v261_v57 }
  0xfc   :  { %9244 = vrsqrt.f32 %v263_v58  ;;  %vm270_vm1 = vweird.f32 %v263_v58 }
 0x102   :  { %v9245_v59 = vpop.eup %9244 }
 0x103   :  { %v265_v60 = vmul.f32 %v9245_v59, %v263_v58  ;;  %vm271_vm0 = vweird.f32 %v9245_v59 }
 0x104   :  { %vm272_vm2 = vmor %vm270_vm1, %vm271_vm0 }
 0x105   :  { %v266_v61 = vmul.f32 %v9245_v59, %v265_v60 }
 0x107   :  { %v267_v62 = vmul.f32 0.5, %v266_v61 }
 0x109   :  { %v268_v63 = vsub.f32 1.5, %v267_v62 }
 0x10b   :  { %v269_v1 = vmul.f32 %v9245_v59, %v268_v63 }
 0x10d   :  { %v273_v2 = vsel %vm272_vm2, %v9245_v59, %v269_v1 }
 0x10e   :  { %v274_v3 = vmul.f32 %v273_v2, %v262_v0 }
 0x110   :  { %v276_v5 = vmul.f32 %v274_v3, %v247_v44  ;;  %v278_v6 = vperm.slane %v274_v3, 0 }
 0x112   :  { %v277_v7 = vsub.f32 %v275_v4, %v276_v5  ;;  %v279_v8 = vmul.f32 %v278_v6, %v236_v35  ;;  %v280_v9 = vmul.f32 %v278_v6, %v237_v34 }
 0x114   :  { %v281_v10 = vperm.slane %v277_v7, 0 }
 0x116   :  { %v282_v11 = vadd.f32 %v281_v10, %v279_v8  ;;  %v283_v12 = vadd.f32 %v281_v10, %v280_v9 }
 0x117   :  { %9640 = dma.done.wait [#allocation4 + $0x1], 1024 }
 0x118   :  { %9641 = vsyncadd [#allocation4 + $0x1], 4294966272  ;;  %v6245_v13 = vld [vmem:[#allocation3 + $0x1c0] sm:$0xf]  ;;  %v310_v37 = vpack.c.bf16 %v283_v12, %v282_v11  ;;  %s425_s27 = sshll.u32 %s10510_s4, 4  ;;  %s9667_s28 = smov 256   ;;  %s426_s27 = int_to_ptr.hbm [resolvable:$true] %s425_s27 }
 0x119   :  { %v8634_v14 = vld [vmem:[#allocation3 + $0x1dc] sm:$0xf0]  ;;  %s9668_s29 = smov 16   ;;  %v9246_v39 = vld [vmem:[#allocation10] ss:$0 sm:$0xff] }
 0x11a   :  { %v6241_v15 = vld [vmem:[#allocation3 + $0x180] sm:$0xf]  ;;  %v6246_v16 = vor.u32 %v8634_v14, %v6245_v13  ;;  %v403_v11 = vld [vmem:[#allocation10 + $0x1] sm:$0x1] }
 0x11b   :  { %v8633_v17 = vld [vmem:[#allocation3 + $0x19c] sm:$0xf0] }
 0x11c   :  { %361 = vmatpush.bf16.msra.mxu1 %v6246_v16  ;;  %v6242_v18 = vor.u32 %v8633_v17, %v6241_v15  ;;  %v6237_v19 = vld [vmem:[#allocation3 + $0x140] sm:$0xf]  ;;  %v416_v15 = vld [vmem:[#allocation10 + $0x2] sm:$0x1] }
 0x11d   :  { %v8632_v20 = vld [vmem:[#allocation3 + $0x15c] sm:$0xf0] }
 0x11e   :  { %v6238_v21 = vor.u32 %v8632_v20, %v6237_v19  ;;  %v6233_v22 = vld [vmem:[#allocation3 + $0x100] sm:$0xf] }
 0x11f   :  { %v8631_v23 = vld [vmem:[#allocation3 + $0x11c] sm:$0xf0] }
 0x120   :  { %362 = vmatpush.bf16.msra.mxu1 %v6242_v18  ;;  %v6234_v24 = vor.u32 %v8631_v23, %v6233_v22  ;;  %v6229_v25 = vld [vmem:[#allocation3 + $0xc0] sm:$0xf] }
 0x121   :  { %v8630_v26 = vld [vmem:[#allocation3 + $0xdc] sm:$0xf0] }
 0x122   :  { %v6230_v27 = vor.u32 %v8630_v26, %v6229_v25  ;;  %v6225_v28 = vld [vmem:[#allocation3 + $0x80] sm:$0xf] }
 0x123   :  { %v8629_v29 = vld [vmem:[#allocation3 + $0x9c] sm:$0xf0] }
 0x124   :  { %363 = vmatpush.bf16.msra.mxu1 %v6238_v21  ;;  %v6226_v30 = vor.u32 %v8629_v29, %v6225_v28  ;;  %v6221_v31 = vld [vmem:[#allocation3 + $0x40] sm:$0xf] }
 0x125   :  { %v8628_v32 = vld [vmem:[#allocation3 + $0x5c] sm:$0xf0] }
 0x126   :  { %v6222_v33 = vor.u32 %v8628_v32, %v6221_v31  ;;  %v6217_v34 = vld [vmem:[#allocation3] sm:$0xf] }
 0x127   :  { %v8627_v35 = vld [vmem:[#allocation3 + $0x1c] sm:$0xf0] }
 0x128   :  { %364 = vmatpush.bf16.msra.mxu1 %v6234_v24  ;;  %v6218_v36 = vor.u32 %v8627_v35, %v6217_v34  ;;  %432 = dma.hbm_to_vmem [thread:$0]  %s426_s27, 8192, %s9781_s25, [#allocation4 + $0x1], %s9667_s28, %s9664_s19, %s9668_s29 }
 0x12c   :  { %365 = vmatpush.bf16.msra.mxu1 %v6230_v27 }
 0x130   :  { %366 = vmatpush.bf16.msra.mxu1 %v6226_v30 }
 0x134   :  { %367 = vmatpush.bf16.msra.mxu1 %v6222_v33 }
 0x138   :  { %368 = vmatpush.bf16.msra.mxu1 %v6218_v36 }
 0x13b   :  { %369 = vmatmul.bf16.vlgmr.msra.gmra.mxu1 %v310_v37 }
 0x1b8   :  { %v370_v38 = vpop.f32.mrf.mxu1 }
 0x1b9   :  { %v371_v40 = vadd.f32 %v9246_v39, %v370_v38 }
 0x1bb   :  { %v375_v43 = vmul.f32 0.02, %v371_v40 }
 0x1bd   :  { %v377_v46 = vmax.f32 %v371_v40, %v375_v43 }
 0x1c0   :  { %v372_v41 = vpop.f32.mrf.mxu1 }
 0x1c1   :  { %v373_v42 = vadd.f32 %v9246_v39, %v372_v41 }
 0x1c3   :  { %v376_v44 = vmul.f32 0.02, %v373_v42 }
 0x1c5   :  { %v378_v45 = vmax.f32 %v373_v42, %v376_v44 }
 0x1c7   :  { %v380_v47 = vmul.f32 0.0, %v378_v45 }
 0x1c9   :  { %v381_v48 = vadd.f32 %v380_v47, %v377_v46 }
 0x1cb   :  { %v382_v49 = vrot.slane %v381_v48, 4 }
 0x1cd   :  { %v383_v50 = vadd.f32 %v382_v49, %v381_v48 }
 0x1cf   :  { %v384_v51 = vrot.slane %v383_v50, 2 }
 0x1d1   :  { %v385_v52 = vadd.f32 %v384_v51, %v383_v50 }
 0x1d3   :  { %v386_v53 = vrot.slane %v385_v52, 1 }
 0x1d5   :  { %v387_v54 = vadd.f32 %v386_v53, %v385_v52 }
 0x1d7   :  { %v388_v55 = vmul.f32 0.125, %v387_v54 }
 0x1d9   :  { %v389_v56 = vsub.f32 %v377_v46, %v388_v55  ;;  %v390_v57 = vsub.f32 %v378_v45, %v388_v55 }
 0x1db   :  { %v392_v58 = vmul.f32 0.0, %v390_v57  ;;  %v393_v59 = vmul.f32 %v389_v56, %v389_v56 }
 0x1dd   :  { %v394_v60 = vmul.f32 %v392_v58, %v392_v58 }
 0x1df   :  { %v395_v61 = vadd.f32 %v394_v60, %v393_v59 }
 0x1e1   :  { %v396_v62 = vrot.slane %v395_v61, 4 }
 0x1e3   :  { %v397_v63 = vadd.f32 %v396_v62, %v395_v61 }
 0x1e5   :  { %v398_v0 = vrot.slane %v397_v63, 2 }
 0x1e7   :  { %v399_v1 = vadd.f32 %v398_v0, %v397_v63 }
 0x1e9   :  { %v400_v2 = vrot.slane %v399_v1, 1 }
 0x1eb   :  { %v401_v3 = vadd.f32 %v400_v2, %v399_v1 }
 0x1ed   :  { %v402_v4 = vmul.f32 0.125, %v401_v3 }
 0x1ef   :  { %v404_v5 = vadd.f32 1e-05, %v402_v4 }
 0x1f1   :  { %9247 = vrsqrt.f32 %v404_v5  ;;  %vm411_vm4 = vweird.f32 %v404_v5 }
 0x1f7   :  { %v9248_v6 = vpop.eup %9247 }
 0x1f8   :  { %v406_v7 = vmul.f32 %v9248_v6, %v404_v5  ;;  %vm412_vm3 = vweird.f32 %v9248_v6 }
 0x1f9   :  { %vm413_vm5 = vmor %vm411_vm4, %vm412_vm3 }
 0x1fa   :  { %v407_v8 = vmul.f32 %v9248_v6, %v406_v7 }
 0x1fc   :  { %v408_v9 = vmul.f32 0.5, %v407_v8 }
 0x1fe   :  { %v409_v10 = vsub.f32 1.5, %v408_v9 }
 0x200   :  { %v410_v12 = vmul.f32 %v9248_v6, %v409_v10 }
 0x202   :  { %v414_v13 = vsel %vm413_vm5, %v9248_v6, %v410_v12 }
 0x203   :  { %v415_v14 = vmul.f32 %v414_v13, %v403_v11 }
 0x205   :  { %v417_v16 = vmul.f32 %v415_v14, %v388_v55  ;;  %v419_v17 = vperm.slane %v415_v14, 0 }
 0x207   :  { %v418_v18 = vsub.f32 %v416_v15, %v417_v16  ;;  %v420_v19 = vmul.f32 %v419_v17, %v377_v46  ;;  %v421_v20 = vmul.f32 %v419_v17, %v378_v45 }
 0x209   :  { %v422_v21 = vperm.slane %v418_v18, 0 }
 0x20b   :  { %v9799_v22 = vadd.f32 %v422_v21, %v420_v19  ;;  %v9801_v23 = vadd.f32 %v422_v21, %v421_v20 }
 0x20c   :  { %9642 = dma.done.wait [#allocation4], 2048 }
 0x20d   :  { %9643 = vsyncadd [#allocation4], 4294965248  ;;  %v6305_v24 = vld [vmem:[#allocation2 + $0x1c0] sm:$0xf]  ;;  %v8649_v26 = vld [vmem:[#allocation2 + $0x1c4] sm:$0xf]  ;;  %v452_v8 = vpack.c.bf16 %v9801_v23, %v9799_v22 }
 0x20e   :  { %v8650_v25 = vld [vmem:[#allocation2 + $0x1dc] sm:$0xf0]  ;;  %v6307_v28 = vld [vmem:[#allocation2 + $0x1e0] sm:$0xf0]  ;;  %s682_s12 = sshll.u32 %s10511_s5, 4  ;;  %vm650_vm11 = vcmask 1040384   ;;  %s683_s12 = int_to_ptr.hbm [resolvable:$true] %s682_s12 }
 0x20f   :  { %v6306_v27 = vor.u32 %v8650_v25, %v6305_v24  ;;  %v6297_v29 = vld [vmem:[#allocation2 + $0x180] sm:$0xf]  ;;  %v6310_v31 = vor.u32 %v8649_v26, %v6307_v28  ;;  %v8647_v32 = vld [vmem:[#allocation2 + $0x184] sm:$0xf] }
 0x210   :  { %v8648_v30 = vld [vmem:[#allocation2 + $0x19c] sm:$0xf0]  ;;  %v6299_v33 = vld [vmem:[#allocation2 + $0x1a0] sm:$0xf0] }
 0x211   :  { %539 = vmatpush.bf16.msra.mxu2 %v6306_v27  ;;  %v6298_v34 = vor.u32 %v8648_v30, %v6297_v29  ;;  %553 = vmatpush.bf16.msra.mxu3 %v6310_v31  ;;  %v6302_v35 = vor.u32 %v8647_v32, %v6299_v33  ;;  %v6289_v36 = vld [vmem:[#allocation2 + $0x140] sm:$0xf]  ;;  %v8645_v38 = vld [vmem:[#allocation2 + $0x144] sm:$0xf] }
 0x212   :  { %v8646_v37 = vld [vmem:[#allocation2 + $0x15c] sm:$0xf0]  ;;  %v6291_v39 = vld [vmem:[#allocation2 + $0x160] sm:$0xf0] }
 0x213   :  { %v6290_v40 = vor.u32 %v8646_v37, %v6289_v36  ;;  %v6294_v41 = vor.u32 %v8645_v38, %v6291_v39  ;;  %v6281_v42 = vld [vmem:[#allocation2 + $0x100] sm:$0xf]  ;;  %v8643_v44 = vld [vmem:[#allocation2 + $0x104] sm:$0xf] }
 0x214   :  { %v8644_v43 = vld [vmem:[#allocation2 + $0x11c] sm:$0xf0]  ;;  %v6283_v45 = vld [vmem:[#allocation2 + $0x120] sm:$0xf0] }
 0x215   :  { %540 = vmatpush.bf16.msra.mxu2 %v6298_v34  ;;  %554 = vmatpush.bf16.msra.mxu3 %v6302_v35  ;;  %v6282_v46 = vor.u32 %v8644_v43, %v6281_v42  ;;  %v6286_v47 = vor.u32 %v8643_v44, %v6283_v45  ;;  %v6273_v48 = vld [vmem:[#allocation2 + $0xc0] sm:$0xf]  ;;  %v8641_v50 = vld [vmem:[#allocation2 + $0xc4] sm:$0xf] }
 0x216   :  { %v8642_v49 = vld [vmem:[#allocation2 + $0xdc] sm:$0xf0]  ;;  %v6275_v51 = vld [vmem:[#allocation2 + $0xe0] sm:$0xf0] }
 0x217   :  { %v6274_v52 = vor.u32 %v8642_v49, %v6273_v48  ;;  %v6278_v53 = vor.u32 %v8641_v50, %v6275_v51  ;;  %v6265_v54 = vld [vmem:[#allocation2 + $0x80] sm:$0xf]  ;;  %v8639_v56 = vld [vmem:[#allocation2 + $0x84] sm:$0xf] }
 0x218   :  { %v8640_v55 = vld [vmem:[#allocation2 + $0x9c] sm:$0xf0]  ;;  %v6267_v57 = vld [vmem:[#allocation2 + $0xa0] sm:$0xf0] }
 0x219   :  { %541 = vmatpush.bf16.msra.mxu2 %v6290_v40  ;;  %555 = vmatpush.bf16.msra.mxu3 %v6294_v41  ;;  %v6266_v58 = vor.u32 %v8640_v55, %v6265_v54  ;;  %v6270_v59 = vor.u32 %v8639_v56, %v6267_v57  ;;  %v6257_v60 = vld [vmem:[#allocation2 + $0x40] sm:$0xf]  ;;  %v8637_v62 = vld [vmem:[#allocation2 + $0x44] sm:$0xf] }
 0x21a   :  { %v8638_v61 = vld [vmem:[#allocation2 + $0x5c] sm:$0xf0]  ;;  %v6259_v63 = vld [vmem:[#allocation2 + $0x60] sm:$0xf0] }
 0x21b   :  { %v6258_v0 = vor.u32 %v8638_v61, %v6257_v60  ;;  %v6262_v1 = vor.u32 %v8637_v62, %v6259_v63  ;;  %v6249_v2 = vld [vmem:[#allocation2] sm:$0xf]  ;;  %v8635_v4 = vld [vmem:[#allocation2 + $0x4] sm:$0xf] }
 0x21c   :  { %v8636_v3 = vld [vmem:[#allocation2 + $0x1c] sm:$0xf0]  ;;  %v6251_v5 = vld [vmem:[#allocation2 + $0x20] sm:$0xf0] }
 0x21d   :  { %542 = vmatpush.bf16.msra.mxu2 %v6282_v46  ;;  %556 = vmatpush.bf16.msra.mxu3 %v6286_v47  ;;  %v6250_v6 = vor.u32 %v8636_v3, %v6249_v2  ;;  %v6254_v7 = vor.u32 %v8635_v4, %v6251_v5  ;;  %689 = dma.hbm_to_vmem [thread:$0]  %s683_s12, 16384, %s9774_s17, [#allocation4], %s9667_s28, %s9664_s19, %s9668_s29 }
 0x21e   :  { %v453_v9 = vld [vmem:[%s10516_s10] ss:$4 sm:$0x3] }
 0x21f   :  { %v455_v12 = vperm.slane %v453_v9, 0  ;;  %v456_v13 = vperm.slane %v453_v9, 1 }
 0x221   :  { %543 = vmatpush.bf16.msra.mxu2 %v6274_v52  ;;  %557 = vmatpush.bf16.msra.mxu3 %v6278_v53 }
 0x225   :  { %544 = vmatpush.bf16.msra.mxu2 %v6266_v58  ;;  %558 = vmatpush.bf16.msra.mxu3 %v6270_v59 }
 0x229   :  { %545 = vmatpush.bf16.msra.mxu2 %v6258_v0  ;;  %559 = vmatpush.bf16.msra.mxu3 %v6262_v1 }
 0x22d   :  { %546 = vmatpush.bf16.msra.mxu2 %v6250_v6  ;;  %560 = vmatpush.bf16.msra.mxu3 %v6254_v7 }
 0x230   :  { %547 = vmatmul.bf16.vlgmr.msra.gmra.mxu2 %v452_v8  ;;  %561 = vmatmul.bf16.vlgmr.msra.gmra.mxu3 %v452_v8 }
 0x2b3   :  { %v548_v10 = vpop.f32.mrf.mxu2  ;;  %v562_v11 = vpop.f32.mrf.mxu3 }
 0x2b4   :  { %v549_v14 = vadd.f32 %v548_v10, %v455_v12  ;;  %v563_v15 = vadd.f32 %v562_v11, %v456_v13 }
 0x2b6   :  { %v567_v20 = vmul.f32 0.02, %v549_v14  ;;  %v568_v22 = vmul.f32 0.02, %v563_v15 }
 0x2b8   :  { %v9819_v26 = vmax.f32 %v549_v14, %v567_v20  ;;  %v9822_v28 = vmax.f32 %v563_v15, %v568_v22 }
 0x2bb   :  { %v550_v16 = vpop.f32.mrf.mxu2  ;;  %v564_v18 = vpop.f32.mrf.mxu3 }
 0x2bc   :  { %v551_v17 = vadd.f32 %v550_v16, %v455_v12  ;;  %v565_v19 = vadd.f32 %v564_v18, %v456_v13 }
 0x2be   :  { %v569_v21 = vmul.f32 0.02, %v551_v17  ;;  %v570_v23 = vmul.f32 0.02, %v565_v19 }
 0x2c0   :  { %v9815_v24 = vmax.f32 %v551_v17, %v569_v21  ;;  %v9817_v25 = vmax.f32 %v565_v19, %v570_v23  ;;  %v6311_v23 = vld [vmem:[%s10516_s10 + $0x1] ss:$4 sm:$0x3] }
 0x2c2   :  { %v577_v27 = vmul.f32 0.0, %v9815_v24  ;;  %v578_v29 = vmul.f32 0.0, %v9817_v25 }
 0x2c4   :  { %v579_v30 = vadd.f32 %v577_v27, %v9819_v26  ;;  %v586_v31 = vadd.f32 %v578_v29, %v9822_v28 }
 0x2c6   :  { %v580_v32 = vrot.slane %v579_v30, 4  ;;  %v587_v33 = vrot.slane %v586_v31, 4 }
 0x2c8   :  { %v581_v34 = vadd.f32 %v580_v32, %v579_v30  ;;  %v588_v35 = vadd.f32 %v587_v33, %v586_v31 }
 0x2ca   :  { %v582_v36 = vrot.slane %v581_v34, 2  ;;  %v589_v37 = vrot.slane %v588_v35, 2 }
 0x2cc   :  { %v583_v38 = vadd.f32 %v582_v36, %v581_v34  ;;  %v590_v39 = vadd.f32 %v589_v37, %v588_v35  ;;  %v6312_v35 = vld [vmem:[%s10516_s10 + $0x2] ss:$4 sm:$0x3] }
 0x2ce   :  { %v584_v40 = vrot.slane %v583_v38, 1  ;;  %v591_v41 = vrot.slane %v590_v39, 1 }
 0x2d0   :  { %v585_v42 = vadd.f32 %v584_v40, %v583_v38  ;;  %v592_v43 = vadd.f32 %v591_v41, %v590_v39 }
 0x2d2   :  { %v593_v44 = vmul.f32 0.125, %v585_v42  ;;  %v594_v45 = vmul.f32 0.125, %v592_v43 }
 0x2d4   :  { %v595_v46 = vsub.f32 %v9819_v26, %v593_v44  ;;  %v597_v47 = vsub.f32 %v9815_v24, %v593_v44  ;;  %v596_v48 = vsub.f32 %v9822_v28, %v594_v45  ;;  %v598_v49 = vsub.f32 %v9817_v25, %v594_v45 }
 0x2d6   :  { %v601_v50 = vmul.f32 0.0, %v597_v47  ;;  %v602_v51 = vmul.f32 0.0, %v598_v49  ;;  %v603_v52 = vmul.f32 %v595_v46, %v595_v46  ;;  %v604_v54 = vmul.f32 %v596_v48, %v596_v48 }
 0x2d8   :  { %v605_v53 = vmul.f32 %v601_v50, %v601_v50  ;;  %v606_v55 = vmul.f32 %v602_v51, %v602_v51 }
 0x2da   :  { %v607_v56 = vadd.f32 %v605_v53, %v603_v52  ;;  %v614_v57 = vadd.f32 %v606_v55, %v604_v54 }
 0x2dc   :  { %v608_v58 = vrot.slane %v607_v56, 4  ;;  %v615_v59 = vrot.slane %v614_v57, 4 }
 0x2de   :  { %v609_v60 = vadd.f32 %v608_v58, %v607_v56  ;;  %v616_v61 = vadd.f32 %v615_v59, %v614_v57 }
 0x2e0   :  { %v610_v62 = vrot.slane %v609_v60, 2  ;;  %v617_v63 = vrot.slane %v616_v61, 2 }
 0x2e2   :  { %v611_v0 = vadd.f32 %v610_v62, %v609_v60  ;;  %v618_v1 = vadd.f32 %v617_v63, %v616_v61 }
 0x2e4   :  { %v612_v2 = vrot.slane %v611_v0, 1  ;;  %v619_v3 = vrot.slane %v618_v1, 1 }
 0x2e6   :  { %v613_v4 = vadd.f32 %v612_v2, %v611_v0  ;;  %v620_v5 = vadd.f32 %v619_v3, %v618_v1 }
 0x2e8   :  { %v621_v6 = vmul.f32 0.125, %v613_v4  ;;  %v622_v7 = vmul.f32 0.125, %v620_v5 }
 0x2ea   :  { %v625_v8 = vadd.f32 1e-05, %v621_v6  ;;  %v626_v9 = vadd.f32 1e-05, %v622_v7 }
 0x2ec   :  { %9249 = vrsqrt.f32 %v625_v8  ;;  %vm643_vm8 = vweird.f32 %v626_v9  ;;  %vm633_vm10 = vweird.f32 %v625_v8 }
 0x2ed   :  { %9251 = vrsqrt.f32 %v626_v9 }
 0x2f2   :  { %v9250_v10 = vpop.eup %9249 }
 0x2f3   :  { %v9252_v11 = vpop.eup %9251  ;;  %v628_v12 = vmul.f32 %v9250_v10, %v625_v8  ;;  %vm634_vm7 = vweird.f32 %v9250_v10 }
 0x2f4   :  { %v638_v13 = vmul.f32 %v9252_v11, %v626_v9  ;;  %vm644_vm6 = vweird.f32 %v9252_v11  ;;  %vm635_vm12 = vmor %vm633_vm10, %vm634_vm7 }
 0x2f5   :  { %v629_v14 = vmul.f32 %v9250_v10, %v628_v12  ;;  %vm645_vm9 = vmor %vm643_vm8, %vm644_vm6 }
 0x2f6   :  { %v639_v15 = vmul.f32 %v9252_v11, %v638_v13 }
 0x2f7   :  { %v630_v16 = vmul.f32 0.5, %v629_v14 }
 0x2f8   :  { %v640_v17 = vmul.f32 0.5, %v639_v15 }
 0x2f9   :  { %v631_v18 = vsub.f32 1.5, %v630_v16 }
 0x2fa   :  { %v641_v19 = vsub.f32 1.5, %v640_v17 }
 0x2fb   :  { %v632_v20 = vmul.f32 %v9250_v10, %v631_v18 }
 0x2fc   :  { %v642_v21 = vmul.f32 %v9252_v11, %v641_v19 }
 0x2fd   :  { %v636_v29 = vsel %vm635_vm12, %v9250_v10, %v632_v20 }
 0x2fe   :  { %v646_v22 = vsel %vm645_vm9, %v9252_v11, %v642_v21 }
 0x2ff   :  { %v649_v27 = vrot.slane %v646_v22, 7 }
 0x301   :  { %v651_v30 = vsel %vm650_vm11, %v636_v29, %v649_v27 }
 0x302   :  { %v653_v31 = vmul.f32 %v6311_v23, %v651_v30 }
 0x304   :  { %v657_v32 = vperm.slane %v653_v31, 0  ;;  %v658_v33 = vperm.slane %v653_v31, 1 }
 0x306   :  { %v662_v34 = vmul.f32 %v658_v33, %v594_v45  ;;  %v661_v36 = vmul.f32 %v657_v32, %v593_v44  ;;  %v669_v40 = vmul.f32 %v657_v32, %v9819_v26  ;;  %v670_v41 = vmul.f32 %v658_v33, %v9822_v28 }
 0x307   :  { %v671_v42 = vmul.f32 %v657_v32, %v9815_v24  ;;  %v672_v43 = vmul.f32 %v658_v33, %v9817_v25 }
 0x308   :  { %v665_v37 = vrot.slane %v662_v34, 7 }
 0x30a   :  { %v666_v38 = vsel %vm650_vm11, %v661_v36, %v665_v37 }
 0x30b   :  { %v668_v39 = vsub.f32 %v6312_v35, %v666_v38 }
 0x30d   :  { %v674_v46 = vperm.slane %v668_v39, 0  ;;  %v675_v47 = vperm.slane %v668_v39, 1 }
 0x30f   :  { %v9843_v45 = vadd.f32 %v674_v46, %v669_v40  ;;  %v9845_v48 = vadd.f32 %v675_v47, %v670_v41  ;;  %v9847_v49 = vadd.f32 %v674_v46, %v671_v42  ;;  %v9849_v44 = vadd.f32 %v675_v47, %v672_v43 }
 0x310   :  { %9644 = dma.done.wait [#allocation4 + $0x1], 8192 }
 0x311   :  { %9645 = vsyncadd [#allocation4 + $0x1], 4294959104  ;;  %v6427_v50 = vld [vmem:[#allocation3 + $0x1c0] sm:$0xf]  ;;  %v8679_v24 = vld [vmem:[#allocation3 + $0x1c4] sm:$0xf] }
 0x312   :  { %v8681_v26 = vld [vmem:[#allocation3 + $0x1dc] sm:$0xf0]  ;;  %v6429_v53 = vld [vmem:[#allocation3 + $0x1e0] sm:$0xf0]  ;;  %s1433_s0 = sshll.u32 %s10512_s6, 4  ;;  %vm1368_vm8 = vcmask 1042434   ;;  %s1434_s0 = int_to_ptr.hbm [resolvable:$true] %s1433_s0 }
 0x313   :  { %v6555_v51 = vld [vmem:[#allocation3 + $0x3c0] sm:$0xf]  ;;  %v6428_v28 = vor.u32 %v8681_v26, %v6427_v50  ;;  %v6432_v54 = vor.u32 %v8679_v24, %v6429_v53  ;;  %v8711_v55 = vld [vmem:[#allocation3 + $0x3c4] sm:$0xf]  ;;  %vm1370_vm10 = vcmask 1041408  }
 0x314   :  { %v8713_v52 = vld [vmem:[#allocation3 + $0x3dc] sm:$0xf0]  ;;  %v6557_v56 = vld [vmem:[#allocation3 + $0x3e0] sm:$0xf0] }
 0x315   :  { %v6556_v25 = vor.u32 %v8713_v52, %v6555_v51  ;;  %v6411_v57 = vld [vmem:[#allocation3 + $0x180] sm:$0xf]  ;;  %1090 = vmatpush.bf16.msrb.mxu0 %v6428_v28  ;;  %v6560_v58 = vor.u32 %v8711_v55, %v6557_v56  ;;  %1118 = vmatpush.bf16.msrb.mxu2 %v6432_v54  ;;  %v8675_v0 = vld [vmem:[#allocation3 + $0x184] sm:$0xf] }
 0x316   :  { %v8677_v59 = vld [vmem:[#allocation3 + $0x19c] sm:$0xf0]  ;;  %v6413_v1 = vld [vmem:[#allocation3 + $0x1a0] sm:$0xf0] }
 0x317   :  { %v6539_v60 = vld [vmem:[#allocation3 + $0x380] sm:$0xf]  ;;  %1104 = vmatpush.bf16.msrb.mxu1 %v6556_v25  ;;  %v6412_v62 = vor.u32 %v8677_v59, %v6411_v57  ;;  %v8707_v2 = vld [vmem:[#allocation3 + $0x384] sm:$0xf]  ;;  %1132 = vmatpush.bf16.msrb.mxu3 %v6560_v58  ;;  %v6416_v3 = vor.u32 %v8675_v0, %v6413_v1 }
 0x318   :  { %v8709_v61 = vld [vmem:[#allocation3 + $0x39c] sm:$0xf0]  ;;  %v6541_v4 = vld [vmem:[#allocation3 + $0x3a0] sm:$0xf0] }
 0x319   :  { %v6540_v63 = vor.u32 %v8709_v61, %v6539_v60  ;;  %v6395_v5 = vld [vmem:[#allocation3 + $0x140] sm:$0xf]  ;;  %v6544_v7 = vor.u32 %v8707_v2, %v6541_v4  ;;  %v8671_v10 = vld [vmem:[#allocation3 + $0x144] sm:$0xf]  ;;  %1091 = vmatpush.bf16.msrb.mxu0 %v6412_v62  ;;  %1119 = vmatpush.bf16.msrb.mxu2 %v6416_v3 }
 0x31a   :  { %v8673_v6 = vld [vmem:[#allocation3 + $0x15c] sm:$0xf0]  ;;  %v6397_v12 = vld [vmem:[#allocation3 + $0x160] sm:$0xf0] }
 0x31b   :  { %v6523_v8 = vld [vmem:[#allocation3 + $0x340] sm:$0xf]  ;;  %v6396_v11 = vor.u32 %v8673_v6, %v6395_v5  ;;  %v8703_v13 = vld [vmem:[#allocation3 + $0x344] sm:$0xf]  ;;  %1105 = vmatpush.bf16.msrb.mxu1 %v6540_v63  ;;  %v6400_v16 = vor.u32 %v8671_v10, %v6397_v12  ;;  %1133 = vmatpush.bf16.msrb.mxu3 %v6544_v7 }
 0x31c   :  { %v8705_v9 = vld [vmem:[#allocation3 + $0x35c] sm:$0xf0]  ;;  %v6525_v14 = vld [vmem:[#allocation3 + $0x360] sm:$0xf0] }
 0x31d   :  { %v6524_v15 = vor.u32 %v8705_v9, %v6523_v8  ;;  %v6379_v17 = vld [vmem:[#allocation3 + $0x100] sm:$0xf]  ;;  %v6528_v20 = vor.u32 %v8703_v13, %v6525_v14  ;;  %v8667_v22 = vld [vmem:[#allocation3 + $0x104] sm:$0xf]  ;;  %1092 = vmatpush.bf16.msrb.mxu0 %v6396_v11  ;;  %1120 = vmatpush.bf16.msrb.mxu2 %v6400_v16  ;;  %v6435_v14 = vld [vmem:[#allocation3 + $0x1c8] sm:$0xf] }
 0x31e   :  { %v8669_v18 = vld [vmem:[#allocation3 + $0x11c] sm:$0xf0]  ;;  %v6381_v23 = vld [vmem:[#allocation3 + $0x120] sm:$0xf0]  ;;  %v6563_v16 = vld [vmem:[#allocation3 + $0x3c8] sm:$0xf] }
 0x31f   :  { %v6507_v19 = vld [vmem:[#allocation3 + $0x300] sm:$0xf]  ;;  %v8699_v27 = vld [vmem:[#allocation3 + $0x304] sm:$0xf]  ;;  %v6380_v30 = vor.u32 %v8669_v18, %v6379_v17  ;;  %1106 = vmatpush.bf16.msrb.mxu1 %v6524_v15  ;;  %v6384_v32 = vor.u32 %v8667_v22, %v6381_v23  ;;  %1134 = vmatpush.bf16.msrb.mxu3 %v6528_v20  ;;  %v8682_v15 = vld [vmem:[#allocation3 + $0x1e4] sm:$0xf0] }
 0x320   :  { %v8701_v21 = vld [vmem:[#allocation3 + $0x31c] sm:$0xf0]  ;;  %v6509_v29 = vld [vmem:[#allocation3 + $0x320] sm:$0xf0]  ;;  %v8714_v18 = vld [vmem:[#allocation3 + $0x3e4] sm:$0xf0] }
 0x321   :  { %v6508_v31 = vor.u32 %v8701_v21, %v6507_v19  ;;  %v6363_v33 = vld [vmem:[#allocation3 + $0xc0] sm:$0xf]  ;;  %v6512_v36 = vor.u32 %v8699_v27, %v6509_v29  ;;  %v8663_v38 = vld [vmem:[#allocation3 + $0xc4] sm:$0xf]  ;;  %1093 = vmatpush.bf16.msrb.mxu0 %v6380_v30  ;;  %1121 = vmatpush.bf16.msrb.mxu2 %v6384_v32  ;;  %v8680_v19 = vld [vmem:[#allocation3 + $0x1cc] sm:$0xf]  ;;  %v6436_v30 = vor.u32 %v8682_v15, %v6435_v14 }
 0x322   :  { %v8665_v34 = vld [vmem:[#allocation3 + $0xdc] sm:$0xf0]  ;;  %v6365_v39 = vld [vmem:[#allocation3 + $0xe0] sm:$0xf0]  ;;  %v6437_v20 = vld [vmem:[#allocation3 + $0x1e8] sm:$0xf0] }
 0x323   :  { %v6491_v35 = vld [vmem:[#allocation3 + $0x2c0] sm:$0xf]  ;;  %v8695_v40 = vld [vmem:[#allocation3 + $0x2c4] sm:$0xf]  ;;  %v6364_v42 = vor.u32 %v8665_v34, %v6363_v33  ;;  %1107 = vmatpush.bf16.msrb.mxu1 %v6508_v31  ;;  %v6368_v46 = vor.u32 %v8663_v38, %v6365_v39  ;;  %1135 = vmatpush.bf16.msrb.mxu3 %v6512_v36  ;;  %v8712_v23 = vld [vmem:[#allocation3 + $0x3cc] sm:$0xf]  ;;  %v6564_v31 = vor.u32 %v8714_v18, %v6563_v16 }
 0x324   :  { %v8697_v37 = vld [vmem:[#allocation3 + $0x2dc] sm:$0xf0]  ;;  %v6493_v41 = vld [vmem:[#allocation3 + $0x2e0] sm:$0xf0]  ;;  %v6565_v27 = vld [vmem:[#allocation3 + $0x3e8] sm:$0xf0]  ;;  %v6440_v32 = vor.u32 %v8680_v19, %v6437_v20 }
 0x325   :  { %v6492_v43 = vor.u32 %v8697_v37, %v6491_v35  ;;  %v6347_v47 = vld [vmem:[#allocation3 + $0x80] sm:$0xf]  ;;  %v6496_v51 = vor.u32 %v8695_v40, %v6493_v41  ;;  %v8659_v52 = vld [vmem:[#allocation3 + $0x84] sm:$0xf]  ;;  %1094 = vmatpush.bf16.msrb.mxu0 %v6364_v42  ;;  %1122 = vmatpush.bf16.msrb.mxu2 %v6368_v46  ;;  %v6419_v33 = vld [vmem:[#allocation3 + $0x188] sm:$0xf]  ;;  %v6568_v36 = vor.u32 %v8712_v23, %v6565_v27 }
 0x326   :  { %v8661_v50 = vld [vmem:[#allocation3 + $0x9c] sm:$0xf0]  ;;  %v6349_v24 = vld [vmem:[#allocation3 + $0xa0] sm:$0xf0]  ;;  %v8678_v34 = vld [vmem:[#allocation3 + $0x1a4] sm:$0xf0]  ;;  %v9853_v37 = vpack.c.bf16 %v9847_v49, %v9843_v45  ;;  %v9857_v41 = vpack.c.bf16 %v9849_v44, %v9845_v48 }
 0x327   :  { %v6475_v26 = vld [vmem:[#allocation3 + $0x280] sm:$0xf]  ;;  %v8691_v53 = vld [vmem:[#allocation3 + $0x284] sm:$0xf]  ;;  %v6348_v54 = vor.u32 %v8661_v50, %v6347_v47  ;;  %1108 = vmatpush.bf16.msrb.mxu1 %v6492_v43  ;;  %v6352_v56 = vor.u32 %v8659_v52, %v6349_v24  ;;  %1136 = vmatpush.bf16.msrb.mxu3 %v6496_v51  ;;  %v6547_v35 = vld [vmem:[#allocation3 + $0x388] sm:$0xf]  ;;  %v6420_v46 = vor.u32 %v8678_v34, %v6419_v33 }
 0x328   :  { %v8693_v28 = vld [vmem:[#allocation3 + $0x29c] sm:$0xf0]  ;;  %v6477_v25 = vld [vmem:[#allocation3 + $0x2a0] sm:$0xf0]  ;;  %v8710_v38 = vld [vmem:[#allocation3 + $0x3a4] sm:$0xf0] }
 0x329   :  { %v6476_v55 = vor.u32 %v8693_v28, %v6475_v26  ;;  %v6331_v57 = vld [vmem:[#allocation3 + $0x40] sm:$0xf]  ;;  %v6480_v60 = vor.u32 %v8691_v53, %v6477_v25  ;;  %v8655_v62 = vld [vmem:[#allocation3 + $0x44] sm:$0xf]  ;;  %1095 = vmatpush.bf16.msrb.mxu0 %v6348_v54  ;;  %1123 = vmatpush.bf16.msrb.mxu2 %v6352_v56  ;;  %v8676_v39 = vld [vmem:[#allocation3 + $0x18c] sm:$0xf]  ;;  %v6548_v47 = vor.u32 %v8710_v38, %v6547_v35 }
 0x32a   :  { %v8657_v58 = vld [vmem:[#allocation3 + $0x5c] sm:$0xf0]  ;;  %v6333_v63 = vld [vmem:[#allocation3 + $0x60] sm:$0xf0]  ;;  %v6421_v40 = vld [vmem:[#allocation3 + $0x1a8] sm:$0xf0] }
 0x32b   :  { %v6459_v59 = vld [vmem:[#allocation3 + $0x240] sm:$0xf]  ;;  %v8687_v0 = vld [vmem:[#allocation3 + $0x244] sm:$0xf]  ;;  %v6332_v2 = vor.u32 %v8657_v58, %v6331_v57  ;;  %1109 = vmatpush.bf16.msrb.mxu1 %v6476_v55  ;;  %v6336_v6 = vor.u32 %v8655_v62, %v6333_v63  ;;  %1137 = vmatpush.bf16.msrb.mxu3 %v6480_v60  ;;  %v8708_v42 = vld [vmem:[#allocation3 + $0x38c] sm:$0xf]  ;;  %v6424_v50 = vor.u32 %v8676_v39, %v6421_v40 }
 0x32c   :  { %v8689_v61 = vld [vmem:[#allocation3 + $0x25c] sm:$0xf0]  ;;  %v6461_v1 = vld [vmem:[#allocation3 + $0x260] sm:$0xf0]  ;;  %v6549_v43 = vld [vmem:[#allocation3 + $0x3a8] sm:$0xf0] }
 0x32d   :  { %v6315_v3 = vld [vmem:[#allocation3] sm:$0xf]  ;;  %v6460_v5 = vor.u32 %v8689_v61, %v6459_v59  ;;  %v8651_v9 = vld [vmem:[#allocation3 + $0x4] sm:$0xf]  ;;  %v6464_v10 = vor.u32 %v8687_v0, %v6461_v1  ;;  %1096 = vmatpush.bf16.msrb.mxu0 %v6332_v2  ;;  %1124 = vmatpush.bf16.msrb.mxu2 %v6336_v6  ;;  %v6403_v45 = vld [vmem:[#allocation3 + $0x148] sm:$0xf]  ;;  %v6552_v51 = vor.u32 %v8708_v42, %v6549_v43 }
 0x32e   :  { %v8653_v4 = vld [vmem:[#allocation3 + $0x1c] sm:$0xf0]  ;;  %v6317_v11 = vld [vmem:[#allocation3 + $0x20] sm:$0xf0]  ;;  %v8674_v49 = vld [vmem:[#allocation3 + $0x164] sm:$0xf0] }
 0x32f   :  { %v6443_v7 = vld [vmem:[#allocation3 + $0x200] sm:$0xf]  ;;  %v8683_v12 = vld [vmem:[#allocation3 + $0x204] sm:$0xf]  ;;  %v6316_v17 = vor.u32 %v8653_v4, %v6315_v3  ;;  %1110 = vmatpush.bf16.msrb.mxu1 %v6460_v5  ;;  %v6320_v22 = vor.u32 %v8651_v9, %v6317_v11  ;;  %1138 = vmatpush.bf16.msrb.mxu3 %v6464_v10  ;;  %v6531_v26 = vld [vmem:[#allocation3 + $0x348] sm:$0xf]  ;;  %v6404_v53 = vor.u32 %v8674_v49, %v6403_v45 }
 0x330   :  { %v8685_v8 = vld [vmem:[#allocation3 + $0x21c] sm:$0xf0]  ;;  %v6445_v13 = vld [vmem:[#allocation3 + $0x220] sm:$0xf0]  ;;  %v8706_v28 = vld [vmem:[#allocation3 + $0x364] sm:$0xf0] }
 0x331   :  { %v6444_v21 = vor.u32 %v8685_v8, %v6443_v7  ;;  %v6448_v29 = vor.u32 %v8683_v12, %v6445_v13  ;;  %1097 = vmatpush.bf16.msrb.mxu0 %v6316_v17  ;;  %1125 = vmatpush.bf16.msrb.mxu2 %v6320_v22  ;;  %v8672_v52 = vld [vmem:[#allocation3 + $0x14c] sm:$0xf]  ;;  %v6532_v25 = vor.u32 %v8706_v28, %v6531_v26  ;;  %v6387_v55 = vld [vmem:[#allocation3 + $0x108] sm:$0xf] }
 0x332   :  { %v6405_v48 = vld [vmem:[#allocation3 + $0x168] sm:$0xf0]  ;;  %v8670_v56 = vld [vmem:[#allocation3 + $0x124] sm:$0xf0] }
 0x333   :  { %1111 = vmatpush.bf16.msrb.mxu1 %v6444_v21  ;;  %1139 = vmatpush.bf16.msrb.mxu3 %v6448_v29  ;;  %v8704_v44 = vld [vmem:[#allocation3 + $0x34c] sm:$0xf]  ;;  %v6408_v54 = vor.u32 %v8672_v52, %v6405_v48  ;;  %v6515_v57 = vld [vmem:[#allocation3 + $0x308] sm:$0xf]  ;;  %v6388_v0 = vor.u32 %v8670_v56, %v6387_v55 }
 0x334   :  { %1098 = vmatmul.bf16.vlgmr.msrb.gmra.mxu0 %v9853_v37  ;;  %1126 = vmatmul.bf16.vlgmr.msrb.gmra.mxu2 %v9853_v37  ;;  %v6533_v24 = vld [vmem:[#allocation3 + $0x368] sm:$0xf0]  ;;  %v8702_v59 = vld [vmem:[#allocation3 + $0x324] sm:$0xf0] }
 0x335   :  { %1146 = vmatpush.bf16.msra.mxu0 %v6436_v30  ;;  %1174 = vmatpush.bf16.msra.mxu2 %v6440_v32  ;;  %v6536_v58 = vor.u32 %v8704_v44, %v6533_v24  ;;  %v8668_v60 = vld [vmem:[#allocation3 + $0x10c] sm:$0xf]  ;;  %v6516_v1 = vor.u32 %v8702_v59, %v6515_v57  ;;  %v6371_v3 = vld [vmem:[#allocation3 + $0xc8] sm:$0xf] }
 0x336   :  { %1112 = vmatmul.bf16.vlgmr.msrb.gmra.mxu1 %v9857_v41  ;;  %1140 = vmatmul.bf16.vlgmr.msrb.gmra.mxu3 %v9857_v41  ;;  %v6389_v61 = vld [vmem:[#allocation3 + $0x128] sm:$0xf0]  ;;  %v8666_v4 = vld [vmem:[#allocation3 + $0xe4] sm:$0xf0] }
 0x337   :  { %1160 = vmatpush.bf16.msra.mxu1 %v6564_v31  ;;  %1188 = vmatpush.bf16.msra.mxu3 %v6568_v36  ;;  %v8700_v62 = vld [vmem:[#allocation3 + $0x30c] sm:$0xf]  ;;  %v6392_v2 = vor.u32 %v8668_v60, %v6389_v61  ;;  %v6499_v5 = vld [vmem:[#allocation3 + $0x2c8] sm:$0xf]  ;;  %v6372_v12 = vor.u32 %v8666_v4, %v6371_v3 }
 0x338   :  { %v6517_v63 = vld [vmem:[#allocation3 + $0x328] sm:$0xf0]  ;;  %v8698_v7 = vld [vmem:[#allocation3 + $0x2e4] sm:$0xf0] }
 0x339   :  { %1147 = vmatpush.bf16.msra.mxu0 %v6420_v46  ;;  %1175 = vmatpush.bf16.msra.mxu2 %v6424_v50  ;;  %v6520_v6 = vor.u32 %v8700_v62, %v6517_v63  ;;  %v8664_v8 = vld [vmem:[#allocation3 + $0xcc] sm:$0xf]  ;;  %v6500_v13 = vor.u32 %v8698_v7, %v6499_v5  ;;  %v6355_v15 = vld [vmem:[#allocation3 + $0x88] sm:$0xf] }
 0x33a   :  { %v6373_v9 = vld [vmem:[#allocation3 + $0xe8] sm:$0xf0]  ;;  %v8662_v16 = vld [vmem:[#allocation3 + $0xa4] sm:$0xf0] }
 0x33b   :  { %1161 = vmatpush.bf16.msra.mxu1 %v6548_v47  ;;  %1189 = vmatpush.bf16.msra.mxu3 %v6552_v51  ;;  %v8696_v10 = vld [vmem:[#allocation3 + $0x2cc] sm:$0xf]  ;;  %v6376_v14 = vor.u32 %v8664_v8, %v6373_v9  ;;  %v6483_v17 = vld [vmem:[#allocation3 + $0x288] sm:$0xf]  ;;  %v6356_v27 = vor.u32 %v8662_v16, %v6355_v15 }
 0x33c   :  { %v6501_v11 = vld [vmem:[#allocation3 + $0x2e8] sm:$0xf0]  ;;  %v8694_v19 = vld [vmem:[#allocation3 + $0x2a4] sm:$0xf0] }
 0x33d   :  { %1148 = vmatpush.bf16.msra.mxu0 %v6404_v53  ;;  %1176 = vmatpush.bf16.msra.mxu2 %v6408_v54  ;;  %v6504_v18 = vor.u32 %v8696_v10, %v6501_v11  ;;  %v8660_v20 = vld [vmem:[#allocation3 + $0x8c] sm:$0xf]  ;;  %v6484_v29 = vor.u32 %v8694_v19, %v6483_v17  ;;  %v6339_v31 = vld [vmem:[#allocation3 + $0x48] sm:$0xf] }
 0x33e   :  { %v6357_v21 = vld [vmem:[#allocation3 + $0xa8] sm:$0xf0]  ;;  %v8658_v32 = vld [vmem:[#allocation3 + $0x64] sm:$0xf0] }
 0x33f   :  { %1162 = vmatpush.bf16.msra.mxu1 %v6532_v25  ;;  %1190 = vmatpush.bf16.msra.mxu3 %v6536_v58  ;;  %v8692_v22 = vld [vmem:[#allocation3 + $0x28c] sm:$0xf]  ;;  %v6360_v30 = vor.u32 %v8660_v20, %v6357_v21  ;;  %v6467_v33 = vld [vmem:[#allocation3 + $0x248] sm:$0xf]  ;;  %v6340_v42 = vor.u32 %v8658_v32, %v6339_v31 }
 0x340   :  { %v6485_v23 = vld [vmem:[#allocation3 + $0x2a8] sm:$0xf0]  ;;  %v8690_v35 = vld [vmem:[#allocation3 + $0x264] sm:$0xf0] }
 0x341   :  { %1149 = vmatpush.bf16.msra.mxu0 %v6388_v0  ;;  %1177 = vmatpush.bf16.msra.mxu2 %v6392_v2  ;;  %v6488_v34 = vor.u32 %v8692_v22, %v6485_v23  ;;  %v8656_v36 = vld [vmem:[#allocation3 + $0x4c] sm:$0xf]  ;;  %v6468_v43 = vor.u32 %v8690_v35, %v6467_v33  ;;  %v6323_v47 = vld [vmem:[#allocation3 + $0x8] sm:$0xf] }
 0x342   :  { %v6341_v38 = vld [vmem:[#allocation3 + $0x68] sm:$0xf0]  ;;  %v8654_v50 = vld [vmem:[#allocation3 + $0x24] sm:$0xf0] }
 0x343   :  { %1163 = vmatpush.bf16.msra.mxu1 %v6516_v1  ;;  %1191 = vmatpush.bf16.msra.mxu3 %v6520_v6  ;;  %v8688_v39 = vld [vmem:[#allocation3 + $0x24c] sm:$0xf]  ;;  %v6344_v46 = vor.u32 %v8656_v36, %v6341_v38  ;;  %v6451_v45 = vld [vmem:[#allocation3 + $0x208] sm:$0xf]  ;;  %v6324_v44 = vor.u32 %v8654_v50, %v6323_v47 }
 0x344   :  { %v6469_v40 = vld [vmem:[#allocation3 + $0x268] sm:$0xf0]  ;;  %v8686_v26 = vld [vmem:[#allocation3 + $0x224] sm:$0xf0] }
 0x345   :  { %1150 = vmatpush.bf16.msra.mxu0 %v6372_v12  ;;  %1178 = vmatpush.bf16.msra.mxu2 %v6376_v14  ;;  %v6472_v49 = vor.u32 %v8688_v39, %v6469_v40  ;;  %v8652_v51 = vld [vmem:[#allocation3 + $0xc] sm:$0xf]  ;;  %v6452_v24 = vor.u32 %v8686_v26, %v6451_v45  ;;  %v9867_v54 = vld [vmem:[#allocation11] ss:$4 sm:$0xf] }
 0x346   :  { %v6325_v28 = vld [vmem:[#allocation3 + $0x28] sm:$0xf0]  ;;  %v762_v56 = vperm.slane %v9867_v54, 0  ;;  %v763_v61 = vperm.slane %v9867_v54, 1  ;;  %v764_v31 = vperm.slane %v9867_v54, 2 }
 0x347   :  { %1164 = vmatpush.bf16.msra.mxu1 %v6500_v13  ;;  %1192 = vmatpush.bf16.msra.mxu3 %v6504_v18  ;;  %v8684_v52 = vld [vmem:[#allocation3 + $0x20c] sm:$0xf]  ;;  %v6328_v53 = vor.u32 %v8652_v51, %v6325_v28 }
 0x348   :  { %v6453_v48 = vld [vmem:[#allocation3 + $0x228] sm:$0xf0] }
 0x349   :  { %1151 = vmatpush.bf16.msra.mxu0 %v6356_v27  ;;  %1179 = vmatpush.bf16.msra.mxu2 %v6360_v30  ;;  %v6456_v25 = vor.u32 %v8684_v52, %v6453_v48  ;;  %1438 = dma.hbm_to_vmem [thread:$0]  %s1434_s0, 32768, %s9781_s25, [#allocation4 + $0x1] }
 0x34b   :  { %1165 = vmatpush.bf16.msra.mxu1 %v6484_v29  ;;  %1193 = vmatpush.bf16.msra.mxu3 %v6488_v34 }
 0x34d   :  { %1152 = vmatpush.bf16.msra.mxu0 %v6340_v42  ;;  %1180 = vmatpush.bf16.msra.mxu2 %v6344_v46 }
 0x34f   :  { %1166 = vmatpush.bf16.msra.mxu1 %v6468_v43  ;;  %1194 = vmatpush.bf16.msra.mxu3 %v6472_v49  ;;  %v765_v43 = vperm.slane %v9867_v54, 3 }
 0x351   :  { %1153 = vmatpush.bf16.msra.mxu0 %v6324_v44  ;;  %1181 = vmatpush.bf16.msra.mxu2 %v6328_v53 }
 0x353   :  { %1167 = vmatpush.bf16.msra.mxu1 %v6452_v24  ;;  %1195 = vmatpush.bf16.msra.mxu3 %v6456_v25 }
 0x354   :  { %1154 = vmatmul.bf16.vlgmr.msra.gmra.mxu0 %v9853_v37  ;;  %1182 = vmatmul.bf16.vlgmr.msra.gmra.mxu2 %v9853_v37 }
 0x356   :  { %1168 = vmatmul.bf16.vlgmr.msra.gmra.mxu1 %v9857_v41  ;;  %1196 = vmatmul.bf16.vlgmr.msra.gmra.mxu3 %v9857_v41 }
 0x3b1   :  { %v1099_v55 = vpop.f32.mrf.mxu0 }
 0x3b2   :  { %v1100_v58 = vadd.f32 %v1099_v55, %v762_v56 }
 0x3b3   :  { %v1113_v57 = vpop.f32.mrf.mxu1 }
 0x3b4   :  { %v1114_v59 = vadd.f32 %v1113_v57, %v1100_v58 }
 0x3b6   :  { %v1202_v1 = vmul.f32 0.02, %v1114_v59 }
 0x3b7   :  { %v1127_v60 = vpop.f32.mrf.mxu2 }
 0x3b8   :  { %v1128_v0 = vadd.f32 %v1127_v60, %v763_v61  ;;  %v9875_v5 = vmax.f32 %v1114_v59, %v1202_v1 }
 0x3b9   :  { %v1101_v37 = vpop.f32.mrf.mxu0  ;;  %v1141_v62 = vpop.f32.mrf.mxu3 }
 0x3ba   :  { %v1102_v41 = vadd.f32 %v1101_v37, %v762_v56  ;;  %v1142_v4 = vadd.f32 %v1141_v62, %v1128_v0 }
 0x3bb   :  { %v1115_v63 = vpop.f32.mrf.mxu1 }
 0x3bc   :  { %v1116_v2 = vadd.f32 %v1115_v63, %v1102_v41  ;;  %v1203_v11 = vmul.f32 0.02, %v1142_v4 }
 0x3be   :  { %v1206_v3 = vmul.f32 0.02, %v1116_v2  ;;  %v9881_v16 = vmax.f32 %v1142_v4, %v1203_v11 }
 0x3bf   :  { %v1129_v7 = vpop.f32.mrf.mxu2 }
 0x3c0   :  { %v9877_v6 = vmax.f32 %v1116_v2, %v1206_v3  ;;  %v1130_v8 = vadd.f32 %v1129_v7, %v763_v61 }
 0x3c1   :  { %v1143_v9 = vpop.f32.mrf.mxu3 }
 0x3c2   :  { %v1222_v10 = vmul.f32 0.0, %v9877_v6  ;;  %v1144_v12 = vadd.f32 %v1143_v9, %v1130_v8 }
 0x3c4   :  { %v1226_v13 = vadd.f32 %v1222_v10, %v9875_v5  ;;  %v1207_v14 = vmul.f32 0.02, %v1144_v12 }
 0x3c6   :  { %v1227_v15 = vrot.slane %v1226_v13, 4  ;;  %v9883_v17 = vmax.f32 %v1144_v12, %v1207_v14 }
 0x3c8   :  { %v1228_v18 = vadd.f32 %v1227_v15, %v1226_v13  ;;  %v1223_v19 = vmul.f32 0.0, %v9883_v17 }
 0x3ca   :  { %v1229_v20 = vrot.slane %v1228_v18, 2  ;;  %v1233_v21 = vadd.f32 %v1223_v19, %v9881_v16 }
 0x3cc   :  { %v1230_v22 = vadd.f32 %v1229_v20, %v1228_v18  ;;  %v1234_v23 = vrot.slane %v1233_v21, 4 }
 0x3ce   :  { %v1231_v27 = vrot.slane %v1230_v22, 1  ;;  %v1235_v30 = vadd.f32 %v1234_v23, %v1233_v21 }
 0x3d0   :  { %v1232_v33 = vadd.f32 %v1231_v27, %v1230_v22  ;;  %v1236_v34 = vrot.slane %v1235_v30, 2 }
 0x3d1   :  { %v1155_v29 = vpop.f32.mrf.mxu0 }
 0x3d2   :  { %v9888_v35 = vmul.f32 0.125, %v1232_v33  ;;  %v1237_v36 = vadd.f32 %v1236_v34, %v1235_v30  ;;  %v1156_v38 = vadd.f32 %v1155_v29, %v764_v31 }
 0x3d3   :  { %v1169_v32 = vpop.f32.mrf.mxu1 }
 0x3d4   :  { %v1238_v39 = vrot.slane %v1237_v36, 1  ;;  %v1262_v42 = vsub.f32 %v9877_v6, %v9888_v35  ;;  %v1170_v45 = vadd.f32 %v1169_v32, %v1156_v38  ;;  %v1258_v54 = vsub.f32 %v9875_v5, %v9888_v35 }
 0x3d6   :  { %v1239_v50 = vadd.f32 %v1238_v39, %v1237_v36  ;;  %v1270_v52 = vmul.f32 0.0, %v1262_v42  ;;  %v1204_v53 = vmul.f32 0.02, %v1170_v45  ;;  %v1274_v0 = vmul.f32 %v1258_v54, %v1258_v54 }
 0x3d7   :  { %v1183_v40 = vpop.f32.mrf.mxu2 }
 0x3d8   :  { %v9893_v51 = vmul.f32 0.125, %v1239_v50  ;;  %v1184_v48 = vadd.f32 %v1183_v40, %v765_v43  ;;  %v1278_v58 = vmul.f32 %v1270_v52, %v1270_v52  ;;  %v9903_v62 = vmax.f32 %v1170_v45, %v1204_v53 }
 0x3d9   :  { %v1197_v46 = vpop.f32.mrf.mxu3  ;;  %v1157_v47 = vpop.f32.mrf.mxu0 }
 0x3da   :  { %v1158_v49 = vadd.f32 %v1157_v47, %v764_v31  ;;  %v1259_v44 = vsub.f32 %v9881_v16, %v9893_v51  ;;  %v1263_v24 = vsub.f32 %v9883_v17, %v9893_v51  ;;  %v1198_v59 = vadd.f32 %v1197_v46, %v1184_v48 }
 0x3db   :  { %v1171_v26 = vpop.f32.mrf.mxu1  ;;  %v1282_v4 = vadd.f32 %v1278_v58, %v1274_v0 }
 0x3dc   :  { %v1172_v28 = vadd.f32 %v1171_v26, %v1158_v49  ;;  %v1271_v55 = vmul.f32 0.0, %v1263_v24  ;;  %v1275_v61 = vmul.f32 %v1259_v44, %v1259_v44  ;;  %v1205_v7 = vmul.f32 0.02, %v1198_v59 }
 0x3dd   :  { %v1283_v14 = vrot.slane %v1282_v4, 4 }
 0x3de   :  { %v1208_v25 = vmul.f32 0.02, %v1172_v28  ;;  %v1279_v37 = vmul.f32 %v1271_v55, %v1271_v55  ;;  %v9909_v15 = vmax.f32 %v1198_v59, %v1205_v7 }
 0x3df   :  { %v1185_v57 = vpop.f32.mrf.mxu2  ;;  %v1284_v23 = vadd.f32 %v1283_v14, %v1282_v4 }
 0x3e0   :  { %v9901_v56 = vmax.f32 %v1172_v28, %v1208_v25  ;;  %v1186_v60 = vadd.f32 %v1185_v57, %v765_v43  ;;  %v1289_v2 = vadd.f32 %v1279_v37, %v1275_v61 }
 0x3e1   :  { %v1199_v63 = vpop.f32.mrf.mxu3  ;;  %v1285_v33 = vrot.slane %v1284_v23, 2 }
 0x3e2   :  { %v1224_v41 = vmul.f32 0.0, %v9901_v56  ;;  %v1200_v1 = vadd.f32 %v1199_v63, %v1186_v60  ;;  %v1290_v9 = vrot.slane %v1289_v2, 4 }
 0x3e3   :  { %v1286_v42 = vadd.f32 %v1285_v33, %v1284_v23 }
 0x3e4   :  { %v1240_v3 = vadd.f32 %v1224_v41, %v9903_v62  ;;  %v1209_v8 = vmul.f32 0.02, %v1200_v1  ;;  %v1291_v12 = vadd.f32 %v1290_v9, %v1289_v2 }
 0x3e5   :  { %v1287_v49 = vrot.slane %v1286_v42, 1 }
 0x3e6   :  { %v1241_v10 = vrot.slane %v1240_v3, 4  ;;  %v9907_v11 = vmax.f32 %v1200_v1, %v1209_v8  ;;  %v1292_v20 = vrot.slane %v1291_v12, 2 }
 0x3e7   :  { %v1288_v25 = vadd.f32 %v1287_v49, %v1286_v42 }
 0x3e8   :  { %v1242_v13 = vadd.f32 %v1241_v10, %v1240_v3  ;;  %v1225_v18 = vmul.f32 0.0, %v9907_v11  ;;  %v1293_v30 = vadd.f32 %v1292_v20, %v1291_v12 }
 0x3e9   :  { %v1310_v61 = vmul.f32 0.125, %v1288_v25 }
 0x3ea   :  { %v1243_v19 = vrot.slane %v1242_v13, 2  ;;  %v1247_v21 = vadd.f32 %v1225_v18, %v9909_v15  ;;  %v1294_v38 = vrot.slane %v1293_v30, 1 }
 0x3eb   :  { %v1316_v1 = vadd.f32 1e-05, %v1310_v61 }
 0x3ec   :  { %v1244_v22 = vadd.f32 %v1243_v19, %v1242_v13  ;;  %v1248_v27 = vrot.slane %v1247_v21, 4  ;;  %v1295_v47 = vadd.f32 %v1294_v38, %v1293_v30 }
 0x3ed   :  { %vm1326_vm7 = vweird.f32 %v1316_v1 }
 0x3ee   :  { %v1245_v29 = vrot.slane %v1244_v22, 1  ;;  %v1249_v31 = vadd.f32 %v1248_v27, %v1247_v21  ;;  %v1311_v48 = vmul.f32 0.125, %v1295_v47 }
 0x3f0   :  { %v1246_v32 = vadd.f32 %v1245_v29, %v1244_v22  ;;  %v1250_v34 = vrot.slane %v1249_v31, 2  ;;  %v1317_v57 = vadd.f32 1e-05, %v1311_v48 }
 0x3f2   :  { %v9913_v36 = vmul.f32 0.125, %v1246_v32  ;;  %v1251_v39 = vadd.f32 %v1250_v34, %v1249_v31  ;;  %9253 = vrsqrt.f32 %v1317_v57  ;;  %vm1336_vm14 = vweird.f32 %v1317_v57 }
 0x3f3   :  { %9255 = vrsqrt.f32 %v1316_v1 }
 0x3f4   :  { %v1264_v40 = vsub.f32 %v9901_v56, %v9913_v36  ;;  %v1260_v43 = vsub.f32 %v9903_v62, %v9913_v36  ;;  %v1252_v46 = vrot.slane %v1251_v39, 1 }
 0x3f6   :  { %v1272_v50 = vmul.f32 0.0, %v1264_v40  ;;  %v1253_v45 = vadd.f32 %v1252_v46, %v1251_v39  ;;  %v1276_v26 = vmul.f32 %v1260_v43, %v1260_v43 }
 0x3f8   :  { %v1280_v28 = vmul.f32 %v1272_v50, %v1272_v50  ;;  %v9919_v52 = vmul.f32 0.125, %v1253_v45  ;;  %v9254_v8 = vpop.eup %9253 }
 0x3f9   :  { %v1331_v14 = vmul.f32 %v9254_v8, %v1317_v57  ;;  %v9256_v19 = vpop.eup %9255  ;;  %vm1337_vm13 = vweird.f32 %v9254_v8 }
 0x3fa   :  { %v1296_v44 = vadd.f32 %v1280_v28, %v1276_v26  ;;  %v1261_v24 = vsub.f32 %v9909_v15, %v9919_v52  ;;  %v1265_v53 = vsub.f32 %v9907_v11, %v9919_v52  ;;  %v1321_v23 = vmul.f32 %v9256_v19, %v1316_v1  ;;  %vm1338_vm0 = vmor %vm1336_vm14, %vm1337_vm13 }
 0x3fb   :  { %v1332_v21 = vmul.f32 %v9254_v8, %v1331_v14  ;;  %vm1327_vm3 = vweird.f32 %v9256_v19 }
 0x3fc   :  { %v1297_v54 = vrot.slane %v1296_v44, 4  ;;  %v1273_v55 = vmul.f32 0.0, %v1265_v53  ;;  %v1277_v59 = vmul.f32 %v1261_v24, %v1261_v24  ;;  %v1322_v31 = vmul.f32 %v9256_v19, %v1321_v23  ;;  %vm1328_vm9 = vmor %vm1326_vm7, %vm1327_vm3 }
 0x3fd   :  { %v1333_v29 = vmul.f32 0.5, %v1332_v21 }
 0x3fe   :  { %v1298_v58 = vadd.f32 %v1297_v54, %v1296_v44  ;;  %v1281_v60 = vmul.f32 %v1273_v55, %v1273_v55  ;;  %v1323_v39 = vmul.f32 0.5, %v1322_v31  ;;  %v1315_v55 = vld [vmem:[#allocation11 + $0x1] ss:$4 sm:$0xf] }
 0x3ff   :  { %v1334_v33 = vsub.f32 1.5, %v1333_v29 }
 0x400   :  { %v1299_v37 = vrot.slane %v1298_v58, 2  ;;  %v1303_v41 = vadd.f32 %v1281_v60, %v1277_v59  ;;  %v1324_v47 = vsub.f32 1.5, %v1323_v39 }
 0x401   :  { %v1335_v43 = vmul.f32 %v9254_v8, %v1334_v33 }
 0x402   :  { %v1300_v63 = vadd.f32 %v1299_v37, %v1298_v58  ;;  %v1304_v0 = vrot.slane %v1303_v41, 4  ;;  %v1325_v28 = vmul.f32 %v9256_v19, %v1324_v47 }
 0x403   :  { %v1339_v49 = vsel %vm1338_vm0, %v9254_v8, %v1335_v43 }
 0x404   :  { %v1301_v2 = vrot.slane %v1300_v63, 1  ;;  %v1305_v3 = vadd.f32 %v1304_v0, %v1303_v41  ;;  %v1364_v24 = vrot.slane %v1339_v49, 7  ;;  %v1329_v57 = vsel %vm1328_vm9, %v9256_v19, %v1325_v28 }
 0x406   :  { %v1302_v4 = vadd.f32 %v1301_v2, %v1300_v63  ;;  %v1306_v7 = vrot.slane %v1305_v3, 2  ;;  %v1367_v58 = vsel %vm650_vm11, %v1329_v57, %v1364_v24 }
 0x408   :  { %v1312_v9 = vmul.f32 0.125, %v1302_v4  ;;  %v1307_v10 = vadd.f32 %v1306_v7, %v1305_v3 }
 0x40a   :  { %v1318_v12 = vadd.f32 1e-05, %v1312_v9  ;;  %v1308_v13 = vrot.slane %v1307_v10, 1 }
 0x40c   :  { %9257 = vrsqrt.f32 %v1318_v12  ;;  %v1309_v18 = vadd.f32 %v1308_v13, %v1307_v10  ;;  %vm1346_vm1 = vweird.f32 %v1318_v12  ;;  %v1375_v10 = vld [vmem:[#allocation11 + $0x2] ss:$4 sm:$0xf] }
 0x40e   :  { %v1313_v20 = vmul.f32 0.125, %v1309_v18 }
 0x410   :  { %v1319_v22 = vadd.f32 1e-05, %v1313_v20 }
 0x412   :  { %v9258_v27 = vpop.eup %9257  ;;  %9259 = vrsqrt.f32 %v1319_v22  ;;  %vm1356_vm5 = vweird.f32 %v1319_v22 }
 0x413   :  { %v1341_v30 = vmul.f32 %v9258_v27, %v1318_v12  ;;  %vm1347_vm15 = vweird.f32 %v9258_v27 }
 0x414   :  { %vm1348_vm4 = vmor %vm1346_vm1, %vm1347_vm15 }
 0x415   :  { %v1342_v32 = vmul.f32 %v9258_v27, %v1341_v30 }
 0x417   :  { %v1343_v34 = vmul.f32 0.5, %v1342_v32 }
 0x418   :  { %v9260_v38 = vpop.eup %9259 }
 0x419   :  { %v1344_v40 = vsub.f32 1.5, %v1343_v34  ;;  %v1351_v42 = vmul.f32 %v9260_v38, %v1319_v22  ;;  %vm1357_vm2 = vweird.f32 %v9260_v38 }
 0x41a   :  { %vm1358_vm6 = vmor %vm1356_vm5, %vm1357_vm2 }
 0x41b   :  { %v1352_v46 = vmul.f32 %v9260_v38, %v1351_v42  ;;  %v1345_v50 = vmul.f32 %v9258_v27, %v1344_v40 }
 0x41d   :  { %v1353_v45 = vmul.f32 0.5, %v1352_v46  ;;  %v1349_v48 = vsel %vm1348_vm4, %v9258_v27, %v1345_v50 }
 0x41e   :  { %v1365_v25 = vrot.slane %v1349_v48, 6 }
 0x41f   :  { %v1354_v26 = vsub.f32 1.5, %v1353_v45 }
 0x421   :  { %v1355_v44 = vmul.f32 %v9260_v38, %v1354_v26 }
 0x423   :  { %v1359_v53 = vsel %vm1358_vm6, %v9260_v38, %v1355_v44 }
 0x424   :  { %v1366_v54 = vrot.slane %v1359_v53, 5 }
 0x426   :  { %v1369_v59 = vsel %vm1368_vm8, %v1365_v25, %v1366_v54 }
 0x427   :  { %v1371_v60 = vsel %vm1370_vm10, %v1367_v58, %v1369_v59 }
 0x428   :  { %v1373_v61 = vmul.f32 %v1371_v60, %v1315_v55 }
 0x42a   :  { %v1377_v37 = vperm.slane %v1373_v61, 0  ;;  %v1378_v41 = vperm.slane %v1373_v61, 1  ;;  %v1379_v63 = vperm.slane %v1373_v61, 2  ;;  %v1380_v0 = vperm.slane %v1373_v61, 3 }
 0x42c   :  { %v1386_v1 = vmul.f32 %v1378_v41, %v9893_v51  ;;  %v1387_v2 = vmul.f32 %v1379_v63, %v9913_v36  ;;  %v1388_v3 = vmul.f32 %v1380_v0, %v9919_v52  ;;  %v1385_v4 = vmul.f32 %v1377_v37, %v9888_v35 }
 0x42d   :  { %v1401_v19 = vmul.f32 %v1377_v37, %v9875_v5  ;;  %v1402_v51 = vmul.f32 %v1378_v41, %v9881_v16  ;;  %v1403_v36 = vmul.f32 %v1379_v63, %v9903_v62  ;;  %v1404_v52 = vmul.f32 %v1380_v0, %v9909_v15 }
 0x42e   :  { %v1393_v7 = vrot.slane %v1386_v1, 7  ;;  %v1394_v8 = vrot.slane %v1387_v2, 6  ;;  %v1395_v9 = vrot.slane %v1388_v3, 5  ;;  %v1405_v23 = vmul.f32 %v1377_v37, %v9877_v6 }
 0x42f   :  { %v1406_v27 = vmul.f32 %v1378_v41, %v9883_v17  ;;  %v1407_v29 = vmul.f32 %v1379_v63, %v9901_v56  ;;  %v1408_v30 = vmul.f32 %v1380_v0, %v9907_v11 }
 0x430   :  { %v1396_v12 = vsel %vm650_vm11, %v1385_v4, %v1393_v7  ;;  %v1397_v13 = vsel %vm1368_vm8, %v1394_v8, %v1395_v9 }
 0x431   :  { %v1398_v14 = vsel %vm1370_vm10, %v1396_v12, %v1397_v13 }
 0x432   :  { %v1400_v18 = vsub.f32 %v1375_v10, %v1398_v14 }
 0x434   :  { %v1410_v35 = vperm.slane %v1400_v18, 0  ;;  %v1411_v20 = vperm.slane %v1400_v18, 1  ;;  %v1412_v21 = vperm.slane %v1400_v18, 2  ;;  %v1413_v22 = vperm.slane %v1400_v18, 3 }
 0x436   :  { %v9943_v31 = vadd.f32 %v1410_v35, %v1401_v19  ;;  %v9945_v5 = vadd.f32 %v1411_v20, %v1402_v51  ;;  %v9947_v16 = vadd.f32 %v1412_v21, %v1403_v36  ;;  %v9949_v62 = vadd.f32 %v1413_v22, %v1404_v52 }
 0x437   :  { %v9951_v15 = vadd.f32 %v1410_v35, %v1405_v23  ;;  %v9953_v32 = vadd.f32 %v1411_v20, %v1406_v27  ;;  %v9955_v33 = vadd.f32 %v1412_v21, %v1407_v29  ;;  %v9957_v6 = vadd.f32 %v1413_v22, %v1408_v30 }
 0x438   :  { %9646 = dma.done.wait [#allocation4], 16384 }
 0x439   :  { %9647 = vsyncadd [#allocation4], 4294950912  ;;  %v6683_v17 = vld [vmem:[#allocation2 + $0x1c0] sm:$0xf]  ;;  %s2671_s24 = sshll.u32 %s10513_s7, 4  ;;  %s2672_s24 = int_to_ptr.hbm [resolvable:$true] %s2671_s24 }
 0x43a   :  { %v8745_v56 = vld [vmem:[#allocation2 + $0x1dc] sm:$0xf0] }
 0x43b   :  { %v6811_v11 = vld [vmem:[#allocation2 + $0x3c0] sm:$0xf]  ;;  %v6684_v34 = vor.u32 %v8745_v56, %v6683_v17 }
 0x43c   :  { %v8777_v38 = vld [vmem:[#allocation2 + $0x3dc] sm:$0xf0] }
 0x43d   :  { %v6939_v39 = vld [vmem:[#allocation2 + $0x5c0] sm:$0xf]  ;;  %v6812_v42 = vor.u32 %v8777_v38, %v6811_v11  ;;  %2225 = vmatpush.bf16.msrb.mxu0 %v6684_v34 }
 0x43e   :  { %v8809_v40 = vld [vmem:[#allocation2 + $0x5dc] sm:$0xf0] }
 0x43f   :  { %v6940_v43 = vor.u32 %v8809_v40, %v6939_v39  ;;  %v7067_v46 = vld [vmem:[#allocation2 + $0x7c0] sm:$0xf]  ;;  %2239 = vmatpush.bf16.msrb.mxu1 %v6812_v42 }
 0x440   :  { %v8841_v47 = vld [vmem:[#allocation2 + $0x7dc] sm:$0xf0] }
 0x441   :  { %v6667_v50 = vld [vmem:[#allocation2 + $0x180] sm:$0xf]  ;;  %v7068_v45 = vor.u32 %v8841_v47, %v7067_v46  ;;  %2253 = vmatpush.bf16.msrb.mxu2 %v6940_v43 }
 0x442   :  { %v8741_v49 = vld [vmem:[#allocation2 + $0x19c] sm:$0xf0] }
 0x443   :  { %v6795_v26 = vld [vmem:[#allocation2 + $0x380] sm:$0xf]  ;;  %v6668_v48 = vor.u32 %v8741_v49, %v6667_v50  ;;  %2267 = vmatpush.bf16.msrb.mxu3 %v7068_v45 }
 0x444   :  { %v8773_v28 = vld [vmem:[#allocation2 + $0x39c] sm:$0xf0] }
 0x445   :  { %v6796_v44 = vor.u32 %v8773_v28, %v6795_v26  ;;  %v6923_v24 = vld [vmem:[#allocation2 + $0x580] sm:$0xf]  ;;  %2226 = vmatpush.bf16.msrb.mxu0 %v6668_v48 }
 0x446   :  { %v8805_v53 = vld [vmem:[#allocation2 + $0x59c] sm:$0xf0] }
 0x447   :  { %v7051_v25 = vld [vmem:[#allocation2 + $0x780] sm:$0xf]  ;;  %v6924_v54 = vor.u32 %v8805_v53, %v6923_v24  ;;  %2240 = vmatpush.bf16.msrb.mxu1 %v6796_v44 }
 0x448   :  { %v8837_v55 = vld [vmem:[#allocation2 + $0x79c] sm:$0xf0] }
 0x449   :  { %v6651_v57 = vld [vmem:[#allocation2 + $0x140] sm:$0xf]  ;;  %v7052_v59 = vor.u32 %v8837_v55, %v7051_v25  ;;  %2254 = vmatpush.bf16.msrb.mxu2 %v6924_v54 }
 0x44a   :  { %v8737_v58 = vld [vmem:[#allocation2 + $0x15c] sm:$0xf0] }
 0x44b   :  { %v6779_v60 = vld [vmem:[#allocation2 + $0x340] sm:$0xf]  ;;  %v6652_v41 = vor.u32 %v8737_v58, %v6651_v57  ;;  %2268 = vmatpush.bf16.msrb.mxu3 %v7052_v59 }
 0x44c   :  { %v8769_v61 = vld [vmem:[#allocation2 + $0x35c] sm:$0xf0] }
 0x44d   :  { %v6907_v37 = vld [vmem:[#allocation2 + $0x540] sm:$0xf]  ;;  %v6780_v2 = vor.u32 %v8769_v61, %v6779_v60  ;;  %2227 = vmatpush.bf16.msrb.mxu0 %v6652_v41 }
 0x44e   :  { %v8801_v63 = vld [vmem:[#allocation2 + $0x55c] sm:$0xf0] }
 0x44f   :  { %v7035_v0 = vld [vmem:[#allocation2 + $0x740] sm:$0xf]  ;;  %v6908_v3 = vor.u32 %v8801_v63, %v6907_v37  ;;  %2241 = vmatpush.bf16.msrb.mxu1 %v6780_v2 }
 0x450   :  { %v8833_v1 = vld [vmem:[#allocation2 + $0x75c] sm:$0xf0] }
 0x451   :  { %v6635_v4 = vld [vmem:[#allocation2 + $0x100] sm:$0xf]  ;;  %v7036_v9 = vor.u32 %v8833_v1, %v7035_v0  ;;  %2255 = vmatpush.bf16.msrb.mxu2 %v6908_v3 }
 0x452   :  { %v8733_v7 = vld [vmem:[#allocation2 + $0x11c] sm:$0xf0] }
 0x453   :  { %v6763_v8 = vld [vmem:[#allocation2 + $0x300] sm:$0xf]  ;;  %v6636_v19 = vor.u32 %v8733_v7, %v6635_v4  ;;  %2269 = vmatpush.bf16.msrb.mxu3 %v7036_v9  ;;  %v8743_v7 = vld [vmem:[#allocation2 + $0x1c4] sm:$0xf] }
 0x454   :  { %v8765_v10 = vld [vmem:[#allocation2 + $0x31c] sm:$0xf0]  ;;  %v8775_v9 = vld [vmem:[#allocation2 + $0x3c4] sm:$0xf] }
 0x455   :  { %v6891_v12 = vld [vmem:[#allocation2 + $0x500] sm:$0xf]  ;;  %v6764_v51 = vor.u32 %v8765_v10, %v6763_v8  ;;  %2228 = vmatpush.bf16.msrb.mxu0 %v6636_v19  ;;  %v6685_v8 = vld [vmem:[#allocation2 + $0x1e0] sm:$0xf0] }
 0x456   :  { %v8797_v13 = vld [vmem:[#allocation2 + $0x51c] sm:$0xf0] }
 0x457   :  { %v7019_v14 = vld [vmem:[#allocation2 + $0x700] sm:$0xf]  ;;  %v6892_v36 = vor.u32 %v8797_v13, %v6891_v12  ;;  %2242 = vmatpush.bf16.msrb.mxu1 %v6764_v51  ;;  %v6813_v12 = vld [vmem:[#allocation2 + $0x3e0] sm:$0xf0] }
 0x458   :  { %v8829_v18 = vld [vmem:[#allocation2 + $0x71c] sm:$0xf0]  ;;  %v8807_v13 = vld [vmem:[#allocation2 + $0x5c4] sm:$0xf] }
 0x459   :  { %v6619_v52 = vld [vmem:[#allocation2 + $0xc0] sm:$0xf]  ;;  %v7020_v21 = vor.u32 %v8829_v18, %v7019_v14  ;;  %2256 = vmatpush.bf16.msrb.mxu2 %v6892_v36  ;;  %v6941_v14 = vld [vmem:[#allocation2 + $0x5e0] sm:$0xf0] }
 0x45a   :  { %v8729_v35 = vld [vmem:[#allocation2 + $0xdc] sm:$0xf0]  ;;  %v8839_v51 = vld [vmem:[#allocation2 + $0x7c4] sm:$0xf] }
 0x45b   :  { %v6747_v20 = vld [vmem:[#allocation2 + $0x2c0] sm:$0xf]  ;;  %v6620_v17 = vor.u32 %v8729_v35, %v6619_v52  ;;  %2270 = vmatpush.bf16.msrb.mxu3 %v7020_v21  ;;  %v7069_v36 = vld [vmem:[#allocation2 + $0x7e0] sm:$0xf0]  ;;  %v6688_v35 = vor.u32 %v8743_v7, %v6685_v8  ;;  %v6944_v21 = vor.u32 %v8807_v13, %v6941_v14 }
 0x45c   :  { %v8761_v22 = vld [vmem:[#allocation2 + $0x2dc] sm:$0xf0]  ;;  %v8755_v13 = vld [vmem:[#allocation2 + $0x284] sm:$0xf] }
 0x45d   :  { %v6875_v23 = vld [vmem:[#allocation2 + $0x4c0] sm:$0xf]  ;;  %v6748_v56 = vor.u32 %v8761_v22, %v6747_v20  ;;  %2229 = vmatpush.bf16.msrb.mxu0 %v6620_v17  ;;  %v6816_v20 = vor.u32 %v8775_v9, %v6813_v12  ;;  %v8739_v22 = vld [vmem:[#allocation2 + $0x184] sm:$0xf] }
 0x45e   :  { %v8793_v27 = vld [vmem:[#allocation2 + $0x4dc] sm:$0xf0]  ;;  %v6797_v17 = vld [vmem:[#allocation2 + $0x3a0] sm:$0xf0] }
 0x45f   :  { %v7003_v29 = vld [vmem:[#allocation2 + $0x6c0] sm:$0xf]  ;;  %v6876_v11 = vor.u32 %v8793_v27, %v6875_v23  ;;  %2243 = vmatpush.bf16.msrb.mxu1 %v6748_v56  ;;  %v6669_v23 = vld [vmem:[#allocation2 + $0x1a0] sm:$0xf0] }
 0x460   :  { %v8825_v30 = vld [vmem:[#allocation2 + $0x6dc] sm:$0xf0]  ;;  %v8771_v27 = vld [vmem:[#allocation2 + $0x384] sm:$0xf] }
 0x461   :  { %v6603_v34 = vld [vmem:[#allocation2 + $0x80] sm:$0xf]  ;;  %v7004_v40 = vor.u32 %v8825_v30, %v7003_v29  ;;  %2257 = vmatpush.bf16.msrb.mxu2 %v6876_v11  ;;  %v7072_v29 = vor.u32 %v8839_v51, %v7069_v36  ;;  %v9961_v30 = vpack.c.bf16 %v9955_v33, %v9947_v16  ;;  %v8803_v56 = vld [vmem:[#allocation2 + $0x584] sm:$0xf]  ;;  %v9973_v16 = vpack.c.bf16 %v9953_v32, %v9945_v5 }
 0x462   :  { %v8725_v38 = vld [vmem:[#allocation2 + $0x9c] sm:$0xf0]  ;;  %v6925_v11 = vld [vmem:[#allocation2 + $0x5a0] sm:$0xf0]  ;;  %v6800_v33 = vor.u32 %v8771_v27, %v6797_v17 }
 0x463   :  { %v6731_v39 = vld [vmem:[#allocation2 + $0x280] sm:$0xf]  ;;  %v6604_v45 = vor.u32 %v8725_v38, %v6603_v34  ;;  %2271 = vmatpush.bf16.msrb.mxu3 %v7004_v40  ;;  %v9965_v34 = vpack.c.bf16 %v9951_v15, %v9943_v31  ;;  %v9969_v38 = vpack.c.bf16 %v9957_v6, %v9949_v62  ;;  %v7053_v40 = vld [vmem:[#allocation2 + $0x7a0] sm:$0xf0] }
 0x464   :  { %v8757_v42 = vld [vmem:[#allocation2 + $0x29c] sm:$0xf0]  ;;  %v6653_v31 = vld [vmem:[#allocation2 + $0x160] sm:$0xf0] }
 0x465   :  { %v6859_v43 = vld [vmem:[#allocation2 + $0x480] sm:$0xf]  ;;  %v6732_v49 = vor.u32 %v8757_v42, %v6731_v39  ;;  %2230 = vmatpush.bf16.msrb.mxu0 %v6604_v45  ;;  %v8835_v39 = vld [vmem:[#allocation2 + $0x784] sm:$0xf]  ;;  %v6672_v42 = vor.u32 %v8739_v22, %v6669_v23 }
 0x466   :  { %v8789_v46 = vld [vmem:[#allocation2 + $0x49c] sm:$0xf0]  ;;  %v8767_v15 = vld [vmem:[#allocation2 + $0x344] sm:$0xf]  ;;  %v7056_v62 = vor.u32 %v8835_v39, %v7053_v40 }
 0x467   :  { %v6987_v47 = vld [vmem:[#allocation2 + $0x680] sm:$0xf]  ;;  %v6860_v26 = vor.u32 %v8789_v46, %v6859_v43  ;;  %2244 = vmatpush.bf16.msrb.mxu1 %v6732_v49  ;;  %v6928_v43 = vor.u32 %v8803_v56, %v6925_v11  ;;  %v8735_v46 = vld [vmem:[#allocation2 + $0x144] sm:$0xf] }
 0x468   :  { %v8821_v50 = vld [vmem:[#allocation2 + $0x69c] sm:$0xf0]  ;;  %v6781_v6 = vld [vmem:[#allocation2 + $0x360] sm:$0xf0]  ;;  %v6656_v45 = vor.u32 %v8735_v46, %v6653_v31 }
 0x469   :  { %v6587_v28 = vld [vmem:[#allocation2 + $0x40] sm:$0xf]  ;;  %v6988_v24 = vor.u32 %v8821_v50, %v6987_v47  ;;  %2258 = vmatpush.bf16.msrb.mxu2 %v6860_v26  ;;  %v8799_v47 = vld [vmem:[#allocation2 + $0x544] sm:$0xf]  ;;  %v6784_v49 = vor.u32 %v8767_v15, %v6781_v6 }
 0x46a   :  { %v8721_v48 = vld [vmem:[#allocation2 + $0x5c] sm:$0xf0]  ;;  %v6909_v50 = vld [vmem:[#allocation2 + $0x560] sm:$0xf0] }
 0x46b   :  { %v6715_v44 = vld [vmem:[#allocation2 + $0x240] sm:$0xf]  ;;  %v6588_v58 = vor.u32 %v8721_v48, %v6587_v28  ;;  %2272 = vmatpush.bf16.msrb.mxu3 %v6988_v24  ;;  %v8831_v5 = vld [vmem:[#allocation2 + $0x744] sm:$0xf]  ;;  %v6912_v26 = vor.u32 %v8799_v47, %v6909_v50 }
 0x46c   :  { %v8753_v53 = vld [vmem:[#allocation2 + $0x25c] sm:$0xf0]  ;;  %v7037_v32 = vld [vmem:[#allocation2 + $0x760] sm:$0xf0] }
 0x46d   :  { %v6843_v25 = vld [vmem:[#allocation2 + $0x440] sm:$0xf]  ;;  %v6716_v61 = vor.u32 %v8753_v53, %v6715_v44  ;;  %2231 = vmatpush.bf16.msrb.mxu0 %v6588_v58  ;;  %v8731_v28 = vld [vmem:[#allocation2 + $0x104] sm:$0xf]  ;;  %v7040_v24 = vor.u32 %v8831_v5, %v7037_v32 }
 0x46e   :  { %v8785_v54 = vld [vmem:[#allocation2 + $0x45c] sm:$0xf0]  ;;  %v6637_v48 = vld [vmem:[#allocation2 + $0x120] sm:$0xf0] }
 0x46f   :  { %v6971_v55 = vld [vmem:[#allocation2 + $0x640] sm:$0xf]  ;;  %v6844_v37 = vor.u32 %v8785_v54, %v6843_v25  ;;  %2245 = vmatpush.bf16.msrb.mxu1 %v6716_v61  ;;  %v8763_v44 = vld [vmem:[#allocation2 + $0x304] sm:$0xf]  ;;  %v6640_v58 = vor.u32 %v8731_v28, %v6637_v48  ;;  %v8778_v48 = vld [vmem:[#allocation2 + $0x3e4] sm:$0xf0] }
 0x470   :  { %v8817_v57 = vld [vmem:[#allocation2 + $0x65c] sm:$0xf0]  ;;  %v6765_v53 = vld [vmem:[#allocation2 + $0x320] sm:$0xf0] }
 0x471   :  { %v6571_v59 = vld [vmem:[#allocation2] sm:$0xf]  ;;  %v6972_v1 = vor.u32 %v8817_v57, %v6971_v55  ;;  %2259 = vmatpush.bf16.msrb.mxu2 %v6844_v37  ;;  %v8795_v25 = vld [vmem:[#allocation2 + $0x504] sm:$0xf] }
 0x472   :  { %v8717_v60 = vld [vmem:[#allocation2 + $0x1c] sm:$0xf0]  ;;  %v6893_v54 = vld [vmem:[#allocation2 + $0x520] sm:$0xf0] }
 0x473   :  { %v6699_v41 = vld [vmem:[#allocation2 + $0x200] sm:$0xf]  ;;  %v6572_v10 = vor.u32 %v8717_v60, %v6571_v59  ;;  %2273 = vmatpush.bf16.msrb.mxu3 %v6972_v1  ;;  %v8827_v55 = vld [vmem:[#allocation2 + $0x704] sm:$0xf]  ;;  %v6768_v59 = vor.u32 %v8763_v44, %v6765_v53  ;;  %v6896_v60 = vor.u32 %v8795_v25, %v6893_v54  ;;  %v6947_v44 = vld [vmem:[#allocation2 + $0x5c8] sm:$0xf] }
 0x474   :  { %v8749_v63 = vld [vmem:[#allocation2 + $0x21c] sm:$0xf0]  ;;  %v7021_v57 = vld [vmem:[#allocation2 + $0x720] sm:$0xf0]  ;;  %v7075_v54 = vld [vmem:[#allocation2 + $0x7c8] sm:$0xf] }
 0x475   :  { %v6827_v0 = vld [vmem:[#allocation2 + $0x400] sm:$0xf]  ;;  %v6700_v18 = vor.u32 %v8749_v63, %v6699_v41  ;;  %2232 = vmatpush.bf16.msrb.mxu0 %v6572_v10  ;;  %v8727_v61 = vld [vmem:[#allocation2 + $0xc4] sm:$0xf]  ;;  %v7024_v63 = vor.u32 %v8827_v55, %v7021_v57  ;;  %v8842_v55 = vld [vmem:[#allocation2 + $0x7e4] sm:$0xf0] }
 0x476   :  { %v8781_v2 = vld [vmem:[#allocation2 + $0x41c] sm:$0xf0]  ;;  %v6621_v37 = vld [vmem:[#allocation2 + $0xe0] sm:$0xf0] }
 0x477   :  { %v6955_v3 = vld [vmem:[#allocation2 + $0x600] sm:$0xf]  ;;  %v6828_v19 = vor.u32 %v8781_v2, %v6827_v0  ;;  %2246 = vmatpush.bf16.msrb.mxu1 %v6700_v18  ;;  %v8759_v41 = vld [vmem:[#allocation2 + $0x2c4] sm:$0xf]  ;;  %v6624_v7 = vor.u32 %v8727_v61, %v6621_v37  ;;  %v6675_v61 = vld [vmem:[#allocation2 + $0x188] sm:$0xf] }
 0x478   :  { %v8813_v4 = vld [vmem:[#allocation2 + $0x61c] sm:$0xf0]  ;;  %2233 = vmatmul.bf16.vlgmr.msrb.gmra.mxu0 %v9965_v34  ;;  %v6749_v0 = vld [vmem:[#allocation2 + $0x2e0] sm:$0xf0]  ;;  %v8742_v37 = vld [vmem:[#allocation2 + $0x1a4] sm:$0xf0] }
 0x479   :  { %v6956_v52 = vor.u32 %v8813_v4, %v6955_v3  ;;  %2260 = vmatpush.bf16.msrb.mxu2 %v6828_v19  ;;  %2281 = vmatpush.bf16.msra.mxu0 %v6688_v35  ;;  %v8791_v1 = vld [vmem:[#allocation2 + $0x4c4] sm:$0xf]  ;;  %v6752_v8 = vor.u32 %v8759_v41, %v6749_v0  ;;  %v6803_v41 = vld [vmem:[#allocation2 + $0x388] sm:$0xf] }
 0x47a   :  { %2247 = vmatmul.bf16.vlgmr.msrb.gmra.mxu1 %v9973_v16  ;;  %v6877_v2 = vld [vmem:[#allocation2 + $0x4e0] sm:$0xf0]  ;;  %v8774_v0 = vld [vmem:[#allocation2 + $0x3a4] sm:$0xf0] }
 0x47b   :  { %2274 = vmatpush.bf16.msrb.mxu3 %v6956_v52  ;;  %2295 = vmatpush.bf16.msra.mxu1 %v6816_v20  ;;  %v8823_v3 = vld [vmem:[#allocation2 + $0x6c4] sm:$0xf]  ;;  %v6880_v9 = vor.u32 %v8791_v1, %v6877_v2  ;;  %v6931_v1 = vld [vmem:[#allocation2 + $0x588] sm:$0xf] }
 0x47c   :  { %2261 = vmatmul.bf16.vlgmr.msrb.gmra.mxu2 %v9961_v30  ;;  %v7005_v4 = vld [vmem:[#allocation2 + $0x6e0] sm:$0xf0]  ;;  %v8806_v2 = vld [vmem:[#allocation2 + $0x5a4] sm:$0xf0] }
 0x47d   :  { %2309 = vmatpush.bf16.msra.mxu2 %v6944_v21  ;;  %2282 = vmatpush.bf16.msra.mxu0 %v6672_v42  ;;  %v8723_v10 = vld [vmem:[#allocation2 + $0x84] sm:$0xf]  ;;  %v7008_v14 = vor.u32 %v8823_v3, %v7005_v4  ;;  %v7059_v3 = vld [vmem:[#allocation2 + $0x788] sm:$0xf] }
 0x47e   :  { %2275 = vmatmul.bf16.vlgmr.msrb.gmra.mxu3 %v9969_v38  ;;  %v6605_v12 = vld [vmem:[#allocation2 + $0xa0] sm:$0xf0]  ;;  %v8838_v4 = vld [vmem:[#allocation2 + $0x7a4] sm:$0xf0] }
 0x47f   :  { %2323 = vmatpush.bf16.msra.mxu3 %v7072_v29  ;;  %2296 = vmatpush.bf16.msra.mxu1 %v6800_v33  ;;  %v6733_v18 = vld [vmem:[#allocation2 + $0x2a0] sm:$0xf0]  ;;  %v6608_v35 = vor.u32 %v8723_v10, %v6605_v12  ;;  %v6659_v10 = vld [vmem:[#allocation2 + $0x148] sm:$0xf] }
 0x480   :  { %v8787_v19 = vld [vmem:[#allocation2 + $0x484] sm:$0xf]  ;;  %v6736_v20 = vor.u32 %v8755_v13, %v6733_v18  ;;  %v8738_v12 = vld [vmem:[#allocation2 + $0x164] sm:$0xf0] }
 0x481   :  { %2310 = vmatpush.bf16.msra.mxu2 %v6928_v43  ;;  %2283 = vmatpush.bf16.msra.mxu0 %v6656_v45  ;;  %v6861_v51 = vld [vmem:[#allocation2 + $0x4a0] sm:$0xf0]  ;;  %v6691_v45 = vld [vmem:[#allocation2 + $0x1c8] sm:$0xf] }
 0x482   :  { %v8819_v36 = vld [vmem:[#allocation2 + $0x684] sm:$0xf]  ;;  %v6864_v21 = vor.u32 %v8787_v19, %v6861_v51  ;;  %v6787_v13 = vld [vmem:[#allocation2 + $0x348] sm:$0xf] }
 0x483   :  { %2324 = vmatpush.bf16.msra.mxu3 %v7056_v62  ;;  %2297 = vmatpush.bf16.msra.mxu1 %v6784_v49  ;;  %v6989_v52 = vld [vmem:[#allocation2 + $0x6a0] sm:$0xf0]  ;;  %v8746_v49 = vld [vmem:[#allocation2 + $0x1e4] sm:$0xf0] }
 0x484   :  { %v8719_v22 = vld [vmem:[#allocation2 + $0x44] sm:$0xf]  ;;  %v6992_v29 = vor.u32 %v8819_v36, %v6989_v52  ;;  %v8770_v18 = vld [vmem:[#allocation2 + $0x364] sm:$0xf0] }
 0x485   :  { %2311 = vmatpush.bf16.msra.mxu2 %v6912_v26  ;;  %2284 = vmatpush.bf16.msra.mxu0 %v6640_v58  ;;  %v6589_v23 = vld [vmem:[#allocation2 + $0x60] sm:$0xf0]  ;;  %v6819_v26 = vld [vmem:[#allocation2 + $0x3c8] sm:$0xf]  ;;  %v6692_v58 = vor.u32 %v8746_v49, %v6691_v45 }
 0x486   :  { %v8751_v27 = vld [vmem:[#allocation2 + $0x244] sm:$0xf]  ;;  %v6592_v42 = vor.u32 %v8719_v22, %v6589_v23  ;;  %v6915_v19 = vld [vmem:[#allocation2 + $0x548] sm:$0xf] }
 0x487   :  { %2325 = vmatpush.bf16.msra.mxu3 %v7040_v24  ;;  %2298 = vmatpush.bf16.msra.mxu1 %v6768_v59  ;;  %v6717_v17 = vld [vmem:[#allocation2 + $0x260] sm:$0xf0]  ;;  %v8810_v24 = vld [vmem:[#allocation2 + $0x5e4] sm:$0xf0]  ;;  %v6820_v59 = vor.u32 %v8778_v48, %v6819_v26 }
 0x488   :  { %v8783_v56 = vld [vmem:[#allocation2 + $0x444] sm:$0xf]  ;;  %v6720_v46 = vor.u32 %v8751_v27, %v6717_v17  ;;  %v8802_v51 = vld [vmem:[#allocation2 + $0x564] sm:$0xf0] }
 0x489   :  { %2312 = vmatpush.bf16.msra.mxu2 %v6896_v60  ;;  %2285 = vmatpush.bf16.msra.mxu0 %v6624_v7  ;;  %v6845_v11 = vld [vmem:[#allocation2 + $0x460] sm:$0xf0]  ;;  %v6948_v60 = vor.u32 %v8810_v24, %v6947_v44  ;;  %v6676_v7 = vor.u32 %v8742_v37, %v6675_v61  ;;  %v7043_v36 = vld [vmem:[#allocation2 + $0x748] sm:$0xf] }
 0x48a   :  { %v8815_v39 = vld [vmem:[#allocation2 + $0x644] sm:$0xf]  ;;  %v6848_v31 = vor.u32 %v8783_v56, %v6845_v11  ;;  %v8834_v52 = vld [vmem:[#allocation2 + $0x764] sm:$0xf0] }
 0x48b   :  { %2326 = vmatpush.bf16.msra.mxu3 %v7024_v63  ;;  %2299 = vmatpush.bf16.msra.mxu1 %v6752_v8  ;;  %v6973_v40 = vld [vmem:[#allocation2 + $0x660] sm:$0xf0]  ;;  %v7076_v63 = vor.u32 %v8842_v55, %v7075_v54  ;;  %v6804_v8 = vor.u32 %v8774_v0, %v6803_v41  ;;  %v6643_v22 = vld [vmem:[#allocation2 + $0x108] sm:$0xf] }
 0x48c   :  { %v8715_v33 = vld [vmem:[#allocation2 + $0x4] sm:$0xf]  ;;  %v6976_v47 = vor.u32 %v8815_v39, %v6973_v40  ;;  %v8734_v23 = vld [vmem:[#allocation2 + $0x124] sm:$0xf0] }
 0x48d   :  { %2313 = vmatpush.bf16.msra.mxu2 %v6880_v9  ;;  %2286 = vmatpush.bf16.msra.mxu0 %v6608_v35  ;;  %v6573_v43 = vld [vmem:[#allocation2 + $0x20] sm:$0xf0]  ;;  %v6932_v9 = vor.u32 %v8806_v2, %v6931_v1  ;;  %v6660_v35 = vor.u32 %v8738_v12, %v6659_v10  ;;  %v6771_v27 = vld [vmem:[#allocation2 + $0x308] sm:$0xf] }
 0x48e   :  { %v8747_v15 = vld [vmem:[#allocation2 + $0x204] sm:$0xf]  ;;  %v6576_v28 = vor.u32 %v8715_v33, %v6573_v43  ;;  %v8766_v17 = vld [vmem:[#allocation2 + $0x324] sm:$0xf0] }
 0x48f   :  { %2327 = vmatpush.bf16.msra.mxu3 %v7008_v14  ;;  %2300 = vmatpush.bf16.msra.mxu1 %v6736_v20  ;;  %v6701_v62 = vld [vmem:[#allocation2 + $0x220] sm:$0xf0]  ;;  %v7060_v14 = vor.u32 %v8838_v4, %v7059_v3  ;;  %v6788_v20 = vor.u32 %v8770_v18, %v6787_v13  ;;  %v6899_v56 = vld [vmem:[#allocation2 + $0x508] sm:$0xf]  ;;  %v6772_v33 = vor.u32 %v8766_v17, %v6771_v27  ;;  %v8808_v27 = vld [vmem:[#allocation2 + $0x5cc] sm:$0xf] }
 0x490   :  { %v8779_v6 = vld [vmem:[#allocation2 + $0x404] sm:$0xf]  ;;  %v6704_v53 = vor.u32 %v8747_v15, %v6701_v62  ;;  %v8798_v11 = vld [vmem:[#allocation2 + $0x524] sm:$0xf0] }
 0x491   :  { %2314 = vmatpush.bf16.msra.mxu2 %v6864_v21  ;;  %v6829_v50 = vld [vmem:[#allocation2 + $0x420] sm:$0xf0]  ;;  %2287 = vmatpush.bf16.msra.mxu0 %v6592_v42  ;;  %v6916_v21 = vor.u32 %v8802_v51, %v6915_v19  ;;  %v7027_v39 = vld [vmem:[#allocation2 + $0x708] sm:$0xf]  ;;  %v6644_v42 = vor.u32 %v8734_v23, %v6643_v22  ;;  %v6900_v43 = vor.u32 %v8798_v11, %v6899_v56  ;;  %v6821_v23 = vld [vmem:[#allocation2 + $0x3e8] sm:$0xf0] }
 0x492   :  { %v8811_v5 = vld [vmem:[#allocation2 + $0x604] sm:$0xf]  ;;  %v6832_v25 = vor.u32 %v8779_v6, %v6829_v50  ;;  %v8830_v40 = vld [vmem:[#allocation2 + $0x724] sm:$0xf0]  ;;  %v8840_v11 = vld [vmem:[#allocation2 + $0x7cc] sm:$0xf] }
 0x493   :  { %2328 = vmatpush.bf16.msra.mxu3 %v6992_v29  ;;  %v6957_v32 = vld [vmem:[#allocation2 + $0x620] sm:$0xf0]  ;;  %2301 = vmatpush.bf16.msra.mxu1 %v6720_v46  ;;  %v7044_v29 = vor.u32 %v8834_v52, %v7043_v36  ;;  %v6627_v46 = vld [vmem:[#allocation2 + $0xc8] sm:$0xf]  ;;  %v7028_v62 = vor.u32 %v8830_v40, %v7027_v39  ;;  %v7077_v39 = vld [vmem:[#allocation2 + $0x7e8] sm:$0xf0] }
 0x494   :  { %v6960_v57 = vor.u32 %v8811_v5, %v6957_v32  ;;  %v6755_v15 = vld [vmem:[#allocation2 + $0x2c8] sm:$0xf] }
 0x495   :  { %2315 = vmatpush.bf16.msra.mxu2 %v6848_v31  ;;  %2288 = vmatpush.bf16.msra.mxu0 %v6576_v28  ;;  %v8730_v31 = vld [vmem:[#allocation2 + $0xe4] sm:$0xf0] }
 0x496   :  { %v8762_v6 = vld [vmem:[#allocation2 + $0x2e4] sm:$0xf0]  ;;  %v6628_v45 = vor.u32 %v8730_v31, %v6627_v46  ;;  %v8740_v46 = vld [vmem:[#allocation2 + $0x18c] sm:$0xf] }
 0x497   :  { %2329 = vmatpush.bf16.msra.mxu3 %v6976_v47  ;;  %2302 = vmatpush.bf16.msra.mxu1 %v6704_v53  ;;  %v6883_v47 = vld [vmem:[#allocation2 + $0x4c8] sm:$0xf]  ;;  %v6756_v49 = vor.u32 %v8762_v6, %v6755_v15  ;;  %v6677_v31 = vld [vmem:[#allocation2 + $0x1a8] sm:$0xf0] }
 0x498   :  { %2289 = vmatmul.bf16.vlgmr.msra.gmra.mxu0 %v9965_v34  ;;  %v8794_v50 = vld [vmem:[#allocation2 + $0x4e4] sm:$0xf0]  ;;  %v8772_v15 = vld [vmem:[#allocation2 + $0x38c] sm:$0xf] }
 0x499   :  { %2316 = vmatpush.bf16.msra.mxu2 %v6832_v25  ;;  %2337 = vmatpush.bf16.msrb.mxu0 %v6692_v58  ;;  %v7011_v5 = vld [vmem:[#allocation2 + $0x6c8] sm:$0xf]  ;;  %v6884_v26 = vor.u32 %v8794_v50, %v6883_v47  ;;  %v6805_v6 = vld [vmem:[#allocation2 + $0x3a8] sm:$0xf0] }
 0x49a   :  { %2303 = vmatmul.bf16.vlgmr.msra.gmra.mxu1 %v9973_v16  ;;  %v8826_v32 = vld [vmem:[#allocation2 + $0x6e4] sm:$0xf0]  ;;  %v8804_v47 = vld [vmem:[#allocation2 + $0x58c] sm:$0xf] }
 0x49b   :  { %2330 = vmatpush.bf16.msra.mxu3 %v6960_v57  ;;  %2351 = vmatpush.bf16.msrb.mxu1 %v6820_v59  ;;  %v6611_v28 = vld [vmem:[#allocation2 + $0x88] sm:$0xf]  ;;  %v7012_v24 = vor.u32 %v8826_v32, %v7011_v5  ;;  %v6933_v50 = vld [vmem:[#allocation2 + $0x5a8] sm:$0xf0] }
 0x49c   :  { %2317 = vmatmul.bf16.vlgmr.msra.gmra.mxu2 %v9961_v30  ;;  %v8726_v48 = vld [vmem:[#allocation2 + $0xa4] sm:$0xf0]  ;;  %v8836_v5 = vld [vmem:[#allocation2 + $0x78c] sm:$0xf] }
 0x49d   :  { %2365 = vmatpush.bf16.msrb.mxu2 %v6948_v60  ;;  %2338 = vmatpush.bf16.msrb.mxu0 %v6676_v7  ;;  %v6739_v44 = vld [vmem:[#allocation2 + $0x288] sm:$0xf]  ;;  %v6612_v58 = vor.u32 %v8726_v48, %v6611_v28  ;;  %v7061_v32 = vld [vmem:[#allocation2 + $0x7a8] sm:$0xf0] }
 0x49e   :  { %2331 = vmatmul.bf16.vlgmr.msra.gmra.mxu3 %v9969_v38  ;;  %v8758_v53 = vld [vmem:[#allocation2 + $0x2a4] sm:$0xf0]  ;;  %v8736_v28 = vld [vmem:[#allocation2 + $0x14c] sm:$0xf] }
 0x49f   :  { %2379 = vmatpush.bf16.msrb.mxu3 %v7076_v63  ;;  %2352 = vmatpush.bf16.msrb.mxu1 %v6804_v8  ;;  %v6867_v25 = vld [vmem:[#allocation2 + $0x488] sm:$0xf]  ;;  %v6740_v59 = vor.u32 %v8758_v53, %v6739_v44  ;;  %v6661_v48 = vld [vmem:[#allocation2 + $0x168] sm:$0xf0] }
 0x4a0   :  { %v8790_v54 = vld [vmem:[#allocation2 + $0x4a4] sm:$0xf0]  ;;  %v8768_v44 = vld [vmem:[#allocation2 + $0x34c] sm:$0xf] }
 0x4a1   :  { %2366 = vmatpush.bf16.msrb.mxu2 %v6932_v9  ;;  %2339 = vmatpush.bf16.msrb.mxu0 %v6660_v35  ;;  %v6995_v55 = vld [vmem:[#allocation2 + $0x688] sm:$0xf]  ;;  %v6868_v60 = vor.u32 %v8790_v54, %v6867_v25  ;;  %v8744_v35 = vld [vmem:[#allocation2 + $0x1cc] sm:$0xf] }
 0x4a2   :  { %v8822_v57 = vld [vmem:[#allocation2 + $0x6a4] sm:$0xf0]  ;;  %v6789_v53 = vld [vmem:[#allocation2 + $0x368] sm:$0xf0] }
 0x4a3   :  { %2380 = vmatpush.bf16.msrb.mxu3 %v7060_v14  ;;  %2353 = vmatpush.bf16.msrb.mxu1 %v6788_v20  ;;  %v6595_v61 = vld [vmem:[#allocation2 + $0x48] sm:$0xf]  ;;  %v6996_v63 = vor.u32 %v8822_v57, %v6995_v55  ;;  %v6693_v20 = vld [vmem:[#allocation2 + $0x1e8] sm:$0xf0] }
 0x4a4   :  { %v8722_v37 = vld [vmem:[#allocation2 + $0x64] sm:$0xf0]  ;;  %v8800_v25 = vld [vmem:[#allocation2 + $0x54c] sm:$0xf] }
 0x4a5   :  { %2367 = vmatpush.bf16.msrb.mxu2 %v6916_v21  ;;  %2340 = vmatpush.bf16.msrb.mxu0 %v6644_v42  ;;  %v6723_v41 = vld [vmem:[#allocation2 + $0x248] sm:$0xf]  ;;  %v6596_v7 = vor.u32 %v8722_v37, %v6595_v61  ;;  %v8776_v21 = vld [vmem:[#allocation2 + $0x3cc] sm:$0xf]  ;;  %v6696_v42 = vor.u32 %v8744_v35, %v6693_v20 }
 0x4a6   :  { %v8754_v0 = vld [vmem:[#allocation2 + $0x264] sm:$0xf0]  ;;  %v6917_v54 = vld [vmem:[#allocation2 + $0x568] sm:$0xf0] }
 0x4a7   :  { %2381 = vmatpush.bf16.msrb.mxu3 %v7044_v29  ;;  %2354 = vmatpush.bf16.msrb.mxu1 %v6772_v33  ;;  %v6851_v1 = vld [vmem:[#allocation2 + $0x448] sm:$0xf]  ;;  %v6724_v10 = vor.u32 %v8754_v0, %v6723_v41  ;;  %v6949_v29 = vld [vmem:[#allocation2 + $0x5e8] sm:$0xf0]  ;;  %v6824_v33 = vor.u32 %v8776_v21, %v6821_v23 }
 0x4a8   :  { %v8786_v2 = vld [vmem:[#allocation2 + $0x464] sm:$0xf0]  ;;  %v8832_v55 = vld [vmem:[#allocation2 + $0x74c] sm:$0xf] }
 0x4a9   :  { %2368 = vmatpush.bf16.msrb.mxu2 %v6900_v43  ;;  %2341 = vmatpush.bf16.msrb.mxu0 %v6628_v45  ;;  %v6979_v3 = vld [vmem:[#allocation2 + $0x648] sm:$0xf]  ;;  %v6852_v12 = vor.u32 %v8786_v2, %v6851_v1  ;;  %v6952_v43 = vor.u32 %v8808_v27, %v6949_v29  ;;  %v6680_v45 = vor.u32 %v8740_v46, %v6677_v31  ;;  %v7045_v57 = vld [vmem:[#allocation2 + $0x768] sm:$0xf0] }
 0x4aa   :  { %v8818_v4 = vld [vmem:[#allocation2 + $0x664] sm:$0xf0]  ;;  %v8732_v61 = vld [vmem:[#allocation2 + $0x10c] sm:$0xf] }
 0x4ab   :  { %2382 = vmatpush.bf16.msrb.mxu3 %v7028_v62  ;;  %2355 = vmatpush.bf16.msrb.mxu1 %v6756_v49  ;;  %v6579_v8 = vld [vmem:[#allocation2 + $0x8] sm:$0xf]  ;;  %v6980_v19 = vor.u32 %v8818_v4, %v6979_v3  ;;  %v7080_v62 = vor.u32 %v8840_v11, %v7077_v39  ;;  %v6808_v49 = vor.u32 %v8772_v15, %v6805_v6  ;;  %v6645_v37 = vld [vmem:[#allocation2 + $0x128] sm:$0xf0] }
 0x4ac   :  { %v8718_v9 = vld [vmem:[#allocation2 + $0x24] sm:$0xf0]  ;;  %v8764_v41 = vld [vmem:[#allocation2 + $0x30c] sm:$0xf] }
 0x4ad   :  { %2369 = vmatpush.bf16.msrb.mxu2 %v6884_v26  ;;  %2342 = vmatpush.bf16.msrb.mxu0 %v6612_v58  ;;  %v6707_v13 = vld [vmem:[#allocation2 + $0x208] sm:$0xf]  ;;  %v6580_v22 = vor.u32 %v8718_v9, %v6579_v8  ;;  %v6936_v26 = vor.u32 %v8804_v47, %v6933_v50  ;;  %v6664_v58 = vor.u32 %v8736_v28, %v6661_v48  ;;  %v6773_v0 = vld [vmem:[#allocation2 + $0x328] sm:$0xf0] }
 0x4ae   :  { %v8750_v14 = vld [vmem:[#allocation2 + $0x224] sm:$0xf0]  ;;  %v8796_v1 = vld [vmem:[#allocation2 + $0x50c] sm:$0xf]  ;;  %v6776_v8 = vor.u32 %v8764_v41, %v6773_v0 }
 0x4af   :  { %2383 = vmatpush.bf16.msrb.mxu3 %v7012_v24  ;;  %2356 = vmatpush.bf16.msrb.mxu1 %v6740_v59  ;;  %v6835_v18 = vld [vmem:[#allocation2 + $0x408] sm:$0xf]  ;;  %v6708_v17 = vor.u32 %v8750_v14, %v6707_v13  ;;  %v7064_v24 = vor.u32 %v8836_v5, %v7061_v32  ;;  %v6792_v59 = vor.u32 %v8768_v44, %v6789_v53  ;;  %v6901_v2 = vld [vmem:[#allocation2 + $0x528] sm:$0xf0] }
 0x4b0   :  { %v8782_v51 = vld [vmem:[#allocation2 + $0x424] sm:$0xf0]  ;;  %v8828_v3 = vld [vmem:[#allocation2 + $0x70c] sm:$0xf]  ;;  %v6904_v9 = vor.u32 %v8796_v1, %v6901_v2 }
 0x4b1   :  { %2370 = vmatpush.bf16.msrb.mxu2 %v6868_v60  ;;  %v6963_v36 = vld [vmem:[#allocation2 + $0x608] sm:$0xf]  ;;  %2343 = vmatpush.bf16.msrb.mxu0 %v6596_v7  ;;  %v6836_v56 = vor.u32 %v8782_v51, %v6835_v18  ;;  %v6920_v60 = vor.u32 %v8800_v25, %v6917_v54  ;;  %v7029_v4 = vld [vmem:[#allocation2 + $0x728] sm:$0xf0]  ;;  %v6648_v7 = vor.u32 %v8732_v61, %v6645_v37 }
 0x4b2   :  { %v8814_v52 = vld [vmem:[#allocation2 + $0x624] sm:$0xf0]  ;;  %v8760_v13 = vld [vmem:[#allocation2 + $0x2cc] sm:$0xf]  ;;  %v7032_v14 = vor.u32 %v8828_v3, %v7029_v4 }
 0x4b3   :  { %2384 = vmatpush.bf16.msrb.mxu3 %v6996_v63  ;;  %2357 = vmatpush.bf16.msrb.mxu1 %v6724_v10  ;;  %v6964_v40 = vor.u32 %v8814_v52, %v6963_v36  ;;  %v7048_v63 = vor.u32 %v8832_v55, %v7045_v57  ;;  %v8728_v10 = vld [vmem:[#allocation2 + $0xcc] sm:$0xf] }
 0x4b4   :  { %v6757_v18 = vld [vmem:[#allocation2 + $0x2e8] sm:$0xf0] }
 0x4b5   :  { %2371 = vmatpush.bf16.msrb.mxu2 %v6852_v12  ;;  %2344 = vmatpush.bf16.msrb.mxu0 %v6580_v22  ;;  %v6629_v12 = vld [vmem:[#allocation2 + $0xe8] sm:$0xf0]  ;;  %v6760_v20 = vor.u32 %v8760_v13, %v6757_v18 }
 0x4b6   :  { %v6885_v51 = vld [vmem:[#allocation2 + $0x4e8] sm:$0xf0]  ;;  %v6632_v35 = vor.u32 %v8728_v10, %v6629_v12 }
 0x4b7   :  { %2385 = vmatpush.bf16.msrb.mxu3 %v6980_v19  ;;  %2358 = vmatpush.bf16.msrb.mxu1 %v6708_v17  ;;  %v8792_v19 = vld [vmem:[#allocation2 + $0x4cc] sm:$0xf] }
 0x4b8   :  { %2345 = vmatmul.bf16.vlgmr.msrb.gmra.mxu0 %v9965_v34  ;;  %v8824_v36 = vld [vmem:[#allocation2 + $0x6cc] sm:$0xf]  ;;  %v6888_v21 = vor.u32 %v8792_v19, %v6885_v51 }
 0x4b9   :  { %2372 = vmatpush.bf16.msrb.mxu2 %v6836_v56  ;;  %2393 = vmatpush.bf16.msra.mxu0 %v6696_v42  ;;  %v7013_v52 = vld [vmem:[#allocation2 + $0x6e8] sm:$0xf0] }
 0x4ba   :  { %2359 = vmatmul.bf16.vlgmr.msrb.gmra.mxu1 %v9973_v16  ;;  %v8724_v22 = vld [vmem:[#allocation2 + $0x8c] sm:$0xf]  ;;  %v7016_v29 = vor.u32 %v8824_v36, %v7013_v52 }
 0x4bb   :  { %2386 = vmatpush.bf16.msrb.mxu3 %v6964_v40  ;;  %2407 = vmatpush.bf16.msra.mxu1 %v6824_v33  ;;  %v6613_v23 = vld [vmem:[#allocation2 + $0xa8] sm:$0xf0] }
 0x4bc   :  { %2373 = vmatmul.bf16.vlgmr.msrb.gmra.mxu2 %v9961_v30  ;;  %v8756_v27 = vld [vmem:[#allocation2 + $0x28c] sm:$0xf]  ;;  %v6616_v42 = vor.u32 %v8724_v22, %v6613_v23 }
 0x4bd   :  { %2421 = vmatpush.bf16.msra.mxu2 %v6952_v43  ;;  %2394 = vmatpush.bf16.msra.mxu0 %v6680_v45  ;;  %v6741_v17 = vld [vmem:[#allocation2 + $0x2a8] sm:$0xf0] }
 0x4be   :  { %2387 = vmatmul.bf16.vlgmr.msrb.gmra.mxu3 %v9969_v38  ;;  %v8788_v56 = vld [vmem:[#allocation2 + $0x48c] sm:$0xf]  ;;  %v6744_v33 = vor.u32 %v8756_v27, %v6741_v17 }
 0x4bf   :  { %2435 = vmatpush.bf16.msra.mxu3 %v7080_v62  ;;  %2408 = vmatpush.bf16.msra.mxu1 %v6808_v49  ;;  %v6869_v11 = vld [vmem:[#allocation2 + $0x4a8] sm:$0xf0] }
 0x4c0   :  { %v8820_v39 = vld [vmem:[#allocation2 + $0x68c] sm:$0xf]  ;;  %v6872_v43 = vor.u32 %v8788_v56, %v6869_v11 }
 0x4c1   :  { %2422 = vmatpush.bf16.msra.mxu2 %v6936_v26  ;;  %2395 = vmatpush.bf16.msra.mxu0 %v6664_v58  ;;  %v6997_v40 = vld [vmem:[#allocation2 + $0x6a8] sm:$0xf0] }
 0x4c2   :  { %v8720_v46 = vld [vmem:[#allocation2 + $0x4c] sm:$0xf]  ;;  %v7000_v62 = vor.u32 %v8820_v39, %v6997_v40 }
 0x4c3   :  { %2436 = vmatpush.bf16.msra.mxu3 %v7064_v24  ;;  %2409 = vmatpush.bf16.msra.mxu1 %v6792_v59  ;;  %v6597_v31 = vld [vmem:[#allocation2 + $0x68] sm:$0xf0] }
 0x4c4   :  { %v8752_v15 = vld [vmem:[#allocation2 + $0x24c] sm:$0xf]  ;;  %v6600_v45 = vor.u32 %v8720_v46, %v6597_v31 }
 0x4c5   :  { %2423 = vmatpush.bf16.msra.mxu2 %v6920_v60  ;;  %2396 = vmatpush.bf16.msra.mxu0 %v6648_v7  ;;  %v6725_v6 = vld [vmem:[#allocation2 + $0x268] sm:$0xf0] }
 0x4c6   :  { %v8784_v47 = vld [vmem:[#allocation2 + $0x44c] sm:$0xf]  ;;  %v6728_v49 = vor.u32 %v8752_v15, %v6725_v6 }
 0x4c7   :  { %2437 = vmatpush.bf16.msra.mxu3 %v7048_v63  ;;  %2410 = vmatpush.bf16.msra.mxu1 %v6776_v8  ;;  %v6853_v50 = vld [vmem:[#allocation2 + $0x468] sm:$0xf0] }
 0x4c8   :  { %v8816_v5 = vld [vmem:[#allocation2 + $0x64c] sm:$0xf]  ;;  %v6856_v26 = vor.u32 %v8784_v47, %v6853_v50 }
 0x4c9   :  { %2424 = vmatpush.bf16.msra.mxu2 %v6904_v9  ;;  %2397 = vmatpush.bf16.msra.mxu0 %v6632_v35  ;;  %v6981_v32 = vld [vmem:[#allocation2 + $0x668] sm:$0xf0] }
 0x4ca   :  { %v8716_v28 = vld [vmem:[#allocation2 + $0xc] sm:$0xf]  ;;  %v6984_v24 = vor.u32 %v8816_v5, %v6981_v32 }
 0x4cb   :  { %2438 = vmatpush.bf16.msra.mxu3 %v7032_v14  ;;  %2411 = vmatpush.bf16.msra.mxu1 %v6760_v20  ;;  %v6581_v48 = vld [vmem:[#allocation2 + $0x28] sm:$0xf0] }
 0x4cc   :  { %v8748_v44 = vld [vmem:[#allocation2 + $0x20c] sm:$0xf]  ;;  %v6584_v58 = vor.u32 %v8716_v28, %v6581_v48 }
 0x4cd   :  { %2425 = vmatpush.bf16.msra.mxu2 %v6888_v21  ;;  %2398 = vmatpush.bf16.msra.mxu0 %v6616_v42  ;;  %v6709_v53 = vld [vmem:[#allocation2 + $0x228] sm:$0xf0] }
 0x4ce   :  { %v8780_v25 = vld [vmem:[#allocation2 + $0x40c] sm:$0xf]  ;;  %v6712_v59 = vor.u32 %v8748_v44, %v6709_v53 }
 0x4cf   :  { %2439 = vmatpush.bf16.msra.mxu3 %v7016_v29  ;;  %2412 = vmatpush.bf16.msra.mxu1 %v6744_v33  ;;  %v6837_v54 = vld [vmem:[#allocation2 + $0x428] sm:$0xf0] }
 0x4d0   :  { %v8812_v55 = vld [vmem:[#allocation2 + $0x60c] sm:$0xf]  ;;  %v6840_v60 = vor.u32 %v8780_v25, %v6837_v54 }
 0x4d1   :  { %2426 = vmatpush.bf16.msra.mxu2 %v6872_v43  ;;  %v6965_v57 = vld [vmem:[#allocation2 + $0x628] sm:$0xf0]  ;;  %2399 = vmatpush.bf16.msra.mxu0 %v6600_v45 }
 0x4d2   :  { %v6968_v61 = vor.u32 %v8812_v55, %v6965_v57  ;;  %v9991_v4 = vld [vmem:[#allocation13] ss:$4 sm:$0xf]  ;;  %2678 = dma.hbm_to_vmem [thread:$0]  %s2672_s24, 16384, %s9774_s17, [#allocation4], %s9657_s21, %s9664_s19, %s9658_s11 }
 0x4d3   :  { %2440 = vmatpush.bf16.msra.mxu3 %v7000_v62  ;;  %2413 = vmatpush.bf16.msra.mxu1 %v6728_v49  ;;  %v1577_v9 = vperm.slane %v9991_v4, 0  ;;  %v1579_v5 = vperm.slane %v9991_v4, 2 }
 0x4d5   :  { %2427 = vmatpush.bf16.msra.mxu2 %v6856_v26  ;;  %2400 = vmatpush.bf16.msra.mxu0 %v6584_v58 }
 0x4d7   :  { %2441 = vmatpush.bf16.msra.mxu3 %v6984_v24  ;;  %2414 = vmatpush.bf16.msra.mxu1 %v6712_v59 }
 0x4d8   :  { %2401 = vmatmul.bf16.vlgmr.msra.gmra.mxu0 %v9965_v34 }
 0x4d9   :  { %2428 = vmatpush.bf16.msra.mxu2 %v6840_v60 }
 0x4da   :  { %2415 = vmatmul.bf16.vlgmr.msra.gmra.mxu1 %v9973_v16  ;;  %v1578_v16 = vperm.slane %v9991_v4, 1 }
 0x4db   :  { %2442 = vmatpush.bf16.msra.mxu3 %v6968_v61 }
 0x4dc   :  { %2429 = vmatmul.bf16.vlgmr.msra.gmra.mxu2 %v9961_v30 }
 0x4de   :  { %2443 = vmatmul.bf16.vlgmr.msra.gmra.mxu3 %v9969_v38 }
 0x4f5   :  { %v2234_v37 = vpop.f32.mrf.mxu0 }
 0x4f6   :  { %v2235_v18 = vadd.f32 %v2234_v37, %v1577_v9 }
 0x4f7   :  { %v2248_v41 = vpop.f32.mrf.mxu1 }
 0x4f8   :  { %v2249_v20 = vadd.f32 %v2248_v41, %v2235_v18 }
 0x4fd   :  { %v2236_v1 = vpop.f32.mrf.mxu0 }
 0x4fe   :  { %v2237_v30 = vadd.f32 %v2236_v1, %v1577_v9 }
 0x4ff   :  { %v2262_v63 = vpop.f32.mrf.mxu2  ;;  %v2250_v2 = vpop.f32.mrf.mxu1 }
 0x500   :  { %v2251_v19 = vadd.f32 %v2250_v2, %v2237_v30  ;;  %v2263_v56 = vadd.f32 %v2262_v63, %v2249_v20 }
 0x501   :  { %v2276_v0 = vpop.f32.mrf.mxu3 }
 0x502   :  { %v2277_v33 = vadd.f32 %v2276_v0, %v2263_v56 }
 0x504   :  { %v2449_v15 = vmul.f32 0.02, %v2277_v33 }
 0x506   :  { %v10003_v47 = vmax.f32 %v2277_v33, %v2449_v15 }
 0x507   :  { %v2264_v3 = vpop.f32.mrf.mxu2 }
 0x508   :  { %v2265_v21 = vadd.f32 %v2264_v3, %v2251_v19 }
 0x509   :  { %v2278_v7 = vpop.f32.mrf.mxu3 }
 0x50a   :  { %v2279_v11 = vadd.f32 %v2278_v7, %v2265_v21 }
 0x50c   :  { %v2453_v43 = vmul.f32 0.02, %v2279_v11 }
 0x50e   :  { %v10000_v62 = vmax.f32 %v2279_v11, %v2453_v43 }
 0x510   :  { %v2469_v50 = vmul.f32 0.0, %v10000_v62 }
 0x512   :  { %v2473_v28 = vadd.f32 %v2469_v50, %v10003_v47 }
 0x514   :  { %v2474_v25 = vrot.slane %v2473_v28, 4 }
 0x515   :  { %v2290_v8 = vpop.f32.mrf.mxu0 }
 0x516   :  { %v2291_v10 = vadd.f32 %v2290_v8, %v1578_v16  ;;  %v2475_v60 = vadd.f32 %v2474_v25, %v2473_v28 }
 0x517   :  { %v2304_v34 = vpop.f32.mrf.mxu1 }
 0x518   :  { %v2305_v13 = vadd.f32 %v2304_v34, %v2291_v10  ;;  %v2476_v2 = vrot.slane %v2475_v60, 2 }
 0x51a   :  { %v2477_v34 = vadd.f32 %v2476_v2, %v2475_v60 }
 0x51d   :  { %v2292_v14 = vpop.f32.mrf.mxu0 }
 0x51e   :  { %v2293_v51 = vadd.f32 %v2292_v14, %v1578_v16 }
 0x51f   :  { %v2318_v12 = vpop.f32.mrf.mxu2  ;;  %v2306_v36 = vpop.f32.mrf.mxu1 }
 0x520   :  { %v2307_v52 = vadd.f32 %v2306_v36, %v2293_v51  ;;  %v2319_v35 = vadd.f32 %v2318_v12, %v2305_v13  ;;  %v1580_v36 = vperm.slane %v9991_v4, 3 }
 0x521   :  { %v2332_v38 = vpop.f32.mrf.mxu3 }
 0x522   :  { %v2333_v29 = vadd.f32 %v2332_v38, %v2319_v35  ;;  %v2478_v38 = vrot.slane %v2477_v34, 1 }
 0x524   :  { %v2450_v40 = vmul.f32 0.02, %v2333_v29  ;;  %v2479_v19 = vadd.f32 %v2478_v38, %v2477_v34 }
 0x526   :  { %v9997_v46 = vmax.f32 %v2333_v29, %v2450_v40  ;;  %v10026_v21 = vmul.f32 0.125, %v2479_v19 }
 0x527   :  { %v2320_v22 = vpop.f32.mrf.mxu2 }
 0x528   :  { %v2321_v23 = vadd.f32 %v2320_v22, %v2307_v52  ;;  %v2509_v56 = vsub.f32 %v10000_v62, %v10026_v21 }
 0x529   :  { %v2334_v27 = vpop.f32.mrf.mxu3 }
 0x52a   :  { %v2335_v17 = vadd.f32 %v2334_v27, %v2321_v23  ;;  %v2517_v50 = vmul.f32 0.0, %v2509_v56 }
 0x52c   :  { %v2454_v39 = vmul.f32 0.02, %v2335_v17 }
 0x52e   :  { %v9995_v42 = vmax.f32 %v2335_v17, %v2454_v39 }
 0x530   :  { %v2470_v31 = vmul.f32 0.0, %v9995_v42 }
 0x532   :  { %v2480_v6 = vadd.f32 %v2470_v31, %v9997_v46 }
 0x534   :  { %v2481_v26 = vrot.slane %v2480_v6, 4 }
 0x535   :  { %v2346_v32 = vpop.f32.mrf.mxu0 }
 0x536   :  { %v2347_v45 = vadd.f32 %v2346_v32, %v1579_v5  ;;  %v2482_v24 = vadd.f32 %v2481_v26, %v2480_v6  ;;  %v2505_v26 = vsub.f32 %v10003_v47, %v10026_v21 }
 0x537   :  { %v2360_v49 = vpop.f32.mrf.mxu1 }
 0x538   :  { %v2361_v48 = vadd.f32 %v2360_v49, %v2347_v45  ;;  %v2483_v59 = vrot.slane %v2482_v24, 2 }
 0x53a   :  { %v2484_v63 = vadd.f32 %v2483_v59, %v2482_v24  ;;  %v2521_v59 = vmul.f32 %v2505_v26, %v2505_v26 }
 0x53c   :  { %v2485_v8 = vrot.slane %v2484_v63, 1 }
 0x53d   :  { %v2348_v55 = vpop.f32.mrf.mxu0 }
 0x53e   :  { %v2349_v57 = vadd.f32 %v2348_v55, %v1579_v5  ;;  %v2486_v30 = vadd.f32 %v2485_v8, %v2484_v63 }
 0x53f   :  { %v2374_v44 = vpop.f32.mrf.mxu2  ;;  %v2362_v58 = vpop.f32.mrf.mxu1 }
 0x540   :  { %v2375_v54 = vadd.f32 %v2374_v44, %v2361_v48  ;;  %v2363_v61 = vadd.f32 %v2362_v58, %v2349_v57  ;;  %v10021_v14 = vmul.f32 0.125, %v2486_v30 }
 0x541   :  { %v2388_v53 = vpop.f32.mrf.mxu3 }
 0x542   :  { %v2389_v37 = vadd.f32 %v2388_v53, %v2375_v54  ;;  %v2510_v35 = vsub.f32 %v9995_v42, %v10021_v14  ;;  %v2506_v39 = vsub.f32 %v9997_v46, %v10021_v14  ;;  %v2525_v53 = vmul.f32 %v2517_v50, %v2517_v50 }
 0x544   :  { %v2451_v3 = vmul.f32 0.02, %v2389_v37  ;;  %v2518_v29 = vmul.f32 0.0, %v2510_v35  ;;  %v2522_v5 = vmul.f32 %v2506_v39, %v2506_v39  ;;  %v2529_v63 = vadd.f32 %v2525_v53, %v2521_v59 }
 0x546   :  { %v10015_v16 = vmax.f32 %v2389_v37, %v2451_v3  ;;  %v2526_v31 = vmul.f32 %v2518_v29, %v2518_v29  ;;  %v2530_v8 = vrot.slane %v2529_v63, 4 }
 0x547   :  { %v2376_v41 = vpop.f32.mrf.mxu2 }
 0x548   :  { %v2377_v0 = vadd.f32 %v2376_v41, %v2363_v61  ;;  %v2536_v48 = vadd.f32 %v2526_v31, %v2522_v5 }
 0x549   :  { %v2390_v1 = vpop.f32.mrf.mxu3 }
 0x54a   :  { %v2391_v7 = vadd.f32 %v2390_v1, %v2377_v0  ;;  %v2537_v61 = vrot.slane %v2536_v48, 4 }
 0x54c   :  { %v2455_v9 = vmul.f32 0.02, %v2391_v7  ;;  %v2538_v3 = vadd.f32 %v2537_v61, %v2536_v48 }
 0x54e   :  { %v10017_v10 = vmax.f32 %v2391_v7, %v2455_v9 }
 0x550   :  { %v2471_v12 = vmul.f32 0.0, %v10017_v10 }
 0x552   :  { %v2487_v13 = vadd.f32 %v2471_v12, %v10015_v16  ;;  %v2539_v12 = vrot.slane %v2538_v3, 2 }
 0x554   :  { %v2488_v18 = vrot.slane %v2487_v13, 4 }
 0x555   :  { %v2402_v52 = vpop.f32.mrf.mxu0 }
 0x556   :  { %v2489_v51 = vadd.f32 %v2488_v18, %v2487_v13  ;;  %v2403_v27 = vadd.f32 %v2402_v52, %v1580_v36  ;;  %v2531_v13 = vadd.f32 %v2530_v8, %v2529_v63 }
 0x557   :  { %v2416_v22 = vpop.f32.mrf.mxu1 }
 0x558   :  { %v2490_v20 = vrot.slane %v2489_v51, 2  ;;  %v2417_v40 = vadd.f32 %v2416_v22, %v2403_v27  ;;  %v2532_v52 = vrot.slane %v2531_v13, 2 }
 0x55a   :  { %v2491_v23 = vadd.f32 %v2490_v20, %v2489_v51  ;;  %v2540_v51 = vadd.f32 %v2539_v12, %v2538_v3  ;;  %v2533_v27 = vadd.f32 %v2532_v52, %v2531_v13 }
 0x55c   :  { %v2492_v17 = vrot.slane %v2491_v23, 1  ;;  %v2541_v22 = vrot.slane %v2540_v51, 1  ;;  %v2534_v39 = vrot.slane %v2533_v27, 1 }
 0x55d   :  { %v2404_v43 = vpop.f32.mrf.mxu0 }
 0x55e   :  { %v2493_v4 = vadd.f32 %v2492_v17, %v2491_v23  ;;  %v2405_v6 = vadd.f32 %v2404_v43, %v1580_v36  ;;  %v2542_v56 = vadd.f32 %v2541_v22, %v2540_v51 }
 0x55f   :  { %v2430_v11 = vpop.f32.mrf.mxu2  ;;  %v2418_v28 = vpop.f32.mrf.mxu1 }
 0x560   :  { %v10032_v15 = vmul.f32 0.125, %v2493_v4  ;;  %v2431_v49 = vadd.f32 %v2430_v11, %v2417_v40  ;;  %v2419_v24 = vadd.f32 %v2418_v28, %v2405_v6  ;;  %v2535_v6 = vadd.f32 %v2534_v39, %v2533_v27 }
 0x561   :  { %v2444_v33 = vpop.f32.mrf.mxu3 }
 0x562   :  { %v2507_v32 = vsub.f32 %v10015_v16, %v10032_v15  ;;  %v2511_v45 = vsub.f32 %v10017_v10, %v10032_v15  ;;  %v2445_v57 = vadd.f32 %v2444_v33, %v2431_v49  ;;  %v2558_v33 = vmul.f32 0.125, %v2542_v56 }
 0x563   :  { %v2557_v26 = vmul.f32 0.125, %v2535_v6 }
 0x564   :  { %v2519_v44 = vmul.f32 0.0, %v2511_v45  ;;  %v2523_v54 = vmul.f32 %v2507_v32, %v2507_v32  ;;  %v2452_v1 = vmul.f32 0.02, %v2445_v57  ;;  %v2564_v32 = vadd.f32 1e-05, %v2558_v33 }
 0x566   :  { %v2527_v55 = vmul.f32 %v2519_v44, %v2519_v44  ;;  %v10042_v34 = vmax.f32 %v2445_v57, %v2452_v1  ;;  %9261 = vrsqrt.f32 %v2564_v32  ;;  %vm2583_vm13 = vweird.f32 %v2564_v32 }
 0x567   :  { %v2432_v25 = vpop.f32.mrf.mxu2 }
 0x568   :  { %v2433_v58 = vadd.f32 %v2432_v25, %v2419_v24  ;;  %v2543_v37 = vadd.f32 %v2527_v55, %v2523_v54  ;;  %v2563_v24 = vadd.f32 1e-05, %v2557_v26 }
 0x569   :  { %v2446_v60 = vpop.f32.mrf.mxu3 }
 0x56a   :  { %v2447_v41 = vadd.f32 %v2446_v60, %v2433_v58  ;;  %v2544_v0 = vrot.slane %v2543_v37, 4  ;;  %vm2573_vm6 = vweird.f32 %v2563_v24 }
 0x56c   :  { %v2456_v2 = vmul.f32 0.02, %v2447_v41  ;;  %v2545_v9 = vadd.f32 %v2544_v0, %v2543_v37  ;;  %v9262_v54 = vpop.eup %9261 }
 0x56d   :  { %v2578_v59 = vmul.f32 %v9262_v54, %v2564_v32  ;;  %vm2584_vm12 = vweird.f32 %v9262_v54 }
 0x56e   :  { %v10040_v7 = vmax.f32 %v2447_v41, %v2456_v2  ;;  %v2546_v18 = vrot.slane %v2545_v9, 2  ;;  %vm2585_vm15 = vmor %vm2583_vm13, %vm2584_vm12 }
 0x56f   :  { %v2579_v63 = vmul.f32 %v9262_v54, %v2578_v59 }
 0x570   :  { %v2472_v30 = vmul.f32 0.0, %v10040_v7  ;;  %v2547_v35 = vadd.f32 %v2546_v18, %v2545_v9 }
 0x571   :  { %v2580_v3 = vmul.f32 0.5, %v2579_v63 }
 0x572   :  { %v2494_v38 = vadd.f32 %v2472_v30, %v10042_v34  ;;  %v2548_v29 = vrot.slane %v2547_v35, 1 }
 0x573   :  { %v2581_v30 = vsub.f32 1.5, %v2580_v3 }
 0x574   :  { %v2495_v19 = vrot.slane %v2494_v38, 4  ;;  %v2549_v4 = vadd.f32 %v2548_v29, %v2547_v35 }
 0x576   :  { %v2496_v36 = vadd.f32 %v2495_v19, %v2494_v38  ;;  %v2559_v50 = vmul.f32 0.125, %v2549_v4  ;;  %v2582_v19 = vmul.f32 %v9262_v54, %v2581_v30  ;;  %v2562_v4 = vld [vmem:[#allocation13 + $0x1] ss:$4 sm:$0xf] }
 0x578   :  { %v2497_v20 = vrot.slane %v2496_v36, 2  ;;  %v2565_v28 = vadd.f32 1e-05, %v2559_v50 }
 0x57a   :  { %v2498_v23 = vadd.f32 %v2497_v20, %v2496_v36  ;;  %9263 = vrsqrt.f32 %v2565_v28  ;;  %vm2593_vm0 = vweird.f32 %v2565_v28  ;;  %v2586_v20 = vsel %vm2585_vm15, %v9262_v54, %v2582_v19  ;;  %v2620_v54 = vld [vmem:[#allocation13 + $0x2] ss:$4 sm:$0xf] }
 0x57b   :  { %9265 = vrsqrt.f32 %v2563_v24 }
 0x57c   :  { %v2499_v17 = vrot.slane %v2498_v23, 1 }
 0x57e   :  { %v2500_v11 = vadd.f32 %v2499_v17, %v2498_v23  ;;  %v2611_v17 = vrot.slane %v2586_v20, 7 }
 0x580   :  { %v10046_v40 = vmul.f32 0.125, %v2500_v11  ;;  %v9264_v57 = vpop.eup %9263 }
 0x581   :  { %v9266_v61 = vpop.eup %9265  ;;  %v2588_v37 = vmul.f32 %v9264_v57, %v2565_v28  ;;  %vm2594_vm14 = vweird.f32 %v9264_v57 }
 0x582   :  { %v2508_v43 = vsub.f32 %v10042_v34, %v10046_v40  ;;  %v2512_v31 = vsub.f32 %v10040_v7, %v10046_v40  ;;  %v2568_v0 = vmul.f32 %v9266_v61, %v2563_v24  ;;  %vm2574_vm2 = vweird.f32 %v9266_v61  ;;  %vm2595_vm3 = vmor %vm2593_vm0, %vm2594_vm14 }
 0x583   :  { %v2589_v2 = vmul.f32 %v9264_v57, %v2588_v37  ;;  %vm2575_vm7 = vmor %vm2573_vm6, %vm2574_vm2 }
 0x584   :  { %v2520_v5 = vmul.f32 0.0, %v2512_v31  ;;  %v2524_v45 = vmul.f32 %v2508_v43, %v2508_v43  ;;  %v2569_v8 = vmul.f32 %v9266_v61, %v2568_v0 }
 0x585   :  { %v2590_v9 = vmul.f32 0.5, %v2589_v2 }
 0x586   :  { %v2528_v49 = vmul.f32 %v2520_v5, %v2520_v5  ;;  %v2570_v38 = vmul.f32 0.5, %v2569_v8 }
 0x587   :  { %v2591_v13 = vsub.f32 1.5, %v2590_v9 }
 0x588   :  { %v2550_v48 = vadd.f32 %v2528_v49, %v2524_v45  ;;  %v2571_v36 = vsub.f32 1.5, %v2570_v38 }
 0x589   :  { %v2592_v52 = vmul.f32 %v9264_v57, %v2591_v13 }
 0x58a   :  { %v2551_v44 = vrot.slane %v2550_v48, 4  ;;  %v2572_v23 = vmul.f32 %v9266_v61, %v2571_v36 }
 0x58b   :  { %v2596_v27 = vsel %vm2595_vm3, %v9264_v57, %v2592_v52 }
 0x58c   :  { %v2552_v53 = vadd.f32 %v2551_v44, %v2550_v48  ;;  %v2612_v11 = vrot.slane %v2596_v27, 6  ;;  %v2576_v33 = vsel %vm2575_vm7, %v9266_v61, %v2572_v23 }
 0x58d   :  { %v2614_v43 = vsel %vm650_vm11, %v2576_v33, %v2611_v17 }
 0x58e   :  { %v2553_v25 = vrot.slane %v2552_v53, 2 }
 0x590   :  { %v2554_v55 = vadd.f32 %v2553_v25, %v2552_v53 }
 0x592   :  { %v2555_v58 = vrot.slane %v2554_v55, 1 }
 0x594   :  { %v2556_v60 = vadd.f32 %v2555_v58, %v2554_v55 }
 0x596   :  { %v2560_v41 = vmul.f32 0.125, %v2556_v60 }
 0x598   :  { %v2566_v1 = vadd.f32 1e-05, %v2560_v41 }
 0x59a   :  { %9267 = vrsqrt.f32 %v2566_v1  ;;  %vm2603_vm4 = vweird.f32 %v2566_v1 }
 0x5a0   :  { %v9268_v12 = vpop.eup %9267 }
 0x5a1   :  { %v2598_v18 = vmul.f32 %v9268_v12, %v2566_v1  ;;  %vm2604_vm1 = vweird.f32 %v9268_v12 }
 0x5a2   :  { %vm2605_vm5 = vmor %vm2603_vm4, %vm2604_vm1 }
 0x5a3   :  { %v2599_v51 = vmul.f32 %v9268_v12, %v2598_v18 }
 0x5a5   :  { %v2600_v35 = vmul.f32 0.5, %v2599_v51 }
 0x5a7   :  { %v2601_v22 = vsub.f32 1.5, %v2600_v35 }
 0x5a9   :  { %v2602_v29 = vmul.f32 %v9268_v12, %v2601_v22 }
 0x5ab   :  { %v2606_v56 = vsel %vm2605_vm5, %v9268_v12, %v2602_v29 }
 0x5ac   :  { %v2613_v39 = vrot.slane %v2606_v56, 5 }
 0x5ae   :  { %v2615_v31 = vsel %vm1368_vm8, %v2612_v11, %v2613_v39 }
 0x5af   :  { %v2616_v6 = vsel %vm1370_vm10, %v2614_v43, %v2615_v31 }
 0x5b0   :  { %v2618_v50 = vmul.f32 %v2616_v6, %v2562_v4 }
 0x5b2   :  { %v2622_v5 = vperm.slane %v2618_v50, 0  ;;  %v2623_v32 = vperm.slane %v2618_v50, 1  ;;  %v2624_v45 = vperm.slane %v2618_v50, 2  ;;  %v2625_v49 = vperm.slane %v2618_v50, 3 }
 0x5b4   :  { %v2631_v26 = vmul.f32 %v2623_v32, %v10021_v14  ;;  %v2632_v28 = vmul.f32 %v2624_v45, %v10032_v15  ;;  %v2633_v48 = vmul.f32 %v2625_v49, %v10046_v40  ;;  %v2630_v44 = vmul.f32 %v2622_v5, %v10026_v21 }
 0x5b5   :  { %v2646_v60 = vmul.f32 %v2622_v5, %v10003_v47  ;;  %v2647_v14 = vmul.f32 %v2623_v32, %v9997_v46  ;;  %v2648_v15 = vmul.f32 %v2624_v45, %v10015_v16  ;;  %v2649_v40 = vmul.f32 %v2625_v49, %v10042_v34 }
 0x5b6   :  { %v2638_v24 = vrot.slane %v2631_v26, 7  ;;  %v2639_v53 = vrot.slane %v2632_v28, 6  ;;  %v2640_v25 = vrot.slane %v2633_v48, 5  ;;  %v2650_v63 = vmul.f32 %v2622_v5, %v10000_v62 }
 0x5b7   :  { %v2651_v0 = vmul.f32 %v2623_v32, %v9995_v42  ;;  %v2652_v1 = vmul.f32 %v2624_v45, %v10017_v10  ;;  %v2653_v2 = vmul.f32 %v2625_v49, %v10040_v7 }
 0x5b8   :  { %v2641_v55 = vsel %vm650_vm11, %v2630_v44, %v2638_v24  ;;  %v2642_v57 = vsel %vm1368_vm8, %v2639_v53, %v2640_v25 }
 0x5b9   :  { %v2643_v58 = vsel %vm1370_vm10, %v2641_v55, %v2642_v57 }
 0x5ba   :  { %v2645_v59 = vsub.f32 %v2620_v54, %v2643_v58 }
 0x5bc   :  { %v2655_v21 = vperm.slane %v2645_v59, 0  ;;  %v2656_v61 = vperm.slane %v2645_v59, 1  ;;  %v2657_v37 = vperm.slane %v2645_v59, 2  ;;  %v2658_v41 = vperm.slane %v2645_v59, 3 }
 0x5be   :  { %v10070_v3 = vadd.f32 %v2655_v21, %v2646_v60  ;;  %v10072_v47 = vadd.f32 %v2656_v61, %v2647_v14  ;;  %v10074_v46 = vadd.f32 %v2657_v37, %v2648_v15  ;;  %v10076_v16 = vadd.f32 %v2658_v41, %v2649_v40 }
 0x5bf   :  { %v10078_v34 = vadd.f32 %v2655_v21, %v2650_v63  ;;  %v10080_v8 = vadd.f32 %v2656_v61, %v2651_v0  ;;  %v10082_v9 = vadd.f32 %v2657_v37, %v2652_v1  ;;  %v10084_v62 = vadd.f32 %v2658_v41, %v2653_v2 }
 0x5c0   :  { %9648 = dma.done.wait [#allocation4 + $0x1], 32768 }
 0x5c1   :  { %9649 = vsyncadd [#allocation4 + $0x1], 4294934528  ;;  %v7307_v42 = vld [vmem:[#allocation3 + $0x1c0] sm:$0xf] }
 0x5c2   :  { %v8903_v10 = vld [vmem:[#allocation3 + $0x1dc] sm:$0xf0] }
 0x5c3   :  { %v7563_v7 = vld [vmem:[#allocation3 + $0x3c0] sm:$0xf]  ;;  %v7308_v30 = vor.u32 %v8903_v10, %v7307_v42 }
 0x5c4   :  { %v8967_v12 = vld [vmem:[#allocation3 + $0x3dc] sm:$0xf0] }
 0x5c5   :  { %v7819_v38 = vld [vmem:[#allocation3 + $0x5c0] sm:$0xf]  ;;  %v7564_v18 = vor.u32 %v8967_v12, %v7563_v7  ;;  %4240 = vmatpush.bf16.msrb.mxu0 %v7308_v30 }
 0x5c6   :  { %v9031_v13 = vld [vmem:[#allocation3 + $0x5dc] sm:$0xf0] }
 0x5c7   :  { %v7820_v19 = vor.u32 %v9031_v13, %v7819_v38  ;;  %v8075_v51 = vld [vmem:[#allocation3 + $0x7c0] sm:$0xf]  ;;  %4254 = vmatpush.bf16.msrb.mxu1 %v7564_v18 }
 0x5c8   :  { %v9095_v36 = vld [vmem:[#allocation3 + $0x7dc] sm:$0xf0] }
 0x5c9   :  { %v7275_v52 = vld [vmem:[#allocation3 + $0x180] sm:$0xf]  ;;  %v8076_v35 = vor.u32 %v9095_v36, %v8075_v51  ;;  %4268 = vmatpush.bf16.msrb.mxu2 %v7820_v19 }
 0x5ca   :  { %v8895_v20 = vld [vmem:[#allocation3 + $0x19c] sm:$0xf0] }
 0x5cb   :  { %v7531_v22 = vld [vmem:[#allocation3 + $0x380] sm:$0xf]  ;;  %v7276_v27 = vor.u32 %v8895_v20, %v7275_v52  ;;  %4282 = vmatpush.bf16.msrb.mxu3 %v8076_v35 }
 0x5cc   :  { %v8959_v23 = vld [vmem:[#allocation3 + $0x39c] sm:$0xf0] }
 0x5cd   :  { %v7532_v29 = vor.u32 %v8959_v23, %v7531_v22  ;;  %v7787_v17 = vld [vmem:[#allocation3 + $0x580] sm:$0xf]  ;;  %4241 = vmatpush.bf16.msrb.mxu0 %v7276_v27 }
 0x5ce   :  { %v9023_v56 = vld [vmem:[#allocation3 + $0x59c] sm:$0xf0] }
 0x5cf   :  { %v8043_v11 = vld [vmem:[#allocation3 + $0x780] sm:$0xf]  ;;  %v7788_v39 = vor.u32 %v9023_v56, %v7787_v17  ;;  %4255 = vmatpush.bf16.msrb.mxu1 %v7532_v29 }
 0x5d0   :  { %v9087_v4 = vld [vmem:[#allocation3 + $0x79c] sm:$0xf0] }
 0x5d1   :  { %v7243_v33 = vld [vmem:[#allocation3 + $0x140] sm:$0xf]  ;;  %v8044_v31 = vor.u32 %v9087_v4, %v8043_v11  ;;  %4269 = vmatpush.bf16.msrb.mxu2 %v7788_v39 }
 0x5d2   :  { %v8887_v43 = vld [vmem:[#allocation3 + $0x15c] sm:$0xf0] }
 0x5d3   :  { %v7499_v6 = vld [vmem:[#allocation3 + $0x340] sm:$0xf]  ;;  %v7244_v32 = vor.u32 %v8887_v43, %v7243_v33  ;;  %4283 = vmatpush.bf16.msrb.mxu3 %v8044_v31 }
 0x5d4   :  { %v8951_v50 = vld [vmem:[#allocation3 + $0x35c] sm:$0xf0] }
 0x5d5   :  { %v7755_v5 = vld [vmem:[#allocation3 + $0x540] sm:$0xf]  ;;  %v7500_v28 = vor.u32 %v8951_v50, %v7499_v6  ;;  %4242 = vmatpush.bf16.msrb.mxu0 %v7244_v32 }
 0x5d6   :  { %v9015_v45 = vld [vmem:[#allocation3 + $0x55c] sm:$0xf0] }
 0x5d7   :  { %v8011_v49 = vld [vmem:[#allocation3 + $0x740] sm:$0xf]  ;;  %v7756_v48 = vor.u32 %v9015_v45, %v7755_v5  ;;  %4256 = vmatpush.bf16.msrb.mxu1 %v7500_v28 }
 0x5d8   :  { %v9079_v26 = vld [vmem:[#allocation3 + $0x75c] sm:$0xf0] }
 0x5d9   :  { %v7211_v44 = vld [vmem:[#allocation3 + $0x100] sm:$0xf]  ;;  %v8012_v25 = vor.u32 %v9079_v26, %v8011_v49  ;;  %4270 = vmatpush.bf16.msrb.mxu2 %v7756_v48 }
 0x5da   :  { %v8879_v24 = vld [vmem:[#allocation3 + $0x11c] sm:$0xf0] }
 0x5db   :  { %v7467_v53 = vld [vmem:[#allocation3 + $0x300] sm:$0xf]  ;;  %v7212_v60 = vor.u32 %v8879_v24, %v7211_v44  ;;  %4284 = vmatpush.bf16.msrb.mxu3 %v8012_v25  ;;  %v8899_v24 = vld [vmem:[#allocation3 + $0x1c4] sm:$0xf] }
 0x5dc   :  { %v8943_v54 = vld [vmem:[#allocation3 + $0x31c] sm:$0xf0]  ;;  %v8963_v25 = vld [vmem:[#allocation3 + $0x3c4] sm:$0xf] }
 0x5dd   :  { %v7723_v55 = vld [vmem:[#allocation3 + $0x500] sm:$0xf]  ;;  %v7468_v14 = vor.u32 %v8943_v54, %v7467_v53  ;;  %4243 = vmatpush.bf16.msrb.mxu0 %v7212_v60  ;;  %v7309_v53 = vld [vmem:[#allocation3 + $0x1e0] sm:$0xf0] }
 0x5de   :  { %v9007_v57 = vld [vmem:[#allocation3 + $0x51c] sm:$0xf0] }
 0x5df   :  { %v7979_v58 = vld [vmem:[#allocation3 + $0x700] sm:$0xf]  ;;  %v7724_v15 = vor.u32 %v9007_v57, %v7723_v55  ;;  %4257 = vmatpush.bf16.msrb.mxu1 %v7468_v14  ;;  %v7565_v55 = vld [vmem:[#allocation3 + $0x3e0] sm:$0xf0] }
 0x5e0   :  { %v9071_v59 = vld [vmem:[#allocation3 + $0x71c] sm:$0xf0]  ;;  %v9027_v57 = vld [vmem:[#allocation3 + $0x5c4] sm:$0xf] }
 0x5e1   :  { %v7179_v40 = vld [vmem:[#allocation3 + $0xc0] sm:$0xf]  ;;  %v7980_v37 = vor.u32 %v9071_v59, %v7979_v58  ;;  %4271 = vmatpush.bf16.msrb.mxu2 %v7724_v15  ;;  %v7821_v58 = vld [vmem:[#allocation3 + $0x5e0] sm:$0xf0] }
 0x5e2   :  { %v8871_v21 = vld [vmem:[#allocation3 + $0xdc] sm:$0xf0]  ;;  %v9091_v14 = vld [vmem:[#allocation3 + $0x7c4] sm:$0xf] }
 0x5e3   :  { %v7435_v61 = vld [vmem:[#allocation3 + $0x2c0] sm:$0xf]  ;;  %v7180_v42 = vor.u32 %v8871_v21, %v7179_v40  ;;  %4285 = vmatpush.bf16.msrb.mxu3 %v7980_v37  ;;  %v8077_v15 = vld [vmem:[#allocation3 + $0x7e0] sm:$0xf0]  ;;  %v7312_v21 = vor.u32 %v8899_v24, %v7309_v53  ;;  %v7824_v37 = vor.u32 %v9027_v57, %v7821_v58 }
 0x5e4   :  { %v8935_v41 = vld [vmem:[#allocation3 + $0x2dc] sm:$0xf0]  ;;  %v8923_v57 = vld [vmem:[#allocation3 + $0x284] sm:$0xf] }
 0x5e5   :  { %v7691_v63 = vld [vmem:[#allocation3 + $0x4c0] sm:$0xf]  ;;  %v7436_v10 = vor.u32 %v8935_v41, %v7435_v61  ;;  %4244 = vmatpush.bf16.msrb.mxu0 %v7180_v42  ;;  %v7568_v61 = vor.u32 %v8963_v25, %v7565_v55  ;;  %v8891_v41 = vld [vmem:[#allocation3 + $0x184] sm:$0xf] }
 0x5e6   :  { %v8999_v0 = vld [vmem:[#allocation3 + $0x4dc] sm:$0xf0]  ;;  %v7533_v42 = vld [vmem:[#allocation3 + $0x3a0] sm:$0xf0] }
 0x5e7   :  { %v7947_v1 = vld [vmem:[#allocation3 + $0x6c0] sm:$0xf]  ;;  %v7692_v7 = vor.u32 %v8999_v0, %v7691_v63  ;;  %4258 = vmatpush.bf16.msrb.mxu1 %v7436_v10  ;;  %v7277_v63 = vld [vmem:[#allocation3 + $0x1a0] sm:$0xf0] }
 0x5e8   :  { %v9063_v2 = vld [vmem:[#allocation3 + $0x6dc] sm:$0xf0]  ;;  %v8955_v0 = vld [vmem:[#allocation3 + $0x384] sm:$0xf] }
 0x5e9   :  { %v7147_v30 = vld [vmem:[#allocation3 + $0x80] sm:$0xf]  ;;  %v7948_v13 = vor.u32 %v9063_v2, %v7947_v1  ;;  %4272 = vmatpush.bf16.msrb.mxu2 %v7692_v7  ;;  %v8080_v1 = vor.u32 %v9091_v14, %v8077_v15  ;;  %v10088_v2 = vpack.c.bf16 %v10082_v9, %v10074_v46  ;;  %v9019_v10 = vld [vmem:[#allocation3 + $0x584] sm:$0xf]  ;;  %v10100_v46 = vpack.c.bf16 %v10080_v8, %v10072_v47 }
 0x5ea   :  { %v8863_v12 = vld [vmem:[#allocation3 + $0x9c] sm:$0xf0]  ;;  %v7789_v7 = vld [vmem:[#allocation3 + $0x5a0] sm:$0xf0]  ;;  %v7536_v9 = vor.u32 %v8955_v0, %v7533_v42 }
 0x5eb   :  { %v7403_v38 = vld [vmem:[#allocation3 + $0x280] sm:$0xf]  ;;  %v7148_v35 = vor.u32 %v8863_v12, %v7147_v30  ;;  %4286 = vmatpush.bf16.msrb.mxu3 %v7948_v13  ;;  %v10092_v30 = vpack.c.bf16 %v10078_v34, %v10070_v3  ;;  %v10096_v12 = vpack.c.bf16 %v10084_v62, %v10076_v16  ;;  %v8045_v13 = vld [vmem:[#allocation3 + $0x7a0] sm:$0xf0] }
 0x5ec   :  { %v8927_v18 = vld [vmem:[#allocation3 + $0x29c] sm:$0xf0]  ;;  %v7245_v3 = vld [vmem:[#allocation3 + $0x160] sm:$0xf0] }
 0x5ed   :  { %v7659_v19 = vld [vmem:[#allocation3 + $0x480] sm:$0xf]  ;;  %v7404_v20 = vor.u32 %v8927_v18, %v7403_v38  ;;  %4245 = vmatpush.bf16.msrb.mxu0 %v7148_v35  ;;  %v9083_v38 = vld [vmem:[#allocation3 + $0x784] sm:$0xf]  ;;  %v7280_v18 = vor.u32 %v8891_v41, %v7277_v63 }
 0x5ee   :  { %v8991_v51 = vld [vmem:[#allocation3 + $0x49c] sm:$0xf0]  ;;  %v8947_v34 = vld [vmem:[#allocation3 + $0x344] sm:$0xf]  ;;  %v8048_v16 = vor.u32 %v9083_v38, %v8045_v13 }
 0x5ef   :  { %v7915_v36 = vld [vmem:[#allocation3 + $0x680] sm:$0xf]  ;;  %v7660_v22 = vor.u32 %v8991_v51, %v7659_v19  ;;  %4259 = vmatpush.bf16.msrb.mxu1 %v7404_v20  ;;  %v7792_v19 = vor.u32 %v9019_v10, %v7789_v7  ;;  %v8883_v51 = vld [vmem:[#allocation3 + $0x144] sm:$0xf] }
 0x5f0   :  { %v9055_v52 = vld [vmem:[#allocation3 + $0x69c] sm:$0xf0]  ;;  %v7501_v62 = vld [vmem:[#allocation3 + $0x360] sm:$0xf0]  ;;  %v7248_v35 = vor.u32 %v8883_v51, %v7245_v3 }
 0x5f1   :  { %v7115_v23 = vld [vmem:[#allocation3 + $0x40] sm:$0xf]  ;;  %v7916_v17 = vor.u32 %v9055_v52, %v7915_v36  ;;  %4273 = vmatpush.bf16.msrb.mxu2 %v7660_v22  ;;  %v9011_v36 = vld [vmem:[#allocation3 + $0x544] sm:$0xf]  ;;  %v7504_v20 = vor.u32 %v8947_v34, %v7501_v62 }
 0x5f2   :  { %v8855_v27 = vld [vmem:[#allocation3 + $0x5c] sm:$0xf0]  ;;  %v7757_v52 = vld [vmem:[#allocation3 + $0x560] sm:$0xf0] }
 0x5f3   :  { %v7371_v29 = vld [vmem:[#allocation3 + $0x240] sm:$0xf]  ;;  %v7116_v43 = vor.u32 %v8855_v27, %v7115_v23  ;;  %4287 = vmatpush.bf16.msrb.mxu3 %v7916_v17  ;;  %v9075_v47 = vld [vmem:[#allocation3 + $0x744] sm:$0xf]  ;;  %v7760_v22 = vor.u32 %v9011_v36, %v7757_v52 }
 0x5f4   :  { %v8919_v56 = vld [vmem:[#allocation3 + $0x25c] sm:$0xf0]  ;;  %v8013_v8 = vld [vmem:[#allocation3 + $0x760] sm:$0xf0] }
 0x5f5   :  { %v7627_v11 = vld [vmem:[#allocation3 + $0x440] sm:$0xf]  ;;  %v7372_v50 = vor.u32 %v8919_v56, %v7371_v29  ;;  %4246 = vmatpush.bf16.msrb.mxu0 %v7116_v43  ;;  %v8875_v23 = vld [vmem:[#allocation3 + $0x104] sm:$0xf]  ;;  %v8016_v17 = vor.u32 %v9075_v47, %v8013_v8 }
 0x5f6   :  { %v8983_v39 = vld [vmem:[#allocation3 + $0x45c] sm:$0xf0]  ;;  %v7213_v27 = vld [vmem:[#allocation3 + $0x120] sm:$0xf0] }
 0x5f7   :  { %v7883_v4 = vld [vmem:[#allocation3 + $0x640] sm:$0xf]  ;;  %v7628_v5 = vor.u32 %v8983_v39, %v7627_v11  ;;  %4260 = vmatpush.bf16.msrb.mxu1 %v7372_v50  ;;  %v8939_v29 = vld [vmem:[#allocation3 + $0x304] sm:$0xf]  ;;  %v7216_v43 = vor.u32 %v8875_v23, %v7213_v27  ;;  %v8968_v27 = vld [vmem:[#allocation3 + $0x3e4] sm:$0xf0] }
 0x5f8   :  { %v9047_v33 = vld [vmem:[#allocation3 + $0x65c] sm:$0xf0]  ;;  %v7469_v56 = vld [vmem:[#allocation3 + $0x320] sm:$0xf0] }
 0x5f9   :  { %v7083_v31 = vld [vmem:[#allocation3] sm:$0xf]  ;;  %v7884_v26 = vor.u32 %v9047_v33, %v7883_v4  ;;  %4274 = vmatpush.bf16.msrb.mxu2 %v7628_v5  ;;  %v9003_v11 = vld [vmem:[#allocation3 + $0x504] sm:$0xf] }
 0x5fa   :  { %v8847_v6 = vld [vmem:[#allocation3 + $0x1c] sm:$0xf0]  ;;  %v7725_v39 = vld [vmem:[#allocation3 + $0x520] sm:$0xf0] }
 0x5fb   :  { %v7339_v32 = vld [vmem:[#allocation3 + $0x200] sm:$0xf]  ;;  %v7084_v54 = vor.u32 %v8847_v6, %v7083_v31  ;;  %4288 = vmatpush.bf16.msrb.mxu3 %v7884_v26  ;;  %v9067_v4 = vld [vmem:[#allocation3 + $0x704] sm:$0xf]  ;;  %v7472_v31 = vor.u32 %v8939_v29, %v7469_v56  ;;  %v7728_v6 = vor.u32 %v9003_v11, %v7725_v39  ;;  %v7827_v29 = vld [vmem:[#allocation3 + $0x5c8] sm:$0xf] }
 0x5fc   :  { %v8911_v45 = vld [vmem:[#allocation3 + $0x21c] sm:$0xf0]  ;;  %v7981_v33 = vld [vmem:[#allocation3 + $0x720] sm:$0xf0]  ;;  %v8083_v39 = vld [vmem:[#allocation3 + $0x7c8] sm:$0xf] }
 0x5fd   :  { %v7595_v49 = vld [vmem:[#allocation3 + $0x400] sm:$0xf]  ;;  %v7340_v59 = vor.u32 %v8911_v45, %v7339_v32  ;;  %4247 = vmatpush.bf16.msrb.mxu0 %v7084_v54  ;;  %v8867_v50 = vld [vmem:[#allocation3 + $0xc4] sm:$0xf]  ;;  %v7984_v45 = vor.u32 %v9067_v4, %v7981_v33  ;;  %v9096_v4 = vld [vmem:[#allocation3 + $0x7e4] sm:$0xf0] }
 0x5fe   :  { %v8975_v28 = vld [vmem:[#allocation3 + $0x41c] sm:$0xf0]  ;;  %v7181_v5 = vld [vmem:[#allocation3 + $0xe0] sm:$0xf0] }
 0x5ff   :  { %v7851_v48 = vld [vmem:[#allocation3 + $0x600] sm:$0xf]  ;;  %v7596_v60 = vor.u32 %v8975_v28, %v7595_v49  ;;  %4261 = vmatpush.bf16.msrb.mxu1 %v7340_v59  ;;  %v8931_v32 = vld [vmem:[#allocation3 + $0x2c4] sm:$0xf]  ;;  %v7184_v24 = vor.u32 %v8867_v50, %v7181_v5  ;;  %v7283_v50 = vld [vmem:[#allocation3 + $0x188] sm:$0xf] }
 0x600   :  { %v9039_v44 = vld [vmem:[#allocation3 + $0x61c] sm:$0xf0]  ;;  %4248 = vmatmul.bf16.vlgmr.msrb.gmra.mxu0 %v10092_v30  ;;  %v7437_v49 = vld [vmem:[#allocation3 + $0x2e0] sm:$0xf0]  ;;  %v8896_v5 = vld [vmem:[#allocation3 + $0x1a4] sm:$0xf0] }
 0x601   :  { %v7852_v40 = vor.u32 %v9039_v44, %v7851_v48  ;;  %4275 = vmatpush.bf16.msrb.mxu2 %v7596_v60  ;;  %4296 = vmatpush.bf16.msra.mxu0 %v7312_v21  ;;  %v8995_v26 = vld [vmem:[#allocation3 + $0x4c4] sm:$0xf]  ;;  %v7440_v53 = vor.u32 %v8931_v32, %v7437_v49  ;;  %v7539_v32 = vld [vmem:[#allocation3 + $0x388] sm:$0xf] }
 0x602   :  { %4262 = vmatmul.bf16.vlgmr.msrb.gmra.mxu1 %v10100_v46  ;;  %v7693_v28 = vld [vmem:[#allocation3 + $0x4e0] sm:$0xf0]  ;;  %v8960_v49 = vld [vmem:[#allocation3 + $0x3a4] sm:$0xf0] }
 0x603   :  { %4289 = vmatpush.bf16.msrb.mxu3 %v7852_v40  ;;  %4310 = vmatpush.bf16.msra.mxu1 %v7568_v61  ;;  %v9059_v48 = vld [vmem:[#allocation3 + $0x6c4] sm:$0xf]  ;;  %v7696_v25 = vor.u32 %v8995_v26, %v7693_v28  ;;  %v7795_v26 = vld [vmem:[#allocation3 + $0x588] sm:$0xf] }
 0x604   :  { %4276 = vmatmul.bf16.vlgmr.msrb.gmra.mxu2 %v10088_v2  ;;  %v7949_v44 = vld [vmem:[#allocation3 + $0x6e0] sm:$0xf0]  ;;  %v9024_v28 = vld [vmem:[#allocation3 + $0x5a4] sm:$0xf0] }
 0x605   :  { %4324 = vmatpush.bf16.msra.mxu2 %v7824_v37  ;;  %4297 = vmatpush.bf16.msra.mxu0 %v7280_v18  ;;  %v8859_v54 = vld [vmem:[#allocation3 + $0x84] sm:$0xf]  ;;  %v7952_v58 = vor.u32 %v9059_v48, %v7949_v44  ;;  %v8051_v48 = vld [vmem:[#allocation3 + $0x788] sm:$0xf] }
 0x606   :  { %4290 = vmatmul.bf16.vlgmr.msrb.gmra.mxu3 %v10096_v12  ;;  %v7149_v55 = vld [vmem:[#allocation3 + $0xa0] sm:$0xf0]  ;;  %v9088_v44 = vld [vmem:[#allocation3 + $0x7a4] sm:$0xf0] }
 0x607   :  { %4338 = vmatpush.bf16.msra.mxu3 %v8080_v1  ;;  %4311 = vmatpush.bf16.msra.mxu1 %v7536_v9  ;;  %v7405_v59 = vld [vmem:[#allocation3 + $0x2a0] sm:$0xf0]  ;;  %v7152_v21 = vor.u32 %v8859_v54, %v7149_v55  ;;  %v7251_v54 = vld [vmem:[#allocation3 + $0x148] sm:$0xf] }
 0x608   :  { %v8987_v60 = vld [vmem:[#allocation3 + $0x484] sm:$0xf]  ;;  %v7408_v61 = vor.u32 %v8923_v57, %v7405_v59  ;;  %v8888_v55 = vld [vmem:[#allocation3 + $0x164] sm:$0xf0] }
 0x609   :  { %4325 = vmatpush.bf16.msra.mxu2 %v7792_v19  ;;  %4298 = vmatpush.bf16.msra.mxu0 %v7248_v35  ;;  %v7661_v14 = vld [vmem:[#allocation3 + $0x4a0] sm:$0xf0]  ;;  %v7315_v35 = vld [vmem:[#allocation3 + $0x1c8] sm:$0xf] }
 0x60a   :  { %v9051_v15 = vld [vmem:[#allocation3 + $0x684] sm:$0xf]  ;;  %v7664_v37 = vor.u32 %v8987_v60, %v7661_v14  ;;  %v7507_v57 = vld [vmem:[#allocation3 + $0x348] sm:$0xf] }
 0x60b   :  { %4339 = vmatpush.bf16.msra.mxu3 %v8048_v16  ;;  %4312 = vmatpush.bf16.msra.mxu1 %v7504_v20  ;;  %v7917_v40 = vld [vmem:[#allocation3 + $0x6a0] sm:$0xf0]  ;;  %v8904_v20 = vld [vmem:[#allocation3 + $0x1e4] sm:$0xf0] }
 0x60c   :  { %v8851_v41 = vld [vmem:[#allocation3 + $0x44] sm:$0xf]  ;;  %v7920_v1 = vor.u32 %v9051_v15, %v7917_v40  ;;  %v8952_v59 = vld [vmem:[#allocation3 + $0x364] sm:$0xf0] }
 0x60d   :  { %4326 = vmatpush.bf16.msra.mxu2 %v7760_v22  ;;  %4299 = vmatpush.bf16.msra.mxu0 %v7216_v43  ;;  %v7117_v63 = vld [vmem:[#allocation3 + $0x60] sm:$0xf0]  ;;  %v7571_v22 = vld [vmem:[#allocation3 + $0x3c8] sm:$0xf]  ;;  %v7316_v43 = vor.u32 %v8904_v20, %v7315_v35 }
 0x60e   :  { %v8915_v0 = vld [vmem:[#allocation3 + $0x244] sm:$0xf]  ;;  %v7120_v18 = vor.u32 %v8851_v41, %v7117_v63  ;;  %v7763_v60 = vld [vmem:[#allocation3 + $0x548] sm:$0xf] }
 0x60f   :  { %4340 = vmatpush.bf16.msra.mxu3 %v8016_v17  ;;  %4313 = vmatpush.bf16.msra.mxu1 %v7472_v31  ;;  %v7373_v42 = vld [vmem:[#allocation3 + $0x260] sm:$0xf0]  ;;  %v9032_v17 = vld [vmem:[#allocation3 + $0x5e4] sm:$0xf0]  ;;  %v7572_v31 = vor.u32 %v8968_v27, %v7571_v22 }
 0x610   :  { %v8979_v10 = vld [vmem:[#allocation3 + $0x444] sm:$0xf]  ;;  %v7376_v51 = vor.u32 %v8915_v0, %v7373_v42  ;;  %v9016_v14 = vld [vmem:[#allocation3 + $0x564] sm:$0xf0] }
 0x611   :  { %4327 = vmatpush.bf16.msra.mxu2 %v7728_v6  ;;  %4300 = vmatpush.bf16.msra.mxu0 %v7184_v24  ;;  %v7629_v7 = vld [vmem:[#allocation3 + $0x460] sm:$0xf0]  ;;  %v7828_v6 = vor.u32 %v9032_v17, %v7827_v29  ;;  %v7284_v24 = vor.u32 %v8896_v5, %v7283_v50  ;;  %v8019_v15 = vld [vmem:[#allocation3 + $0x748] sm:$0xf] }
 0x612   :  { %v9043_v38 = vld [vmem:[#allocation3 + $0x644] sm:$0xf]  ;;  %v7632_v3 = vor.u32 %v8979_v10, %v7629_v7  ;;  %v9080_v40 = vld [vmem:[#allocation3 + $0x764] sm:$0xf0] }
 0x613   :  { %4341 = vmatpush.bf16.msra.mxu3 %v7984_v45  ;;  %4314 = vmatpush.bf16.msra.mxu1 %v7440_v53  ;;  %v7885_v13 = vld [vmem:[#allocation3 + $0x660] sm:$0xf0]  ;;  %v8084_v45 = vor.u32 %v9096_v4, %v8083_v39  ;;  %v7540_v53 = vor.u32 %v8960_v49, %v7539_v32  ;;  %v7219_v41 = vld [vmem:[#allocation3 + $0x108] sm:$0xf] }
 0x614   :  { %v8843_v9 = vld [vmem:[#allocation3 + $0x4] sm:$0xf]  ;;  %v7888_v36 = vor.u32 %v9043_v38, %v7885_v13  ;;  %v8880_v63 = vld [vmem:[#allocation3 + $0x124] sm:$0xf0] }
 0x615   :  { %4328 = vmatpush.bf16.msra.mxu2 %v7696_v25  ;;  %4301 = vmatpush.bf16.msra.mxu0 %v7152_v21  ;;  %v7085_v19 = vld [vmem:[#allocation3 + $0x20] sm:$0xf0]  ;;  %v7796_v25 = vor.u32 %v9024_v28, %v7795_v26  ;;  %v7252_v21 = vor.u32 %v8888_v55, %v7251_v54  ;;  %v7475_v0 = vld [vmem:[#allocation3 + $0x308] sm:$0xf] }
 0x616   :  { %v8907_v34 = vld [vmem:[#allocation3 + $0x204] sm:$0xf]  ;;  %v7088_v23 = vor.u32 %v8843_v9, %v7085_v19  ;;  %v8944_v42 = vld [vmem:[#allocation3 + $0x324] sm:$0xf0] }
 0x617   :  { %4342 = vmatpush.bf16.msra.mxu3 %v7952_v58  ;;  %4315 = vmatpush.bf16.msra.mxu1 %v7408_v61  ;;  %v7341_v16 = vld [vmem:[#allocation3 + $0x220] sm:$0xf0]  ;;  %v8052_v58 = vor.u32 %v9088_v44, %v8051_v48  ;;  %v7508_v61 = vor.u32 %v8952_v59, %v7507_v57  ;;  %v7731_v10 = vld [vmem:[#allocation3 + $0x508] sm:$0xf]  ;;  %v7476_v9 = vor.u32 %v8944_v42, %v7475_v0  ;;  %v9028_v0 = vld [vmem:[#allocation3 + $0x5cc] sm:$0xf] }
 0x618   :  { %v8971_v62 = vld [vmem:[#allocation3 + $0x404] sm:$0xf]  ;;  %v7344_v56 = vor.u32 %v8907_v34, %v7341_v16  ;;  %v9008_v7 = vld [vmem:[#allocation3 + $0x524] sm:$0xf0] }
 0x619   :  { %4329 = vmatpush.bf16.msra.mxu2 %v7664_v37  ;;  %v7597_v52 = vld [vmem:[#allocation3 + $0x420] sm:$0xf0]  ;;  %4302 = vmatpush.bf16.msra.mxu0 %v7120_v18  ;;  %v7764_v37 = vor.u32 %v9016_v14, %v7763_v60  ;;  %v7987_v38 = vld [vmem:[#allocation3 + $0x708] sm:$0xf]  ;;  %v7220_v18 = vor.u32 %v8880_v63, %v7219_v41  ;;  %v7732_v19 = vor.u32 %v9008_v7, %v7731_v10  ;;  %v7573_v63 = vld [vmem:[#allocation3 + $0x3e8] sm:$0xf0] }
 0x61a   :  { %v9035_v47 = vld [vmem:[#allocation3 + $0x604] sm:$0xf]  ;;  %v7600_v11 = vor.u32 %v8971_v62, %v7597_v52  ;;  %v9072_v13 = vld [vmem:[#allocation3 + $0x724] sm:$0xf0]  ;;  %v9092_v7 = vld [vmem:[#allocation3 + $0x7cc] sm:$0xf] }
 0x61b   :  { %4343 = vmatpush.bf16.msra.mxu3 %v7920_v1  ;;  %v7853_v8 = vld [vmem:[#allocation3 + $0x620] sm:$0xf0]  ;;  %4316 = vmatpush.bf16.msra.mxu1 %v7376_v51  ;;  %v8020_v1 = vor.u32 %v9080_v40, %v8019_v15  ;;  %v7187_v51 = vld [vmem:[#allocation3 + $0xc8] sm:$0xf]  ;;  %v7988_v16 = vor.u32 %v9072_v13, %v7987_v38  ;;  %v8085_v38 = vld [vmem:[#allocation3 + $0x7e8] sm:$0xf0] }
 0x61c   :  { %v7856_v33 = vor.u32 %v9035_v47, %v7853_v8  ;;  %v7443_v34 = vld [vmem:[#allocation3 + $0x2c8] sm:$0xf] }
 0x61d   :  { %4330 = vmatpush.bf16.msra.mxu2 %v7632_v3  ;;  %4303 = vmatpush.bf16.msra.mxu0 %v7088_v23  ;;  %v8872_v3 = vld [vmem:[#allocation3 + $0xe4] sm:$0xf0] }
 0x61e   :  { %v8936_v62 = vld [vmem:[#allocation3 + $0x2e4] sm:$0xf0]  ;;  %v7188_v35 = vor.u32 %v8872_v3, %v7187_v51  ;;  %v8892_v51 = vld [vmem:[#allocation3 + $0x18c] sm:$0xf] }
 0x61f   :  { %4344 = vmatpush.bf16.msra.mxu3 %v7888_v36  ;;  %4317 = vmatpush.bf16.msra.mxu1 %v7344_v56  ;;  %v7699_v36 = vld [vmem:[#allocation3 + $0x4c8] sm:$0xf]  ;;  %v7444_v20 = vor.u32 %v8936_v62, %v7443_v34  ;;  %v7285_v3 = vld [vmem:[#allocation3 + $0x1a8] sm:$0xf0] }
 0x620   :  { %4304 = vmatmul.bf16.vlgmr.msra.gmra.mxu0 %v10092_v30  ;;  %v9000_v52 = vld [vmem:[#allocation3 + $0x4e4] sm:$0xf0]  ;;  %v8956_v34 = vld [vmem:[#allocation3 + $0x38c] sm:$0xf] }
 0x621   :  { %4331 = vmatpush.bf16.msra.mxu2 %v7600_v11  ;;  %4352 = vmatpush.bf16.msrb.mxu0 %v7316_v43  ;;  %v7955_v47 = vld [vmem:[#allocation3 + $0x6c8] sm:$0xf]  ;;  %v7700_v22 = vor.u32 %v9000_v52, %v7699_v36  ;;  %v7541_v62 = vld [vmem:[#allocation3 + $0x3a8] sm:$0xf0] }
 0x622   :  { %4318 = vmatmul.bf16.vlgmr.msra.gmra.mxu1 %v10100_v46  ;;  %v9064_v8 = vld [vmem:[#allocation3 + $0x6e4] sm:$0xf0]  ;;  %v9020_v36 = vld [vmem:[#allocation3 + $0x58c] sm:$0xf] }
 0x623   :  { %4345 = vmatpush.bf16.msra.mxu3 %v7856_v33  ;;  %4366 = vmatpush.bf16.msrb.mxu1 %v7572_v31  ;;  %v7155_v23 = vld [vmem:[#allocation3 + $0x88] sm:$0xf]  ;;  %v7956_v17 = vor.u32 %v9064_v8, %v7955_v47  ;;  %v7797_v52 = vld [vmem:[#allocation3 + $0x5a8] sm:$0xf0] }
 0x624   :  { %4332 = vmatmul.bf16.vlgmr.msra.gmra.mxu2 %v10088_v2  ;;  %v8864_v27 = vld [vmem:[#allocation3 + $0xa4] sm:$0xf0]  ;;  %v9084_v47 = vld [vmem:[#allocation3 + $0x78c] sm:$0xf] }
 0x625   :  { %4380 = vmatpush.bf16.msrb.mxu2 %v7828_v6  ;;  %4353 = vmatpush.bf16.msrb.mxu0 %v7284_v24  ;;  %v7411_v29 = vld [vmem:[#allocation3 + $0x288] sm:$0xf]  ;;  %v7156_v43 = vor.u32 %v8864_v27, %v7155_v23  ;;  %v8053_v8 = vld [vmem:[#allocation3 + $0x7a8] sm:$0xf0] }
 0x626   :  { %4346 = vmatmul.bf16.vlgmr.msra.gmra.mxu3 %v10096_v12  ;;  %v8928_v56 = vld [vmem:[#allocation3 + $0x2a4] sm:$0xf0]  ;;  %v8884_v23 = vld [vmem:[#allocation3 + $0x14c] sm:$0xf] }
 0x627   :  { %4394 = vmatpush.bf16.msrb.mxu3 %v8084_v45  ;;  %4367 = vmatpush.bf16.msrb.mxu1 %v7540_v53  ;;  %v7667_v11 = vld [vmem:[#allocation3 + $0x488] sm:$0xf]  ;;  %v7412_v31 = vor.u32 %v8928_v56, %v7411_v29  ;;  %v7253_v27 = vld [vmem:[#allocation3 + $0x168] sm:$0xf0] }
 0x628   :  { %v8992_v39 = vld [vmem:[#allocation3 + $0x4a4] sm:$0xf0]  ;;  %v8948_v29 = vld [vmem:[#allocation3 + $0x34c] sm:$0xf] }
 0x629   :  { %4381 = vmatpush.bf16.msrb.mxu2 %v7796_v25  ;;  %4354 = vmatpush.bf16.msrb.mxu0 %v7252_v21  ;;  %v7923_v4 = vld [vmem:[#allocation3 + $0x688] sm:$0xf]  ;;  %v7668_v6 = vor.u32 %v8992_v39, %v7667_v11  ;;  %v8900_v21 = vld [vmem:[#allocation3 + $0x1cc] sm:$0xf] }
 0x62a   :  { %v9056_v33 = vld [vmem:[#allocation3 + $0x6a4] sm:$0xf0]  ;;  %v7509_v56 = vld [vmem:[#allocation3 + $0x368] sm:$0xf0] }
 0x62b   :  { %4395 = vmatpush.bf16.msrb.mxu3 %v8052_v58  ;;  %4368 = vmatpush.bf16.msrb.mxu1 %v7508_v61  ;;  %v7123_v50 = vld [vmem:[#allocation3 + $0x48] sm:$0xf]  ;;  %v7924_v45 = vor.u32 %v9056_v33, %v7923_v4  ;;  %v7317_v61 = vld [vmem:[#allocation3 + $0x1e8] sm:$0xf0] }
 0x62c   :  { %v8856_v5 = vld [vmem:[#allocation3 + $0x64] sm:$0xf0]  ;;  %v9012_v11 = vld [vmem:[#allocation3 + $0x54c] sm:$0xf] }
 0x62d   :  { %4382 = vmatpush.bf16.msrb.mxu2 %v7764_v37  ;;  %4355 = vmatpush.bf16.msrb.mxu0 %v7220_v18  ;;  %v7379_v32 = vld [vmem:[#allocation3 + $0x248] sm:$0xf]  ;;  %v7124_v24 = vor.u32 %v8856_v5, %v7123_v50  ;;  %v8964_v37 = vld [vmem:[#allocation3 + $0x3cc] sm:$0xf]  ;;  %v7320_v18 = vor.u32 %v8900_v21, %v7317_v61 }
 0x62e   :  { %v8920_v49 = vld [vmem:[#allocation3 + $0x264] sm:$0xf0]  ;;  %v7765_v39 = vld [vmem:[#allocation3 + $0x568] sm:$0xf0] }
 0x62f   :  { %4396 = vmatpush.bf16.msrb.mxu3 %v8020_v1  ;;  %4369 = vmatpush.bf16.msrb.mxu1 %v7476_v9  ;;  %v7635_v26 = vld [vmem:[#allocation3 + $0x448] sm:$0xf]  ;;  %v7380_v54 = vor.u32 %v8920_v49, %v7379_v32  ;;  %v7829_v1 = vld [vmem:[#allocation3 + $0x5e8] sm:$0xf0]  ;;  %v7576_v9 = vor.u32 %v8964_v37, %v7573_v63 }
 0x630   :  { %v8984_v28 = vld [vmem:[#allocation3 + $0x464] sm:$0xf0]  ;;  %v9076_v4 = vld [vmem:[#allocation3 + $0x74c] sm:$0xf] }
 0x631   :  { %4383 = vmatpush.bf16.msrb.mxu2 %v7732_v19  ;;  %4356 = vmatpush.bf16.msrb.mxu0 %v7188_v35  ;;  %v7891_v48 = vld [vmem:[#allocation3 + $0x648] sm:$0xf]  ;;  %v7636_v55 = vor.u32 %v8984_v28, %v7635_v26  ;;  %v7832_v19 = vor.u32 %v9028_v0, %v7829_v1  ;;  %v7288_v35 = vor.u32 %v8892_v51, %v7285_v3  ;;  %v8021_v33 = vld [vmem:[#allocation3 + $0x768] sm:$0xf0] }
 0x632   :  { %v9048_v44 = vld [vmem:[#allocation3 + $0x664] sm:$0xf0]  ;;  %v8876_v50 = vld [vmem:[#allocation3 + $0x10c] sm:$0xf] }
 0x633   :  { %4397 = vmatpush.bf16.msrb.mxu3 %v7988_v16  ;;  %4370 = vmatpush.bf16.msrb.mxu1 %v7444_v20  ;;  %v7091_v53 = vld [vmem:[#allocation3 + $0x8] sm:$0xf]  ;;  %v7892_v60 = vor.u32 %v9048_v44, %v7891_v48  ;;  %v8088_v16 = vor.u32 %v9092_v7, %v8085_v38  ;;  %v7544_v20 = vor.u32 %v8956_v34, %v7541_v62  ;;  %v7221_v5 = vld [vmem:[#allocation3 + $0x128] sm:$0xf0] }
 0x634   :  { %v8848_v25 = vld [vmem:[#allocation3 + $0x24] sm:$0xf0]  ;;  %v8940_v32 = vld [vmem:[#allocation3 + $0x30c] sm:$0xf] }
 0x635   :  { %4384 = vmatpush.bf16.msrb.mxu2 %v7700_v22  ;;  %4357 = vmatpush.bf16.msrb.mxu0 %v7156_v43  ;;  %v7347_v57 = vld [vmem:[#allocation3 + $0x208] sm:$0xf]  ;;  %v7092_v41 = vor.u32 %v8848_v25, %v7091_v53  ;;  %v7800_v22 = vor.u32 %v9020_v36, %v7797_v52  ;;  %v7256_v43 = vor.u32 %v8884_v23, %v7253_v27  ;;  %v7477_v49 = vld [vmem:[#allocation3 + $0x328] sm:$0xf0] }
 0x636   :  { %v8912_v58 = vld [vmem:[#allocation3 + $0x224] sm:$0xf0]  ;;  %v9004_v26 = vld [vmem:[#allocation3 + $0x50c] sm:$0xf]  ;;  %v7480_v53 = vor.u32 %v8940_v32, %v7477_v49  ;;  %v7835_v32 = vld [vmem:[#allocation3 + $0x5d0] sm:$0xf] }
 0x637   :  { %4398 = vmatpush.bf16.msrb.mxu3 %v7956_v17  ;;  %4371 = vmatpush.bf16.msrb.mxu1 %v7412_v31  ;;  %v7603_v59 = vld [vmem:[#allocation3 + $0x408] sm:$0xf]  ;;  %v7348_v42 = vor.u32 %v8912_v58, %v7347_v57  ;;  %v8056_v17 = vor.u32 %v9084_v47, %v8053_v8  ;;  %v7512_v31 = vor.u32 %v8948_v29, %v7509_v56  ;;  %v7733_v28 = vld [vmem:[#allocation3 + $0x528] sm:$0xf0] }
 0x638   :  { %v8976_v14 = vld [vmem:[#allocation3 + $0x424] sm:$0xf0]  ;;  %v9068_v48 = vld [vmem:[#allocation3 + $0x70c] sm:$0xf]  ;;  %v7736_v25 = vor.u32 %v9004_v26, %v7733_v28  ;;  %v8091_v28 = vld [vmem:[#allocation3 + $0x7d0] sm:$0xf] }
 0x639   :  { %4385 = vmatpush.bf16.msrb.mxu2 %v7668_v6  ;;  %v7859_v15 = vld [vmem:[#allocation3 + $0x608] sm:$0xf]  ;;  %4358 = vmatpush.bf16.msrb.mxu0 %v7124_v24  ;;  %v7604_v10 = vor.u32 %v8976_v14, %v7603_v59  ;;  %v7768_v6 = vor.u32 %v9012_v11, %v7765_v39  ;;  %v7989_v44 = vld [vmem:[#allocation3 + $0x728] sm:$0xf0]  ;;  %v7224_v24 = vor.u32 %v8876_v50, %v7221_v5  ;;  %v8969_v5 = vld [vmem:[#allocation3 + $0x3ec] sm:$0xf0] }
 0x63a   :  { %v9040_v40 = vld [vmem:[#allocation3 + $0x624] sm:$0xf0]  ;;  %v8932_v57 = vld [vmem:[#allocation3 + $0x2cc] sm:$0xf]  ;;  %v7992_v58 = vor.u32 %v9068_v48, %v7989_v44  ;;  %v9097_v48 = vld [vmem:[#allocation3 + $0x7ec] sm:$0xf0] }
 0x63b   :  { %4399 = vmatpush.bf16.msrb.mxu3 %v7924_v45  ;;  %4372 = vmatpush.bf16.msrb.mxu1 %v7380_v54  ;;  %v7860_v13 = vor.u32 %v9040_v40, %v7859_v15  ;;  %v8024_v45 = vor.u32 %v9076_v4, %v8021_v33  ;;  %v8868_v54 = vld [vmem:[#allocation3 + $0xcc] sm:$0xf] }
 0x63c   :  { %v7445_v59 = vld [vmem:[#allocation3 + $0x2e8] sm:$0xf0] }
 0x63d   :  { %4386 = vmatpush.bf16.msrb.mxu2 %v7636_v55  ;;  %4359 = vmatpush.bf16.msrb.mxu0 %v7092_v41  ;;  %v7189_v55 = vld [vmem:[#allocation3 + $0xe8] sm:$0xf0]  ;;  %v7448_v61 = vor.u32 %v8932_v57, %v7445_v59  ;;  %v7547_v57 = vld [vmem:[#allocation3 + $0x390] sm:$0xf] }
 0x63e   :  { %v7701_v14 = vld [vmem:[#allocation3 + $0x4e8] sm:$0xf0]  ;;  %v7192_v21 = vor.u32 %v8868_v54, %v7189_v55  ;;  %v7291_v54 = vld [vmem:[#allocation3 + $0x190] sm:$0xf] }
 0x63f   :  { %4400 = vmatpush.bf16.msrb.mxu3 %v7892_v60  ;;  %4373 = vmatpush.bf16.msrb.mxu1 %v7348_v42  ;;  %v8996_v60 = vld [vmem:[#allocation3 + $0x4cc] sm:$0xf]  ;;  %v8897_v55 = vld [vmem:[#allocation3 + $0x1ac] sm:$0xf0] }
 0x640   :  { %4360 = vmatmul.bf16.vlgmr.msrb.gmra.mxu0 %v10092_v30  ;;  %v9060_v15 = vld [vmem:[#allocation3 + $0x6cc] sm:$0xf]  ;;  %v7704_v37 = vor.u32 %v8996_v60, %v7701_v14  ;;  %v8961_v59 = vld [vmem:[#allocation3 + $0x3ac] sm:$0xf0] }
 0x641   :  { %4387 = vmatpush.bf16.msrb.mxu2 %v7604_v10  ;;  %4408 = vmatpush.bf16.msra.mxu0 %v7320_v18  ;;  %v7957_v40 = vld [vmem:[#allocation3 + $0x6e8] sm:$0xf0]  ;;  %v7803_v60 = vld [vmem:[#allocation3 + $0x590] sm:$0xf] }
 0x642   :  { %4374 = vmatmul.bf16.vlgmr.msrb.gmra.mxu1 %v10100_v46  ;;  %v8860_v41 = vld [vmem:[#allocation3 + $0x8c] sm:$0xf]  ;;  %v7960_v1 = vor.u32 %v9060_v15, %v7957_v40  ;;  %v9025_v14 = vld [vmem:[#allocation3 + $0x5ac] sm:$0xf0] }
 0x643   :  { %4401 = vmatpush.bf16.msrb.mxu3 %v7860_v13  ;;  %4422 = vmatpush.bf16.msra.mxu1 %v7576_v9  ;;  %v7157_v63 = vld [vmem:[#allocation3 + $0xa8] sm:$0xf0]  ;;  %v8059_v15 = vld [vmem:[#allocation3 + $0x790] sm:$0xf] }
 0x644   :  { %4388 = vmatmul.bf16.vlgmr.msrb.gmra.mxu2 %v10088_v2  ;;  %v8924_v0 = vld [vmem:[#allocation3 + $0x28c] sm:$0xf]  ;;  %v7160_v18 = vor.u32 %v8860_v41, %v7157_v63  ;;  %v9089_v40 = vld [vmem:[#allocation3 + $0x7ac] sm:$0xf0] }
 0x645   :  { %4436 = vmatpush.bf16.msra.mxu2 %v7832_v19  ;;  %4409 = vmatpush.bf16.msra.mxu0 %v7288_v35  ;;  %v7413_v42 = vld [vmem:[#allocation3 + $0x2a8] sm:$0xf0]  ;;  %v7259_v41 = vld [vmem:[#allocation3 + $0x150] sm:$0xf] }
 0x646   :  { %4402 = vmatmul.bf16.vlgmr.msrb.gmra.mxu3 %v10096_v12  ;;  %v8988_v10 = vld [vmem:[#allocation3 + $0x48c] sm:$0xf]  ;;  %v7416_v9 = vor.u32 %v8924_v0, %v7413_v42  ;;  %v8889_v63 = vld [vmem:[#allocation3 + $0x16c] sm:$0xf0] }
 0x647   :  { %4450 = vmatpush.bf16.msra.mxu3 %v8088_v16  ;;  %4423 = vmatpush.bf16.msra.mxu1 %v7544_v20  ;;  %v7669_v7 = vld [vmem:[#allocation3 + $0x4a8] sm:$0xf0]  ;;  %v7515_v0 = vld [vmem:[#allocation3 + $0x350] sm:$0xf] }
 0x648   :  { %v9052_v38 = vld [vmem:[#allocation3 + $0x68c] sm:$0xf]  ;;  %v7672_v19 = vor.u32 %v8988_v10, %v7669_v7  ;;  %v8953_v42 = vld [vmem:[#allocation3 + $0x36c] sm:$0xf0] }
 0x649   :  { %4437 = vmatpush.bf16.msra.mxu2 %v7800_v22  ;;  %4410 = vmatpush.bf16.msra.mxu0 %v7256_v43  ;;  %v7925_v13 = vld [vmem:[#allocation3 + $0x6a8] sm:$0xf0]  ;;  %v7323_v43 = vld [vmem:[#allocation3 + $0x1d0] sm:$0xf] }
 0x64a   :  { %v8852_v51 = vld [vmem:[#allocation3 + $0x4c] sm:$0xf]  ;;  %v7928_v16 = vor.u32 %v9052_v38, %v7925_v13  ;;  %v7771_v10 = vld [vmem:[#allocation3 + $0x550] sm:$0xf] }
 0x64b   :  { %4451 = vmatpush.bf16.msra.mxu3 %v8056_v17  ;;  %4424 = vmatpush.bf16.msra.mxu1 %v7512_v31  ;;  %v7125_v3 = vld [vmem:[#allocation3 + $0x68] sm:$0xf0]  ;;  %v8905_v31 = vld [vmem:[#allocation3 + $0x1ec] sm:$0xf0] }
 0x64c   :  { %v8916_v34 = vld [vmem:[#allocation3 + $0x24c] sm:$0xf]  ;;  %v7128_v35 = vor.u32 %v8852_v51, %v7125_v3  ;;  %v9017_v7 = vld [vmem:[#allocation3 + $0x56c] sm:$0xf0] }
 0x64d   :  { %4438 = vmatpush.bf16.msra.mxu2 %v7768_v6  ;;  %4411 = vmatpush.bf16.msra.mxu0 %v7224_v24  ;;  %v7381_v62 = vld [vmem:[#allocation3 + $0x268] sm:$0xf0]  ;;  %v7579_v6 = vld [vmem:[#allocation3 + $0x3d0] sm:$0xf]  ;;  %v7324_v24 = vor.u32 %v8905_v31, %v7323_v43 }
 0x64e   :  { %v8980_v36 = vld [vmem:[#allocation3 + $0x44c] sm:$0xf]  ;;  %v7384_v23 = vor.u32 %v8916_v34, %v7381_v62  ;;  %v8027_v38 = vld [vmem:[#allocation3 + $0x750] sm:$0xf] }
 0x64f   :  { %4452 = vmatpush.bf16.msra.mxu3 %v8024_v45  ;;  %4425 = vmatpush.bf16.msra.mxu1 %v7480_v53  ;;  %v7637_v52 = vld [vmem:[#allocation3 + $0x468] sm:$0xf0]  ;;  %v9033_v45 = vld [vmem:[#allocation3 + $0x5ec] sm:$0xf0]  ;;  %v7580_v53 = vor.u32 %v8969_v5, %v7579_v6 }
 0x650   :  { %v9044_v47 = vld [vmem:[#allocation3 + $0x64c] sm:$0xf]  ;;  %v7640_v27 = vor.u32 %v8980_v36, %v7637_v52  ;;  %v9081_v13 = vld [vmem:[#allocation3 + $0x76c] sm:$0xf0] }
 0x651   :  { %4439 = vmatpush.bf16.msra.mxu2 %v7736_v25  ;;  %4412 = vmatpush.bf16.msra.mxu0 %v7192_v21  ;;  %v7893_v8 = vld [vmem:[#allocation3 + $0x668] sm:$0xf0]  ;;  %v7836_v25 = vor.u32 %v9033_v45, %v7835_v32  ;;  %v7292_v21 = vor.u32 %v8897_v55, %v7291_v54  ;;  %v7227_v51 = vld [vmem:[#allocation3 + $0x110] sm:$0xf] }
 0x652   :  { %v8844_v20 = vld [vmem:[#allocation3 + $0xc] sm:$0xf]  ;;  %v7896_v11 = vor.u32 %v9044_v47, %v7893_v8  ;;  %v8881_v3 = vld [vmem:[#allocation3 + $0x12c] sm:$0xf0] }
 0x653   :  { %4453 = vmatpush.bf16.msra.mxu3 %v7992_v58  ;;  %4426 = vmatpush.bf16.msra.mxu1 %v7448_v61  ;;  %v7093_v22 = vld [vmem:[#allocation3 + $0x28] sm:$0xf0]  ;;  %v8092_v58 = vor.u32 %v9097_v48, %v8091_v28  ;;  %v7548_v61 = vor.u32 %v8961_v59, %v7547_v57  ;;  %v7483_v34 = vld [vmem:[#allocation3 + $0x310] sm:$0xf] }
 0x654   :  { %v8908_v29 = vld [vmem:[#allocation3 + $0x20c] sm:$0xf]  ;;  %v7096_v50 = vor.u32 %v8844_v20, %v7093_v22  ;;  %v8945_v62 = vld [vmem:[#allocation3 + $0x32c] sm:$0xf0] }
 0x655   :  { %4440 = vmatpush.bf16.msra.mxu2 %v7704_v37  ;;  %4413 = vmatpush.bf16.msra.mxu0 %v7160_v18  ;;  %v7349_v17 = vld [vmem:[#allocation3 + $0x228] sm:$0xf0]  ;;  %v7804_v37 = vor.u32 %v9025_v14, %v7803_v60  ;;  %v7260_v18 = vor.u32 %v8889_v63, %v7259_v41  ;;  %v7739_v36 = vld [vmem:[#allocation3 + $0x510] sm:$0xf]  ;;  %v7484_v20 = vor.u32 %v8945_v62, %v7483_v34  ;;  %v9029_v34 = vld [vmem:[#allocation3 + $0x5d4] sm:$0xf] }
 0x656   :  { %v8972_v56 = vld [vmem:[#allocation3 + $0x40c] sm:$0xf]  ;;  %v7352_v49 = vor.u32 %v8908_v29, %v7349_v17  ;;  %v9009_v52 = vld [vmem:[#allocation3 + $0x52c] sm:$0xf0] }
 0x657   :  { %4454 = vmatpush.bf16.msra.mxu3 %v7960_v1  ;;  %4427 = vmatpush.bf16.msra.mxu1 %v7416_v9  ;;  %v7605_v39 = vld [vmem:[#allocation3 + $0x428] sm:$0xf0]  ;;  %v8060_v1 = vor.u32 %v9089_v40, %v8059_v15  ;;  %v7516_v9 = vor.u32 %v8953_v42, %v7515_v0  ;;  %v7995_v47 = vld [vmem:[#allocation3 + $0x710] sm:$0xf]  ;;  %v7740_v22 = vor.u32 %v9009_v52, %v7739_v36  ;;  %v9093_v52 = vld [vmem:[#allocation3 + $0x7d4] sm:$0xf] }
 0x658   :  { %v9036_v4 = vld [vmem:[#allocation3 + $0x60c] sm:$0xf]  ;;  %v7608_v26 = vor.u32 %v8972_v56, %v7605_v39  ;;  %v9073_v8 = vld [vmem:[#allocation3 + $0x72c] sm:$0xf0] }
 0x659   :  { %4441 = vmatpush.bf16.msra.mxu2 %v7672_v19  ;;  %v7861_v33 = vld [vmem:[#allocation3 + $0x628] sm:$0xf0]  ;;  %4414 = vmatpush.bf16.msra.mxu0 %v7128_v35  ;;  %v7772_v19 = vor.u32 %v9017_v7, %v7771_v10  ;;  %v7228_v35 = vor.u32 %v8881_v3, %v7227_v51  ;;  %v7451_v29 = vld [vmem:[#allocation3 + $0x2d0] sm:$0xf]  ;;  %v7996_v17 = vor.u32 %v9073_v8, %v7995_v47  ;;  %v7581_v3 = vld [vmem:[#allocation3 + $0x3f0] sm:$0xf0] }
 0x65a   :  { %v7864_v44 = vor.u32 %v9036_v4, %v7861_v33  ;;  %v8937_v56 = vld [vmem:[#allocation3 + $0x2ec] sm:$0xf0]  ;;  %v8093_v47 = vld [vmem:[#allocation3 + $0x7f0] sm:$0xf0] }
 0x65b   :  { %4455 = vmatpush.bf16.msra.mxu3 %v7928_v16  ;;  %4428 = vmatpush.bf16.msra.mxu1 %v7384_v23  ;;  %v8028_v16 = vor.u32 %v9081_v13, %v8027_v38  ;;  %v7195_v23 = vld [vmem:[#allocation3 + $0xd0] sm:$0xf]  ;;  %v7452_v31 = vor.u32 %v8937_v56, %v7451_v29  ;;  %v8957_v29 = vld [vmem:[#allocation3 + $0x394] sm:$0xf] }
 0x65c   :  { %v9001_v39 = vld [vmem:[#allocation3 + $0x4ec] sm:$0xf0]  ;;  %v7549_v56 = vld [vmem:[#allocation3 + $0x3b0] sm:$0xf0] }
 0x65d   :  { %4442 = vmatpush.bf16.msra.mxu2 %v7640_v27  ;;  %4415 = vmatpush.bf16.msra.mxu0 %v7096_v50  ;;  %v8873_v27 = vld [vmem:[#allocation3 + $0xec] sm:$0xf0] }
 0x65e   :  { %v7963_v4 = vld [vmem:[#allocation3 + $0x6d0] sm:$0xf]  ;;  %v7196_v43 = vor.u32 %v8873_v27, %v7195_v23  ;;  %v8893_v23 = vld [vmem:[#allocation3 + $0x194] sm:$0xf] }
 0x65f   :  { %4456 = vmatpush.bf16.msra.mxu3 %v7896_v11  ;;  %4429 = vmatpush.bf16.msra.mxu1 %v7352_v49  ;;  %v7707_v11 = vld [vmem:[#allocation3 + $0x4d0] sm:$0xf]  ;;  %v7293_v27 = vld [vmem:[#allocation3 + $0x1b0] sm:$0xf0] }
 0x660   :  { %4416 = vmatmul.bf16.vlgmr.msra.gmra.mxu0 %v10092_v30  ;;  %v9065_v33 = vld [vmem:[#allocation3 + $0x6ec] sm:$0xf0]  ;;  %v7708_v6 = vor.u32 %v9001_v39, %v7707_v11  ;;  %v9021_v11 = vld [vmem:[#allocation3 + $0x594] sm:$0xf] }
 0x661   :  { %4443 = vmatpush.bf16.msra.mxu2 %v7608_v26  ;;  %4464 = vmatpush.bf16.msrb.mxu0 %v7324_v24  ;;  %v7163_v50 = vld [vmem:[#allocation3 + $0x90] sm:$0xf]  ;;  %v7964_v45 = vor.u32 %v9065_v33, %v7963_v4  ;;  %v7805_v39 = vld [vmem:[#allocation3 + $0x5b0] sm:$0xf0] }
 0x662   :  { %4430 = vmatmul.bf16.vlgmr.msra.gmra.mxu1 %v10100_v46  ;;  %v8865_v5 = vld [vmem:[#allocation3 + $0xac] sm:$0xf0]  ;;  %v9085_v4 = vld [vmem:[#allocation3 + $0x794] sm:$0xf] }
 0x663   :  { %4457 = vmatpush.bf16.msra.mxu3 %v7864_v44  ;;  %4478 = vmatpush.bf16.msrb.mxu1 %v7580_v53  ;;  %v7419_v32 = vld [vmem:[#allocation3 + $0x290] sm:$0xf]  ;;  %v7164_v24 = vor.u32 %v8865_v5, %v7163_v50  ;;  %v8061_v33 = vld [vmem:[#allocation3 + $0x7b0] sm:$0xf0] }
 0x664   :  { %4444 = vmatmul.bf16.vlgmr.msra.gmra.mxu2 %v10088_v2  ;;  %v8929_v49 = vld [vmem:[#allocation3 + $0x2ac] sm:$0xf0]  ;;  %v8885_v50 = vld [vmem:[#allocation3 + $0x154] sm:$0xf] }
 0x665   :  { %4492 = vmatpush.bf16.msrb.mxu2 %v7836_v25  ;;  %4465 = vmatpush.bf16.msrb.mxu0 %v7292_v21  ;;  %v7675_v26 = vld [vmem:[#allocation3 + $0x490] sm:$0xf]  ;;  %v7420_v53 = vor.u32 %v8929_v49, %v7419_v32  ;;  %v7261_v5 = vld [vmem:[#allocation3 + $0x170] sm:$0xf0] }
 0x666   :  { %4458 = vmatmul.bf16.vlgmr.msra.gmra.mxu3 %v10096_v12  ;;  %v8993_v28 = vld [vmem:[#allocation3 + $0x4ac] sm:$0xf0]  ;;  %v8949_v32 = vld [vmem:[#allocation3 + $0x354] sm:$0xf] }
 0x667   :  { %4506 = vmatpush.bf16.msrb.mxu3 %v8092_v58  ;;  %4479 = vmatpush.bf16.msrb.mxu1 %v7548_v61  ;;  %v7931_v48 = vld [vmem:[#allocation3 + $0x690] sm:$0xf]  ;;  %v7676_v25 = vor.u32 %v8993_v28, %v7675_v26  ;;  %v7517_v49 = vld [vmem:[#allocation3 + $0x370] sm:$0xf0] }
 0x668   :  { %v9057_v44 = vld [vmem:[#allocation3 + $0x6ac] sm:$0xf0]  ;;  %v9013_v26 = vld [vmem:[#allocation3 + $0x554] sm:$0xf] }
 0x669   :  { %4493 = vmatpush.bf16.msrb.mxu2 %v7804_v37  ;;  %4466 = vmatpush.bf16.msrb.mxu0 %v7260_v18  ;;  %v7131_v54 = vld [vmem:[#allocation3 + $0x50] sm:$0xf]  ;;  %v7932_v58 = vor.u32 %v9057_v44, %v7931_v48  ;;  %v8901_v18 = vld [vmem:[#allocation3 + $0x1d4] sm:$0xf] }
 0x66a   :  { %v8857_v55 = vld [vmem:[#allocation3 + $0x6c] sm:$0xf0]  ;;  %v7773_v28 = vld [vmem:[#allocation3 + $0x570] sm:$0xf0] }
 0x66b   :  { %4507 = vmatpush.bf16.msrb.mxu3 %v8060_v1  ;;  %4480 = vmatpush.bf16.msrb.mxu1 %v7516_v9  ;;  %v7387_v57 = vld [vmem:[#allocation3 + $0x250] sm:$0xf]  ;;  %v7132_v21 = vor.u32 %v8857_v55, %v7131_v54  ;;  %v7325_v9 = vld [vmem:[#allocation3 + $0x1f0] sm:$0xf0]  ;;  %v7776_v54 = vor.u32 %v9013_v26, %v7773_v28 }
 0x66c   :  { %v8921_v59 = vld [vmem:[#allocation3 + $0x26c] sm:$0xf0]  ;;  %v9077_v48 = vld [vmem:[#allocation3 + $0x754] sm:$0xf] }
 0x66d   :  { %4494 = vmatpush.bf16.msrb.mxu2 %v7772_v19  ;;  %4467 = vmatpush.bf16.msrb.mxu0 %v7228_v35  ;;  %v7643_v60 = vld [vmem:[#allocation3 + $0x450] sm:$0xf]  ;;  %v7388_v41 = vor.u32 %v8921_v59, %v7387_v57  ;;  %v8965_v19 = vld [vmem:[#allocation3 + $0x3d4] sm:$0xf]  ;;  %v7328_v35 = vor.u32 %v8901_v18, %v7325_v9 }
 0x66e   :  { %v8985_v14 = vld [vmem:[#allocation3 + $0x46c] sm:$0xf0]  ;;  %v8029_v44 = vld [vmem:[#allocation3 + $0x770] sm:$0xf0] }
 0x66f   :  { %4508 = vmatpush.bf16.msrb.mxu3 %v8028_v16  ;;  %4481 = vmatpush.bf16.msrb.mxu1 %v7484_v20  ;;  %v7899_v15 = vld [vmem:[#allocation3 + $0x650] sm:$0xf]  ;;  %v7644_v63 = vor.u32 %v8985_v14, %v7643_v60  ;;  %v7837_v16 = vld [vmem:[#allocation3 + $0x5f0] sm:$0xf0]  ;;  %v7584_v20 = vor.u32 %v8965_v19, %v7581_v3  ;;  %v8032_v59 = vor.u32 %v9077_v48, %v8029_v44 }
 0x670   :  { %v9049_v40 = vld [vmem:[#allocation3 + $0x66c] sm:$0xf0]  ;;  %v8877_v55 = vld [vmem:[#allocation3 + $0x114] sm:$0xf] }
 0x671   :  { %4495 = vmatpush.bf16.msrb.mxu2 %v7740_v22  ;;  %4468 = vmatpush.bf16.msrb.mxu0 %v7196_v43  ;;  %v7099_v61 = vld [vmem:[#allocation3 + $0x10] sm:$0xf]  ;;  %v7900_v10 = vor.u32 %v9049_v40, %v7899_v15  ;;  %v7840_v22 = vor.u32 %v9029_v34, %v7837_v16  ;;  %v7296_v43 = vor.u32 %v8893_v23, %v7293_v27  ;;  %v7229_v57 = vld [vmem:[#allocation3 + $0x130] sm:$0xf0] }
 0x672   :  { %v8849_v37 = vld [vmem:[#allocation3 + $0x2c] sm:$0xf0]  ;;  %v7485_v60 = vld [vmem:[#allocation3 + $0x330] sm:$0xf0] }
 0x673   :  { %4509 = vmatpush.bf16.msrb.mxu3 %v7996_v17  ;;  %4482 = vmatpush.bf16.msrb.mxu1 %v7452_v31  ;;  %v7355_v0 = vld [vmem:[#allocation3 + $0x210] sm:$0xf]  ;;  %v7100_v51 = vor.u32 %v8849_v37, %v7099_v61  ;;  %v8096_v17 = vor.u32 %v9093_v52, %v8093_v47  ;;  %v7552_v31 = vor.u32 %v8957_v29, %v7549_v56  ;;  %v9005_v14 = vld [vmem:[#allocation3 + $0x514] sm:$0xf] }
 0x674   :  { %v8913_v1 = vld [vmem:[#allocation3 + $0x22c] sm:$0xf0]  ;;  %v7741_v15 = vld [vmem:[#allocation3 + $0x530] sm:$0xf0]  ;;  %v7232_v37 = vor.u32 %v8877_v55, %v7229_v57 }
 0x675   :  { %4496 = vmatpush.bf16.msrb.mxu2 %v7708_v6  ;;  %4469 = vmatpush.bf16.msrb.mxu0 %v7164_v24  ;;  %v7611_v42 = vld [vmem:[#allocation3 + $0x410] sm:$0xf]  ;;  %v7356_v62 = vor.u32 %v8913_v1, %v7355_v0  ;;  %v7808_v6 = vor.u32 %v9021_v11, %v7805_v39  ;;  %v7264_v24 = vor.u32 %v8885_v50, %v7261_v5  ;;  %v9069_v40 = vld [vmem:[#allocation3 + $0x714] sm:$0xf] }
 0x676   :  { %v8977_v7 = vld [vmem:[#allocation3 + $0x42c] sm:$0xf0]  ;;  %v7744_v0 = vor.u32 %v9005_v14, %v7741_v15  ;;  %v7453_v18 = vld [vmem:[#allocation3 + $0x2f0] sm:$0xf0] }
 0x677   :  { %4510 = vmatpush.bf16.msrb.mxu3 %v7964_v45  ;;  %4483 = vmatpush.bf16.msrb.mxu1 %v7420_v53  ;;  %v7867_v38 = vld [vmem:[#allocation3 + $0x610] sm:$0xf]  ;;  %v7612_v36 = vor.u32 %v8977_v7, %v7611_v42  ;;  %v8064_v45 = vor.u32 %v9085_v4, %v8061_v33  ;;  %v7197_v7 = vld [vmem:[#allocation3 + $0xf0] sm:$0xf0] }
 0x678   :  { %v9041_v13 = vld [vmem:[#allocation3 + $0x62c] sm:$0xf0]  ;;  %v8997_v9 = vld [vmem:[#allocation3 + $0x4d4] sm:$0xf] }
 0x679   :  { %4497 = vmatpush.bf16.msrb.mxu2 %v7676_v25  ;;  %4470 = vmatpush.bf16.msrb.mxu0 %v7132_v21  ;;  %v7868_v8 = vor.u32 %v9041_v13, %v7867_v38  ;;  %v10122_v53 = vld [vmem:[#allocation14] ss:$4 sm:$0xff]  ;;  %v7520_v25 = vor.u32 %v8949_v32, %v7517_v49 }
 0x67a   :  { %v7997_v21 = vld [vmem:[#allocation3 + $0x730] sm:$0xf0]  ;;  %v2944_v61 = vperm.slane %v10122_v53, 0 }
 0x67b   :  { %4511 = vmatpush.bf16.msrb.mxu3 %v7932_v58  ;;  %4484 = vmatpush.bf16.msrb.mxu1 %v7388_v41  ;;  %v8941_v58 = vld [vmem:[#allocation3 + $0x314] sm:$0xf]  ;;  %v8000_v13 = vor.u32 %v9069_v40, %v7997_v21 }
 0x67c   :  { %v8933_v38 = vld [vmem:[#allocation3 + $0x2d4] sm:$0xf] }
 0x67d   :  { %4498 = vmatpush.bf16.msrb.mxu2 %v7644_v63  ;;  %4471 = vmatpush.bf16.msrb.mxu0 %v7100_v51  ;;  %v4249_v41 = vpop.f32.mrf.mxu0  ;;  %v7488_v63 = vor.u32 %v8941_v58, %v7485_v60  ;;  %v7709_v19 = vld [vmem:[#allocation3 + $0x4f0] sm:$0xf0] }
 0x67e   :  { %v4250_v1 = vadd.f32 %v4249_v41, %v2944_v61  ;;  %v9061_v3 = vld [vmem:[#allocation3 + $0x6d4] sm:$0xf] }
 0x67f   :  { %4512 = vmatpush.bf16.msrb.mxu3 %v7900_v10  ;;  %4485 = vmatpush.bf16.msrb.mxu1 %v7356_v62  ;;  %v4263_v42 = vpop.f32.mrf.mxu1  ;;  %v8869_v10 = vld [vmem:[#allocation3 + $0xd4] sm:$0xf]  ;;  %v7456_v62 = vor.u32 %v8933_v38, %v7453_v18  ;;  %v7843_v18 = vld [vmem:[#allocation3 + $0x5d8] sm:$0xf] }
 0x680   :  { %4472 = vmatmul.bf16.vlgmr.msrb.gmra.mxu0 %v10092_v30  ;;  %v4264_v51 = vadd.f32 %v4263_v42, %v4250_v1  ;;  %v7965_v34 = vld [vmem:[#allocation3 + $0x6f0] sm:$0xf0]  ;;  %v7200_v16 = vor.u32 %v8869_v10, %v7197_v7  ;;  %v7331_v1 = vld [vmem:[#allocation3 + $0x1d8] sm:$0xf] }
 0x681   :  { %4499 = vmatpush.bf16.msrb.mxu2 %v7612_v36  ;;  %4520 = vmatpush.bf16.msra.mxu0 %v7328_v35  ;;  %v7712_v36 = vor.u32 %v8997_v9, %v7709_v19  ;;  %v8861_v47 = vld [vmem:[#allocation3 + $0x94] sm:$0xf]  ;;  %v8906_v42 = vld [vmem:[#allocation3 + $0x1f4] sm:$0xf0] }
 0x682   :  { %4486 = vmatmul.bf16.vlgmr.msrb.gmra.mxu1 %v10100_v46  ;;  %v8925_v35 = vld [vmem:[#allocation3 + $0x294] sm:$0xf]  ;;  %v7587_v10 = vld [vmem:[#allocation3 + $0x3d8] sm:$0xf] }
 0x683   :  { %4513 = vmatpush.bf16.msrb.mxu3 %v7868_v8  ;;  %4534 = vmatpush.bf16.msra.mxu1 %v7584_v20  ;;  %v7165_v8 = vld [vmem:[#allocation3 + $0xb0] sm:$0xf0]  ;;  %v7968_v20 = vor.u32 %v9061_v3, %v7965_v34  ;;  %v9034_v9 = vld [vmem:[#allocation3 + $0x5f4] sm:$0xf0] }
 0x684   :  { %4500 = vmatmul.bf16.vlgmr.msrb.gmra.mxu2 %v10088_v2  ;;  %v7421_v27 = vld [vmem:[#allocation3 + $0x2b0] sm:$0xf0]  ;;  %v7168_v4 = vor.u32 %v8861_v47, %v7165_v8  ;;  %v8099_v3 = vld [vmem:[#allocation3 + $0x7d8] sm:$0xf] }
 0x685   :  { %4548 = vmatpush.bf16.msra.mxu2 %v7840_v22  ;;  %4521 = vmatpush.bf16.msra.mxu0 %v7296_v43  ;;  %v8989_v29 = vld [vmem:[#allocation3 + $0x494] sm:$0xf]  ;;  %v4251_v33 = vpop.f32.mrf.mxu0  ;;  %v7424_v43 = vor.u32 %v8925_v35, %v7421_v27  ;;  %v9098_v34 = vld [vmem:[#allocation3 + $0x7f4] sm:$0xf0] }
 0x686   :  { %4514 = vmatmul.bf16.vlgmr.msrb.gmra.mxu3 %v10096_v12  ;;  %v9053_v56 = vld [vmem:[#allocation3 + $0x694] sm:$0xf]  ;;  %v7299_v47 = vld [vmem:[#allocation3 + $0x198] sm:$0xf] }
 0x687   :  { %4562 = vmatpush.bf16.msra.mxu3 %v8096_v17  ;;  %4535 = vmatpush.bf16.msra.mxu1 %v7552_v31  ;;  %v4277_v52 = vpop.f32.mrf.mxu2  ;;  %v7677_v17 = vld [vmem:[#allocation3 + $0x4b0] sm:$0xf0]  ;;  %v4265_v50 = vpop.f32.mrf.mxu1  ;;  %v8898_v8 = vld [vmem:[#allocation3 + $0x1b4] sm:$0xf0] }
 0x688   :  { %v4278_v22 = vadd.f32 %v4277_v52, %v4264_v51  ;;  %v7933_v11 = vld [vmem:[#allocation3 + $0x6b0] sm:$0xf0]  ;;  %v7680_v31 = vor.u32 %v8989_v29, %v7677_v17  ;;  %v7844_v52 = vor.u32 %v9034_v9, %v7843_v18  ;;  %v7555_v35 = vld [vmem:[#allocation3 + $0x398] sm:$0xf] }
 0x689   :  { %4549 = vmatpush.bf16.msra.mxu2 %v7808_v6  ;;  %4522 = vmatpush.bf16.msra.mxu0 %v7264_v24  ;;  %v4291_v23 = vpop.f32.mrf.mxu3  ;;  %v4252_v6 = vadd.f32 %v4251_v33, %v2944_v61  ;;  %v8853_v5 = vld [vmem:[#allocation3 + $0x54] sm:$0xf]  ;;  %v7936_v49 = vor.u32 %v9053_v56, %v7933_v11  ;;  %v9026_v27 = vld [vmem:[#allocation3 + $0x5b4] sm:$0xf0]  ;;  %v7300_v56 = vor.u32 %v8898_v8, %v7299_v47 }
 0x68a   :  { %v10125_v39 = vadd.f32 %v4291_v23, %v4278_v22  ;;  %v7133_v32 = vld [vmem:[#allocation3 + $0x70] sm:$0xf0]  ;;  %v8962_v22 = vld [vmem:[#allocation3 + $0x3b4] sm:$0xf0] }
 0x68b   :  { %4563 = vmatpush.bf16.msra.mxu3 %v8064_v45  ;;  %4536 = vmatpush.bf16.msra.mxu1 %v7520_v25  ;;  %v8917_v45 = vld [vmem:[#allocation3 + $0x254] sm:$0xf]  ;;  %v4266_v44 = vadd.f32 %v4265_v50, %v4252_v6  ;;  %v7811_v23 = vld [vmem:[#allocation3 + $0x598] sm:$0xf]  ;;  %v7556_v11 = vor.u32 %v8962_v22, %v7555_v35 }
 0x68c   :  { %v7389_v26 = vld [vmem:[#allocation3 + $0x270] sm:$0xf0]  ;;  %v8067_v29 = vld [vmem:[#allocation3 + $0x798] sm:$0xf] }
 0x68d   :  { %4550 = vmatpush.bf16.msra.mxu2 %v7776_v54  ;;  %4523 = vmatpush.bf16.msra.mxu0 %v7232_v37  ;;  %v8981_v28 = vld [vmem:[#allocation3 + $0x454] sm:$0xf]  ;;  %v7136_v54 = vor.u32 %v8853_v5, %v7133_v32  ;;  %v7392_v58 = vor.u32 %v8917_v45, %v7389_v26  ;;  %v9090_v17 = vld [vmem:[#allocation3 + $0x7b4] sm:$0xf0] }
 0x68e   :  { %v7645_v48 = vld [vmem:[#allocation3 + $0x470] sm:$0xf0]  ;;  %v7267_v33 = vld [vmem:[#allocation3 + $0x158] sm:$0xf]  ;;  %v8068_v6 = vor.u32 %v9090_v17, %v8067_v29 }
 0x68f   :  { %4564 = vmatpush.bf16.msra.mxu3 %v8032_v59  ;;  %4537 = vmatpush.bf16.msra.mxu1 %v7488_v63  ;;  %v9045_v24 = vld [vmem:[#allocation3 + $0x654] sm:$0xf]  ;;  %v7648_v59 = vor.u32 %v8981_v28, %v7645_v48  ;;  %v4279_v60 = vpop.f32.mrf.mxu2  ;;  %v8954_v50 = vld [vmem:[#allocation3 + $0x374] sm:$0xf0] }
 0x690   :  { %v7901_v25 = vld [vmem:[#allocation3 + $0x670] sm:$0xf0]  ;;  %v4280_v61 = vadd.f32 %v4279_v60, %v4266_v44  ;;  %v7779_v5 = vld [vmem:[#allocation3 + $0x558] sm:$0xf] }
 0x691   :  { %4551 = vmatpush.bf16.msra.mxu2 %v7744_v0  ;;  %4524 = vmatpush.bf16.msra.mxu0 %v7200_v16  ;;  %v8845_v55 = vld [vmem:[#allocation3 + $0x14] sm:$0xf]  ;;  %v7904_v21 = vor.u32 %v9045_v24, %v7901_v25  ;;  %v4293_v37 = vpop.f32.mrf.mxu3  ;;  %v9018_v32 = vld [vmem:[#allocation3 + $0x574] sm:$0xf0] }
 0x692   :  { %v7101_v57 = vld [vmem:[#allocation3 + $0x30] sm:$0xf0]  ;;  %v10127_v7 = vadd.f32 %v4293_v37, %v4280_v61  ;;  %v8035_v45 = vld [vmem:[#allocation3 + $0x758] sm:$0xf]  ;;  %v7780_v48 = vor.u32 %v9018_v32, %v7779_v5 }
 0x693   :  { %4565 = vmatpush.bf16.msra.mxu3 %v8000_v13  ;;  %4538 = vmatpush.bf16.msra.mxu1 %v7456_v62  ;;  %v8909_v14 = vld [vmem:[#allocation3 + $0x214] sm:$0xf]  ;;  %v7104_v38 = vor.u32 %v8845_v55, %v7101_v57  ;;  %v8970_v13 = vld [vmem:[#allocation3 + $0x3f4] sm:$0xf0]  ;;  %v7332_v62 = vor.u32 %v8906_v42, %v7331_v1 }
 0x694   :  { %v7357_v15 = vld [vmem:[#allocation3 + $0x230] sm:$0xf0]  ;;  %v7235_v44 = vld [vmem:[#allocation3 + $0x118] sm:$0xf] }
 0x695   :  { %4552 = vmatpush.bf16.msra.mxu2 %v7712_v36  ;;  %4525 = vmatpush.bf16.msra.mxu0 %v7168_v4  ;;  %v8973_v40 = vld [vmem:[#allocation3 + $0x414] sm:$0xf]  ;;  %v7360_v19 = vor.u32 %v8909_v14, %v7357_v15  ;;  %v7588_v36 = vor.u32 %v8970_v13, %v7587_v10  ;;  %v7812_v4 = vor.u32 %v9026_v27, %v7811_v23  ;;  %v8882_v24 = vld [vmem:[#allocation3 + $0x134] sm:$0xf0]  ;;  %v2945_v14 = vperm.slane %v10122_v53, 1 }
 0x696   :  { %v7613_v41 = vld [vmem:[#allocation3 + $0x430] sm:$0xf0]  ;;  %v7491_v25 = vld [vmem:[#allocation3 + $0x318] sm:$0xf]  ;;  %v7236_v15 = vor.u32 %v8882_v24, %v7235_v44 }
 0x697   :  { %4566 = vmatpush.bf16.msra.mxu3 %v7968_v20  ;;  %4539 = vmatpush.bf16.msra.mxu1 %v7424_v43  ;;  %v9037_v63 = vld [vmem:[#allocation3 + $0x614] sm:$0xf]  ;;  %v7616_v51 = vor.u32 %v8973_v40, %v7613_v41  ;;  %v8100_v20 = vor.u32 %v9098_v34, %v8099_v3  ;;  %v8890_v43 = vld [vmem:[#allocation3 + $0x174] sm:$0xf0] }
 0x698   :  { %v7869_v0 = vld [vmem:[#allocation3 + $0x630] sm:$0xf0]  ;;  %v7268_v26 = vor.u32 %v8890_v43, %v7267_v33  ;;  %v8946_v55 = vld [vmem:[#allocation3 + $0x334] sm:$0xf0] }
 0x699   :  { %4553 = vmatpush.bf16.msra.mxu2 %v7680_v31  ;;  %4526 = vmatpush.bf16.msra.mxu0 %v7136_v54  ;;  %v7872_v16 = vor.u32 %v9037_v63, %v7869_v0  ;;  %v7523_v31 = vld [vmem:[#allocation3 + $0x358] sm:$0xf] }
 0x69a   :  { %v7524_v28 = vor.u32 %v8954_v50, %v7523_v31  ;;  %v7747_v57 = vld [vmem:[#allocation3 + $0x518] sm:$0xf] }
 0x69b   :  { %4567 = vmatpush.bf16.msra.mxu3 %v7936_v49  ;;  %4540 = vmatpush.bf16.msra.mxu1 %v7392_v58  ;;  %v9082_v49 = vld [vmem:[#allocation3 + $0x774] sm:$0xf0] }
 0x69c   :  { %v8036_v54 = vor.u32 %v9082_v49, %v8035_v45  ;;  %v9010_v58 = vld [vmem:[#allocation3 + $0x534] sm:$0xf0] }
 0x69d   :  { %4554 = vmatpush.bf16.msra.mxu2 %v7648_v59  ;;  %4527 = vmatpush.bf16.msra.mxu0 %v7104_v38  ;;  %v8003_v59 = vld [vmem:[#allocation3 + $0x718] sm:$0xf]  ;;  %v4305_v40 = vpop.f32.mrf.mxu0  ;;  %v7748_v61 = vor.u32 %v9010_v58, %v7747_v57 }
 0x69e   :  { %v9074_v60 = vld [vmem:[#allocation3 + $0x734] sm:$0xf0]  ;;  %v4306_v37 = vadd.f32 %v4305_v40, %v2945_v14 }
 0x69f   :  { %4568 = vmatpush.bf16.msra.mxu3 %v7904_v21  ;;  %4541 = vmatpush.bf16.msra.mxu1 %v7360_v19  ;;  %v7492_v21 = vor.u32 %v8946_v55, %v7491_v25  ;;  %v4319_v41 = vpop.f32.mrf.mxu1  ;;  %v7203_v63 = vld [vmem:[#allocation3 + $0xd8] sm:$0xf]  ;;  %v8004_v42 = vor.u32 %v9074_v60, %v8003_v59 }
 0x6a0   :  { %4528 = vmatmul.bf16.vlgmr.msra.gmra.mxu0 %v10092_v30  ;;  %v8874_v0 = vld [vmem:[#allocation3 + $0xf4] sm:$0xf0]  ;;  %v4320_v18 = vadd.f32 %v4319_v41, %v4306_v37 }
 0x6a1   :  { %4555 = vmatpush.bf16.msra.mxu2 %v7616_v51  ;;  %4576 = vmatpush.bf16.msrb.mxu0 %v7332_v62  ;;  %v7459_v1 = vld [vmem:[#allocation3 + $0x2d8] sm:$0xf]  ;;  %v7204_v51 = vor.u32 %v8874_v0, %v7203_v63  ;;  %v8902_v63 = vld [vmem:[#allocation3 + $0x1dc] sm:$0xf] }
 0x6a2   :  { %4542 = vmatmul.bf16.vlgmr.msra.gmra.mxu1 %v10100_v46  ;;  %v8938_v10 = vld [vmem:[#allocation3 + $0x2f4] sm:$0xf0]  ;;  %v7333_v0 = vld [vmem:[#allocation3 + $0x1f8] sm:$0xf0] }
 0x6a3   :  { %4569 = vmatpush.bf16.msra.mxu3 %v7872_v16  ;;  %4590 = vmatpush.bf16.msrb.mxu1 %v7588_v36  ;;  %v7715_v38 = vld [vmem:[#allocation3 + $0x4d8] sm:$0xf]  ;;  %v7460_v3 = vor.u32 %v8938_v10, %v7459_v1  ;;  %v8966_v1 = vld [vmem:[#allocation3 + $0x3dc] sm:$0xf] }
 0x6a4   :  { %4556 = vmatmul.bf16.vlgmr.msra.gmra.mxu2 %v10088_v2  ;;  %v9002_v13 = vld [vmem:[#allocation3 + $0x4f4] sm:$0xf0] }
 0x6a5   :  { %4604 = vmatpush.bf16.msrb.mxu2 %v7844_v52  ;;  %4577 = vmatpush.bf16.msrb.mxu0 %v7300_v56  ;;  %v7971_v9 = vld [vmem:[#allocation3 + $0x6d8] sm:$0xf]  ;;  %v7716_v34 = vor.u32 %v9002_v13, %v7715_v38  ;;  %v7589_v38 = vld [vmem:[#allocation3 + $0x3f8] sm:$0xf0] }
 0x6a6   :  { %4570 = vmatmul.bf16.vlgmr.msra.gmra.mxu3 %v10096_v12  ;;  %v9066_v19 = vld [vmem:[#allocation3 + $0x6f4] sm:$0xf0]  ;;  %v9030_v13 = vld [vmem:[#allocation3 + $0x5dc] sm:$0xf] }
 0x6a7   :  { %4618 = vmatpush.bf16.msrb.mxu3 %v8100_v20  ;;  %4591 = vmatpush.bf16.msrb.mxu1 %v7556_v11  ;;  %v4333_v16 = vpop.f32.mrf.mxu2  ;;  %v7171_v62 = vld [vmem:[#allocation3 + $0x98] sm:$0xf]  ;;  %v7972_v47 = vor.u32 %v9066_v19, %v7971_v9  ;;  %v4307_v11 = vpop.f32.mrf.mxu0 }
 0x6a8   :  { %v8866_v36 = vld [vmem:[#allocation3 + $0xb4] sm:$0xf0]  ;;  %v4334_v8 = vadd.f32 %v4333_v16, %v4320_v18  ;;  %v4308_v43 = vadd.f32 %v4307_v11, %v2945_v14  ;;  %v4321_v31 = vpop.f32.mrf.mxu1  ;;  %v7845_v18 = vld [vmem:[#allocation3 + $0x5f8] sm:$0xf0]  ;;  %v7336_v16 = vor.u32 %v8902_v63, %v7333_v0 }
 0x6a9   :  { %4605 = vmatpush.bf16.msrb.mxu2 %v7812_v4  ;;  %4578 = vmatpush.bf16.msrb.mxu0 %v7268_v26  ;;  %v7427_v52 = vld [vmem:[#allocation3 + $0x298] sm:$0xf]  ;;  %v4347_v35 = vpop.f32.mrf.mxu3  ;;  %v7172_v56 = vor.u32 %v8866_v36, %v7171_v62  ;;  %v7592_v62 = vor.u32 %v8966_v1, %v7589_v38  ;;  %v7848_v36 = vor.u32 %v9030_v13, %v7845_v18  ;;  %v8870_v63 = vld [vmem:[#allocation3 + $0xdc] sm:$0xf] }
 0x6aa   :  { %v8930_v20 = vld [vmem:[#allocation3 + $0x2b4] sm:$0xf0]  ;;  %v10134_v17 = vadd.f32 %v4347_v35, %v4334_v8  ;;  %v8958_v8 = vld [vmem:[#allocation3 + $0x39c] sm:$0xf] }
 0x6ab   :  { %4619 = vmatpush.bf16.msrb.mxu3 %v8068_v6  ;;  %4592 = vmatpush.bf16.msrb.mxu1 %v7524_v28  ;;  %v7683_v22 = vld [vmem:[#allocation3 + $0x498] sm:$0xf]  ;;  %v7428_v4 = vor.u32 %v8930_v20, %v7427_v52  ;;  %v4322_v28 = vadd.f32 %v4321_v31, %v4308_v43  ;;  %v8894_v52 = vld [vmem:[#allocation3 + $0x19c] sm:$0xf] }
 0x6ac   :  { %v8994_v23 = vld [vmem:[#allocation3 + $0x4b4] sm:$0xf0]  ;;  %v7557_v20 = vld [vmem:[#allocation3 + $0x3b8] sm:$0xf0] }
 0x6ad   :  { %4606 = vmatpush.bf16.msrb.mxu2 %v7780_v48  ;;  %4579 = vmatpush.bf16.msrb.mxu0 %v7236_v15  ;;  %v7939_v27 = vld [vmem:[#allocation3 + $0x698] sm:$0xf]  ;;  %v7684_v33 = vor.u32 %v8994_v23, %v7683_v22  ;;  %v9022_v22 = vld [vmem:[#allocation3 + $0x59c] sm:$0xf]  ;;  %v7560_v11 = vor.u32 %v8958_v8, %v7557_v20 }
 0x6ae   :  { %v9058_v29 = vld [vmem:[#allocation3 + $0x6b4] sm:$0xf0]  ;;  %v7813_v23 = vld [vmem:[#allocation3 + $0x5b8] sm:$0xf0] }
 0x6af   :  { %4620 = vmatpush.bf16.msrb.mxu3 %v8036_v54  ;;  %4593 = vmatpush.bf16.msrb.mxu1 %v7492_v21  ;;  %v7139_v6 = vld [vmem:[#allocation3 + $0x58] sm:$0xf]  ;;  %v7940_v32 = vor.u32 %v9058_v29, %v7939_v27  ;;  %v4335_v58 = vpop.f32.mrf.mxu2  ;;  %v9086_v27 = vld [vmem:[#allocation3 + $0x79c] sm:$0xf] }
 0x6b0   :  { %v8858_v50 = vld [vmem:[#allocation3 + $0x74] sm:$0xf0]  ;;  %v4336_v40 = vadd.f32 %v4335_v58, %v4322_v28  ;;  %v8069_v29 = vld [vmem:[#allocation3 + $0x7b8] sm:$0xf0] }
 0x6b1   :  { %4607 = vmatpush.bf16.msrb.mxu2 %v7748_v61  ;;  %4580 = vmatpush.bf16.msrb.mxu0 %v7204_v51  ;;  %v7395_v5 = vld [vmem:[#allocation3 + $0x258] sm:$0xf]  ;;  %v7140_v24 = vor.u32 %v8858_v50, %v7139_v6  ;;  %v4349_v21 = vpop.f32.mrf.mxu3  ;;  %v9094_v51 = vld [vmem:[#allocation3 + $0x7dc] sm:$0xf]  ;;  %v8072_v6 = vor.u32 %v9086_v27, %v8069_v29 }
 0x6b2   :  { %v8922_v45 = vld [vmem:[#allocation3 + $0x274] sm:$0xf0]  ;;  %v7269_v43 = vld [vmem:[#allocation3 + $0x178] sm:$0xf0] }
 0x6b3   :  { %4621 = vmatpush.bf16.msrb.mxu3 %v8004_v42  ;;  %4594 = vmatpush.bf16.msrb.mxu1 %v7460_v3  ;;  %v7651_v49 = vld [vmem:[#allocation3 + $0x458] sm:$0xf]  ;;  %v7396_v55 = vor.u32 %v8922_v45, %v7395_v5  ;;  %v10136_v42 = vadd.f32 %v4349_v21, %v4336_v40  ;;  %v8101_v3 = vld [vmem:[#allocation3 + $0x7f8] sm:$0xf0] }
 0x6b4   :  { %v8986_v26 = vld [vmem:[#allocation3 + $0x474] sm:$0xf0]  ;;  %v8104_v35 = vor.u32 %v9094_v51, %v8101_v3  ;;  %v8950_v31 = vld [vmem:[#allocation3 + $0x35c] sm:$0xf] }
 0x6b5   :  { %4608 = vmatpush.bf16.msrb.mxu2 %v7716_v34  ;;  %v7907_v48 = vld [vmem:[#allocation3 + $0x658] sm:$0xf]  ;;  %4581 = vmatpush.bf16.msrb.mxu0 %v7172_v56  ;;  %v7652_v57 = vor.u32 %v8986_v26, %v7651_v49  ;;  %v7525_v50 = vld [vmem:[#allocation3 + $0x378] sm:$0xf0] }
 0x6b6   :  { %v9050_v44 = vld [vmem:[#allocation3 + $0x674] sm:$0xf0]  ;;  %v9014_v5 = vld [vmem:[#allocation3 + $0x55c] sm:$0xf]  ;;  %v7528_v28 = vor.u32 %v8950_v31, %v7525_v50 }
 0x6b7   :  { %4622 = vmatpush.bf16.msrb.mxu3 %v7972_v47  ;;  %v7107_v25 = vld [vmem:[#allocation3 + $0x18] sm:$0xf]  ;;  %4595 = vmatpush.bf16.msrb.mxu1 %v7428_v4  ;;  %v7908_v15 = vor.u32 %v9050_v44, %v7907_v48  ;;  %v7301_v47 = vld [vmem:[#allocation3 + $0x1b8] sm:$0xf0]  ;;  %v7816_v4 = vor.u32 %v9022_v22, %v7813_v23 }
 0x6b8   :  { %v8850_v54 = vld [vmem:[#allocation3 + $0x34] sm:$0xf0]  ;;  %v7304_v56 = vor.u32 %v8894_v52, %v7301_v47  ;;  %v9078_v45 = vld [vmem:[#allocation3 + $0x75c] sm:$0xf] }
 0x6b9   :  { %4609 = vmatpush.bf16.msrb.mxu2 %v7684_v33  ;;  %v7363_v59 = vld [vmem:[#allocation3 + $0x218] sm:$0xf]  ;;  %4582 = vmatpush.bf16.msrb.mxu0 %v7140_v24  ;;  %v7108_v10 = vor.u32 %v8850_v54, %v7107_v25  ;;  %v8886_v33 = vld [vmem:[#allocation3 + $0x15c] sm:$0xf] }
 0x6ba   :  { %v8914_v60 = vld [vmem:[#allocation3 + $0x234] sm:$0xf0]  ;;  %v8037_v49 = vld [vmem:[#allocation3 + $0x778] sm:$0xf0]  ;;  %v7272_v26 = vor.u32 %v8886_v33, %v7269_v43 }
 0x6bb   :  { %v7619_v14 = vld [vmem:[#allocation3 + $0x418] sm:$0xf]  ;;  %4623 = vmatpush.bf16.msrb.mxu3 %v7940_v32  ;;  %4596 = vmatpush.bf16.msrb.mxu1 %v7396_v55  ;;  %v7364_v9 = vor.u32 %v8914_v60, %v7363_v59  ;;  %v7781_v32 = vld [vmem:[#allocation3 + $0x578] sm:$0xf0]  ;;  %v8040_v54 = vor.u32 %v9078_v45, %v8037_v49 }
 0x6bc   :  { %v8978_v61 = vld [vmem:[#allocation3 + $0x434] sm:$0xf0]  ;;  %v7784_v48 = vor.u32 %v9014_v5, %v7781_v32  ;;  %v8878_v44 = vld [vmem:[#allocation3 + $0x11c] sm:$0xf] }
 0x6bd   :  { %v7875_v37 = vld [vmem:[#allocation3 + $0x618] sm:$0xf]  ;;  %4610 = vmatpush.bf16.msrb.mxu2 %v7652_v57  ;;  %v7620_v19 = vor.u32 %v8978_v61, %v7619_v14  ;;  %4583 = vmatpush.bf16.msrb.mxu0 %v7108_v10  ;;  %v7237_v24 = vld [vmem:[#allocation3 + $0x138] sm:$0xf0]  ;;  %v2946_v14 = vperm.slane %v10122_v53, 2  ;;  %v4361_v40 = vpop.f32.mrf.mxu0 }
 0x6be   :  { %v9042_v41 = vld [vmem:[#allocation3 + $0x634] sm:$0xf0]  ;;  %v8942_v25 = vld [vmem:[#allocation3 + $0x31c] sm:$0xf] }
 0x6bf   :  { %4624 = vmatpush.bf16.msrb.mxu3 %v7908_v15  ;;  %v7876_v34 = vor.u32 %v9042_v41, %v7875_v37  ;;  %4597 = vmatpush.bf16.msrb.mxu1 %v7364_v9  ;;  %v7493_v55 = vld [vmem:[#allocation3 + $0x338] sm:$0xf0]  ;;  %v7240_v15 = vor.u32 %v8878_v44, %v7237_v24  ;;  %v4362_v37 = vadd.f32 %v4361_v40, %v2946_v14  ;;  %v4375_v41 = vpop.f32.mrf.mxu1 }
 0x6c0   :  { %4584 = vmatmul.bf16.vlgmr.msrb.gmra.mxu0 %v10092_v30  ;;  %v9006_v57 = vld [vmem:[#allocation3 + $0x51c] sm:$0xf]  ;;  %v7496_v21 = vor.u32 %v8942_v25, %v7493_v55 }
 0x6c1   :  { %4611 = vmatpush.bf16.msrb.mxu2 %v7620_v19  ;;  %4632 = vmatpush.bf16.msra.mxu0 %v7336_v16  ;;  %v7749_v58 = vld [vmem:[#allocation3 + $0x538] sm:$0xf0]  ;;  %v4376_v9 = vadd.f32 %v4375_v41, %v4362_v37 }
 0x6c2   :  { %4598 = vmatmul.bf16.vlgmr.msrb.gmra.mxu1 %v10100_v46  ;;  %v9070_v59 = vld [vmem:[#allocation3 + $0x71c] sm:$0xf]  ;;  %v7752_v61 = vor.u32 %v9006_v57, %v7749_v58 }
 0x6c3   :  { %4625 = vmatpush.bf16.msrb.mxu3 %v7876_v34  ;;  %4646 = vmatpush.bf16.msra.mxu1 %v7592_v62  ;;  %v8005_v60 = vld [vmem:[#allocation3 + $0x738] sm:$0xf0] }
 0x6c4   :  { %4612 = vmatmul.bf16.vlgmr.msrb.gmra.mxu2 %v10088_v2  ;;  %v7205_v0 = vld [vmem:[#allocation3 + $0xf8] sm:$0xf0]  ;;  %v8008_v10 = vor.u32 %v9070_v59, %v8005_v60 }
 0x6c5   :  { %4660 = vmatpush.bf16.msra.mxu2 %v7848_v36  ;;  %4633 = vmatpush.bf16.msra.mxu0 %v7304_v56  ;;  %v8934_v1 = vld [vmem:[#allocation3 + $0x2dc] sm:$0xf]  ;;  %v7208_v3 = vor.u32 %v8870_v63, %v7205_v0  ;;  %v4363_v33 = vpop.f32.mrf.mxu0 }
 0x6c6   :  { %4626 = vmatmul.bf16.vlgmr.msrb.gmra.mxu3 %v10096_v12  ;;  %v7461_v38 = vld [vmem:[#allocation3 + $0x2f8] sm:$0xf0] }
 0x6c7   :  { %4674 = vmatpush.bf16.msra.mxu3 %v8104_v35  ;;  %4647 = vmatpush.bf16.msra.mxu1 %v7560_v11  ;;  %v8998_v13 = vld [vmem:[#allocation3 + $0x4dc] sm:$0xf]  ;;  %v7464_v34 = vor.u32 %v8934_v1, %v7461_v38  ;;  %v4389_v62 = vpop.f32.mrf.mxu2  ;;  %v4377_v50 = vpop.f32.mrf.mxu1 }
 0x6c8   :  { %v7717_v18 = vld [vmem:[#allocation3 + $0x4f8] sm:$0xf0]  ;;  %v4390_v35 = vadd.f32 %v4389_v62, %v4376_v9  ;;  %v2947_v9 = vperm.slane %v10122_v53, 3 }
 0x6c9   :  { %4661 = vmatpush.bf16.msra.mxu2 %v7816_v4  ;;  %4634 = vmatpush.bf16.msra.mxu0 %v7272_v26  ;;  %v9062_v19 = vld [vmem:[#allocation3 + $0x6dc] sm:$0xf]  ;;  %v7720_v16 = vor.u32 %v8998_v13, %v7717_v18  ;;  %v4403_v20 = vpop.f32.mrf.mxu3 }
 0x6ca   :  { %v7973_v51 = vld [vmem:[#allocation3 + $0x6f8] sm:$0xf0]  ;;  %v10143_v11 = vadd.f32 %v4403_v20, %v4390_v35 }
 0x6cb   :  { %4675 = vmatpush.bf16.msra.mxu3 %v8072_v6  ;;  %4648 = vmatpush.bf16.msra.mxu1 %v7528_v28  ;;  %v8862_v36 = vld [vmem:[#allocation3 + $0x9c] sm:$0xf]  ;;  %v7976_v8 = vor.u32 %v9062_v19, %v7973_v51  ;;  %v4364_v6 = vadd.f32 %v4363_v33, %v2946_v14  ;;  %v2948_v33 = vperm.slane %v10122_v53, 4 }
 0x6cc   :  { %v7173_v52 = vld [vmem:[#allocation3 + $0xb8] sm:$0xf0] }
 0x6cd   :  { %4662 = vmatpush.bf16.msra.mxu2 %v7784_v48  ;;  %4635 = vmatpush.bf16.msra.mxu0 %v7240_v15  ;;  %v8926_v47 = vld [vmem:[#allocation3 + $0x29c] sm:$0xf]  ;;  %v7176_v4 = vor.u32 %v8862_v36, %v7173_v52  ;;  %v4378_v44 = vadd.f32 %v4377_v50, %v4364_v6 }
 0x6ce   :  { %v7429_v22 = vld [vmem:[#allocation3 + $0x2b8] sm:$0xf0] }
 0x6cf   :  { %4676 = vmatpush.bf16.msra.mxu3 %v8040_v54  ;;  %4649 = vmatpush.bf16.msra.mxu1 %v7496_v21  ;;  %v8990_v23 = vld [vmem:[#allocation3 + $0x49c] sm:$0xf]  ;;  %v7432_v43 = vor.u32 %v8926_v47, %v7429_v22  ;;  %v4391_v58 = vpop.f32.mrf.mxu2 }
 0x6d0   :  { %v7685_v27 = vld [vmem:[#allocation3 + $0x4b8] sm:$0xf0]  ;;  %v4392_v40 = vadd.f32 %v4391_v58, %v4378_v44 }
 0x6d1   :  { %4663 = vmatpush.bf16.msra.mxu2 %v7752_v61  ;;  %v9054_v29 = vld [vmem:[#allocation3 + $0x69c] sm:$0xf]  ;;  %4636 = vmatpush.bf16.msra.mxu0 %v7208_v3  ;;  %v7688_v31 = vor.u32 %v8990_v23, %v7685_v27  ;;  %v4405_v21 = vpop.f32.mrf.mxu3 }
 0x6d2   :  { %v7941_v56 = vld [vmem:[#allocation3 + $0x6b8] sm:$0xf0]  ;;  %v10145_v1 = vadd.f32 %v4405_v21, %v4392_v40 }
 0x6d3   :  { %4677 = vmatpush.bf16.msra.mxu3 %v8008_v10  ;;  %4650 = vmatpush.bf16.msra.mxu1 %v7464_v34  ;;  %v8854_v5 = vld [vmem:[#allocation3 + $0x5c] sm:$0xf]  ;;  %v7944_v49 = vor.u32 %v9054_v29, %v7941_v56 }
 0x6d4   :  { %v7141_v32 = vld [vmem:[#allocation3 + $0x78] sm:$0xf0] }
 0x6d5   :  { %4664 = vmatpush.bf16.msra.mxu2 %v7720_v16  ;;  %v8918_v45 = vld [vmem:[#allocation3 + $0x25c] sm:$0xf]  ;;  %4637 = vmatpush.bf16.msra.mxu0 %v7176_v4  ;;  %v7144_v54 = vor.u32 %v8854_v5, %v7141_v32  ;;  %v2949_v32 = vperm.slane %v10122_v53, 5 }
 0x6d6   :  { %v7397_v26 = vld [vmem:[#allocation3 + $0x278] sm:$0xf0] }
 0x6d7   :  { %4678 = vmatpush.bf16.msra.mxu3 %v7976_v8  ;;  %v8982_v28 = vld [vmem:[#allocation3 + $0x45c] sm:$0xf]  ;;  %4651 = vmatpush.bf16.msra.mxu1 %v7432_v43  ;;  %v7400_v55 = vor.u32 %v8918_v45, %v7397_v26 }
 0x6d8   :  { %v7653_v48 = vld [vmem:[#allocation3 + $0x478] sm:$0xf0] }
 0x6d9   :  { %v9046_v24 = vld [vmem:[#allocation3 + $0x65c] sm:$0xf]  ;;  %4665 = vmatpush.bf16.msra.mxu2 %v7688_v31  ;;  %v7656_v57 = vor.u32 %v8982_v28, %v7653_v48  ;;  %4638 = vmatpush.bf16.msra.mxu0 %v7144_v54 }
 0x6da   :  { %v7909_v25 = vld [vmem:[#allocation3 + $0x678] sm:$0xf0] }
 0x6db   :  { %v8846_v59 = vld [vmem:[#allocation3 + $0x1c] sm:$0xf]  ;;  %4679 = vmatpush.bf16.msra.mxu3 %v7944_v49  ;;  %v7912_v15 = vor.u32 %v9046_v24, %v7909_v25  ;;  %4652 = vmatpush.bf16.msra.mxu1 %v7400_v55 }
 0x6dc   :  { %v7109_v60 = vld [vmem:[#allocation3 + $0x38] sm:$0xf0] }
 0x6dd   :  { %v8910_v14 = vld [vmem:[#allocation3 + $0x21c] sm:$0xf]  ;;  %v7112_v10 = vor.u32 %v8846_v59, %v7109_v60  ;;  %4666 = vmatpush.bf16.msra.mxu2 %v7656_v57  ;;  %v4417_v19 = vpop.f32.mrf.mxu0 }
 0x6de   :  { %v7365_v61 = vld [vmem:[#allocation3 + $0x238] sm:$0xf0]  ;;  %v4418_v51 = vadd.f32 %v4417_v19, %v2947_v9 }
 0x6df   :  { %v8974_v37 = vld [vmem:[#allocation3 + $0x41c] sm:$0xf]  ;;  %v7368_v38 = vor.u32 %v8910_v14, %v7365_v61  ;;  %4680 = vmatpush.bf16.msra.mxu3 %v7912_v15  ;;  %4639 = vmatpush.bf16.msra.mxu0 %v7112_v10  ;;  %v4431_v3 = vpop.f32.mrf.mxu1  ;;  %v4698_v14 = vmul.f32 0.02, %v10145_v1 }
 0x6e0   :  { %v7621_v41 = vld [vmem:[#allocation3 + $0x438] sm:$0xf0]  ;;  %v4432_v34 = vadd.f32 %v4431_v3, %v4418_v51  ;;  %v4696_v3 = vmul.f32 0.02, %v10127_v7 }
 0x6e1   :  { %v9038_v63 = vld [vmem:[#allocation3 + $0x61c] sm:$0xf]  ;;  %v7624_v13 = vor.u32 %v8974_v37, %v7621_v41  ;;  %4653 = vmatpush.bf16.msra.mxu1 %v7368_v38  ;;  %v4697_v41 = vmul.f32 0.02, %v10136_v42 }
 0x6e2   :  { %v7877_v0 = vld [vmem:[#allocation3 + $0x638] sm:$0xf0]  ;;  %4640 = vmatmul.bf16.vlgmr.msra.gmra.mxu0 %v10092_v30 }
 0x6e3   :  { %v7880_v18 = vor.u32 %v9038_v63, %v7877_v0  ;;  %4667 = vmatpush.bf16.msra.mxu2 %v7624_v13  ;;  %v4690_v13 = vmul.f32 0.02, %v10143_v11 }
 0x6e4   :  { %4654 = vmatmul.bf16.vlgmr.msra.gmra.mxu1 %v10100_v46 }
 0x6e5   :  { %4681 = vmatpush.bf16.msra.mxu3 %v7880_v18  ;;  %v4419_v47 = vpop.f32.mrf.mxu0  ;;  %v10160_v18 = vmax.f32 %v10145_v1, %v4698_v14  ;;  %v10173_v1 = vmax.f32 %v10143_v11, %v4690_v13 }
 0x6e6   :  { %4668 = vmatmul.bf16.vlgmr.msra.gmra.mxu2 %v10088_v2  ;;  %v4420_v8 = vadd.f32 %v4419_v47, %v2947_v9 }
 0x6e7   :  { %v4445_v16 = vpop.f32.mrf.mxu2  ;;  %v4433_v35 = vpop.f32.mrf.mxu1 }
 0x6e8   :  { %4682 = vmatmul.bf16.vlgmr.msra.gmra.mxu3 %v10096_v12  ;;  %v4446_v62 = vadd.f32 %v4445_v16, %v4432_v34  ;;  %v4434_v30 = vadd.f32 %v4433_v35, %v4420_v8  ;;  %v4689_v34 = vmul.f32 0.02, %v10134_v17  ;;  %v10165_v16 = vmax.f32 %v10136_v42, %v4697_v41 }
 0x6e9   :  { %v4459_v36 = vpop.f32.mrf.mxu3  ;;  %v4730_v35 = vmul.f32 0.0, %v10160_v18  ;;  %v10180_v42 = vmax.f32 %v10127_v7, %v4696_v3 }
 0x6ea   :  { %v4460_v52 = vadd.f32 %v4459_v36, %v4446_v62 }
 0x6ec   :  { %v4691_v63 = vmul.f32 0.02, %v4460_v52 }
 0x6ee   :  { %v10167_v62 = vmax.f32 %v4460_v52, %v4691_v63  ;;  %v10183_v52 = vmax.f32 %v10134_v17, %v4689_v34  ;;  %v4728_v17 = vmul.f32 0.0, %v10180_v42 }
 0x6ef   :  { %v4447_v20 = vpop.f32.mrf.mxu2 }
 0x6f0   :  { %v4448_v46 = vadd.f32 %v4447_v20, %v4434_v30 }
 0x6f1   :  { %v4461_v22 = vpop.f32.mrf.mxu3 }
 0x6f2   :  { %v4462_v2 = vadd.f32 %v4461_v22, %v4448_v46  ;;  %v4688_v46 = vmul.f32 0.02, %v10125_v39  ;;  %v4729_v22 = vmul.f32 0.0, %v10165_v16 }
 0x6f4   :  { %v4699_v59 = vmul.f32 0.02, %v4462_v2  ;;  %v10195_v7 = vmax.f32 %v10125_v39, %v4688_v46 }
 0x6f6   :  { %v10156_v0 = vmax.f32 %v4462_v2, %v4699_v59 }
 0x6f8   :  { %v4731_v36 = vmul.f32 0.0, %v10156_v0 }
 0x6fa   :  { %v4757_v2 = vadd.f32 %v4731_v36, %v10167_v62 }
 0x6fd   :  { %v4473_v23 = vpop.f32.mrf.mxu0 }
 0x6fe   :  { %v4474_v49 = vadd.f32 %v4473_v23, %v2948_v33 }
 0x6ff   :  { %v4487_v12 = vpop.f32.mrf.mxu1 }
 0x700   :  { %v4488_v25 = vadd.f32 %v4487_v12, %v4474_v49  ;;  %v4750_v12 = vadd.f32 %v4730_v35, %v10173_v1 }
 0x705   :  { %v4475_v56 = vpop.f32.mrf.mxu0 }
 0x706   :  { %v4476_v50 = vadd.f32 %v4475_v56, %v2948_v33  ;;  %v4743_v56 = vadd.f32 %v4729_v22, %v10183_v52 }
 0x707   :  { %v4501_v27 = vpop.f32.mrf.mxu2  ;;  %v4489_v4 = vpop.f32.mrf.mxu1 }
 0x708   :  { %v4490_v26 = vadd.f32 %v4489_v4, %v4476_v50  ;;  %v4502_v15 = vadd.f32 %v4501_v27, %v4488_v25  ;;  %v4758_v4 = vrot.slane %v4757_v2, 4 }
 0x709   :  { %v4515_v29 = vpop.f32.mrf.mxu3 }
 0x70a   :  { %v4516_v9 = vadd.f32 %v4515_v29, %v4502_v15  ;;  %v4759_v39 = vadd.f32 %v4758_v4, %v4757_v2 }
 0x70c   :  { %v4692_v30 = vmul.f32 0.02, %v4516_v9 }
 0x70e   :  { %v10191_v27 = vmax.f32 %v4516_v9, %v4692_v30 }
 0x70f   :  { %v4503_v43 = vpop.f32.mrf.mxu2 }
 0x710   :  { %v4504_v54 = vadd.f32 %v4503_v43, %v4490_v26  ;;  %v4751_v43 = vrot.slane %v4750_v12, 4 }
 0x711   :  { %v4517_v31 = vpop.f32.mrf.mxu3 }
 0x712   :  { %v4518_v40 = vadd.f32 %v4517_v31, %v4504_v54 }
 0x714   :  { %v4700_v19 = vmul.f32 0.02, %v4518_v40 }
 0x716   :  { %v10176_v20 = vmax.f32 %v4518_v40, %v4700_v19 }
 0x718   :  { %v4732_v29 = vmul.f32 0.0, %v10176_v20 }
 0x71a   :  { %v4764_v31 = vadd.f32 %v4732_v29, %v10191_v27 }
 0x71d   :  { %v4529_v6 = vpop.f32.mrf.mxu0 }
 0x71e   :  { %v4530_v45 = vadd.f32 %v4529_v6, %v2949_v32  ;;  %v2950_v6 = vperm.slane %v10122_v53, 6 }
 0x71f   :  { %v4543_v5 = vpop.f32.mrf.mxu1 }
 0x720   :  { %v4544_v44 = vadd.f32 %v4543_v5, %v4530_v45  ;;  %v4736_v5 = vadd.f32 %v4728_v17, %v10195_v7 }
 0x725   :  { %v4531_v24 = vpop.f32.mrf.mxu0 }
 0x726   :  { %v4532_v55 = vadd.f32 %v4531_v24, %v2949_v32  ;;  %v4744_v32 = vrot.slane %v4743_v56, 4  ;;  %v4737_v24 = vrot.slane %v4736_v5, 4 }
 0x727   :  { %v4557_v28 = vpop.f32.mrf.mxu2  ;;  %v4545_v57 = vpop.f32.mrf.mxu1 }
 0x728   :  { %v4546_v58 = vadd.f32 %v4545_v57, %v4532_v55  ;;  %v4558_v60 = vadd.f32 %v4557_v28, %v4544_v44  ;;  %v4752_v28 = vadd.f32 %v4751_v43, %v4750_v12  ;;  %v4745_v25 = vadd.f32 %v4744_v32, %v4743_v56 }
 0x729   :  { %v4571_v48 = vpop.f32.mrf.mxu3  ;;  %v4760_v55 = vrot.slane %v4759_v39, 2  ;;  %v4738_v15 = vadd.f32 %v4737_v24, %v4736_v5 }
 0x72a   :  { %v4572_v10 = vadd.f32 %v4571_v48, %v4558_v60  ;;  %v4765_v48 = vrot.slane %v4764_v31, 4  ;;  %v4753_v59 = vrot.slane %v4752_v28, 2  ;;  %v4746_v40 = vrot.slane %v4745_v25, 2 }
 0x72b   :  { %v4739_v9 = vrot.slane %v4738_v15, 2 }
 0x72c   :  { %v4693_v47 = vmul.f32 0.02, %v4572_v10  ;;  %v4766_v60 = vadd.f32 %v4765_v48, %v4764_v31  ;;  %v4754_v63 = vadd.f32 %v4753_v59, %v4752_v28  ;;  %v4747_v19 = vadd.f32 %v4746_v40, %v4745_v25 }
 0x72d   :  { %v4740_v2 = vadd.f32 %v4739_v9, %v4738_v15 }
 0x72e   :  { %v10187_v23 = vmax.f32 %v4572_v10, %v4693_v47  ;;  %v4767_v10 = vrot.slane %v4766_v60, 2  ;;  %v4755_v35 = vrot.slane %v4754_v63, 1 }
 0x72f   :  { %v4559_v21 = vpop.f32.mrf.mxu2  ;;  %v4741_v31 = vrot.slane %v4740_v2, 1 }
 0x730   :  { %v4560_v61 = vadd.f32 %v4559_v21, %v4546_v58  ;;  %v4768_v30 = vadd.f32 %v4767_v10, %v4766_v60  ;;  %v4756_v56 = vadd.f32 %v4755_v35, %v4754_v63 }
 0x731   :  { %v4573_v37 = vpop.f32.mrf.mxu3 }
 0x732   :  { %v4574_v38 = vadd.f32 %v4573_v37, %v4560_v61  ;;  %v4761_v37 = vadd.f32 %v4760_v55, %v4759_v39  ;;  %v4769_v4 = vrot.slane %v4768_v30, 1 }
 0x734   :  { %v4701_v51 = vmul.f32 0.02, %v4574_v38  ;;  %v4762_v3 = vrot.slane %v4761_v37, 1 }
 0x736   :  { %v10170_v8 = vmax.f32 %v4574_v38, %v4701_v51  ;;  %v4763_v12 = vadd.f32 %v4762_v3, %v4761_v37 }
 0x738   :  { %v4733_v11 = vmul.f32 0.0, %v10170_v8 }
 0x73a   :  { %v4771_v33 = vadd.f32 %v4733_v11, %v10187_v23  ;;  %v4748_v11 = vrot.slane %v4747_v19, 1 }
 0x73c   :  { %v4772_v26 = vrot.slane %v4771_v33, 4 }
 0x73d   :  { %v4585_v50 = vpop.f32.mrf.mxu0 }
 0x73e   :  { %v4586_v45 = vadd.f32 %v4585_v50, %v2950_v6  ;;  %v4773_v57 = vadd.f32 %v4772_v26, %v4771_v33  ;;  %v10207_v50 = vmul.f32 0.125, %v4763_v12  ;;  %v4742_v26 = vadd.f32 %v4741_v31, %v4740_v2 }
 0x73f   :  { %v4599_v49 = vpop.f32.mrf.mxu1 }
 0x740   :  { %v4600_v44 = vadd.f32 %v4599_v49, %v4586_v45  ;;  %v4774_v41 = vrot.slane %v4773_v57, 2  ;;  %v10210_v45 = vmul.f32 0.125, %v4756_v56  ;;  %v4770_v49 = vadd.f32 %v4769_v4, %v4768_v30 }
 0x741   :  { %v4811_v48 = vsub.f32 %v10156_v0, %v10207_v50  ;;  %v10223_v60 = vmul.f32 0.125, %v4742_v26 }
 0x742   :  { %v4775_v34 = vadd.f32 %v4774_v41, %v4773_v57  ;;  %v4810_v25 = vsub.f32 %v10160_v18, %v10210_v45  ;;  %v9285_v57 = vld [vmem:[#allocation14] ss:$4 sm:$0xff]  ;;  %v4803_v41 = vsub.f32 %v10167_v62, %v10207_v50  ;;  %v4802_v9 = vsub.f32 %v10173_v1, %v10210_v45 }
 0x744   :  { %v4776_v29 = vrot.slane %v4775_v34, 1  ;;  %v4835_v30 = vmul.f32 %v4803_v41, %v4803_v41  ;;  %v4834_v56 = vmul.f32 %v4802_v9, %v4802_v9 }
 0x745   :  { %v4587_v14 = vpop.f32.mrf.mxu0 }
 0x746   :  { %v4588_v21 = vadd.f32 %v4587_v14, %v2950_v6  ;;  %v4749_v6 = vadd.f32 %v4748_v11, %v4747_v19  ;;  %v4777_v5 = vadd.f32 %v4776_v29, %v4775_v34  ;;  %v4827_v14 = vmul.f32 0.0, %v4811_v48 }
 0x747   :  { %v4613_v54 = vpop.f32.mrf.mxu2  ;;  %v4601_v61 = vpop.f32.mrf.mxu1 }
 0x748   :  { %v4614_v53 = vadd.f32 %v4613_v54, %v4600_v44  ;;  %v4602_v38 = vadd.f32 %v4601_v61, %v4588_v21  ;;  %v10213_v28 = vmul.f32 0.125, %v4749_v6  ;;  %v10217_v44 = vmul.f32 0.125, %v4777_v5 }
 0x749   :  { %v4627_v58 = vpop.f32.mrf.mxu3  ;;  %v10221_v54 = vmul.f32 0.125, %v4770_v49  ;;  %v4826_v21 = vmul.f32 0.0, %v4810_v25  ;;  %v4843_v19 = vmul.f32 %v4827_v14, %v4827_v14  ;;  %v4800_v49 = vsub.f32 %v10195_v7, %v10223_v60 }
 0x74a   :  { %v4628_v13 = vadd.f32 %v4627_v58, %v4614_v53  ;;  %v2951_v58 = vperm.slane %v9285_v57, 7  ;;  %v4809_v53 = vsub.f32 %v10165_v16, %v10213_v28  ;;  %v4813_v15 = vsub.f32 %v10170_v8, %v10217_v44 }
 0x74b   :  { %v4812_v61 = vsub.f32 %v10176_v20, %v10221_v54  ;;  %v4801_v34 = vsub.f32 %v10183_v52, %v10213_v28  ;;  %v4804_v4 = vsub.f32 %v10191_v27, %v10221_v54  ;;  %v4869_v31 = vadd.f32 %v4843_v19, %v4835_v30 }
 0x74c   :  { %v4694_v46 = vmul.f32 0.02, %v4628_v13 }
 0x74d   :  { %v4836_v14 = vmul.f32 %v4804_v4, %v4804_v4 }
 0x74e   :  { %v10203_v33 = vmax.f32 %v4628_v13, %v4694_v46  ;;  %v4825_v13 = vmul.f32 0.0, %v4809_v53  ;;  %v4805_v46 = vsub.f32 %v10187_v23, %v10217_v44 }
 0x74f   :  { %v4615_v51 = vpop.f32.mrf.mxu2 }
 0x750   :  { %v4616_v36 = vadd.f32 %v4615_v51, %v4602_v38  ;;  %v4808_v38 = vsub.f32 %v10180_v42, %v10223_v60  ;;  %v4829_v51 = vmul.f32 0.0, %v4813_v15 }
 0x751   :  { %v4629_v47 = vpop.f32.mrf.mxu3 }
 0x752   :  { %v4630_v22 = vadd.f32 %v4629_v47, %v4616_v36  ;;  %v4842_v36 = vmul.f32 %v4826_v21, %v4826_v21  ;;  %v4828_v47 = vmul.f32 0.0, %v4812_v61  ;;  %v4824_v29 = vmul.f32 0.0, %v4808_v38 }
 0x753   :  { %v4845_v6 = vmul.f32 %v4829_v51, %v4829_v51 }
 0x754   :  { %v4702_v17 = vmul.f32 0.02, %v4630_v22  ;;  %v4862_v26 = vadd.f32 %v4842_v36, %v4834_v56  ;;  %v4844_v48 = vmul.f32 %v4828_v47, %v4828_v47 }
 0x756   :  { %v10205_v43 = vmax.f32 %v4630_v22, %v4702_v17  ;;  %v4841_v17 = vmul.f32 %v4825_v13, %v4825_v13  ;;  %v4863_v41 = vrot.slane %v4862_v26, 4 }
 0x758   :  { %v4734_v32 = vmul.f32 0.0, %v10205_v43 }
 0x75a   :  { %v4778_v39 = vadd.f32 %v4734_v32, %v10203_v33 }
 0x75c   :  { %v4779_v24 = vrot.slane %v4778_v39, 4 }
 0x75e   :  { %v4780_v55 = vadd.f32 %v4779_v24, %v4778_v39  ;;  %v4833_v39 = vmul.f32 %v4801_v34, %v4801_v34  ;;  %v4837_v24 = vmul.f32 %v4805_v46, %v4805_v46  ;;  %v4864_v46 = vadd.f32 %v4863_v41, %v4862_v26 }
 0x75f   :  { %v4641_v59 = vpop.f32.mrf.mxu0 }
 0x760   :  { %v4781_v40 = vrot.slane %v4780_v55, 2  ;;  %v4642_v10 = vadd.f32 %v4641_v59, %v2951_v58  ;;  %v4840_v59 = vmul.f32 %v4824_v29, %v4824_v29  ;;  %v4855_v53 = vadd.f32 %v4841_v17, %v4833_v39 }
 0x761   :  { %v4655_v37 = vpop.f32.mrf.mxu1 }
 0x762   :  { %v4782_v63 = vadd.f32 %v4781_v40, %v4780_v55  ;;  %v4656_v2 = vadd.f32 %v4655_v37, %v4642_v10  ;;  %v4870_v40 = vrot.slane %v4869_v31, 4  ;;  %v4832_v37 = vmul.f32 %v4800_v49, %v4800_v49 }
 0x764   :  { %v4783_v3 = vrot.slane %v4782_v63, 1  ;;  %v4848_v51 = vadd.f32 %v4840_v59, %v4832_v37  ;;  %v4871_v36 = vadd.f32 %v4870_v40, %v4869_v31 }
 0x766   :  { %v4784_v22 = vadd.f32 %v4783_v3, %v4782_v63  ;;  %v4876_v63 = vadd.f32 %v4844_v48, %v4836_v14  ;;  %v4856_v3 = vrot.slane %v4855_v53, 4  ;;  %v4849_v17 = vrot.slane %v4848_v51, 4 }
 0x767   :  { %v4643_v12 = vpop.f32.mrf.mxu0  ;;  %v4872_v4 = vrot.slane %v4871_v36, 2 }
 0x768   :  { %v10243_v5 = vmul.f32 0.125, %v4784_v22  ;;  %v4644_v32 = vadd.f32 %v4643_v12, %v2951_v58  ;;  %v4883_v58 = vadd.f32 %v4845_v6, %v4837_v24  ;;  %v4877_v22 = vrot.slane %v4876_v63, 4 }
 0x769   :  { %v4669_v35 = vpop.f32.mrf.mxu2  ;;  %v4657_v15 = vpop.f32.mrf.mxu1  ;;  %v4857_v56 = vadd.f32 %v4856_v3, %v4855_v53  ;;  %v4850_v24 = vadd.f32 %v4849_v17, %v4848_v51  ;;  %v4873_v26 = vadd.f32 %v4872_v4, %v4871_v36 }
 0x76a   :  { %v4806_v25 = vsub.f32 %v10203_v33, %v10243_v5  ;;  %v4814_v55 = vsub.f32 %v10205_v43, %v10243_v5  ;;  %v4670_v57 = vadd.f32 %v4669_v35, %v4656_v2  ;;  %v4658_v61 = vadd.f32 %v4657_v15, %v4644_v32 }
 0x76b   :  { %v4683_v11 = vpop.f32.mrf.mxu3  ;;  %v4884_v47 = vrot.slane %v4883_v58, 4  ;;  %v4878_v49 = vadd.f32 %v4877_v22, %v4876_v63  ;;  %v4851_v40 = vrot.slane %v4850_v24, 2 }
 0x76c   :  { %v4830_v21 = vmul.f32 0.0, %v4814_v55  ;;  %v4838_v38 = vmul.f32 %v4806_v25, %v4806_v25  ;;  %v4684_v9 = vadd.f32 %v4683_v11, %v4670_v57  ;;  %v4865_v11 = vrot.slane %v4864_v46, 2 }
 0x76d   :  { %v4885_v6 = vadd.f32 %v4884_v47, %v4883_v58  ;;  %v4858_v25 = vrot.slane %v4857_v56, 2  ;;  %v4879_v14 = vrot.slane %v4878_v49, 2 }
 0x76e   :  { %v4846_v13 = vmul.f32 %v4830_v21, %v4830_v21  ;;  %v4695_v12 = vmul.f32 0.02, %v4684_v9  ;;  %v4866_v59 = vadd.f32 %v4865_v11, %v4864_v46  ;;  %v4874_v21 = vrot.slane %v4873_v26, 1 }
 0x76f   :  { %v4886_v55 = vrot.slane %v4885_v6, 2  ;;  %v4859_v58 = vadd.f32 %v4858_v25, %v4857_v56  ;;  %v4880_v63 = vadd.f32 %v4879_v14, %v4878_v49 }
 0x770   :  { %v4890_v35 = vadd.f32 %v4846_v13, %v4838_v38  ;;  %v10253_v48 = vmax.f32 %v4684_v9, %v4695_v12  ;;  %v4867_v41 = vrot.slane %v4866_v59, 1  ;;  %v4852_v13 = vadd.f32 %v4851_v40, %v4850_v24 }
 0x771   :  { %v4671_v10 = vpop.f32.mrf.mxu2  ;;  %v4860_v9 = vrot.slane %v4859_v58, 1  ;;  %v4881_v36 = vrot.slane %v4880_v63, 1 }
 0x772   :  { %v4672_v19 = vadd.f32 %v4671_v10, %v4658_v61  ;;  %v4891_v2 = vrot.slane %v4890_v35, 4  ;;  %v4887_v61 = vadd.f32 %v4886_v55, %v4885_v6 }
 0x773   :  { %v4685_v34 = vpop.f32.mrf.mxu3  ;;  %v4861_v46 = vadd.f32 %v4860_v9, %v4859_v58  ;;  %v4882_v17 = vadd.f32 %v4881_v36, %v4880_v63 }
 0x774   :  { %v4686_v30 = vadd.f32 %v4685_v34, %v4672_v19  ;;  %v4892_v39 = vadd.f32 %v4891_v2, %v4890_v35  ;;  %v4875_v19 = vadd.f32 %v4874_v21, %v4873_v26  ;;  %v4888_v51 = vrot.slane %v4887_v61, 1 }
 0x775   :  { %v4868_v34 = vadd.f32 %v4867_v41, %v4866_v59  ;;  %v4905_v11 = vmul.f32 0.125, %v4861_v46  ;;  %v4908_v26 = vmul.f32 0.125, %v4882_v17 }
 0x776   :  { %v4703_v29 = vmul.f32 0.02, %v4686_v30  ;;  %v4893_v53 = vrot.slane %v4892_v39, 2  ;;  %v4907_v22 = vmul.f32 0.125, %v4875_v19  ;;  %v4889_v2 = vadd.f32 %v4888_v51, %v4887_v61 }
 0x777   :  { %v10267_v14 = vadd.f32 1e-05, %v4905_v11  ;;  %v10273_v58 = vadd.f32 1e-05, %v4908_v26 }
 0x778   :  { %v10251_v32 = vmax.f32 %v4686_v30, %v4703_v29  ;;  %v4894_v10 = vadd.f32 %v4893_v53, %v4892_v39  ;;  %v4853_v30 = vrot.slane %v4852_v13, 1  ;;  %v4906_v29 = vmul.f32 0.125, %v4868_v34 }
 0x779   :  { %v10259_v49 = vadd.f32 1e-05, %v4907_v22  ;;  %v4909_v39 = vmul.f32 0.125, %v4889_v2  ;;  %vm4938_vm3 = vweird.f32 %v10267_v14 }
 0x77a   :  { %v4735_v31 = vmul.f32 0.0, %v10251_v32  ;;  %v4895_v47 = vrot.slane %v4894_v10, 1  ;;  %v4854_v6 = vadd.f32 %v4853_v30, %v4852_v13  ;;  %v10265_v25 = vadd.f32 1e-05, %v4906_v29 }
 0x77b   :  { %9269 = vrsqrt.f32 %v10259_v49  ;;  %v10270_v53 = vadd.f32 1e-05, %v4909_v39  ;;  %vm4958_vm13 = vweird.f32 %v10259_v49 }
 0x77c   :  { %v4785_v57 = vadd.f32 %v4735_v31, %v10253_v48  ;;  %v4896_v56 = vadd.f32 %v4895_v47, %v4894_v10  ;;  %v4904_v59 = vmul.f32 0.125, %v4854_v6  ;;  %9271 = vrsqrt.f32 %v10265_v25 }
 0x77d   :  { %9273 = vrsqrt.f32 %v10267_v14  ;;  %vm4948_vm15 = vweird.f32 %v10265_v25  ;;  %vm4978_vm6 = vweird.f32 %v10270_v53 }
 0x77e   :  { %v4786_v15 = vrot.slane %v4785_v57, 4  ;;  %v4910_v55 = vmul.f32 0.125, %v4896_v56  ;;  %9275 = vrsqrt.f32 %v10270_v53 }
 0x77f   :  { %9277 = vrsqrt.f32 %v10273_v58 }
 0x780   :  { %v4787_v37 = vadd.f32 %v4786_v15, %v4785_v57  ;;  %v10275_v21 = vadd.f32 1e-05, %v4910_v55 }
 0x781   :  { %v10282_v63 = vpop.eup %9269 }
 0x782   :  { %v4788_v38 = vrot.slane %v4787_v37, 2  ;;  %9279 = vrsqrt.f32 %v10275_v21  ;;  %v4953_v19 = vmul.f32 %v10282_v63, %v10259_v49  ;;  %vm4959_vm9 = vweird.f32 %v10282_v63 }
 0x783   :  { %vm10327_vm0 = vmor %vm4958_vm13, %vm4959_vm9  ;;  %vm4968_vm9 = vweird.f32 %v10273_v58 }
 0x784   :  { %v4789_v3 = vadd.f32 %v4788_v38, %v4787_v37  ;;  %v10277_v37 = vadd.f32 1e-05, %v4904_v59  ;;  %v10285_v38 = vpop.eup %9271  ;;  %v4954_v22 = vmul.f32 %v10282_v63, %v4953_v19 }
 0x785   :  { %v10288_v9 = vpop.eup %9273  ;;  %vm4949_vm12 = vweird.f32 %v10285_v38 }
 0x786   :  { %v4790_v35 = vrot.slane %v4789_v3, 1  ;;  %9281 = vrsqrt.f32 %v10277_v37  ;;  %v10292_v51 = vpop.eup %9275  ;;  %vm4939_vm14 = vweird.f32 %v10288_v9  ;;  %vm10331_vm1 = vmor %vm4948_vm15, %vm4949_vm12 }
 0x787   :  { %v10296_v36 = vpop.eup %9277  ;;  %v4973_v2 = vmul.f32 %v10292_v51, %v10270_v53  ;;  %vm4979_vm2 = vweird.f32 %v10292_v51  ;;  %vm10346_vm5 = vmor %vm4938_vm3, %vm4939_vm14  ;;  %vm4988_vm14 = vweird.f32 %v10275_v21  ;;  %vm4928_vm3 = vweird.f32 %v10277_v37 }
 0x788   :  { %v4791_v12 = vadd.f32 %v4790_v35, %v4789_v3  ;;  %v4943_v3 = vmul.f32 %v10285_v38, %v10265_v25  ;;  %v10298_v47 = vpop.eup %9279  ;;  %v4933_v35 = vmul.f32 %v10288_v9, %v10267_v14  ;;  %v4963_v29 = vmul.f32 %v10296_v36, %v10273_v58  ;;  %vm10357_vm12 = vmor %vm4978_vm6, %vm4979_vm2 }
 0x789   :  { %v4983_v56 = vmul.f32 %v10298_v47, %v10275_v21  ;;  %vm4969_vm4 = vweird.f32 %v10296_v36  ;;  %vm4989_vm7 = vweird.f32 %v10298_v47  ;;  %vm5022_vm6 = vcmask 1046534  }
 0x78a   :  { %v10257_v4 = vmul.f32 0.125, %v4791_v12  ;;  %v4944_v12 = vmul.f32 %v10285_v38, %v4943_v3  ;;  %v4934_v11 = vmul.f32 %v10288_v9, %v4933_v35  ;;  %v4964_v55 = vmul.f32 %v10296_v36, %v4963_v29  ;;  %vm10361_vm13 = vmor %vm4968_vm9, %vm4969_vm4 }
 0x78b   :  { %v4984_v59 = vmul.f32 %v10298_v47, %v4983_v56  ;;  %vm5024_vm9 = vcmask 1045508  }
 0x78c   :  { %v4807_v31 = vsub.f32 %v10253_v48, %v10257_v4  ;;  %v4815_v24 = vsub.f32 %v10251_v32, %v10257_v4  ;;  %v10302_v46 = vpop.eup %9281  ;;  %v4945_v26 = vmul.f32 0.5, %v4944_v12 }
 0x78d   :  { %v4923_v6 = vmul.f32 %v10302_v46, %v10277_v37  ;;  %v4985_v19 = vmul.f32 0.5, %v4984_v59 }
 0x78e   :  { %v4831_v57 = vmul.f32 0.0, %v4815_v24  ;;  %v4839_v15 = vmul.f32 %v4807_v31, %v4807_v31  ;;  %v4955_v31 = vmul.f32 0.5, %v4954_v22  ;;  %v4974_v24 = vmul.f32 %v10292_v51, %v4973_v2 }
 0x78f   :  { %v4986_v29 = vsub.f32 1.5, %v4985_v19 }
 0x790   :  { %v4847_v40 = vmul.f32 %v4831_v57, %v4831_v57 }
 0x792   :  { %v4897_v61 = vadd.f32 %v4847_v40, %v4839_v15  ;;  %v4924_v15 = vmul.f32 %v10302_v46, %v4923_v6  ;;  %v4935_v40 = vmul.f32 0.5, %v4934_v11 }
 0x794   :  { %v4898_v41 = vrot.slane %v4897_v61, 4  ;;  %v4925_v3 = vmul.f32 0.5, %v4924_v15 }
 0x796   :  { %v4899_v10 = vadd.f32 %v4898_v41, %v4897_v61  ;;  %v4956_v61 = vsub.f32 1.5, %v4955_v31  ;;  %v4975_v41 = vmul.f32 0.5, %v4974_v24  ;;  %v4926_v56 = vsub.f32 1.5, %v4925_v3 }
 0x798   :  { %v4900_v13 = vrot.slane %v4899_v10, 2  ;;  %v4957_v35 = vmul.f32 %v10282_v63, %v4956_v61 }
 0x79a   :  { %v4901_v34 = vadd.f32 %v4900_v13, %v4899_v10  ;;  %v4946_v10 = vsub.f32 1.5, %v4945_v26  ;;  %v4965_v13 = vmul.f32 0.5, %v4964_v55  ;;  %v4961_v49 = vsel %vm10327_vm0, %v10282_v63, %v4957_v35 }
 0x79b   :  { %v4987_v63 = vmul.f32 %v10298_v47, %v4986_v29  ;;  %vm4929_vm0 = vweird.f32 %v10302_v46 }
 0x79c   :  { %v4902_v30 = vrot.slane %v4901_v34, 1  ;;  %v4947_v2 = vmul.f32 %v10285_v38, %v4946_v10  ;;  %v4966_v12 = vsub.f32 1.5, %v4965_v13 }
 0x79e   :  { %v4903_v17 = vadd.f32 %v4902_v30, %v4901_v34  ;;  %v4936_v34 = vsub.f32 1.5, %v4935_v40  ;;  %v4976_v30 = vsub.f32 1.5, %v4975_v41  ;;  %v4951_v25 = vsel %vm10331_vm1, %v10285_v38, %v4947_v2  ;;  %vm4990_vm1 = vmor %vm4988_vm14, %vm4989_vm7 }
 0x79f   :  { %v4967_v26 = vmul.f32 %v10296_v36, %v4966_v12  ;;  %v5012_v38 = vrot.slane %v4961_v49, 5  ;;  %v5011_v58 = vrot.slane %v4951_v25, 6  ;;  %v4991_v10 = vsel %vm4990_vm1, %v10298_v47, %v4987_v63  ;;  %vm4930_vm7 = vmor %vm4928_vm3, %vm4929_vm0 }
 0x7a0   :  { %v4911_v39 = vmul.f32 0.125, %v4903_v17  ;;  %v4937_v6 = vmul.f32 %v10288_v9, %v4936_v34  ;;  %v4977_v31 = vmul.f32 %v10292_v51, %v4976_v30  ;;  %v5015_v35 = vrot.slane %v4991_v10, 2 }
 0x7a1   :  { %v4971_v41 = vsel %vm10361_vm13, %v10296_v36, %v4967_v26  ;;  %v5018_v19 = vsel %vm1368_vm8, %v5011_v58, %v5012_v38 }
 0x7a2   :  { %v4921_v57 = vadd.f32 1e-05, %v4911_v39  ;;  %v4941_v14 = vsel %vm10346_vm5, %v10288_v9, %v4937_v6  ;;  %v4981_v53 = vsel %vm10357_vm12, %v10292_v51, %v4977_v31  ;;  %v4927_v9 = vmul.f32 %v10302_v46, %v4926_v56 }
 0x7a3   :  { %v5010_v51 = vrot.slane %v4941_v14, 7  ;;  %v5014_v21 = vrot.slane %v4981_v53, 3  ;;  %vm5020_vm5 = vcmask 1044484   ;;  %v5013_v34 = vrot.slane %v4971_v41, 4 }
 0x7a4   :  { %9283 = vrsqrt.f32 %v4921_v57  ;;  %vm4998_vm2 = vweird.f32 %v4921_v57  ;;  %v4931_v47 = vsel %vm4930_vm7, %v10302_v46, %v4927_v9  ;;  %vm5026_vm12 = vcmask 1043456  }
 0x7a5   :  { %v5017_v37 = vsel %vm650_vm11, %v4931_v47, %v5010_v51  ;;  %v5021_v30 = vsel %vm5020_vm5, %v5013_v34, %v5014_v21 }
 0x7aa   :  { %v9284_v22 = vpop.eup %9283 }
 0x7ab   :  { %v4993_v17 = vmul.f32 %v9284_v22, %v4921_v57  ;;  %vm4999_vm15 = vweird.f32 %v9284_v22  ;;  %v4913_v57 = vld [vmem:[#allocation14 + $0x1] ss:$4 sm:$0xff] }
 0x7ac   :  { %vm5000_vm4 = vmor %vm4998_vm2, %vm4999_vm15 }
 0x7ad   :  { %v4994_v24 = vmul.f32 %v9284_v22, %v4993_v17 }
 0x7af   :  { %v4995_v59 = vmul.f32 0.5, %v4994_v24 }
 0x7b1   :  { %v4996_v61 = vsub.f32 1.5, %v4995_v59 }
 0x7b3   :  { %v4997_v13 = vmul.f32 %v9284_v22, %v4996_v61 }
 0x7b5   :  { %v5001_v3 = vsel %vm5000_vm4, %v9284_v22, %v4997_v13  ;;  %v5019_v22 = vsel %vm1370_vm10, %v5017_v37, %v5018_v19 }
 0x7b6   :  { %v5016_v36 = vrot.slane %v5001_v3, 1 }
 0x7b8   :  { %v5023_v2 = vsel %vm5022_vm6, %v5015_v35, %v5016_v36 }
 0x7b9   :  { %v5025_v12 = vsel %vm5024_vm9, %v5021_v30, %v5023_v2 }
 0x7ba   :  { %v5027_v29 = vsel %vm5026_vm12, %v5019_v22, %v5025_v12 }
 0x7bb   :  { %v5029_v17 = vmul.f32 %v5027_v29, %v4913_v57 }
 0x7bd   :  { %v5033_v56 = vperm.slane %v5029_v17, 0  ;;  %v5034_v6 = vperm.slane %v5029_v17, 1  ;;  %v5035_v11 = vperm.slane %v5029_v17, 2  ;;  %v5036_v39 = vperm.slane %v5029_v17, 3 }
 0x7be   :  { %v5037_v46 = vperm.slane %v5029_v17, 4  ;;  %v5038_v49 = vperm.slane %v5029_v17, 5  ;;  %v5039_v31 = vperm.slane %v5029_v17, 6  ;;  %v5040_v24 = vperm.slane %v5029_v17, 7 }
 0x7bf   :  { %v5050_v25 = vmul.f32 %v5034_v6, %v10213_v28  ;;  %v5051_v26 = vmul.f32 %v5035_v11, %v10210_v45  ;;  %v5052_v55 = vmul.f32 %v5036_v39, %v10207_v50  ;;  %v5049_v15 = vmul.f32 %v5033_v56, %v10223_v60 }
 0x7c0   :  { %v5053_v63 = vmul.f32 %v5037_v46, %v10221_v54  ;;  %v5054_v59 = vmul.f32 %v5038_v49, %v10217_v44  ;;  %v5055_v14 = vmul.f32 %v5039_v31, %v10243_v5  ;;  %v5056_v38 = vmul.f32 %v5040_v24, %v10257_v4  ;;  %v5031_v5 = vld [vmem:[#allocation14 + $0x2] ss:$4 sm:$0xff] }
 0x7c1   :  { %v5065_v40 = vrot.slane %v5050_v25, 7  ;;  %v5066_v53 = vrot.slane %v5051_v26, 6  ;;  %v5067_v61 = vrot.slane %v5052_v55, 5  ;;  %v5081_v54 = vmul.f32 %v5033_v56, %v10195_v7 }
 0x7c2   :  { %v5068_v9 = vrot.slane %v5053_v63, 4  ;;  %v5069_v58 = vrot.slane %v5054_v59, 3  ;;  %v5070_v28 = vrot.slane %v5055_v14, 2  ;;  %v5071_v41 = vrot.slane %v5056_v38, 1 }
 0x7c3   :  { %v5072_v45 = vsel %vm650_vm11, %v5049_v15, %v5065_v40  ;;  %v5073_v50 = vsel %vm1368_vm8, %v5066_v53, %v5067_v61  ;;  %v5082_v44 = vmul.f32 %v5034_v6, %v10183_v52  ;;  %v5083_v13 = vmul.f32 %v5035_v11, %v10173_v1 }
 0x7c4   :  { %v5074_v4 = vsel %vm1370_vm10, %v5072_v45, %v5073_v50  ;;  %v5075_v60 = vsel %vm5020_vm5, %v5068_v9, %v5069_v58  ;;  %v5076_v10 = vsel %vm5022_vm6, %v5070_v28, %v5071_v41  ;;  %v5084_v21 = vmul.f32 %v5036_v39, %v10167_v62 }
 0x7c5   :  { %v5077_v51 = vsel %vm5024_vm9, %v5075_v60, %v5076_v10  ;;  %v5085_v19 = vmul.f32 %v5037_v46, %v10191_v27  ;;  %v5086_v3 = vmul.f32 %v5038_v49, %v10187_v23  ;;  %v5087_v52 = vmul.f32 %v5039_v31, %v10203_v33 }
 0x7c6   :  { %v5078_v7 = vsel %vm5026_vm12, %v5074_v4, %v5077_v51  ;;  %v5088_v34 = vmul.f32 %v5040_v24, %v10253_v48  ;;  %v5089_v35 = vmul.f32 %v5033_v56, %v10180_v42  ;;  %v5090_v47 = vmul.f32 %v5034_v6, %v10165_v16 }
 0x7c7   :  { %v5080_v36 = vsub.f32 %v5031_v5, %v5078_v7  ;;  %v5091_v1 = vmul.f32 %v5035_v11, %v10160_v18  ;;  %v5092_v37 = vmul.f32 %v5036_v39, %v10156_v0  ;;  %v5093_v62 = vmul.f32 %v5037_v46, %v10176_v20 }
 0x7c8   :  { %v5094_v27 = vmul.f32 %v5038_v49, %v10170_v8  ;;  %v5095_v23 = vmul.f32 %v5039_v31, %v10205_v43  ;;  %v5096_v57 = vmul.f32 %v5040_v24, %v10251_v32 }
 0x7c9   :  { %v5098_v33 = vperm.slane %v5080_v36, 0  ;;  %v5099_v30 = vperm.slane %v5080_v36, 1  ;;  %v5100_v48 = vperm.slane %v5080_v36, 2  ;;  %v5101_v2 = vperm.slane %v5080_v36, 3 }
 0x7ca   :  { %v5102_v42 = vperm.slane %v5080_v36, 4  ;;  %v5103_v22 = vperm.slane %v5080_v36, 5  ;;  %v5104_v12 = vperm.slane %v5080_v36, 6  ;;  %v5105_v16 = vperm.slane %v5080_v36, 7 }
 0x7cb   :  { %v10417_v29 = vadd.f32 %v5098_v33, %v5081_v54  ;;  %v10419_v18 = vadd.f32 %v5099_v30, %v5082_v44  ;;  %v10421_v0 = vadd.f32 %v5100_v48, %v5083_v13  ;;  %v10423_v20 = vadd.f32 %v5101_v2, %v5084_v21 }
 0x7cc   :  { %v10425_v8 = vadd.f32 %v5102_v42, %v5085_v19  ;;  %v10427_v43 = vadd.f32 %v5103_v22, %v5086_v3  ;;  %v10429_v32 = vadd.f32 %v5104_v12, %v5087_v52  ;;  %v10431_v17 = vadd.f32 %v5105_v16, %v5088_v34 }
 0x7cd   :  { %v10433_v56 = vadd.f32 %v5098_v33, %v5089_v35  ;;  %v10435_v6 = vadd.f32 %v5099_v30, %v5090_v47  ;;  %v10437_v11 = vadd.f32 %v5100_v48, %v5091_v1  ;;  %v10439_v39 = vadd.f32 %v5101_v2, %v5092_v37 }
 0x7ce   :  { %v10441_v46 = vadd.f32 %v5102_v42, %v5093_v62  ;;  %v10443_v49 = vadd.f32 %v5103_v22, %v5094_v27  ;;  %v10445_v31 = vadd.f32 %v5104_v12, %v5095_v23  ;;  %v10447_v24 = vadd.f32 %v5105_v16, %v5096_v57 }
 0x7cf   :  { %9650 = dma.done.wait [#allocation4], 16384 }
 0x7d0   :  { %9651 = vsyncadd [#allocation4], 4294950912  ;;  %v8163_v25 = vld [vmem:[#allocation2 + $0x1c0] sm:$0xf]  ;;  %s6154_s25 = sshll.u32 %s10521_s15, 4  ;;  %s6155_s25 = int_to_ptr.hbm [resolvable:$true] %s6154_s25 }
 0x7d1   :  { %v9114_v26 = vld [vmem:[#allocation2 + $0x1dc] sm:$0xf0] }
 0x7d2   :  { %v8227_v55 = vld [vmem:[#allocation2 + $0x3c0] sm:$0xf]  ;;  %v8164_v63 = vor.u32 %v9114_v26, %v8163_v25 }
 0x7d3   :  { %v9130_v59 = vld [vmem:[#allocation2 + $0x3dc] sm:$0xf0] }
 0x7d4   :  { %v8291_v14 = vld [vmem:[#allocation2 + $0x5c0] sm:$0xf]  ;;  %v8228_v15 = vor.u32 %v9130_v59, %v8227_v55  ;;  %5916 = vmatpush.bf16.msrb.mxu0 %v8164_v63 }
 0x7d5   :  { %v9146_v38 = vld [vmem:[#allocation2 + $0x5dc] sm:$0xf0] }
 0x7d6   :  { %v8292_v40 = vor.u32 %v9146_v38, %v8291_v14  ;;  %v8355_v53 = vld [vmem:[#allocation2 + $0x7c0] sm:$0xf]  ;;  %5930 = vmatpush.bf16.msrb.mxu1 %v8228_v15 }
 0x7d7   :  { %v9162_v61 = vld [vmem:[#allocation2 + $0x7dc] sm:$0xf0] }
 0x7d8   :  { %v8155_v9 = vld [vmem:[#allocation2 + $0x180] sm:$0xf]  ;;  %v8356_v58 = vor.u32 %v9162_v61, %v8355_v53  ;;  %5944 = vmatpush.bf16.msrb.mxu2 %v8292_v40 }
 0x7d9   :  { %v9112_v28 = vld [vmem:[#allocation2 + $0x19c] sm:$0xf0] }
 0x7da   :  { %v8219_v41 = vld [vmem:[#allocation2 + $0x380] sm:$0xf]  ;;  %v8156_v50 = vor.u32 %v9112_v28, %v8155_v9  ;;  %5958 = vmatpush.bf16.msrb.mxu3 %v8356_v58 }
 0x7db   :  { %v9128_v45 = vld [vmem:[#allocation2 + $0x39c] sm:$0xf0] }
 0x7dc   :  { %v8220_v54 = vor.u32 %v9128_v45, %v8219_v41  ;;  %v8283_v44 = vld [vmem:[#allocation2 + $0x580] sm:$0xf]  ;;  %5917 = vmatpush.bf16.msrb.mxu0 %v8156_v50 }
 0x7dd   :  { %v9144_v5 = vld [vmem:[#allocation2 + $0x59c] sm:$0xf0] }
 0x7de   :  { %v8347_v4 = vld [vmem:[#allocation2 + $0x780] sm:$0xf]  ;;  %v8284_v60 = vor.u32 %v9144_v5, %v8283_v44  ;;  %5931 = vmatpush.bf16.msrb.mxu1 %v8220_v54 }
 0x7df   :  { %v9160_v10 = vld [vmem:[#allocation2 + $0x79c] sm:$0xf0] }
 0x7e0   :  { %v8147_v13 = vld [vmem:[#allocation2 + $0x140] sm:$0xf]  ;;  %v8348_v21 = vor.u32 %v9160_v10, %v8347_v4  ;;  %5945 = vmatpush.bf16.msrb.mxu2 %v8284_v60 }
 0x7e1   :  { %v9110_v51 = vld [vmem:[#allocation2 + $0x15c] sm:$0xf0] }
 0x7e2   :  { %v8211_v19 = vld [vmem:[#allocation2 + $0x340] sm:$0xf]  ;;  %v8148_v52 = vor.u32 %v9110_v51, %v8147_v13  ;;  %5959 = vmatpush.bf16.msrb.mxu3 %v8348_v21 }
 0x7e3   :  { %v9126_v3 = vld [vmem:[#allocation2 + $0x35c] sm:$0xf0] }
 0x7e4   :  { %v8275_v7 = vld [vmem:[#allocation2 + $0x540] sm:$0xf]  ;;  %v8212_v47 = vor.u32 %v9126_v3, %v8211_v19  ;;  %5918 = vmatpush.bf16.msrb.mxu0 %v8148_v52 }
 0x7e5   :  { %v9142_v34 = vld [vmem:[#allocation2 + $0x55c] sm:$0xf0] }
 0x7e6   :  { %v8339_v35 = vld [vmem:[#allocation2 + $0x740] sm:$0xf]  ;;  %v8276_v1 = vor.u32 %v9142_v34, %v8275_v7  ;;  %5932 = vmatpush.bf16.msrb.mxu1 %v8212_v47 }
 0x7e7   :  { %v9158_v36 = vld [vmem:[#allocation2 + $0x75c] sm:$0xf0] }
 0x7e8   :  { %v8139_v37 = vld [vmem:[#allocation2 + $0x100] sm:$0xf]  ;;  %v8340_v23 = vor.u32 %v9158_v36, %v8339_v35  ;;  %5946 = vmatpush.bf16.msrb.mxu2 %v8276_v1 }
 0x7e9   :  { %v9108_v62 = vld [vmem:[#allocation2 + $0x11c] sm:$0xf0] }
 0x7ea   :  { %v8203_v27 = vld [vmem:[#allocation2 + $0x300] sm:$0xf]  ;;  %v8140_v42 = vor.u32 %v9108_v62, %v8139_v37  ;;  %5960 = vmatpush.bf16.msrb.mxu3 %v8340_v23 }
 0x7eb   :  { %v9124_v57 = vld [vmem:[#allocation2 + $0x31c] sm:$0xf0] }
 0x7ec   :  { %v8267_v33 = vld [vmem:[#allocation2 + $0x500] sm:$0xf]  ;;  %v8204_v22 = vor.u32 %v9124_v57, %v8203_v27  ;;  %5919 = vmatpush.bf16.msrb.mxu0 %v8140_v42 }
 0x7ed   :  { %v9140_v30 = vld [vmem:[#allocation2 + $0x51c] sm:$0xf0] }
 0x7ee   :  { %v8331_v48 = vld [vmem:[#allocation2 + $0x700] sm:$0xf]  ;;  %v8268_v12 = vor.u32 %v9140_v30, %v8267_v33  ;;  %5933 = vmatpush.bf16.msrb.mxu1 %v8204_v22 }
 0x7ef   :  { %v9156_v2 = vld [vmem:[#allocation2 + $0x71c] sm:$0xf0] }
 0x7f0   :  { %v8131_v16 = vld [vmem:[#allocation2 + $0xc0] sm:$0xf]  ;;  %v8332_v55 = vor.u32 %v9156_v2, %v8331_v48  ;;  %5947 = vmatpush.bf16.msrb.mxu2 %v8268_v12 }
 0x7f1   :  { %v9106_v25 = vld [vmem:[#allocation2 + $0xdc] sm:$0xf0] }
 0x7f2   :  { %v8195_v26 = vld [vmem:[#allocation2 + $0x2c0] sm:$0xf]  ;;  %v8132_v40 = vor.u32 %v9106_v25, %v8131_v16  ;;  %5961 = vmatpush.bf16.msrb.mxu3 %v8332_v55 }
 0x7f3   :  { %v9122_v63 = vld [vmem:[#allocation2 + $0x2dc] sm:$0xf0] }
 0x7f4   :  { %v8259_v59 = vld [vmem:[#allocation2 + $0x4c0] sm:$0xf]  ;;  %v8196_v53 = vor.u32 %v9122_v63, %v8195_v26  ;;  %5920 = vmatpush.bf16.msrb.mxu0 %v8132_v40 }
 0x7f5   :  { %v9138_v14 = vld [vmem:[#allocation2 + $0x4dc] sm:$0xf0] }
 0x7f6   :  { %v8323_v38 = vld [vmem:[#allocation2 + $0x6c0] sm:$0xf]  ;;  %v8260_v61 = vor.u32 %v9138_v14, %v8259_v59  ;;  %5934 = vmatpush.bf16.msrb.mxu1 %v8196_v53 }
 0x7f7   :  { %v9154_v15 = vld [vmem:[#allocation2 + $0x6dc] sm:$0xf0] }
 0x7f8   :  { %v8123_v9 = vld [vmem:[#allocation2 + $0x80] sm:$0xf]  ;;  %v8324_v41 = vor.u32 %v9154_v15, %v8323_v38  ;;  %5948 = vmatpush.bf16.msrb.mxu2 %v8260_v61 }
 0x7f9   :  { %v9104_v58 = vld [vmem:[#allocation2 + $0x9c] sm:$0xf0] }
 0x7fa   :  { %v8187_v28 = vld [vmem:[#allocation2 + $0x280] sm:$0xf]  ;;  %v8124_v4 = vor.u32 %v9104_v58, %v8123_v9  ;;  %5962 = vmatpush.bf16.msrb.mxu3 %v8324_v41 }
 0x7fb   :  { %v9120_v45 = vld [vmem:[#allocation2 + $0x29c] sm:$0xf0] }
 0x7fc   :  { %v8251_v50 = vld [vmem:[#allocation2 + $0x480] sm:$0xf]  ;;  %v8188_v60 = vor.u32 %v9120_v45, %v8187_v28  ;;  %5921 = vmatpush.bf16.msrb.mxu0 %v8124_v4 }
 0x7fd   :  { %v9136_v54 = vld [vmem:[#allocation2 + $0x49c] sm:$0xf0] }
 0x7fe   :  { %v8315_v44 = vld [vmem:[#allocation2 + $0x680] sm:$0xf]  ;;  %v8252_v10 = vor.u32 %v9136_v54, %v8251_v50  ;;  %5935 = vmatpush.bf16.msrb.mxu1 %v8188_v60  ;;  %v10455_v60 = vpack.c.bf16 %v10437_v11, %v10421_v0 }
 0x7ff   :  { %v9152_v5 = vld [vmem:[#allocation2 + $0x69c] sm:$0xf0] }
 0x800   :  { %v8115_v13 = vld [vmem:[#allocation2 + $0x40] sm:$0xf]  ;;  %v8316_v19 = vor.u32 %v9152_v5, %v8315_v44  ;;  %5949 = vmatpush.bf16.msrb.mxu2 %v8252_v10  ;;  %v10451_v44 = vpack.c.bf16 %v10433_v56, %v10417_v29  ;;  %v10459_v10 = vpack.c.bf16 %v10435_v6, %v10419_v18 }
 0x801   :  { %v9102_v51 = vld [vmem:[#allocation2 + $0x5c] sm:$0xf0] }
 0x802   :  { %v8179_v21 = vld [vmem:[#allocation2 + $0x240] sm:$0xf]  ;;  %v8116_v36 = vor.u32 %v9102_v51, %v8115_v13  ;;  %5963 = vmatpush.bf16.msrb.mxu3 %v8316_v19  ;;  %v10463_v51 = vpack.c.bf16 %v10439_v39, %v10423_v20 }
 0x803   :  { %v9118_v3 = vld [vmem:[#allocation2 + $0x25c] sm:$0xf0] }
 0x804   :  { %v8243_v7 = vld [vmem:[#allocation2 + $0x440] sm:$0xf]  ;;  %v8180_v37 = vor.u32 %v9118_v3, %v8179_v21  ;;  %5922 = vmatpush.bf16.msrb.mxu0 %v8116_v36 }
 0x805   :  { %v9134_v52 = vld [vmem:[#allocation2 + $0x45c] sm:$0xf0] }
 0x806   :  { %v8307_v34 = vld [vmem:[#allocation2 + $0x640] sm:$0xf]  ;;  %v8244_v62 = vor.u32 %v9134_v52, %v8243_v7  ;;  %5936 = vmatpush.bf16.msrb.mxu1 %v8180_v37 }
 0x807   :  { %v9150_v35 = vld [vmem:[#allocation2 + $0x65c] sm:$0xf0] }
 0x808   :  { %v8107_v47 = vld [vmem:[#allocation2] sm:$0xf]  ;;  %v8308_v33 = vor.u32 %v9150_v35, %v8307_v34  ;;  %5950 = vmatpush.bf16.msrb.mxu2 %v8244_v62 }
 0x809   :  { %v9100_v1 = vld [vmem:[#allocation2 + $0x1c] sm:$0xf0] }
 0x80a   :  { %v8171_v27 = vld [vmem:[#allocation2 + $0x200] sm:$0xf]  ;;  %v8108_v16 = vor.u32 %v9100_v1, %v8107_v47  ;;  %5964 = vmatpush.bf16.msrb.mxu3 %v8308_v33 }
 0x80b   :  { %v9116_v23 = vld [vmem:[#allocation2 + $0x21c] sm:$0xf0] }
 0x80c   :  { %v8235_v57 = vld [vmem:[#allocation2 + $0x400] sm:$0xf]  ;;  %v8172_v63 = vor.u32 %v9116_v23, %v8171_v27  ;;  %5923 = vmatpush.bf16.msrb.mxu0 %v8108_v16 }
 0x80d   :  { %v9132_v30 = vld [vmem:[#allocation2 + $0x41c] sm:$0xf0] }
 0x80e   :  { %v8299_v48 = vld [vmem:[#allocation2 + $0x600] sm:$0xf]  ;;  %v8236_v59 = vor.u32 %v9132_v30, %v8235_v57  ;;  %5937 = vmatpush.bf16.msrb.mxu1 %v8172_v63 }
 0x80f   :  { %v9148_v2 = vld [vmem:[#allocation2 + $0x61c] sm:$0xf0]  ;;  %5924 = vmatmul.bf16.vlgmr.msrb.gmra.mxu0 %v10451_v44 }
 0x810   :  { %v8419_v42 = vld [vmem:[#allocation2 + $0x9c0] sm:$0xf]  ;;  %v8300_v15 = vor.u32 %v9148_v2, %v8299_v48  ;;  %5951 = vmatpush.bf16.msrb.mxu2 %v8236_v59 }
 0x811   :  { %v9178_v22 = vld [vmem:[#allocation2 + $0x9dc] sm:$0xf0]  ;;  %5938 = vmatmul.bf16.vlgmr.msrb.gmra.mxu1 %v10459_v10 }
 0x812   :  { %v8483_v12 = vld [vmem:[#allocation2 + $0xbc0] sm:$0xf]  ;;  %v8420_v40 = vor.u32 %v9178_v22, %v8419_v42  ;;  %5965 = vmatpush.bf16.msrb.mxu3 %v8300_v15 }
 0x813   :  { %v9194_v25 = vld [vmem:[#allocation2 + $0xbdc] sm:$0xf0]  ;;  %5952 = vmatmul.bf16.vlgmr.msrb.gmra.mxu2 %v10455_v60 }
 0x814   :  { %v8547_v26 = vld [vmem:[#allocation2 + $0xdc0] sm:$0xf]  ;;  %v8484_v53 = vor.u32 %v9194_v25, %v8483_v12  ;;  %5972 = vmatpush.bf16.msra.mxu0 %v8420_v40 }
 0x815   :  { %v9210_v55 = vld [vmem:[#allocation2 + $0xddc] sm:$0xf0]  ;;  %5966 = vmatmul.bf16.vlgmr.msrb.gmra.mxu3 %v10463_v51 }
 0x816   :  { %v8611_v14 = vld [vmem:[#allocation2 + $0xfc0] sm:$0xf]  ;;  %v8548_v61 = vor.u32 %v9210_v55, %v8547_v26  ;;  %5986 = vmatpush.bf16.msra.mxu1 %v8484_v53 }
 0x817   :  { %v9226_v38 = vld [vmem:[#allocation2 + $0xfdc] sm:$0xf0] }
 0x818   :  { %v8411_v9 = vld [vmem:[#allocation2 + $0x980] sm:$0xf]  ;;  %v8612_v41 = vor.u32 %v9226_v38, %v8611_v14  ;;  %6000 = vmatpush.bf16.msra.mxu2 %v8548_v61 }
 0x819   :  { %v9176_v58 = vld [vmem:[#allocation2 + $0x99c] sm:$0xf0] }
 0x81a   :  { %v8475_v28 = vld [vmem:[#allocation2 + $0xb80] sm:$0xf]  ;;  %v8412_v13 = vor.u32 %v9176_v58, %v8411_v9  ;;  %6014 = vmatpush.bf16.msra.mxu3 %v8612_v41 }
 0x81b   :  { %v9192_v45 = vld [vmem:[#allocation2 + $0xb9c] sm:$0xf0] }
 0x81c   :  { %v8539_v50 = vld [vmem:[#allocation2 + $0xd80] sm:$0xf]  ;;  %v8476_v29 = vor.u32 %v9192_v45, %v8475_v28  ;;  %5973 = vmatpush.bf16.msra.mxu0 %v8412_v13 }
 0x81d   :  { %v9208_v54 = vld [vmem:[#allocation2 + $0xd9c] sm:$0xf0] }
 0x81e   :  { %v8603_v5 = vld [vmem:[#allocation2 + $0xf80] sm:$0xf]  ;;  %v8540_v56 = vor.u32 %v9208_v54, %v8539_v50  ;;  %5987 = vmatpush.bf16.msra.mxu1 %v8476_v29 }
 0x81f   :  { %v9224_v4 = vld [vmem:[#allocation2 + $0xf9c] sm:$0xf0] }
 0x820   :  { %v8403_v21 = vld [vmem:[#allocation2 + $0x940] sm:$0xf]  ;;  %v8604_v0 = vor.u32 %v9224_v4, %v8603_v5  ;;  %6001 = vmatpush.bf16.msra.mxu2 %v8540_v56 }
 0x821   :  { %v9174_v19 = vld [vmem:[#allocation2 + $0x95c] sm:$0xf0] }
 0x822   :  { %v8467_v3 = vld [vmem:[#allocation2 + $0xb40] sm:$0xf]  ;;  %v8404_v20 = vor.u32 %v9174_v19, %v8403_v21  ;;  %6015 = vmatpush.bf16.msra.mxu3 %v8604_v0 }
 0x823   :  { %v9190_v11 = vld [vmem:[#allocation2 + $0xb5c] sm:$0xf0] }
 0x824   :  { %v8531_v7 = vld [vmem:[#allocation2 + $0xd40] sm:$0xf]  ;;  %v8468_v39 = vor.u32 %v9190_v11, %v8467_v3  ;;  %5974 = vmatpush.bf16.msra.mxu0 %v8404_v20 }
 0x825   :  { %v9206_v18 = vld [vmem:[#allocation2 + $0xd5c] sm:$0xf0] }
 0x826   :  { %v8595_v6 = vld [vmem:[#allocation2 + $0xf40] sm:$0xf]  ;;  %v8532_v34 = vor.u32 %v9206_v18, %v8531_v7  ;;  %5988 = vmatpush.bf16.msra.mxu1 %v8468_v39 }
 0x827   :  { %v9222_v52 = vld [vmem:[#allocation2 + $0xf5c] sm:$0xf0] }
 0x828   :  { %v8395_v35 = vld [vmem:[#allocation2 + $0x900] sm:$0xf]  ;;  %v8596_v1 = vor.u32 %v9222_v52, %v8595_v6  ;;  %6002 = vmatpush.bf16.msra.mxu2 %v8532_v34 }
 0x829   :  { %v9172_v36 = vld [vmem:[#allocation2 + $0x91c] sm:$0xf0] }
 0x82a   :  { %v8459_v47 = vld [vmem:[#allocation2 + $0xb00] sm:$0xf]  ;;  %v8396_v33 = vor.u32 %v9172_v36, %v8395_v35  ;;  %6016 = vmatpush.bf16.msra.mxu3 %v8596_v1 }
 0x82b   :  { %v9188_v37 = vld [vmem:[#allocation2 + $0xb1c] sm:$0xf0] }
 0x82c   :  { %v8523_v62 = vld [vmem:[#allocation2 + $0xd00] sm:$0xf]  ;;  %v8460_v30 = vor.u32 %v9188_v37, %v8459_v47  ;;  %5975 = vmatpush.bf16.msra.mxu0 %v8396_v33  ;;  %v8229_v33 = vld [vmem:[#allocation2 + $0x3e0] sm:$0xf0] }
 0x82d   :  { %v9204_v27 = vld [vmem:[#allocation2 + $0xd1c] sm:$0xf0] }
 0x82e   :  { %v8587_v23 = vld [vmem:[#allocation2 + $0xf00] sm:$0xf]  ;;  %v8524_v48 = vor.u32 %v9204_v27, %v8523_v62  ;;  %5989 = vmatpush.bf16.msra.mxu1 %v8460_v30  ;;  %v9113_v62 = vld [vmem:[#allocation2 + $0x1c4] sm:$0xf] }
 0x82f   :  { %v9220_v57 = vld [vmem:[#allocation2 + $0xf1c] sm:$0xf0]  ;;  %v8165_v27 = vld [vmem:[#allocation2 + $0x1e0] sm:$0xf0] }
 0x830   :  { %v8387_v2 = vld [vmem:[#allocation2 + $0x8c0] sm:$0xf]  ;;  %v8588_v12 = vor.u32 %v9220_v57, %v8587_v23  ;;  %6003 = vmatpush.bf16.msra.mxu2 %v8524_v48  ;;  %v9129_v23 = vld [vmem:[#allocation2 + $0x3c4] sm:$0xf] }
 0x831   :  { %v9170_v42 = vld [vmem:[#allocation2 + $0x8dc] sm:$0xf0]  ;;  %v9145_v30 = vld [vmem:[#allocation2 + $0x5c4] sm:$0xf] }
 0x832   :  { %v8451_v22 = vld [vmem:[#allocation2 + $0xac0] sm:$0xf]  ;;  %v8388_v59 = vor.u32 %v9170_v42, %v8387_v2  ;;  %6017 = vmatpush.bf16.msra.mxu3 %v8588_v12  ;;  %v8293_v48 = vld [vmem:[#allocation2 + $0x5e0] sm:$0xf0] }
 0x833   :  { %v9186_v16 = vld [vmem:[#allocation2 + $0xadc] sm:$0xf0]  ;;  %v8357_v12 = vld [vmem:[#allocation2 + $0x7e0] sm:$0xf0] }
 0x834   :  { %v8515_v25 = vld [vmem:[#allocation2 + $0xcc0] sm:$0xf]  ;;  %v8452_v14 = vor.u32 %v9186_v16, %v8451_v22  ;;  %5976 = vmatpush.bf16.msra.mxu0 %v8388_v59  ;;  %v9161_v22 = vld [vmem:[#allocation2 + $0x7c4] sm:$0xf] }
 0x835   :  { %v9202_v26 = vld [vmem:[#allocation2 + $0xcdc] sm:$0xf0]  ;;  %v8157_v59 = vld [vmem:[#allocation2 + $0x1a0] sm:$0xf0] }
 0x836   :  { %v8579_v55 = vld [vmem:[#allocation2 + $0xec0] sm:$0xf]  ;;  %v8516_v38 = vor.u32 %v9202_v26, %v8515_v25  ;;  %5990 = vmatpush.bf16.msra.mxu1 %v8452_v14  ;;  %v8168_v25 = vor.u32 %v9113_v62, %v8165_v27  ;;  %v8232_v26 = vor.u32 %v9129_v23, %v8229_v33  ;;  %v9127_v14 = vld [vmem:[#allocation2 + $0x384] sm:$0xf] }
 0x837   :  { %v9218_v63 = vld [vmem:[#allocation2 + $0xedc] sm:$0xf0]  ;;  %v9137_v62 = vld [vmem:[#allocation2 + $0x4c4] sm:$0xf] }
 0x838   :  { %v8379_v15 = vld [vmem:[#allocation2 + $0x880] sm:$0xf]  ;;  %v8580_v61 = vor.u32 %v9218_v63, %v8579_v55  ;;  %6004 = vmatpush.bf16.msra.mxu2 %v8516_v38  ;;  %v8296_v55 = vor.u32 %v9145_v30, %v8293_v48  ;;  %v9111_v63 = vld [vmem:[#allocation2 + $0x184] sm:$0xf]  ;;  %v8360_v38 = vor.u32 %v9161_v22, %v8357_v12 }
 0x839   :  { %v9168_v40 = vld [vmem:[#allocation2 + $0x89c] sm:$0xf0]  ;;  %v8261_v27 = vld [vmem:[#allocation2 + $0x4e0] sm:$0xf0] }
 0x83a   :  { %v8443_v53 = vld [vmem:[#allocation2 + $0xa80] sm:$0xf]  ;;  %v8380_v50 = vor.u32 %v9168_v40, %v8379_v15  ;;  %6018 = vmatpush.bf16.msra.mxu3 %v8580_v61  ;;  %v10471_v15 = vpack.c.bf16 %v10441_v46, %v10425_v8  ;;  %v8221_v40 = vld [vmem:[#allocation2 + $0x3a0] sm:$0xf0]  ;;  %v10483_v8 = vpack.c.bf16 %v10447_v24, %v10431_v17  ;;  %v8160_v46 = vor.u32 %v9111_v63, %v8157_v59 }
 0x83b   :  { %v9184_v9 = vld [vmem:[#allocation2 + $0xa9c] sm:$0xf0]  ;;  %v8285_v61 = vld [vmem:[#allocation2 + $0x5a0] sm:$0xf0]  ;;  %v8264_v48 = vor.u32 %v9137_v62, %v8261_v27 }
 0x83c   :  { %v8507_v58 = vld [vmem:[#allocation2 + $0xc80] sm:$0xf]  ;;  %v8444_v54 = vor.u32 %v9184_v9, %v8443_v53  ;;  %5977 = vmatpush.bf16.msra.mxu0 %v8380_v50  ;;  %v9143_v53 = vld [vmem:[#allocation2 + $0x584] sm:$0xf]  ;;  %v10475_v9 = vpack.c.bf16 %v10445_v31, %v10429_v32 }
 0x83d   :  { %v9200_v28 = vld [vmem:[#allocation2 + $0xc9c] sm:$0xf0]  ;;  %v8288_v50 = vor.u32 %v9143_v53, %v8285_v61  ;;  %v8149_v32 = vld [vmem:[#allocation2 + $0x160] sm:$0xf0] }
 0x83e   :  { %v8571_v41 = vld [vmem:[#allocation2 + $0xe80] sm:$0xf]  ;;  %v8508_v5 = vor.u32 %v9200_v28, %v8507_v58  ;;  %5991 = vmatpush.bf16.msra.mxu1 %v8444_v54  ;;  %v10479_v58 = vpack.c.bf16 %v10443_v49, %v10427_v43  ;;  %v9159_v28 = vld [vmem:[#allocation2 + $0x784] sm:$0xf] }
 0x83f   :  { %v9216_v45 = vld [vmem:[#allocation2 + $0xe9c] sm:$0xf0]  ;;  %v9109_v54 = vld [vmem:[#allocation2 + $0x144] sm:$0xf] }
 0x840   :  { %v8371_v4 = vld [vmem:[#allocation2 + $0x840] sm:$0xf]  ;;  %v8572_v56 = vor.u32 %v9216_v45, %v8571_v41  ;;  %6005 = vmatpush.bf16.msra.mxu2 %v8508_v5  ;;  %v8349_v41 = vld [vmem:[#allocation2 + $0x7a0] sm:$0xf0]  ;;  %v8224_v45 = vor.u32 %v9127_v14, %v8221_v40 }
 0x841   :  { %v9166_v13 = vld [vmem:[#allocation2 + $0x85c] sm:$0xf0]  ;;  %v9125_v31 = vld [vmem:[#allocation2 + $0x344] sm:$0xf]  ;;  %v8352_v43 = vor.u32 %v9159_v28, %v8349_v41 }
 0x842   :  { %v8435_v29 = vld [vmem:[#allocation2 + $0xa40] sm:$0xf]  ;;  %v8372_v7 = vor.u32 %v9166_v13, %v8371_v4  ;;  %6019 = vmatpush.bf16.msra.mxu3 %v8572_v56  ;;  %v8213_v49 = vld [vmem:[#allocation2 + $0x360] sm:$0xf0]  ;;  %v8152_v13 = vor.u32 %v9109_v54, %v8149_v32 }
 0x843   :  { %v9182_v21 = vld [vmem:[#allocation2 + $0xa5c] sm:$0xf0]  ;;  %v9141_v5 = vld [vmem:[#allocation2 + $0x544] sm:$0xf] }
 0x844   :  { %v8499_v19 = vld [vmem:[#allocation2 + $0xc40] sm:$0xf]  ;;  %v8436_v52 = vor.u32 %v9182_v21, %v8435_v29  ;;  %5978 = vmatpush.bf16.msra.mxu0 %v8372_v7  ;;  %v8277_v4 = vld [vmem:[#allocation2 + $0x560] sm:$0xf0]  ;;  %v8216_v29 = vor.u32 %v9125_v31, %v8213_v49 }
 0x845   :  { %v9198_v3 = vld [vmem:[#allocation2 + $0xc5c] sm:$0xf0]  ;;  %v9157_v17 = vld [vmem:[#allocation2 + $0x744] sm:$0xf]  ;;  %v8280_v56 = vor.u32 %v9141_v5, %v8277_v4 }
 0x846   :  { %v8563_v0 = vld [vmem:[#allocation2 + $0xe40] sm:$0xf]  ;;  %v8500_v20 = vor.u32 %v9198_v3, %v8499_v19  ;;  %5992 = vmatpush.bf16.msra.mxu1 %v8436_v52  ;;  %v8341_v24 = vld [vmem:[#allocation2 + $0x760] sm:$0xf0] }
 0x847   :  { %v9214_v11 = vld [vmem:[#allocation2 + $0xe5c] sm:$0xf0]  ;;  %v9107_v21 = vld [vmem:[#allocation2 + $0x104] sm:$0xf] }
 0x848   :  { %v8363_v18 = vld [vmem:[#allocation2 + $0x800] sm:$0xf]  ;;  %v8564_v36 = vor.u32 %v9214_v11, %v8563_v0  ;;  %6006 = vmatpush.bf16.msra.mxu2 %v8500_v20  ;;  %v8141_v19 = vld [vmem:[#allocation2 + $0x120] sm:$0xf0]  ;;  %v8344_v0 = vor.u32 %v9157_v17, %v8341_v24 }
 0x849   :  { %v9164_v6 = vld [vmem:[#allocation2 + $0x81c] sm:$0xf0]  ;;  %v9123_v3 = vld [vmem:[#allocation2 + $0x304] sm:$0xf]  ;;  %v8144_v20 = vor.u32 %v9107_v21, %v8141_v19 }
 0x84a   :  { %v8427_v39 = vld [vmem:[#allocation2 + $0xa00] sm:$0xf]  ;;  %v8364_v57 = vor.u32 %v9164_v6, %v8363_v18  ;;  %6020 = vmatpush.bf16.msra.mxu3 %v8564_v36  ;;  %v8205_v11 = vld [vmem:[#allocation2 + $0x320] sm:$0xf0] }
 0x84b   :  { %v9180_v34 = vld [vmem:[#allocation2 + $0xa1c] sm:$0xf0]  ;;  %v9139_v7 = vld [vmem:[#allocation2 + $0x504] sm:$0xf] }
 0x84c   :  { %v8491_v35 = vld [vmem:[#allocation2 + $0xc00] sm:$0xf]  ;;  %v8428_v2 = vor.u32 %v9180_v34, %v8427_v39  ;;  %5979 = vmatpush.bf16.msra.mxu0 %v8364_v57  ;;  %v8269_v18 = vld [vmem:[#allocation2 + $0x520] sm:$0xf0]  ;;  %v8208_v39 = vor.u32 %v9123_v3, %v8205_v11 }
 0x84d   :  { %v9196_v47 = vld [vmem:[#allocation2 + $0xc1c] sm:$0xf0]  ;;  %v9155_v6 = vld [vmem:[#allocation2 + $0x704] sm:$0xf]  ;;  %v8272_v34 = vor.u32 %v9139_v7, %v8269_v18 }
 0x84e   :  { %v8555_v1 = vld [vmem:[#allocation2 + $0xe00] sm:$0xf]  ;;  %v8492_v42 = vor.u32 %v9196_v47, %v8491_v35  ;;  %5993 = vmatpush.bf16.msra.mxu1 %v8428_v2  ;;  %v8333_v52 = vld [vmem:[#allocation2 + $0x720] sm:$0xf0] }
 0x84f   :  { %v9212_v37 = vld [vmem:[#allocation2 + $0xe1c] sm:$0xf0]  ;;  %5980 = vmatmul.bf16.vlgmr.msra.gmra.mxu0 %v10471_v15  ;;  %v9105_v35 = vld [vmem:[#allocation2 + $0xc4] sm:$0xf] }
 0x850   :  { %v8556_v16 = vor.u32 %v9212_v37, %v8555_v1  ;;  %6007 = vmatpush.bf16.msra.mxu2 %v8492_v42  ;;  %6028 = vmatpush.bf16.msrb.mxu0 %v8168_v25  ;;  %v8133_v36 = vld [vmem:[#allocation2 + $0xe0] sm:$0xf0]  ;;  %v8336_v1 = vor.u32 %v9155_v6, %v8333_v52 }
 0x851   :  { %5994 = vmatmul.bf16.vlgmr.msra.gmra.mxu1 %v10479_v58  ;;  %v9121_v47 = vld [vmem:[#allocation2 + $0x2c4] sm:$0xf]  ;;  %v8136_v33 = vor.u32 %v9105_v35, %v8133_v36 }
 0x852   :  { %6021 = vmatpush.bf16.msra.mxu3 %v8556_v16  ;;  %6042 = vmatpush.bf16.msrb.mxu1 %v8232_v26  ;;  %v8197_v37 = vld [vmem:[#allocation2 + $0x2e0] sm:$0xf0] }
 0x853   :  { %6008 = vmatmul.bf16.vlgmr.msra.gmra.mxu2 %v10475_v9  ;;  %v9153_v23 = vld [vmem:[#allocation2 + $0x6c4] sm:$0xf]  ;;  %v8200_v30 = vor.u32 %v9121_v47, %v8197_v37 }
 0x854   :  { %6056 = vmatpush.bf16.msrb.mxu2 %v8296_v55  ;;  %6029 = vmatpush.bf16.msrb.mxu0 %v8160_v46  ;;  %v8325_v57 = vld [vmem:[#allocation2 + $0x6e0] sm:$0xf0] }
 0x855   :  { %6022 = vmatmul.bf16.vlgmr.msra.gmra.mxu3 %v10483_v8  ;;  %v9103_v2 = vld [vmem:[#allocation2 + $0x84] sm:$0xf]  ;;  %v8328_v12 = vor.u32 %v9153_v23, %v8325_v57 }
 0x856   :  { %6070 = vmatpush.bf16.msrb.mxu3 %v8360_v38  ;;  %6043 = vmatpush.bf16.msrb.mxu1 %v8224_v45  ;;  %v8125_v42 = vld [vmem:[#allocation2 + $0xa0] sm:$0xf0] }
 0x857   :  { %v9119_v22 = vld [vmem:[#allocation2 + $0x284] sm:$0xf]  ;;  %v8128_v59 = vor.u32 %v9103_v2, %v8125_v42 }
 0x858   :  { %6057 = vmatpush.bf16.msrb.mxu2 %v8288_v50  ;;  %6030 = vmatpush.bf16.msrb.mxu0 %v8152_v13  ;;  %v8189_v16 = vld [vmem:[#allocation2 + $0x2a0] sm:$0xf0] }
 0x859   :  { %v9135_v25 = vld [vmem:[#allocation2 + $0x484] sm:$0xf]  ;;  %v8192_v14 = vor.u32 %v9119_v22, %v8189_v16 }
 0x85a   :  { %6071 = vmatpush.bf16.msrb.mxu3 %v8352_v43  ;;  %6044 = vmatpush.bf16.msrb.mxu1 %v8216_v29  ;;  %v8253_v26 = vld [vmem:[#allocation2 + $0x4a0] sm:$0xf0] }
 0x85b   :  { %v9151_v55 = vld [vmem:[#allocation2 + $0x684] sm:$0xf]  ;;  %v8256_v38 = vor.u32 %v9135_v25, %v8253_v26 }
 0x85c   :  { %6058 = vmatpush.bf16.msrb.mxu2 %v8280_v56  ;;  %6031 = vmatpush.bf16.msrb.mxu0 %v8144_v20  ;;  %v8317_v63 = vld [vmem:[#allocation2 + $0x6a0] sm:$0xf0] }
 0x85d   :  { %v9101_v40 = vld [vmem:[#allocation2 + $0x44] sm:$0xf]  ;;  %v8320_v28 = vor.u32 %v9151_v55, %v8317_v63 }
 0x85e   :  { %6072 = vmatpush.bf16.msrb.mxu3 %v8344_v0  ;;  %6045 = vmatpush.bf16.msrb.mxu1 %v8208_v39  ;;  %v8117_v53 = vld [vmem:[#allocation2 + $0x60] sm:$0xf0] }
 0x85f   :  { %v9117_v61 = vld [vmem:[#allocation2 + $0x244] sm:$0xf]  ;;  %v8120_v32 = vor.u32 %v9101_v40, %v8117_v53 }
 0x860   :  { %6059 = vmatpush.bf16.msrb.mxu2 %v8272_v34  ;;  %6032 = vmatpush.bf16.msrb.mxu0 %v8136_v33  ;;  %v8181_v41 = vld [vmem:[#allocation2 + $0x260] sm:$0xf0] }
 0x861   :  { %v9133_v46 = vld [vmem:[#allocation2 + $0x444] sm:$0xf]  ;;  %v8184_v49 = vor.u32 %v9117_v61, %v8181_v41 }
 0x862   :  { %6073 = vmatpush.bf16.msrb.mxu3 %v8336_v1  ;;  %6046 = vmatpush.bf16.msrb.mxu1 %v8200_v30  ;;  %v8245_v45 = vld [vmem:[#allocation2 + $0x460] sm:$0xf0] }
 0x863   :  { %v9149_v50 = vld [vmem:[#allocation2 + $0x644] sm:$0xf]  ;;  %v8248_v5 = vor.u32 %v9133_v46, %v8245_v45 }
 0x864   :  { %6060 = vmatpush.bf16.msrb.mxu2 %v8264_v48  ;;  %v8309_v54 = vld [vmem:[#allocation2 + $0x660] sm:$0xf0]  ;;  %6033 = vmatpush.bf16.msrb.mxu0 %v8128_v59 }
 0x865   :  { %v9099_v31 = vld [vmem:[#allocation2 + $0x4] sm:$0xf]  ;;  %v8312_v13 = vor.u32 %v9149_v50, %v8309_v54 }
 0x866   :  { %6074 = vmatpush.bf16.msrb.mxu3 %v8328_v12  ;;  %v8109_v43 = vld [vmem:[#allocation2 + $0x20] sm:$0xf0]  ;;  %6047 = vmatpush.bf16.msrb.mxu1 %v8192_v14 }
 0x867   :  { %v9115_v4 = vld [vmem:[#allocation2 + $0x204] sm:$0xf]  ;;  %v8112_v11 = vor.u32 %v9099_v31, %v8109_v43 }
 0x868   :  { %6061 = vmatpush.bf16.msrb.mxu2 %v8256_v38  ;;  %v8173_v17 = vld [vmem:[#allocation2 + $0x220] sm:$0xf0]  ;;  %6034 = vmatpush.bf16.msrb.mxu0 %v8120_v32 }
 0x869   :  { %v9131_v24 = vld [vmem:[#allocation2 + $0x404] sm:$0xf]  ;;  %v8176_v52 = vor.u32 %v9115_v4, %v8173_v17 }
 0x86a   :  { %6075 = vmatpush.bf16.msrb.mxu3 %v8320_v28  ;;  %v8237_v29 = vld [vmem:[#allocation2 + $0x420] sm:$0xf0]  ;;  %6048 = vmatpush.bf16.msrb.mxu1 %v8184_v49 }
 0x86b   :  { %v9147_v56 = vld [vmem:[#allocation2 + $0x604] sm:$0xf]  ;;  %v8240_v20 = vor.u32 %v9131_v24, %v8237_v29 }
 0x86c   :  { %v8301_v21 = vld [vmem:[#allocation2 + $0x620] sm:$0xf0]  ;;  %6062 = vmatpush.bf16.msrb.mxu2 %v8248_v5  ;;  %6035 = vmatpush.bf16.msrb.mxu0 %v8112_v11 }
 0x86d   :  { %v9177_v19 = vld [vmem:[#allocation2 + $0x9c4] sm:$0xf]  ;;  %v8304_v35 = vor.u32 %v9147_v56, %v8301_v21 }
 0x86e   :  { %v8421_v3 = vld [vmem:[#allocation2 + $0x9e0] sm:$0xf0]  ;;  %6076 = vmatpush.bf16.msrb.mxu3 %v8312_v13  ;;  %6049 = vmatpush.bf16.msrb.mxu1 %v8176_v52 }
 0x86f   :  { %v9193_v0 = vld [vmem:[#allocation2 + $0xbc4] sm:$0xf]  ;;  %v8424_v36 = vor.u32 %v9177_v19, %v8421_v3  ;;  %6036 = vmatmul.bf16.vlgmr.msrb.gmra.mxu0 %v10451_v44 }
 0x870   :  { %v8485_v7 = vld [vmem:[#allocation2 + $0xbe0] sm:$0xf0]  ;;  %6063 = vmatpush.bf16.msrb.mxu2 %v8240_v20 }
 0x871   :  { %v9209_v18 = vld [vmem:[#allocation2 + $0xdc4] sm:$0xf]  ;;  %v8488_v47 = vor.u32 %v9193_v0, %v8485_v7  ;;  %6084 = vmatpush.bf16.msra.mxu0 %v8424_v36  ;;  %6050 = vmatmul.bf16.vlgmr.msrb.gmra.mxu1 %v10459_v10 }
 0x872   :  { %v8549_v6 = vld [vmem:[#allocation2 + $0xde0] sm:$0xf0]  ;;  %6077 = vmatpush.bf16.msrb.mxu3 %v8304_v35 }
 0x873   :  { %v9225_v39 = vld [vmem:[#allocation2 + $0xfc4] sm:$0xf]  ;;  %v8552_v1 = vor.u32 %v9209_v18, %v8549_v6  ;;  %6098 = vmatpush.bf16.msra.mxu1 %v8488_v47  ;;  %6064 = vmatmul.bf16.vlgmr.msrb.gmra.mxu2 %v10455_v60 }
 0x874   :  { %v8613_v34 = vld [vmem:[#allocation2 + $0xfe0] sm:$0xf0] }
 0x875   :  { %v9175_v37 = vld [vmem:[#allocation2 + $0x984] sm:$0xf]  ;;  %v8616_v23 = vor.u32 %v9225_v39, %v8613_v34  ;;  %6112 = vmatpush.bf16.msra.mxu2 %v8552_v1  ;;  %6078 = vmatmul.bf16.vlgmr.msrb.gmra.mxu3 %v10463_v51 }
 0x876   :  { %v8413_v62 = vld [vmem:[#allocation2 + $0x9a0] sm:$0xf0] }
 0x877   :  { %v9191_v27 = vld [vmem:[#allocation2 + $0xb84] sm:$0xf]  ;;  %v8416_v42 = vor.u32 %v9175_v37, %v8413_v62  ;;  %6126 = vmatpush.bf16.msra.mxu3 %v8616_v23 }
 0x878   :  { %v8477_v57 = vld [vmem:[#allocation2 + $0xba0] sm:$0xf0] }
 0x879   :  { %v9207_v33 = vld [vmem:[#allocation2 + $0xd84] sm:$0xf]  ;;  %v8480_v22 = vor.u32 %v9191_v27, %v8477_v57  ;;  %6085 = vmatpush.bf16.msra.mxu0 %v8416_v42 }
 0x87a   :  { %v8541_v30 = vld [vmem:[#allocation2 + $0xda0] sm:$0xf0] }
 0x87b   :  { %v9223_v48 = vld [vmem:[#allocation2 + $0xf84] sm:$0xf]  ;;  %v8544_v12 = vor.u32 %v9207_v33, %v8541_v30  ;;  %6099 = vmatpush.bf16.msra.mxu1 %v8480_v22 }
 0x87c   :  { %v8605_v2 = vld [vmem:[#allocation2 + $0xfa0] sm:$0xf0] }
 0x87d   :  { %v9173_v16 = vld [vmem:[#allocation2 + $0x944] sm:$0xf]  ;;  %v8608_v55 = vor.u32 %v9223_v48, %v8605_v2  ;;  %6113 = vmatpush.bf16.msra.mxu2 %v8544_v12 }
 0x87e   :  { %v8405_v25 = vld [vmem:[#allocation2 + $0x960] sm:$0xf0] }
 0x87f   :  { %v9189_v26 = vld [vmem:[#allocation2 + $0xb44] sm:$0xf]  ;;  %v8408_v53 = vor.u32 %v9173_v16, %v8405_v25  ;;  %6127 = vmatpush.bf16.msra.mxu3 %v8608_v55 }
 0x880   :  { %v8469_v63 = vld [vmem:[#allocation2 + $0xb60] sm:$0xf0] }
 0x881   :  { %v9205_v59 = vld [vmem:[#allocation2 + $0xd44] sm:$0xf]  ;;  %v8472_v61 = vor.u32 %v9189_v26, %v8469_v63  ;;  %6086 = vmatpush.bf16.msra.mxu0 %v8408_v53 }
 0x882   :  { %v8533_v14 = vld [vmem:[#allocation2 + $0xd60] sm:$0xf0] }
 0x883   :  { %v9221_v38 = vld [vmem:[#allocation2 + $0xf44] sm:$0xf]  ;;  %v8536_v28 = vor.u32 %v9205_v59, %v8533_v14  ;;  %6100 = vmatpush.bf16.msra.mxu1 %v8472_v61 }
 0x884   :  { %v8597_v40 = vld [vmem:[#allocation2 + $0xf60] sm:$0xf0] }
 0x885   :  { %v9171_v41 = vld [vmem:[#allocation2 + $0x904] sm:$0xf]  ;;  %v8600_v45 = vor.u32 %v9221_v38, %v8597_v40  ;;  %6114 = vmatpush.bf16.msra.mxu2 %v8536_v28 }
 0x886   :  { %v8397_v46 = vld [vmem:[#allocation2 + $0x920] sm:$0xf0] }
 0x887   :  { %v9187_v60 = vld [vmem:[#allocation2 + $0xb04] sm:$0xf]  ;;  %v8400_v51 = vor.u32 %v9171_v41, %v8397_v46  ;;  %6128 = vmatpush.bf16.msra.mxu3 %v8600_v45  ;;  %v5270_v46 = vld [vmem:[%s10520_s14] sm:$0x3]  ;;  %s9669_s14 = smov [#allocation16]  }
 0x888   :  { %v8461_v50 = vld [vmem:[#allocation2 + $0xb20] sm:$0xf0]  ;;  %v5272_v45 = vperm.slane %v5270_v46, 0  ;;  %s6152_s11 = sshll.u32 %s9669_s14, 4  ;;  %s6153_s11 = int_to_ptr.vmem [resolvable:$true] %s6152_s11 }
 0x889   :  { %v9203_v54 = vld [vmem:[#allocation2 + $0xd04] sm:$0xf]  ;;  %v8464_v43 = vor.u32 %v9187_v60, %v8461_v50  ;;  %6087 = vmatpush.bf16.msra.mxu0 %v8400_v51 }
 0x88a   :  { %v8525_v32 = vld [vmem:[#allocation2 + $0xd20] sm:$0xf0] }
 0x88b   :  { %v9219_v31 = vld [vmem:[#allocation2 + $0xf04] sm:$0xf]  ;;  %v8528_v10 = vor.u32 %v9203_v54, %v8525_v32  ;;  %6101 = vmatpush.bf16.msra.mxu1 %v8464_v43 }
 0x88c   :  { %v8589_v44 = vld [vmem:[#allocation2 + $0xf20] sm:$0xf0]  ;;  %v5925_v60 = vpop.f32.mrf.mxu0 }
 0x88d   :  { %v9169_v49 = vld [vmem:[#allocation2 + $0x8c4] sm:$0xf]  ;;  %v8592_v17 = vor.u32 %v9219_v31, %v8589_v44  ;;  %6115 = vmatpush.bf16.msra.mxu2 %v8528_v10  ;;  %v5926_v54 = vadd.f32 %v5925_v60, %v5272_v45 }
 0x88e   :  { %v8389_v5 = vld [vmem:[#allocation2 + $0x8e0] sm:$0xf0]  ;;  %v5939_v50 = vpop.f32.mrf.mxu1 }
 0x88f   :  { %v9185_v4 = vld [vmem:[#allocation2 + $0xac4] sm:$0xf]  ;;  %v8392_v19 = vor.u32 %v9169_v49, %v8389_v5  ;;  %6129 = vmatpush.bf16.msra.mxu3 %v8592_v17  ;;  %v5940_v44 = vadd.f32 %v5939_v50, %v5926_v54 }
 0x890   :  { %v8453_v24 = vld [vmem:[#allocation2 + $0xae0] sm:$0xf0] }
 0x891   :  { %v9201_v13 = vld [vmem:[#allocation2 + $0xcc4] sm:$0xf]  ;;  %v8456_v3 = vor.u32 %v9185_v4, %v8453_v24  ;;  %6088 = vmatpush.bf16.msra.mxu0 %v8392_v19 }
 0x892   :  { %v8517_v29 = vld [vmem:[#allocation2 + $0xce0] sm:$0xf0] }
 0x893   :  { %v9217_v56 = vld [vmem:[#allocation2 + $0xec4] sm:$0xf]  ;;  %v8520_v0 = vor.u32 %v9201_v13, %v8517_v29  ;;  %6102 = vmatpush.bf16.msra.mxu1 %v8456_v3 }
 0x894   :  { %v8581_v21 = vld [vmem:[#allocation2 + $0xee0] sm:$0xf0]  ;;  %v5927_v51 = vpop.f32.mrf.mxu0 }
 0x895   :  { %v9167_v11 = vld [vmem:[#allocation2 + $0x884] sm:$0xf]  ;;  %v8584_v6 = vor.u32 %v9217_v56, %v8581_v21  ;;  %6116 = vmatpush.bf16.msra.mxu2 %v8520_v0  ;;  %v5928_v10 = vadd.f32 %v5927_v51, %v5272_v45 }
 0x896   :  { %v8381_v7 = vld [vmem:[#allocation2 + $0x8a0] sm:$0xf0]  ;;  %v5953_v32 = vpop.f32.mrf.mxu2  ;;  %v5941_v43 = vpop.f32.mrf.mxu1 }
 0x897   :  { %v9183_v18 = vld [vmem:[#allocation2 + $0xa84] sm:$0xf]  ;;  %v8384_v36 = vor.u32 %v9167_v11, %v8381_v7  ;;  %6130 = vmatpush.bf16.msra.mxu3 %v8584_v6 }
 0x898   :  { %v8445_v52 = vld [vmem:[#allocation2 + $0xaa0] sm:$0xf0]  ;;  %v5967_v31 = vpop.f32.mrf.mxu3 }
 0x899   :  { %v9199_v20 = vld [vmem:[#allocation2 + $0xc84] sm:$0xf]  ;;  %v8448_v47 = vor.u32 %v9183_v18, %v8445_v52  ;;  %6089 = vmatpush.bf16.msra.mxu0 %v8384_v36 }
 0x89a   :  { %v8509_v39 = vld [vmem:[#allocation2 + $0xca0] sm:$0xf0] }
 0x89b   :  { %v9215_v34 = vld [vmem:[#allocation2 + $0xe84] sm:$0xf]  ;;  %v8512_v1 = vor.u32 %v9199_v20, %v8509_v39  ;;  %6103 = vmatpush.bf16.msra.mxu1 %v8448_v47  ;;  %v5273_v47 = vperm.slane %v5270_v46, 1 }
 0x89c   :  { %v8573_v35 = vld [vmem:[#allocation2 + $0xea0] sm:$0xf0] }
 0x89d   :  { %v9165_v37 = vld [vmem:[#allocation2 + $0x844] sm:$0xf]  ;;  %v8576_v23 = vor.u32 %v9215_v34, %v8573_v35  ;;  %6117 = vmatpush.bf16.msra.mxu2 %v8512_v1 }
 0x89e   :  { %v8373_v62 = vld [vmem:[#allocation2 + $0x860] sm:$0xf0]  ;;  %v5955_v49 = vpop.f32.mrf.mxu2 }
 0x89f   :  { %v9181_v27 = vld [vmem:[#allocation2 + $0xa44] sm:$0xf]  ;;  %v8376_v42 = vor.u32 %v9165_v37, %v8373_v62  ;;  %6131 = vmatpush.bf16.msra.mxu3 %v8576_v23 }
 0x8a0   :  { %v8437_v57 = vld [vmem:[#allocation2 + $0xa60] sm:$0xf0]  ;;  %v5969_v5 = vpop.f32.mrf.mxu3 }
 0x8a1   :  { %v9197_v33 = vld [vmem:[#allocation2 + $0xc44] sm:$0xf]  ;;  %v8440_v22 = vor.u32 %v9181_v27, %v8437_v57  ;;  %6090 = vmatpush.bf16.msra.mxu0 %v8376_v42 }
 0x8a2   :  { %v8501_v30 = vld [vmem:[#allocation2 + $0xc60] sm:$0xf0] }
 0x8a3   :  { %v9213_v48 = vld [vmem:[#allocation2 + $0xe44] sm:$0xf]  ;;  %v8504_v12 = vor.u32 %v9197_v33, %v8501_v30  ;;  %6104 = vmatpush.bf16.msra.mxu1 %v8440_v22 }
 0x8a4   :  { %v8565_v2 = vld [vmem:[#allocation2 + $0xe60] sm:$0xf0] }
 0x8a5   :  { %v9163_v16 = vld [vmem:[#allocation2 + $0x804] sm:$0xf]  ;;  %v8568_v55 = vor.u32 %v9213_v48, %v8565_v2  ;;  %6118 = vmatpush.bf16.msra.mxu2 %v8504_v12 }
 0x8a6   :  { %v8365_v25 = vld [vmem:[#allocation2 + $0x820] sm:$0xf0] }
 0x8a7   :  { %v9179_v26 = vld [vmem:[#allocation2 + $0xa04] sm:$0xf]  ;;  %v8368_v53 = vor.u32 %v9163_v16, %v8365_v25  ;;  %6132 = vmatpush.bf16.msra.mxu3 %v8568_v55 }
 0x8a8   :  { %v8429_v63 = vld [vmem:[#allocation2 + $0xa20] sm:$0xf0] }
 0x8a9   :  { %v9195_v59 = vld [vmem:[#allocation2 + $0xc04] sm:$0xf]  ;;  %v8432_v61 = vor.u32 %v9179_v26, %v8429_v63  ;;  %6091 = vmatpush.bf16.msra.mxu0 %v8368_v53 }
 0x8aa   :  { %v8493_v14 = vld [vmem:[#allocation2 + $0xc20] sm:$0xf0] }
 0x8ab   :  { %v9211_v38 = vld [vmem:[#allocation2 + $0xe04] sm:$0xf]  ;;  %v8496_v28 = vor.u32 %v9195_v59, %v8493_v14  ;;  %6105 = vmatpush.bf16.msra.mxu1 %v8432_v61 }
 0x8ac   :  { %v8557_v40 = vld [vmem:[#allocation2 + $0xe20] sm:$0xf0]  ;;  %6092 = vmatmul.bf16.vlgmr.msra.gmra.mxu0 %v10471_v15  ;;  %v5954_v15 = vadd.f32 %v5953_v32, %v5940_v44 }
 0x8ad   :  { %v8560_v41 = vor.u32 %v9211_v38, %v8557_v40  ;;  %6119 = vmatpush.bf16.msra.mxu2 %v8496_v28 }
 0x8ae   :  { %6106 = vmatmul.bf16.vlgmr.msra.gmra.mxu1 %v10479_v58  ;;  %v5968_v58 = vadd.f32 %v5967_v31, %v5954_v15 }
 0x8af   :  { %6133 = vmatpush.bf16.msra.mxu3 %v8560_v41 }
 0x8b0   :  { %6120 = vmatmul.bf16.vlgmr.msra.gmra.mxu2 %v10475_v9  ;;  %v5942_v9 = vadd.f32 %v5941_v43, %v5928_v10 }
 0x8b2   :  { %6134 = vmatmul.bf16.vlgmr.msra.gmra.mxu3 %v10483_v8  ;;  %v5956_v24 = vadd.f32 %v5955_v49, %v5942_v9 }
 0x8b4   :  { %v5970_v29 = vadd.f32 %v5969_v5, %v5956_v24 }
 0x8cc   :  { %v5981_v8 = vpop.f32.mrf.mxu0 }
 0x8cd   :  { %v5982_v4 = vadd.f32 %v5981_v8, %v5968_v58 }
 0x8ce   :  { %v5995_v17 = vpop.f32.mrf.mxu1 }
 0x8cf   :  { %v5996_v13 = vadd.f32 %v5995_v17, %v5982_v4 }
 0x8d4   :  { %v5983_v19 = vpop.f32.mrf.mxu0 }
 0x8d5   :  { %v5984_v0 = vadd.f32 %v5983_v19, %v5970_v29 }
 0x8d6   :  { %v6009_v56 = vpop.f32.mrf.mxu2  ;;  %v5997_v7 = vpop.f32.mrf.mxu1 }
 0x8d7   :  { %v6010_v21 = vadd.f32 %v6009_v56, %v5996_v13  ;;  %v5998_v18 = vadd.f32 %v5997_v7, %v5984_v0 }
 0x8d8   :  { %v6023_v3 = vpop.f32.mrf.mxu3 }
 0x8d9   :  { %v6024_v11 = vadd.f32 %v6023_v3, %v6010_v21 }
 0x8db   :  { %9286 = vtanh.f32 %v6024_v11 }
 0x8de   :  { %v6011_v6 = vpop.f32.mrf.mxu2 }
 0x8df   :  { %v6012_v52 = vadd.f32 %v6011_v6, %v5998_v18 }
 0x8e0   :  { %v6025_v20 = vpop.f32.mrf.mxu3 }
 0x8e1   :  { %v9287_v39 = vpop.eup %9286  ;;  %v6026_v34 = vadd.f32 %v6025_v20, %v6012_v52 }
 0x8e2   :  { %6144 = vst [vmem:[#allocation16] sm:$0xff] %v9287_v39 }
 0x8e3   :  { %9288 = vtanh.f32 %v6026_v34 }
 0x8e9   :  { %v9289_v35 = vpop.eup %9288 }
 0x8ea   :  { %6146 = vst [vmem:[#allocation16 + $0x10] sm:$0xff] %v9289_v35 }
 0x8ec   :  { %v6037_v36 = vpop.f32.mrf.mxu0 }
 0x8ed   :  { %v6038_v37 = vadd.f32 %v6037_v36, %v5273_v47 }
 0x8ee   :  { %v6051_v1 = vpop.f32.mrf.mxu1 }
 0x8ef   :  { %v6052_v23 = vadd.f32 %v6051_v1, %v6038_v37 }
 0x8f4   :  { %v6039_v57 = vpop.f32.mrf.mxu0 }
 0x8f5   :  { %v6040_v48 = vadd.f32 %v6039_v57, %v5273_v47 }
 0x8f6   :  { %v6065_v62 = vpop.f32.mrf.mxu2  ;;  %v6053_v33 = vpop.f32.mrf.mxu1 }
 0x8f7   :  { %v6066_v30 = vadd.f32 %v6065_v62, %v6052_v23  ;;  %v6054_v22 = vadd.f32 %v6053_v33, %v6040_v48 }
 0x8f8   :  { %v6079_v27 = vpop.f32.mrf.mxu3 }
 0x8f9   :  { %v6080_v42 = vadd.f32 %v6079_v27, %v6066_v30 }
 0x8fe   :  { %v6067_v2 = vpop.f32.mrf.mxu2 }
 0x8ff   :  { %v6068_v55 = vadd.f32 %v6067_v2, %v6054_v22 }
 0x900   :  { %v6081_v12 = vpop.f32.mrf.mxu3 }
 0x901   :  { %v6082_v14 = vadd.f32 %v6081_v12, %v6068_v55 }
 0x929   :  { %v6093_v16 = vpop.f32.mrf.mxu0 }
 0x92a   :  { %v6094_v25 = vadd.f32 %v6093_v16, %v6080_v42 }
 0x92b   :  { %v6107_v26 = vpop.f32.mrf.mxu1 }
 0x92c   :  { %v6108_v63 = vadd.f32 %v6107_v26, %v6094_v25 }
 0x931   :  { %v6095_v53 = vpop.f32.mrf.mxu0 }
 0x932   :  { %v6096_v28 = vadd.f32 %v6095_v53, %v6082_v14 }
 0x933   :  { %v6121_v59 = vpop.f32.mrf.mxu2  ;;  %v6109_v41 = vpop.f32.mrf.mxu1 }
 0x934   :  { %v6122_v38 = vadd.f32 %v6121_v59, %v6108_v63  ;;  %v6110_v46 = vadd.f32 %v6109_v41, %v6096_v28 }
 0x935   :  { %v6135_v40 = vpop.f32.mrf.mxu3 }
 0x936   :  { %v6136_v61 = vadd.f32 %v6135_v40, %v6122_v38 }
 0x938   :  { %9290 = vtanh.f32 %v6136_v61 }
 0x93b   :  { %v6123_v60 = vpop.f32.mrf.mxu2 }
 0x93c   :  { %v6124_v45 = vadd.f32 %v6123_v60, %v6110_v46 }
 0x93d   :  { %v6137_v50 = vpop.f32.mrf.mxu3 }
 0x93e   :  { %v9291_v54 = vpop.eup %9290  ;;  %v6138_v32 = vadd.f32 %v6137_v50, %v6124_v45 }
 0x93f   :  { %6145 = vst [vmem:[#allocation16 + $0x8] sm:$0xff] %v9291_v54 }
 0x940   :  { %9292 = vtanh.f32 %v6138_v32 }
 0x946   :  { %v9293_v31 = vpop.eup %9292 }
 0x947   :  { %6147 = vst [vmem:[#allocation16 + $0x18] sm:$0xff] %v9293_v31 }
 0x948   :  { %6160 = dma.vmem_to_hbm [thread:$0]  %s6153_s11, 512, %s6155_s25, [#allocation7], %s9667_s28, %s9667_s28, %s9668_s29  }
 0x949   :  { %9652 = dma.done.wait [#allocation7], 512  }
 0x94a   :  { %9653 = vsyncadd [#allocation7], 4294966784 }
 0x94b   :  { %6165 = vsyncpa [#allocation6], 1 }
 0x94c   :  { %6166 = vsyncpa [#allocation9], 1 }
 0x94d   :  { %6167 = vsyncpa [#allocation12], 1 }
 0x94e   :  { %6168 = vsyncpa [#allocation15], 1 }
 0x94f   :  { %6169 = vsyncpa [#allocation7], 1 }
 0x950   :  { %6170 = vsyncmov [#allocation4] }
 0x953   :  { %s6171_s1 = vpop.sfrf %6170 }
 0x954   :  { %p8617_p0 = scmp.ne.s32.totalorder %s6171_s1, 0 }
 0x956   :  { %6175 = shalt.err (%p8617_p0)  }
 0x957   :  { %6177 = vsyncmov [#allocation4 + $0x1] }
 0x95a   :  { %s6178_s15 = vpop.sfrf %6177 }
 0x95b   :  { %p8618_p1 = scmp.ne.s32.totalorder %s6178_s15, 0 }
 0x95d   :  { %6182 = shalt.err (%p8618_p1)  }

</bundles_post_ra>
